<compile_context>
chip_gen: v7x
topology: tpu7x:2x2x1
jax: 0.10.0
libtpu: 0.0.40
codegen_flags: <defaults>
</compile_context>

<pallas_src>
import jax
import jax.numpy as jnp
import numpy as np
from jax.experimental import pallas as pl
from jax.experimental.pallas import tpu as pltpu


# ---------------------------------------------------------------------------
# The fused kernel: backbone stand-in + the whole YOLO neck, one image / step.
# ---------------------------------------------------------------------------
def _fused_kernel(*refs):
    (a52_ref, a26_ref, a13_ref,
     wb52, bb52, wb26, bb26, wb13, bb13,
     s0, s1, s2, up1_ref, up2_ref,
     # branch 0
     w0_0, b0_0, d1w_0, d1b_0, w23_0, b23_0, d4w_0, d4b_0, w5r_0, b5r_0,
     # branch 1
     w0a_1, w0b_1, b0_1, d1w_1, d1b_1, w23_1, b23_1, d4w_1, d4b_1, w5r_1, b5r_1,
     # branch 2
     w0a_2, w0b_2, b0_2, d1w_2, d1b_2, w23_2, b23_2, d4w_2, d4b_2, w5r_2, b5r_2,
     out0_ref, out1_ref, out2_ref) = refs

    def relu6(v):
        return jnp.clip(v, 0.0, 6.0)

    def pw(h, w_ref, b_ref):
        # 1x1 conv (+ folded BN / bias); bf16 operands, f32 accumulation.
        return (jnp.dot(h.astype(jnp.bfloat16), w_ref[...],
                        preferred_element_type=jnp.float32) + b_ref[...])

    def dw3x3(h, s_ref, dw_ref, db_ref):
        # 3x3 depthwise conv (padding=1) + folded BN + ReLU6 on an (HW, C) value.
        # (S_k @ h) * w_k == S_k @ (h * w_k): stack the 9 channel-scaled copies
        # and hit them with the pre-concatenated (HW, 9*HW) 0/1 shift matrix.
        stacked = jnp.concatenate([h * dw_ref[k] for k in range(9)], axis=0)
        acc = jnp.dot(s_ref[...], stacked.astype(jnp.bfloat16),
                      preferred_element_type=jnp.float32)
        return relu6(acc + db_ref[...])

    def branch(t0, s_ref, d1w, d1b, w23, b23, d4w, d4b, w5r, b5r):
        h = relu6(t0)                        # pw0 + BN + ReLU6
        h = dw3x3(h, s_ref, d1w, d1b)        # dw1 + BN + ReLU6
        h = relu6(pw(h, w23, b23))           # (pw2+BN)o(pw3+BN) folded, + ReLU6
        ob = h                               # out_branch tap (i == 3)
        h = dw3x3(h, s_ref, d4w, d4b)        # dw4 + BN + ReLU6
        return pw(h, w5r, b5r), ob           # (pw5+BN) o result 1x1 conv folded

    # Backbone stand-in: 1x1 convs on per-scale space-to-depth patches.
    x52 = relu6(pw(a52_ref[0], wb52, bb52))   # (64, 128): 32 real channels
    x26 = relu6(pw(a26_ref[0], wb26, bb26))   # (16, 128): 96 real channels
    x13 = relu6(pw(a13_ref[0], wb13, bb13))   # ( 8, 384): 320 real ch, rows 4..7 pad

    # ---- branch 0 (deepest scale) --------------------------------------
    y0, ob0 = branch(pw(x13, w0_0, b0_0), s0,
                     d1w_0, d1b_0, w23_0, b23_0, d4w_0, d4b_0, w5r_0, b5r_0)
    out0_ref[0] = y0.astype(out0_ref.dtype)

    # ---- branch 1: pw0(cat(up(ob0), x26)) == (U1@ob0)@W_top + x26@W_bot + b0
    up0 = jnp.dot(up1_ref[...], ob0.astype(jnp.bfloat16),
                  preferred_element_type=jnp.float32).astype(jnp.bfloat16)
    t1 = (jnp.dot(up0, w0a_1[...], preferred_element_type=jnp.float32)
          + pw(x26, w0b_1, b0_1))
    y1, ob1 = branch(t1, s1,
                     d1w_1, d1b_1, w23_1, b23_1, d4w_1, d4b_1, w5r_1, b5r_1)
    out1_ref[0] = y1.astype(out1_ref.dtype)

    # ---- branch 2 -------------------------------------------------------
    up1x = jnp.dot(up2_ref[...], ob1.astype(jnp.bfloat16),
                   preferred_element_type=jnp.float32).astype(jnp.bfloat16)
    t2 = (jnp.dot(up1x, w0a_2[...], preferred_element_type=jnp.float32)
          + pw(x52, w0b_2, b0_2))
    y2, _ = branch(t2, s2,
                   d1w_2, d1b_2, w23_2, b23_2, d4w_2, d4b_2, w5r_2, b5r_2)
    out2_ref[0] = y2.astype(out2_ref.dtype)


# ---------------------------------------------------------------------------
# BlockSpec helpers + the single pallas_call wrapper
# ---------------------------------------------------------------------------
def _const_spec(arr):
    nd = arr.ndim
    return pl.BlockSpec(arr.shape, lambda n, _nd=nd: (0,) * _nd)


def _batch_spec(arr):
    return pl.BlockSpec((1,) + arr.shape[1:], lambda n: (n, 0, 0))


def fused_forward(params, a52, a26, a13):
    """Entire Mobile_YOLO neck in ONE pallas_call; grid is (batch,) parallel."""
    N = a52.shape[0]
    p = params
    br0, br1, br2 = p["br0"], p["br1"], p["br2"]
    inputs = [
        a52, a26, a13,
        p["wb52"], p["bb52"], p["wb26"], p["bb26"], p["wb13"], p["bb13"],
        p["s0"], p["s1"], p["s2"], p["up1"], p["up2"],
        br0["w0"], br0["b0"], br0["d1w"], br0["d1b"], br0["w23"], br0["b23"],
        br0["d4w"], br0["d4b"], br0["w5r"], br0["b5r"],
        br1["w0a"], br1["w0b"], br1["b0"], br1["d1w"], br1["d1b"], br1["w23"],
        br1["b23"], br1["d4w"], br1["d4b"], br1["w5r"], br1["b5r"],
        br2["w0a"], br2["w0b"], br2["b0"], br2["d1w"], br2["d1b"], br2["w23"],
        br2["b23"], br2["d4w"], br2["d4b"], br2["w5r"], br2["b5r"],
    ]
    in_specs = ([_batch_spec(a52), _batch_spec(a26), _batch_spec(a13)]
                + [_const_spec(a) for a in inputs[3:]])
    out_shape = (jax.ShapeDtypeStruct((N, 8, 128), jnp.float32),
                 jax.ShapeDtypeStruct((N, 16, 128), jnp.float32),
                 jax.ShapeDtypeStruct((N, 64, 128), jnp.float32))
    out_specs = (pl.BlockSpec((1, 8, 128), lambda n: (n, 0, 0)),
                 pl.BlockSpec((1, 16, 128), lambda n: (n, 0, 0)),
                 pl.BlockSpec((1, 64, 128), lambda n: (n, 0, 0)))
    return pl.pallas_call(
        _fused_kernel,
        out_shape=out_shape,
        grid_spec=pltpu.PrefetchScalarGridSpec(
            num_scalar_prefetch=0,
            grid=(N,),
            in_specs=in_specs,
            out_specs=out_specs),
        compiler_params=pltpu.CompilerParams(
            dimension_semantics=("parallel",)),
    )(*inputs)


# ---------------------------------------------------------------------------
# Deterministic parameter construction (BN folded, linear pairs folded, padded)
# ---------------------------------------------------------------------------
def _fold_bn(gamma, beta, mean, var, eps=1e-5):
    s = gamma / jnp.sqrt(var + eps)
    return s, beta - mean * s


def _make_bn(key, c):
    k1, k2, k3, k4 = jax.random.split(key, 4)
    gamma = 1.0 + 0.1 * jax.random.normal(k1, (c,), jnp.float32)
    beta = 0.1 * jax.random.normal(k2, (c,), jnp.float32)
    mean = 0.1 * jax.random.normal(k3, (c,), jnp.float32)
    var = 0.5 + jax.random.uniform(k4, (c,), jnp.float32)
    return _fold_bn(gamma, beta, mean, var)


def _pw_bn_weights(key, cin, cout):
    """1x1 conv (no bias) with BN folded in -> f32 (cin,cout) weight, (cout,) bias."""
    kw, kb = jax.random.split(key)
    w = 0.1 * jax.random.normal(kw, (cin, cout), jnp.float32)
    s, b = _make_bn(kb, cout)
    return w * s[None, :], b


def make_pw_bn(key, cin, cout, cin_pad=None, cout_pad=None):
    cin_pad = cin if cin_pad is None else cin_pad
    cout_pad = cout if cout_pad is None else cout_pad
    w, b = _pw_bn_weights(key, cin, cout)
    w = jnp.pad(w, ((0, cin_pad - cin), (0, cout_pad - cout)))
    b = jnp.pad(b, (0, cout_pad - cout)).reshape(1, cout_pad)
    return w.astype(jnp.bfloat16), b.astype(jnp.float32)


def make_dw_bn(key, c, c_pad=None):
    c_pad = c if c_pad is None else c_pad
    kw, kb = jax.random.split(key)
    w = 0.1 * jax.random.normal(kw, (9, c), jnp.float32)     # 3x3 taps flattened
    s, b = _make_bn(kb, c)
    w = jnp.pad(w * s[None, :], ((0, 0), (0, c_pad - c))).reshape(9, 1, c_pad)
    b = jnp.pad(b, (0, c_pad - c)).reshape(1, c_pad)
    return w.astype(jnp.float32), b.astype(jnp.float32)


def make_branch(key, in_f, m1, m2, f_out, *, in_pad=None, m2_pad=None,
                split=None, f_pad=128):
    """One embedding chain + result conv with the linear pairs folded offline:
       (pw2+BN)->(pw3+BN)   ==> w23/b23   (no ReLU6 between them in the reference)
       (pw5+BN)->result conv ==> w5r/b5r
    """
    m2_pad = m2 if m2_pad is None else m2_pad
    ks = jax.random.split(key, 7)
    p = {}
    # pw0 (+BN); ReLU6 applied in-kernel
    w0, b0 = _pw_bn_weights(ks[0], in_f, m1)
    if split is None:
        in_pad_ = in_f if in_pad is None else in_pad
        p["w0"] = jnp.pad(w0, ((0, in_pad_ - in_f), (0, 0))).astype(jnp.bfloat16)
    else:
        c_up, c_skip, c_skip_pad = split            # rows: [upsampled | skip(+pad)]
        p["w0a"] = w0[:c_up].astype(jnp.bfloat16)
        p["w0b"] = jnp.pad(w0[c_up:], ((0, c_skip_pad - c_skip), (0, 0))
                           ).astype(jnp.bfloat16)
    p["b0"] = b0.reshape(1, m1).astype(jnp.float32)
    # dw1 (+BN)
    p["d1w"], p["d1b"] = make_dw_bn(ks[1], m1)
    # pw2 (+BN, no ReLU6) folded with pw3 (+BN); ReLU6 applied in-kernel
    w2, b2 = _pw_bn_weights(ks[2], m1, in_f)
    w3, b3 = _pw_bn_weights(ks[3], in_f, m2)
    w23 = w2 @ w3
    b23 = b2 @ w3 + b3
    p["w23"] = jnp.pad(w23, ((0, 0), (0, m2_pad - m2))).astype(jnp.bfloat16)
    p["b23"] = jnp.pad(b23, (0, m2_pad - m2)).reshape(1, m2_pad).astype(jnp.float32)
    # dw4 (+BN)
    p["d4w"], p["d4b"] = make_dw_bn(ks[4], m2, c_pad=m2_pad)
    # pw5 (+BN, no ReLU6) folded with the result 1x1 conv (with bias)
    w5, b5 = _pw_bn_weights(ks[5], m2, in_f)
    kw, kb = jax.random.split(ks[6])
    wr = 0.1 * jax.random.normal(kw, (in_f, f_out), jnp.float32)
    br = 0.1 * jax.random.normal(kb, (f_out,), jnp.float32)
    w5r = w5 @ wr
    b5r = b5 @ wr + br
    p["w5r"] = jnp.pad(w5r, ((0, m2_pad - m2), (0, f_pad - f_out))).astype(jnp.bfloat16)
    p["b5r"] = jnp.pad(b5r, (0, f_pad - f_out)).reshape(1, f_pad).astype(jnp.float32)
    return p


def make_shift_cat(h, w, hw_pad=None):
    """(HW_pad, 9*HW_pad) 0/1 matrix: hstack of the nine zero-padded 3x3 spatial
    shift matrices.  Padded rows/columns are all-zero."""
    hw = h * w
    p = hw if hw_pad is None else hw_pad
    m = np.zeros((9, p, p), np.float32)
    k = 0
    for dy in (-1, 0, 1):
        for dx in (-1, 0, 1):
            for y in range(h):
                for x in range(w):
                    yy, xx = y + dy, x + dx
                    if 0 <= yy < h and 0 <= xx < w:
                        m[k, y * w + x, yy * w + xx] = 1.0
            k += 1
    return jnp.asarray(np.concatenate(list(m), axis=1), jnp.bfloat16)   # (p, 9p)


def make_up_mat(h_lo, w_lo, cols_pad=None):
    """(4*HW_lo, HW_lo_pad) 0/1 nearest-neighbour x2 upsample matrix.
    Padded columns are all-zero, so padded source rows are never read."""
    h_hi, w_hi = 2 * h_lo, 2 * w_lo
    cols = h_lo * w_lo if cols_pad is None else cols_pad
    m = np.zeros((h_hi * w_hi, cols), np.float32)
    for y in range(h_hi):
        for x in range(w_hi):
            m[y * w_hi + x, (y // 2) * w_lo + (x // 2)] = 1.0
    return jnp.asarray(m, jnp.bfloat16)


def make_params(key, classes_num=2, num_anchors=3):
    # mobilenetv2 layers_out_filters[-3:] = (32, 96, 320)
    f_out = num_anchors * (5 + classes_num)
    ks = jax.random.split(key, 6)
    p = {}
    # TODO(synk): mobilenet.mobilenetv2 source was not provided; the backbone is a
    # deterministic space-to-depth + 1x1-conv stand-in producing the same feature
    # pyramid shapes (32ch @ /8, 96ch @ /16, 320ch @ /32), lane-padded.
    p["wb52"], p["bb52"] = make_pw_bn(ks[0], 192, 32, cin_pad=256, cout_pad=128)
    p["wb26"], p["bb26"] = make_pw_bn(ks[1], 768, 96, cout_pad=128)
    p["wb13"], p["bb13"] = make_pw_bn(ks[2], 3072, 320, cout_pad=384)
    # the three YOLO branches (linear stage pairs folded offline)
    p["br0"] = make_branch(ks[3], 320, 512, 256, f_out, in_pad=384, m2_pad=256)
    p["br1"] = make_branch(ks[4], 256 + 96, 256, 128, f_out, m2_pad=128,
                           split=(256, 96, 128))
    p["br2"] = make_branch(ks[5], 128 + 32, 128, 64, f_out, m2_pad=128,
                           split=(128, 32, 128))
    # constant 0/1 matrices: concatenated 3x3 shift taps + nearest x2 upsample
    p["s0"] = make_shift_cat(2, 2, hw_pad=8)   # 2x2 spatial, rows padded to 8
    p["s1"] = make_shift_cat(4, 4)
    p["s2"] = make_shift_cat(8, 8)
    p["up1"] = make_up_mat(2, 2, cols_pad=8)
    p["up2"] = make_up_mat(4, 4)
    return p


# ---------------------------------------------------------------------------
# Forward pass (mirrors Mobile_YOLO.forward); only input prep / output strip
# happens outside the kernel.
# ---------------------------------------------------------------------------
def space_to_depth(x_nhwc, f):
    N, H, W_, C = x_nhwc.shape
    x = x_nhwc.reshape(N, H // f, f, W_ // f, f, C)
    x = x.transpose(0, 1, 3, 2, 4, 5)
    return x.reshape(N, H // f, W_ // f, f * f * C)


def mobile_yolo_forward(params, x_nchw, *, classes_num=2, num_anchors=3):
    f_out = num_anchors * (5 + classes_num)
    N = x_nchw.shape[0]
    x = jnp.transpose(x_nchw, (0, 2, 3, 1)).astype(jnp.bfloat16)   # NCHW -> NHWC

    # Backbone stand-in inputs: per-scale space-to-depth patches of the raw
    # image, zero padded to lane/sublane multiples.
    a52 = space_to_depth(x, 8).reshape(N, 64, 192)
    a52 = jnp.pad(a52, ((0, 0), (0, 0), (0, 64)))          # K: 192 -> 256
    a26 = space_to_depth(x, 16).reshape(N, 16, 768)
    a13 = space_to_depth(x, 32).reshape(N, 4, 3072)
    a13 = jnp.pad(a13, ((0, 0), (0, 4), (0, 0)))           # rows: 4 -> 8 (sublanes)

    out0, out1, out2 = fused_forward(params, a52, a26, a13)

    def to_nchw(o, hw):
        o = o[:, :hw * hw, :f_out].reshape(N, hw, hw, f_out)   # strip padding
        return jnp.transpose(o, (0, 3, 1, 2))

    return to_nchw(out0, 2), to_nchw(out1, 4), to_nchw(out2, 8)


# ---------------------------------------------------------------------------
if __name__ == "__main__":
    classes_num, num_anchors = 2, 3
    params = make_params(jax.random.PRNGKey(1), classes_num, num_anchors)
    x = jax.random.normal(jax.random.PRNGKey(0), (2, 3, 64, 64), jnp.float32)

    fwd = jax.jit(mobile_yolo_forward)
    out0, out1, out2 = fwd(params, x)
    jax.block_until_ready((out0, out1, out2))

    f_out = num_anchors * (5 + classes_num)
    assert out0.shape == (2, f_out, 2, 2), out0.shape
    assert out1.shape == (2, f_out, 4, 4), out1.shape
    assert out2.shape == (2, f_out, 8, 8), out2.shape
    assert all(bool(jnp.all(jnp.isfinite(o))) for o in (out0, out1, out2))
    print("KERNEL_OK")
</pallas_src>

<mosaic_0001>
module attributes {stable_mosaic.version = 11 : i64} {
  func.func @_fused_kernel(%arg0: i32, %arg1: memref<1x64x256xbf16, #tpu.memory_space<vmem>>, %arg2: memref<1x16x768xbf16, #tpu.memory_space<vmem>>, %arg3: memref<1x8x3072xbf16, #tpu.memory_space<vmem>>, %arg4: memref<256x128xbf16, #tpu.memory_space<vmem>>, %arg5: memref<1x128xf32, #tpu.memory_space<vmem>>, %arg6: memref<768x128xbf16, #tpu.memory_space<vmem>>, %arg7: memref<1x128xf32, #tpu.memory_space<vmem>>, %arg8: memref<3072x384xbf16, #tpu.memory_space<vmem>>, %arg9: memref<1x384xf32, #tpu.memory_space<vmem>>, %arg10: memref<8x72xbf16, #tpu.memory_space<vmem>>, %arg11: memref<16x144xbf16, #tpu.memory_space<vmem>>, %arg12: memref<64x576xbf16, #tpu.memory_space<vmem>>, %arg13: memref<16x8xbf16, #tpu.memory_space<vmem>>, %arg14: memref<64x16xbf16, #tpu.memory_space<vmem>>, %arg15: memref<384x512xbf16, #tpu.memory_space<vmem>>, %arg16: memref<1x512xf32, #tpu.memory_space<vmem>>, %arg17: memref<9x1x512xf32, #tpu.memory_space<vmem>>, %arg18: memref<1x512xf32, #tpu.memory_space<vmem>>, %arg19: memref<512x256xbf16, #tpu.memory_space<vmem>>, %arg20: memref<1x256xf32, #tpu.memory_space<vmem>>, %arg21: memref<9x1x256xf32, #tpu.memory_space<vmem>>, %arg22: memref<1x256xf32, #tpu.memory_space<vmem>>, %arg23: memref<256x128xbf16, #tpu.memory_space<vmem>>, %arg24: memref<1x128xf32, #tpu.memory_space<vmem>>, %arg25: memref<256x256xbf16, #tpu.memory_space<vmem>>, %arg26: memref<128x256xbf16, #tpu.memory_space<vmem>>, %arg27: memref<1x256xf32, #tpu.memory_space<vmem>>, %arg28: memref<9x1x256xf32, #tpu.memory_space<vmem>>, %arg29: memref<1x256xf32, #tpu.memory_space<vmem>>, %arg30: memref<256x128xbf16, #tpu.memory_space<vmem>>, %arg31: memref<1x128xf32, #tpu.memory_space<vmem>>, %arg32: memref<9x1x128xf32, #tpu.memory_space<vmem>>, %arg33: memref<1x128xf32, #tpu.memory_space<vmem>>, %arg34: memref<128x128xbf16, #tpu.memory_space<vmem>>, %arg35: memref<1x128xf32, #tpu.memory_space<vmem>>, %arg36: memref<128x128xbf16, #tpu.memory_space<vmem>>, %arg37: memref<128x128xbf16, #tpu.memory_space<vmem>>, %arg38: memref<1x128xf32, #tpu.memory_space<vmem>>, %arg39: memref<9x1x128xf32, #tpu.memory_space<vmem>>, %arg40: memref<1x128xf32, #tpu.memory_space<vmem>>, %arg41: memref<128x128xbf16, #tpu.memory_space<vmem>>, %arg42: memref<1x128xf32, #tpu.memory_space<vmem>>, %arg43: memref<9x1x128xf32, #tpu.memory_space<vmem>>, %arg44: memref<1x128xf32, #tpu.memory_space<vmem>>, %arg45: memref<128x128xbf16, #tpu.memory_space<vmem>>, %arg46: memref<1x128xf32, #tpu.memory_space<vmem>>, %arg47: memref<1x8x128xf32, #tpu.memory_space<vmem>>, %arg48: memref<1x16x128xf32, #tpu.memory_space<vmem>>, %arg49: memref<1x64x128xf32, #tpu.memory_space<vmem>>) attributes {dimension_semantics = [#tpu.dimension_semantics<parallel>], iteration_bounds = array<i64: 2>, scalar_prefetch = 0 : i64, scratch_operands = 0 : i64, tpu.core_type = #tpu.core_type<tc>, window_params = [{transform_indices = @transform_0, window_bounds = array<i64: 1, 64, 256>}, {transform_indices = @transform_1, window_bounds = array<i64: 1, 16, 768>}, {transform_indices = @transform_2, window_bounds = array<i64: 1, 8, 3072>}, {pipeline_mode = #tpu.pipeline_mode<synchronous>, transform_indices = @transform_3, window_bounds = array<i64: 256, 128>}, {pipeline_mode = #tpu.pipeline_mode<synchronous>, transform_indices = @transform_4, window_bounds = array<i64: 1, 128>}, {pipeline_mode = #tpu.pipeline_mode<synchronous>, transform_indices = @transform_5, window_bounds = array<i64: 768, 128>}, {pipeline_mode = #tpu.pipeline_mode<synchronous>, transform_indices = @transform_6, window_bounds = array<i64: 1, 128>}, {pipeline_mode = #tpu.pipeline_mode<synchronous>, transform_indices = @transform_7, window_bounds = array<i64: 3072, 384>}, {pipeline_mode = #tpu.pipeline_mode<synchronous>, transform_indices = @transform_8, window_bounds = array<i64: 1, 384>}, {pipeline_mode = #tpu.pipeline_mode<synchronous>, transform_indices = @transform_9, window_bounds = array<i64: 8, 72>}, {pipeline_mode = #tpu.pipeline_mode<synchronous>, transform_indices = @transform_10, window_bounds = array<i64: 16, 144>}, {pipeline_mode = #tpu.pipeline_mode<synchronous>, transform_indices = @transform_11, window_bounds = array<i64: 64, 576>}, {pipeline_mode = #tpu.pipeline_mode<synchronous>, transform_indices = @transform_12, window_bounds = array<i64: 16, 8>}, {pipeline_mode = #tpu.pipeline_mode<synchronous>, transform_indices = @transform_13, window_bounds = array<i64: 64, 16>}, {pipeline_mode = #tpu.pipeline_mode<synchronous>, transform_indices = @transform_14, window_bounds = array<i64: 384, 512>}, {pipeline_mode = #tpu.pipeline_mode<synchronous>, transform_indices = @transform_15, window_bounds = array<i64: 1, 512>}, {pipeline_mode = #tpu.pipeline_mode<synchronous>, transform_indices = @transform_16, window_bounds = array<i64: 9, 1, 512>}, {pipeline_mode = #tpu.pipeline_mode<synchronous>, transform_indices = @transform_17, window_bounds = array<i64: 1, 512>}, {pipeline_mode = #tpu.pipeline_mode<synchronous>, transform_indices = @transform_18, window_bounds = array<i64: 512, 256>}, {pipeline_mode = #tpu.pipeline_mode<synchronous>, transform_indices = @transform_19, window_bounds = array<i64: 1, 256>}, {pipeline_mode = #tpu.pipeline_mode<synchronous>, transform_indices = @transform_20, window_bounds = array<i64: 9, 1, 256>}, {pipeline_mode = #tpu.pipeline_mode<synchronous>, transform_indices = @transform_21, window_bounds = array<i64: 1, 256>}, {pipeline_mode = #tpu.pipeline_mode<synchronous>, transform_indices = @transform_22, window_bounds = array<i64: 256, 128>}, {pipeline_mode = #tpu.pipeline_mode<synchronous>, transform_indices = @transform_23, window_bounds = array<i64: 1, 128>}, {pipeline_mode = #tpu.pipeline_mode<synchronous>, transform_indices = @transform_24, window_bounds = array<i64: 256, 256>}, {pipeline_mode = #tpu.pipeline_mode<synchronous>, transform_indices = @transform_25, window_bounds = array<i64: 128, 256>}, {pipeline_mode = #tpu.pipeline_mode<synchronous>, transform_indices = @transform_26, window_bounds = array<i64: 1, 256>}, {pipeline_mode = #tpu.pipeline_mode<synchronous>, transform_indices = @transform_27, window_bounds = array<i64: 9, 1, 256>}, {pipeline_mode = #tpu.pipeline_mode<synchronous>, transform_indices = @transform_28, window_bounds = array<i64: 1, 256>}, {pipeline_mode = #tpu.pipeline_mode<synchronous>, transform_indices = @transform_29, window_bounds = array<i64: 256, 128>}, {pipeline_mode = #tpu.pipeline_mode<synchronous>, transform_indices = @transform_30, window_bounds = array<i64: 1, 128>}, {pipeline_mode = #tpu.pipeline_mode<synchronous>, transform_indices = @transform_31, window_bounds = array<i64: 9, 1, 128>}, {pipeline_mode = #tpu.pipeline_mode<synchronous>, transform_indices = @transform_32, window_bounds = array<i64: 1, 128>}, {pipeline_mode = #tpu.pipeline_mode<synchronous>, transform_indices = @transform_33, window_bounds = array<i64: 128, 128>}, {pipeline_mode = #tpu.pipeline_mode<synchronous>, transform_indices = @transform_34, window_bounds = array<i64: 1, 128>}, {pipeline_mode = #tpu.pipeline_mode<synchronous>, transform_indices = @transform_35, window_bounds = array<i64: 128, 128>}, {pipeline_mode = #tpu.pipeline_mode<synchronous>, transform_indices = @transform_36, window_bounds = array<i64: 128, 128>}, {pipeline_mode = #tpu.pipeline_mode<synchronous>, transform_indices = @transform_37, window_bounds = array<i64: 1, 128>}, {pipeline_mode = #tpu.pipeline_mode<synchronous>, transform_indices = @transform_38, window_bounds = array<i64: 9, 1, 128>}, {pipeline_mode = #tpu.pipeline_mode<synchronous>, transform_indices = @transform_39, window_bounds = array<i64: 1, 128>}, {pipeline_mode = #tpu.pipeline_mode<synchronous>, transform_indices = @transform_40, window_bounds = array<i64: 128, 128>}, {pipeline_mode = #tpu.pipeline_mode<synchronous>, transform_indices = @transform_41, window_bounds = array<i64: 1, 128>}, {pipeline_mode = #tpu.pipeline_mode<synchronous>, transform_indices = @transform_42, window_bounds = array<i64: 9, 1, 128>}, {pipeline_mode = #tpu.pipeline_mode<synchronous>, transform_indices = @transform_43, window_bounds = array<i64: 1, 128>}, {pipeline_mode = #tpu.pipeline_mode<synchronous>, transform_indices = @transform_44, window_bounds = array<i64: 128, 128>}, {pipeline_mode = #tpu.pipeline_mode<synchronous>, transform_indices = @transform_45, window_bounds = array<i64: 1, 128>}, {transform_indices = @transform_46, window_bounds = array<i64: 1, 8, 128>}, {transform_indices = @transform_47, window_bounds = array<i64: 1, 16, 128>}, {transform_indices = @transform_48, window_bounds = array<i64: 1, 64, 128>}]} {
    %c0 = arith.constant 0 : index
    %c0_0 = arith.constant 0 : index
    %c0_1 = arith.constant 0 : index
    %0 = vector.load %arg1[%c0, %c0_0, %c0_1] : memref<1x64x256xbf16, #tpu.memory_space<vmem>>, vector<1x64x256xbf16>
    %1 = vector.shape_cast %0 : vector<1x64x256xbf16> to vector<64x256xbf16>
    %c0_2 = arith.constant 0 : index
    %c0_3 = arith.constant 0 : index
    %2 = vector.load %arg4[%c0_2, %c0_3] : memref<256x128xbf16, #tpu.memory_space<vmem>>, vector<256x128xbf16>
    %cst = arith.constant dense<0.000000e+00> : vector<64x128xf32>
    %3 = tpu.matmul %1, %2, %cst {dimension_numbers = #tpu.dot_dimension_numbers<[1], [0], [0], [1], [0, 0, 1, 1], [], []>} : vector<64x256xbf16>, vector<256x128xbf16>, vector<64x128xf32> -> vector<64x128xf32>
    %c0_4 = arith.constant 0 : index
    %c0_5 = arith.constant 0 : index
    %4 = vector.load %arg5[%c0_4, %c0_5] : memref<1x128xf32, #tpu.memory_space<vmem>>, vector<1x128xf32>
    %5 = vector.broadcast %4 : vector<1x128xf32> to vector<64x128xf32>
    %6 = arith.addf %3, %5 : vector<64x128xf32>
    %cst_6 = arith.constant 0.000000e+00 : f32
    %cst_7 = arith.constant 6.000000e+00 : f32
    %7 = vector.broadcast %cst_6 : f32 to vector<64x128xf32>
    %8 = arith.maximumf %7, %6 : vector<64x128xf32>
    %9 = vector.broadcast %cst_7 : f32 to vector<64x128xf32>
    %10 = arith.minimumf %9, %8 : vector<64x128xf32>
    %c0_8 = arith.constant 0 : index
    %c0_9 = arith.constant 0 : index
    %c0_10 = arith.constant 0 : index
    %11 = vector.load %arg2[%c0_8, %c0_9, %c0_10] : memref<1x16x768xbf16, #tpu.memory_space<vmem>>, vector<1x16x768xbf16>
    %12 = vector.shape_cast %11 : vector<1x16x768xbf16> to vector<16x768xbf16>
    %c0_11 = arith.constant 0 : index
    %c0_12 = arith.constant 0 : index
    %13 = vector.load %arg6[%c0_11, %c0_12] : memref<768x128xbf16, #tpu.memory_space<vmem>>, vector<768x128xbf16>
    %cst_13 = arith.constant dense<0.000000e+00> : vector<16x128xf32>
    %14 = tpu.matmul %12, %13, %cst_13 {dimension_numbers = #tpu.dot_dimension_numbers<[1], [0], [0], [1], [0, 0, 1, 1], [], []>} : vector<16x768xbf16>, vector<768x128xbf16>, vector<16x128xf32> -> vector<16x128xf32>
    %c0_14 = arith.constant 0 : index
    %c0_15 = arith.constant 0 : index
    %15 = vector.load %arg7[%c0_14, %c0_15] : memref<1x128xf32, #tpu.memory_space<vmem>>, vector<1x128xf32>
    %16 = vector.broadcast %15 : vector<1x128xf32> to vector<16x128xf32>
    %17 = arith.addf %14, %16 : vector<16x128xf32>
    %cst_16 = arith.constant 0.000000e+00 : f32
    %cst_17 = arith.constant 6.000000e+00 : f32
    %18 = vector.broadcast %cst_16 : f32 to vector<16x128xf32>
    %19 = arith.maximumf %18, %17 : vector<16x128xf32>
    %20 = vector.broadcast %cst_17 : f32 to vector<16x128xf32>
    %21 = arith.minimumf %20, %19 : vector<16x128xf32>
    %c0_18 = arith.constant 0 : index
    %c0_19 = arith.constant 0 : index
    %c0_20 = arith.constant 0 : index
    %22 = vector.load %arg3[%c0_18, %c0_19, %c0_20] : memref<1x8x3072xbf16, #tpu.memory_space<vmem>>, vector<1x8x3072xbf16>
    %23 = vector.shape_cast %22 : vector<1x8x3072xbf16> to vector<8x3072xbf16>
    %c0_21 = arith.constant 0 : index
    %c0_22 = arith.constant 0 : index
    %24 = vector.load %arg8[%c0_21, %c0_22] : memref<3072x384xbf16, #tpu.memory_space<vmem>>, vector<3072x384xbf16>
    %cst_23 = arith.constant dense<0.000000e+00> : vector<8x384xf32>
    %25 = tpu.matmul %23, %24, %cst_23 {dimension_numbers = #tpu.dot_dimension_numbers<[1], [0], [0], [1], [0, 0, 1, 1], [], []>} : vector<8x3072xbf16>, vector<3072x384xbf16>, vector<8x384xf32> -> vector<8x384xf32>
    %c0_24 = arith.constant 0 : index
    %c0_25 = arith.constant 0 : index
    %26 = vector.load %arg9[%c0_24, %c0_25] : memref<1x384xf32, #tpu.memory_space<vmem>>, vector<1x384xf32>
    %27 = vector.broadcast %26 : vector<1x384xf32> to vector<8x384xf32>
    %28 = arith.addf %25, %27 : vector<8x384xf32>
    %cst_26 = arith.constant 0.000000e+00 : f32
    %cst_27 = arith.constant 6.000000e+00 : f32
    %29 = vector.broadcast %cst_26 : f32 to vector<8x384xf32>
    %30 = arith.maximumf %29, %28 : vector<8x384xf32>
    %31 = vector.broadcast %cst_27 : f32 to vector<8x384xf32>
    %32 = arith.minimumf %31, %30 : vector<8x384xf32>
    %33 = arith.truncf %32 : vector<8x384xf32> to vector<8x384xbf16>
    %c0_28 = arith.constant 0 : index
    %c0_29 = arith.constant 0 : index
    %34 = vector.load %arg15[%c0_28, %c0_29] : memref<384x512xbf16, #tpu.memory_space<vmem>>, vector<384x512xbf16>
    %cst_30 = arith.constant dense<0.000000e+00> : vector<8x512xf32>
    %35 = tpu.matmul %33, %34, %cst_30 {dimension_numbers = #tpu.dot_dimension_numbers<[1], [0], [0], [1], [0, 0, 1, 1], [], []>} : vector<8x384xbf16>, vector<384x512xbf16>, vector<8x512xf32> -> vector<8x512xf32>
    %c0_31 = arith.constant 0 : index
    %c0_32 = arith.constant 0 : index
    %36 = vector.load %arg16[%c0_31, %c0_32] : memref<1x512xf32, #tpu.memory_space<vmem>>, vector<1x512xf32>
    %37 = vector.broadcast %36 : vector<1x512xf32> to vector<8x512xf32>
    %38 = arith.addf %35, %37 : vector<8x512xf32>
    %cst_33 = arith.constant 0.000000e+00 : f32
    %cst_34 = arith.constant 6.000000e+00 : f32
    %39 = vector.broadcast %cst_33 : f32 to vector<8x512xf32>
    %40 = arith.maximumf %39, %38 : vector<8x512xf32>
    %41 = vector.broadcast %cst_34 : f32 to vector<8x512xf32>
    %42 = arith.minimumf %41, %40 : vector<8x512xf32>
    %c0_35 = arith.constant 0 : index
    %c0_36 = arith.constant 0 : index
    %c0_37 = arith.constant 0 : index
    %43 = vector.load %arg17[%c0_35, %c0_36, %c0_37] : memref<9x1x512xf32, #tpu.memory_space<vmem>>, vector<1x1x512xf32>
    %44 = vector.shape_cast %43 : vector<1x1x512xf32> to vector<1x512xf32>
    %45 = vector.broadcast %44 : vector<1x512xf32> to vector<8x512xf32>
    %46 = arith.mulf %42, %45 : vector<8x512xf32>
    %c1 = arith.constant 1 : index
    %c0_38 = arith.constant 0 : index
    %c0_39 = arith.constant 0 : index
    %47 = vector.load %arg17[%c1, %c0_38, %c0_39] : memref<9x1x512xf32, #tpu.memory_space<vmem>>, vector<1x1x512xf32>
    %48 = vector.shape_cast %47 : vector<1x1x512xf32> to vector<1x512xf32>
    %49 = vector.broadcast %48 : vector<1x512xf32> to vector<8x512xf32>
    %50 = arith.mulf %42, %49 : vector<8x512xf32>
    %c2 = arith.constant 2 : index
    %c0_40 = arith.constant 0 : index
    %c0_41 = arith.constant 0 : index
    %51 = vector.load %arg17[%c2, %c0_40, %c0_41] : memref<9x1x512xf32, #tpu.memory_space<vmem>>, vector<1x1x512xf32>
    %52 = vector.shape_cast %51 : vector<1x1x512xf32> to vector<1x512xf32>
    %53 = vector.broadcast %52 : vector<1x512xf32> to vector<8x512xf32>
    %54 = arith.mulf %42, %53 : vector<8x512xf32>
    %c3 = arith.constant 3 : index
    %c0_42 = arith.constant 0 : index
    %c0_43 = arith.constant 0 : index
    %55 = vector.load %arg17[%c3, %c0_42, %c0_43] : memref<9x1x512xf32, #tpu.memory_space<vmem>>, vector<1x1x512xf32>
    %56 = vector.shape_cast %55 : vector<1x1x512xf32> to vector<1x512xf32>
    %57 = vector.broadcast %56 : vector<1x512xf32> to vector<8x512xf32>
    %58 = arith.mulf %42, %57 : vector<8x512xf32>
    %c4 = arith.constant 4 : index
    %c0_44 = arith.constant 0 : index
    %c0_45 = arith.constant 0 : index
    %59 = vector.load %arg17[%c4, %c0_44, %c0_45] : memref<9x1x512xf32, #tpu.memory_space<vmem>>, vector<1x1x512xf32>
    %60 = vector.shape_cast %59 : vector<1x1x512xf32> to vector<1x512xf32>
    %61 = vector.broadcast %60 : vector<1x512xf32> to vector<8x512xf32>
    %62 = arith.mulf %42, %61 : vector<8x512xf32>
    %c5 = arith.constant 5 : index
    %c0_46 = arith.constant 0 : index
    %c0_47 = arith.constant 0 : index
    %63 = vector.load %arg17[%c5, %c0_46, %c0_47] : memref<9x1x512xf32, #tpu.memory_space<vmem>>, vector<1x1x512xf32>
    %64 = vector.shape_cast %63 : vector<1x1x512xf32> to vector<1x512xf32>
    %65 = vector.broadcast %64 : vector<1x512xf32> to vector<8x512xf32>
    %66 = arith.mulf %42, %65 : vector<8x512xf32>
    %c6 = arith.constant 6 : index
    %c0_48 = arith.constant 0 : index
    %c0_49 = arith.constant 0 : index
    %67 = vector.load %arg17[%c6, %c0_48, %c0_49] : memref<9x1x512xf32, #tpu.memory_space<vmem>>, vector<1x1x512xf32>
    %68 = vector.shape_cast %67 : vector<1x1x512xf32> to vector<1x512xf32>
    %69 = vector.broadcast %68 : vector<1x512xf32> to vector<8x512xf32>
    %70 = arith.mulf %42, %69 : vector<8x512xf32>
    %c7 = arith.constant 7 : index
    %c0_50 = arith.constant 0 : index
    %c0_51 = arith.constant 0 : index
    %71 = vector.load %arg17[%c7, %c0_50, %c0_51] : memref<9x1x512xf32, #tpu.memory_space<vmem>>, vector<1x1x512xf32>
    %72 = vector.shape_cast %71 : vector<1x1x512xf32> to vector<1x512xf32>
    %73 = vector.broadcast %72 : vector<1x512xf32> to vector<8x512xf32>
    %74 = arith.mulf %42, %73 : vector<8x512xf32>
    %c8 = arith.constant 8 : index
    %c0_52 = arith.constant 0 : index
    %c0_53 = arith.constant 0 : index
    %75 = vector.load %arg17[%c8, %c0_52, %c0_53] : memref<9x1x512xf32, #tpu.memory_space<vmem>>, vector<1x1x512xf32>
    %76 = vector.shape_cast %75 : vector<1x1x512xf32> to vector<1x512xf32>
    %77 = vector.broadcast %76 : vector<1x512xf32> to vector<8x512xf32>
    %78 = arith.mulf %42, %77 : vector<8x512xf32>
    %79 = tpu.concatenate %46, %50, %54, %58, %62, %66, %70, %74, %78 in 0 : vector<8x512xf32>, vector<8x512xf32>, vector<8x512xf32>, vector<8x512xf32>, vector<8x512xf32>, vector<8x512xf32>, vector<8x512xf32>, vector<8x512xf32>, vector<8x512xf32> -> vector<72x512xf32>
    %c0_54 = arith.constant 0 : index
    %c0_55 = arith.constant 0 : index
    %80 = vector.load %arg10[%c0_54, %c0_55] : memref<8x72xbf16, #tpu.memory_space<vmem>>, vector<8x72xbf16>
    %81 = arith.truncf %79 : vector<72x512xf32> to vector<72x512xbf16>
    %cst_56 = arith.constant dense<0.000000e+00> : vector<8x512xf32>
    %82 = tpu.matmul %80, %81, %cst_56 {dimension_numbers = #tpu.dot_dimension_numbers<[1], [0], [0], [1], [0, 0, 1, 1], [], []>} : vector<8x72xbf16>, vector<72x512xbf16>, vector<8x512xf32> -> vector<8x512xf32>
    %c0_57 = arith.constant 0 : index
    %c0_58 = arith.constant 0 : index
    %83 = vector.load %arg18[%c0_57, %c0_58] : memref<1x512xf32, #tpu.memory_space<vmem>>, vector<1x512xf32>
    %84 = vector.broadcast %83 : vector<1x512xf32> to vector<8x512xf32>
    %85 = arith.addf %82, %84 : vector<8x512xf32>
    %cst_59 = arith.constant 0.000000e+00 : f32
    %cst_60 = arith.constant 6.000000e+00 : f32
    %86 = vector.broadcast %cst_59 : f32 to vector<8x512xf32>
    %87 = arith.maximumf %86, %85 : vector<8x512xf32>
    %88 = vector.broadcast %cst_60 : f32 to vector<8x512xf32>
    %89 = arith.minimumf %88, %87 : vector<8x512xf32>
    %90 = arith.truncf %89 : vector<8x512xf32> to vector<8x512xbf16>
    %c0_61 = arith.constant 0 : index
    %c0_62 = arith.constant 0 : index
    %91 = vector.load %arg19[%c0_61, %c0_62] : memref<512x256xbf16, #tpu.memory_space<vmem>>, vector<512x256xbf16>
    %cst_63 = arith.constant dense<0.000000e+00> : vector<8x256xf32>
    %92 = tpu.matmul %90, %91, %cst_63 {dimension_numbers = #tpu.dot_dimension_numbers<[1], [0], [0], [1], [0, 0, 1, 1], [], []>} : vector<8x512xbf16>, vector<512x256xbf16>, vector<8x256xf32> -> vector<8x256xf32>
    %c0_64 = arith.constant 0 : index
    %c0_65 = arith.constant 0 : index
    %93 = vector.load %arg20[%c0_64, %c0_65] : memref<1x256xf32, #tpu.memory_space<vmem>>, vector<1x256xf32>
    %94 = vector.broadcast %93 : vector<1x256xf32> to vector<8x256xf32>
    %95 = arith.addf %92, %94 : vector<8x256xf32>
    %cst_66 = arith.constant 0.000000e+00 : f32
    %cst_67 = arith.constant 6.000000e+00 : f32
    %96 = vector.broadcast %cst_66 : f32 to vector<8x256xf32>
    %97 = arith.maximumf %96, %95 : vector<8x256xf32>
    %98 = vector.broadcast %cst_67 : f32 to vector<8x256xf32>
    %99 = arith.minimumf %98, %97 : vector<8x256xf32>
    %c0_68 = arith.constant 0 : index
    %c0_69 = arith.constant 0 : index
    %c0_70 = arith.constant 0 : index
    %100 = vector.load %arg21[%c0_68, %c0_69, %c0_70] : memref<9x1x256xf32, #tpu.memory_space<vmem>>, vector<1x1x256xf32>
    %101 = vector.shape_cast %100 : vector<1x1x256xf32> to vector<1x256xf32>
    %102 = vector.broadcast %101 : vector<1x256xf32> to vector<8x256xf32>
    %103 = arith.mulf %99, %102 : vector<8x256xf32>
    %c1_71 = arith.constant 1 : index
    %c0_72 = arith.constant 0 : index
    %c0_73 = arith.constant 0 : index
    %104 = vector.load %arg21[%c1_71, %c0_72, %c0_73] : memref<9x1x256xf32, #tpu.memory_space<vmem>>, vector<1x1x256xf32>
    %105 = vector.shape_cast %104 : vector<1x1x256xf32> to vector<1x256xf32>
    %106 = vector.broadcast %105 : vector<1x256xf32> to vector<8x256xf32>
    %107 = arith.mulf %99, %106 : vector<8x256xf32>
    %c2_74 = arith.constant 2 : index
    %c0_75 = arith.constant 0 : index
    %c0_76 = arith.constant 0 : index
    %108 = vector.load %arg21[%c2_74, %c0_75, %c0_76] : memref<9x1x256xf32, #tpu.memory_space<vmem>>, vector<1x1x256xf32>
    %109 = vector.shape_cast %108 : vector<1x1x256xf32> to vector<1x256xf32>
    %110 = vector.broadcast %109 : vector<1x256xf32> to vector<8x256xf32>
    %111 = arith.mulf %99, %110 : vector<8x256xf32>
    %c3_77 = arith.constant 3 : index
    %c0_78 = arith.constant 0 : index
    %c0_79 = arith.constant 0 : index
    %112 = vector.load %arg21[%c3_77, %c0_78, %c0_79] : memref<9x1x256xf32, #tpu.memory_space<vmem>>, vector<1x1x256xf32>
    %113 = vector.shape_cast %112 : vector<1x1x256xf32> to vector<1x256xf32>
    %114 = vector.broadcast %113 : vector<1x256xf32> to vector<8x256xf32>
    %115 = arith.mulf %99, %114 : vector<8x256xf32>
    %c4_80 = arith.constant 4 : index
    %c0_81 = arith.constant 0 : index
    %c0_82 = arith.constant 0 : index
    %116 = vector.load %arg21[%c4_80, %c0_81, %c0_82] : memref<9x1x256xf32, #tpu.memory_space<vmem>>, vector<1x1x256xf32>
    %117 = vector.shape_cast %116 : vector<1x1x256xf32> to vector<1x256xf32>
    %118 = vector.broadcast %117 : vector<1x256xf32> to vector<8x256xf32>
    %119 = arith.mulf %99, %118 : vector<8x256xf32>
    %c5_83 = arith.constant 5 : index
    %c0_84 = arith.constant 0 : index
    %c0_85 = arith.constant 0 : index
    %120 = vector.load %arg21[%c5_83, %c0_84, %c0_85] : memref<9x1x256xf32, #tpu.memory_space<vmem>>, vector<1x1x256xf32>
    %121 = vector.shape_cast %120 : vector<1x1x256xf32> to vector<1x256xf32>
    %122 = vector.broadcast %121 : vector<1x256xf32> to vector<8x256xf32>
    %123 = arith.mulf %99, %122 : vector<8x256xf32>
    %c6_86 = arith.constant 6 : index
    %c0_87 = arith.constant 0 : index
    %c0_88 = arith.constant 0 : index
    %124 = vector.load %arg21[%c6_86, %c0_87, %c0_88] : memref<9x1x256xf32, #tpu.memory_space<vmem>>, vector<1x1x256xf32>
    %125 = vector.shape_cast %124 : vector<1x1x256xf32> to vector<1x256xf32>
    %126 = vector.broadcast %125 : vector<1x256xf32> to vector<8x256xf32>
    %127 = arith.mulf %99, %126 : vector<8x256xf32>
    %c7_89 = arith.constant 7 : index
    %c0_90 = arith.constant 0 : index
    %c0_91 = arith.constant 0 : index
    %128 = vector.load %arg21[%c7_89, %c0_90, %c0_91] : memref<9x1x256xf32, #tpu.memory_space<vmem>>, vector<1x1x256xf32>
    %129 = vector.shape_cast %128 : vector<1x1x256xf32> to vector<1x256xf32>
    %130 = vector.broadcast %129 : vector<1x256xf32> to vector<8x256xf32>
    %131 = arith.mulf %99, %130 : vector<8x256xf32>
    %c8_92 = arith.constant 8 : index
    %c0_93 = arith.constant 0 : index
    %c0_94 = arith.constant 0 : index
    %132 = vector.load %arg21[%c8_92, %c0_93, %c0_94] : memref<9x1x256xf32, #tpu.memory_space<vmem>>, vector<1x1x256xf32>
    %133 = vector.shape_cast %132 : vector<1x1x256xf32> to vector<1x256xf32>
    %134 = vector.broadcast %133 : vector<1x256xf32> to vector<8x256xf32>
    %135 = arith.mulf %99, %134 : vector<8x256xf32>
    %136 = tpu.concatenate %103, %107, %111, %115, %119, %123, %127, %131, %135 in 0 : vector<8x256xf32>, vector<8x256xf32>, vector<8x256xf32>, vector<8x256xf32>, vector<8x256xf32>, vector<8x256xf32>, vector<8x256xf32>, vector<8x256xf32>, vector<8x256xf32> -> vector<72x256xf32>
    %c0_95 = arith.constant 0 : index
    %c0_96 = arith.constant 0 : index
    %137 = vector.load %arg10[%c0_95, %c0_96] : memref<8x72xbf16, #tpu.memory_space<vmem>>, vector<8x72xbf16>
    %138 = arith.truncf %136 : vector<72x256xf32> to vector<72x256xbf16>
    %cst_97 = arith.constant dense<0.000000e+00> : vector<8x256xf32>
    %139 = tpu.matmul %137, %138, %cst_97 {dimension_numbers = #tpu.dot_dimension_numbers<[1], [0], [0], [1], [0, 0, 1, 1], [], []>} : vector<8x72xbf16>, vector<72x256xbf16>, vector<8x256xf32> -> vector<8x256xf32>
    %c0_98 = arith.constant 0 : index
    %c0_99 = arith.constant 0 : index
    %140 = vector.load %arg22[%c0_98, %c0_99] : memref<1x256xf32, #tpu.memory_space<vmem>>, vector<1x256xf32>
    %141 = vector.broadcast %140 : vector<1x256xf32> to vector<8x256xf32>
    %142 = arith.addf %139, %141 : vector<8x256xf32>
    %cst_100 = arith.constant 0.000000e+00 : f32
    %cst_101 = arith.constant 6.000000e+00 : f32
    %143 = vector.broadcast %cst_100 : f32 to vector<8x256xf32>
    %144 = arith.maximumf %143, %142 : vector<8x256xf32>
    %145 = vector.broadcast %cst_101 : f32 to vector<8x256xf32>
    %146 = arith.minimumf %145, %144 : vector<8x256xf32>
    %147 = arith.truncf %146 : vector<8x256xf32> to vector<8x256xbf16>
    %c0_102 = arith.constant 0 : index
    %c0_103 = arith.constant 0 : index
    %148 = vector.load %arg23[%c0_102, %c0_103] : memref<256x128xbf16, #tpu.memory_space<vmem>>, vector<256x128xbf16>
    %cst_104 = arith.constant dense<0.000000e+00> : vector<8x128xf32>
    %149 = tpu.matmul %147, %148, %cst_104 {dimension_numbers = #tpu.dot_dimension_numbers<[1], [0], [0], [1], [0, 0, 1, 1], [], []>} : vector<8x256xbf16>, vector<256x128xbf16>, vector<8x128xf32> -> vector<8x128xf32>
    %c0_105 = arith.constant 0 : index
    %c0_106 = arith.constant 0 : index
    %150 = vector.load %arg24[%c0_105, %c0_106] : memref<1x128xf32, #tpu.memory_space<vmem>>, vector<1x128xf32>
    %151 = vector.broadcast %150 : vector<1x128xf32> to vector<8x128xf32>
    %152 = arith.addf %149, %151 : vector<8x128xf32>
    %c0_107 = arith.constant 0 : index
    %c0_108 = arith.constant 0 : index
    %c0_109 = arith.constant 0 : index
    %153 = vector.load %arg47[%c0_107, %c0_108, %c0_109] : memref<1x8x128xf32, #tpu.memory_space<vmem>>, vector<1x8x128xf32>
    %154 = vector.shape_cast %153 : vector<1x8x128xf32> to vector<8x128xf32>
    %155 = vector.shape_cast %152 : vector<8x128xf32> to vector<1x8x128xf32>
    tpu.vector_store %arg47[%c0_107, %c0_108, %c0_109], %155 {strides = array<i32>} : memref<1x8x128xf32, #tpu.memory_space<vmem>>, vector<1x8x128xf32>,
    %c0_110 = arith.constant 0 : index
    %c0_111 = arith.constant 0 : index
    %156 = vector.load %arg13[%c0_110, %c0_111] : memref<16x8xbf16, #tpu.memory_space<vmem>>, vector<16x8xbf16>
    %157 = arith.truncf %99 : vector<8x256xf32> to vector<8x256xbf16>
    %cst_112 = arith.constant dense<0.000000e+00> : vector<16x256xf32>
    %158 = tpu.matmul %156, %157, %cst_112 {dimension_numbers = #tpu.dot_dimension_numbers<[1], [0], [0], [1], [0, 0, 1, 1], [], []>} : vector<16x8xbf16>, vector<8x256xbf16>, vector<16x256xf32> -> vector<16x256xf32>
    %159 = arith.truncf %158 : vector<16x256xf32> to vector<16x256xbf16>
    %c0_113 = arith.constant 0 : index
    %c0_114 = arith.constant 0 : index
    %160 = vector.load %arg25[%c0_113, %c0_114] : memref<256x256xbf16, #tpu.memory_space<vmem>>, vector<256x256xbf16>
    %cst_115 = arith.constant dense<0.000000e+00> : vector<16x256xf32>
    %161 = tpu.matmul %159, %160, %cst_115 {dimension_numbers = #tpu.dot_dimension_numbers<[1], [0], [0], [1], [0, 0, 1, 1], [], []>} : vector<16x256xbf16>, vector<256x256xbf16>, vector<16x256xf32> -> vector<16x256xf32>
    %162 = arith.truncf %21 : vector<16x128xf32> to vector<16x128xbf16>
    %c0_116 = arith.constant 0 : index
    %c0_117 = arith.constant 0 : index
    %163 = vector.load %arg26[%c0_116, %c0_117] : memref<128x256xbf16, #tpu.memory_space<vmem>>, vector<128x256xbf16>
    %cst_118 = arith.constant dense<0.000000e+00> : vector<16x256xf32>
    %164 = tpu.matmul %162, %163, %cst_118 {dimension_numbers = #tpu.dot_dimension_numbers<[1], [0], [0], [1], [0, 0, 1, 1], [], []>} : vector<16x128xbf16>, vector<128x256xbf16>, vector<16x256xf32> -> vector<16x256xf32>
    %c0_119 = arith.constant 0 : index
    %c0_120 = arith.constant 0 : index
    %165 = vector.load %arg27[%c0_119, %c0_120] : memref<1x256xf32, #tpu.memory_space<vmem>>, vector<1x256xf32>
    %166 = vector.broadcast %165 : vector<1x256xf32> to vector<16x256xf32>
    %167 = arith.addf %164, %166 : vector<16x256xf32>
    %168 = arith.addf %161, %167 : vector<16x256xf32>
    %cst_121 = arith.constant 0.000000e+00 : f32
    %cst_122 = arith.constant 6.000000e+00 : f32
    %169 = vector.broadcast %cst_121 : f32 to vector<16x256xf32>
    %170 = arith.maximumf %169, %168 : vector<16x256xf32>
    %171 = vector.broadcast %cst_122 : f32 to vector<16x256xf32>
    %172 = arith.minimumf %171, %170 : vector<16x256xf32>
    %c0_123 = arith.constant 0 : index
    %c0_124 = arith.constant 0 : index
    %c0_125 = arith.constant 0 : index
    %173 = vector.load %arg28[%c0_123, %c0_124, %c0_125] : memref<9x1x256xf32, #tpu.memory_space<vmem>>, vector<1x1x256xf32>
    %174 = vector.shape_cast %173 : vector<1x1x256xf32> to vector<1x256xf32>
    %175 = vector.broadcast %174 : vector<1x256xf32> to vector<16x256xf32>
    %176 = arith.mulf %172, %175 : vector<16x256xf32>
    %c1_126 = arith.constant 1 : index
    %c0_127 = arith.constant 0 : index
    %c0_128 = arith.constant 0 : index
    %177 = vector.load %arg28[%c1_126, %c0_127, %c0_128] : memref<9x1x256xf32, #tpu.memory_space<vmem>>, vector<1x1x256xf32>
    %178 = vector.shape_cast %177 : vector<1x1x256xf32> to vector<1x256xf32>
    %179 = vector.broadcast %178 : vector<1x256xf32> to vector<16x256xf32>
    %180 = arith.mulf %172, %179 : vector<16x256xf32>
    %c2_129 = arith.constant 2 : index
    %c0_130 = arith.constant 0 : index
    %c0_131 = arith.constant 0 : index
    %181 = vector.load %arg28[%c2_129, %c0_130, %c0_131] : memref<9x1x256xf32, #tpu.memory_space<vmem>>, vector<1x1x256xf32>
    %182 = vector.shape_cast %181 : vector<1x1x256xf32> to vector<1x256xf32>
    %183 = vector.broadcast %182 : vector<1x256xf32> to vector<16x256xf32>
    %184 = arith.mulf %172, %183 : vector<16x256xf32>
    %c3_132 = arith.constant 3 : index
    %c0_133 = arith.constant 0 : index
    %c0_134 = arith.constant 0 : index
    %185 = vector.load %arg28[%c3_132, %c0_133, %c0_134] : memref<9x1x256xf32, #tpu.memory_space<vmem>>, vector<1x1x256xf32>
    %186 = vector.shape_cast %185 : vector<1x1x256xf32> to vector<1x256xf32>
    %187 = vector.broadcast %186 : vector<1x256xf32> to vector<16x256xf32>
    %188 = arith.mulf %172, %187 : vector<16x256xf32>
    %c4_135 = arith.constant 4 : index
    %c0_136 = arith.constant 0 : index
    %c0_137 = arith.constant 0 : index
    %189 = vector.load %arg28[%c4_135, %c0_136, %c0_137] : memref<9x1x256xf32, #tpu.memory_space<vmem>>, vector<1x1x256xf32>
    %190 = vector.shape_cast %189 : vector<1x1x256xf32> to vector<1x256xf32>
    %191 = vector.broadcast %190 : vector<1x256xf32> to vector<16x256xf32>
    %192 = arith.mulf %172, %191 : vector<16x256xf32>
    %c5_138 = arith.constant 5 : index
    %c0_139 = arith.constant 0 : index
    %c0_140 = arith.constant 0 : index
    %193 = vector.load %arg28[%c5_138, %c0_139, %c0_140] : memref<9x1x256xf32, #tpu.memory_space<vmem>>, vector<1x1x256xf32>
    %194 = vector.shape_cast %193 : vector<1x1x256xf32> to vector<1x256xf32>
    %195 = vector.broadcast %194 : vector<1x256xf32> to vector<16x256xf32>
    %196 = arith.mulf %172, %195 : vector<16x256xf32>
    %c6_141 = arith.constant 6 : index
    %c0_142 = arith.constant 0 : index
    %c0_143 = arith.constant 0 : index
    %197 = vector.load %arg28[%c6_141, %c0_142, %c0_143] : memref<9x1x256xf32, #tpu.memory_space<vmem>>, vector<1x1x256xf32>
    %198 = vector.shape_cast %197 : vector<1x1x256xf32> to vector<1x256xf32>
    %199 = vector.broadcast %198 : vector<1x256xf32> to vector<16x256xf32>
    %200 = arith.mulf %172, %199 : vector<16x256xf32>
    %c7_144 = arith.constant 7 : index
    %c0_145 = arith.constant 0 : index
    %c0_146 = arith.constant 0 : index
    %201 = vector.load %arg28[%c7_144, %c0_145, %c0_146] : memref<9x1x256xf32, #tpu.memory_space<vmem>>, vector<1x1x256xf32>
    %202 = vector.shape_cast %201 : vector<1x1x256xf32> to vector<1x256xf32>
    %203 = vector.broadcast %202 : vector<1x256xf32> to vector<16x256xf32>
    %204 = arith.mulf %172, %203 : vector<16x256xf32>
    %c8_147 = arith.constant 8 : index
    %c0_148 = arith.constant 0 : index
    %c0_149 = arith.constant 0 : index
    %205 = vector.load %arg28[%c8_147, %c0_148, %c0_149] : memref<9x1x256xf32, #tpu.memory_space<vmem>>, vector<1x1x256xf32>
    %206 = vector.shape_cast %205 : vector<1x1x256xf32> to vector<1x256xf32>
    %207 = vector.broadcast %206 : vector<1x256xf32> to vector<16x256xf32>
    %208 = arith.mulf %172, %207 : vector<16x256xf32>
    %209 = tpu.concatenate %176, %180, %184, %188, %192, %196, %200, %204, %208 in 0 : vector<16x256xf32>, vector<16x256xf32>, vector<16x256xf32>, vector<16x256xf32>, vector<16x256xf32>, vector<16x256xf32>, vector<16x256xf32>, vector<16x256xf32>, vector<16x256xf32> -> vector<144x256xf32>
    %c0_150 = arith.constant 0 : index
    %c0_151 = arith.constant 0 : index
    %210 = vector.load %arg11[%c0_150, %c0_151] : memref<16x144xbf16, #tpu.memory_space<vmem>>, vector<16x144xbf16>
    %211 = arith.truncf %209 : vector<144x256xf32> to vector<144x256xbf16>
    %cst_152 = arith.constant dense<0.000000e+00> : vector<16x256xf32>
    %212 = tpu.matmul %210, %211, %cst_152 {dimension_numbers = #tpu.dot_dimension_numbers<[1], [0], [0], [1], [0, 0, 1, 1], [], []>} : vector<16x144xbf16>, vector<144x256xbf16>, vector<16x256xf32> -> vector<16x256xf32>
    %c0_153 = arith.constant 0 : index
    %c0_154 = arith.constant 0 : index
    %213 = vector.load %arg29[%c0_153, %c0_154] : memref<1x256xf32, #tpu.memory_space<vmem>>, vector<1x256xf32>
    %214 = vector.broadcast %213 : vector<1x256xf32> to vector<16x256xf32>
    %215 = arith.addf %212, %214 : vector<16x256xf32>
    %cst_155 = arith.constant 0.000000e+00 : f32
    %cst_156 = arith.constant 6.000000e+00 : f32
    %216 = vector.broadcast %cst_155 : f32 to vector<16x256xf32>
    %217 = arith.maximumf %216, %215 : vector<16x256xf32>
    %218 = vector.broadcast %cst_156 : f32 to vector<16x256xf32>
    %219 = arith.minimumf %218, %217 : vector<16x256xf32>
    %220 = arith.truncf %219 : vector<16x256xf32> to vector<16x256xbf16>
    %c0_157 = arith.constant 0 : index
    %c0_158 = arith.constant 0 : index
    %221 = vector.load %arg30[%c0_157, %c0_158] : memref<256x128xbf16, #tpu.memory_space<vmem>>, vector<256x128xbf16>
    %cst_159 = arith.constant dense<0.000000e+00> : vector<16x128xf32>
    %222 = tpu.matmul %220, %221, %cst_159 {dimension_numbers = #tpu.dot_dimension_numbers<[1], [0], [0], [1], [0, 0, 1, 1], [], []>} : vector<16x256xbf16>, vector<256x128xbf16>, vector<16x128xf32> -> vector<16x128xf32>
    %c0_160 = arith.constant 0 : index
    %c0_161 = arith.constant 0 : index
    %223 = vector.load %arg31[%c0_160, %c0_161] : memref<1x128xf32, #tpu.memory_space<vmem>>, vector<1x128xf32>
    %224 = vector.broadcast %223 : vector<1x128xf32> to vector<16x128xf32>
    %225 = arith.addf %222, %224 : vector<16x128xf32>
    %cst_162 = arith.constant 0.000000e+00 : f32
    %cst_163 = arith.constant 6.000000e+00 : f32
    %226 = vector.broadcast %cst_162 : f32 to vector<16x128xf32>
    %227 = arith.maximumf %226, %225 : vector<16x128xf32>
    %228 = vector.broadcast %cst_163 : f32 to vector<16x128xf32>
    %229 = arith.minimumf %228, %227 : vector<16x128xf32>
    %c0_164 = arith.constant 0 : index
    %c0_165 = arith.constant 0 : index
    %c0_166 = arith.constant 0 : index
    %230 = vector.load %arg32[%c0_164, %c0_165, %c0_166] : memref<9x1x128xf32, #tpu.memory_space<vmem>>, vector<1x1x128xf32>
    %231 = vector.shape_cast %230 : vector<1x1x128xf32> to vector<1x128xf32>
    %232 = vector.broadcast %231 : vector<1x128xf32> to vector<16x128xf32>
    %233 = arith.mulf %229, %232 : vector<16x128xf32>
    %c1_167 = arith.constant 1 : index
    %c0_168 = arith.constant 0 : index
    %c0_169 = arith.constant 0 : index
    %234 = vector.load %arg32[%c1_167, %c0_168, %c0_169] : memref<9x1x128xf32, #tpu.memory_space<vmem>>, vector<1x1x128xf32>
    %235 = vector.shape_cast %234 : vector<1x1x128xf32> to vector<1x128xf32>
    %236 = vector.broadcast %235 : vector<1x128xf32> to vector<16x128xf32>
    %237 = arith.mulf %229, %236 : vector<16x128xf32>
    %c2_170 = arith.constant 2 : index
    %c0_171 = arith.constant 0 : index
    %c0_172 = arith.constant 0 : index
    %238 = vector.load %arg32[%c2_170, %c0_171, %c0_172] : memref<9x1x128xf32, #tpu.memory_space<vmem>>, vector<1x1x128xf32>
    %239 = vector.shape_cast %238 : vector<1x1x128xf32> to vector<1x128xf32>
    %240 = vector.broadcast %239 : vector<1x128xf32> to vector<16x128xf32>
    %241 = arith.mulf %229, %240 : vector<16x128xf32>
    %c3_173 = arith.constant 3 : index
    %c0_174 = arith.constant 0 : index
    %c0_175 = arith.constant 0 : index
    %242 = vector.load %arg32[%c3_173, %c0_174, %c0_175] : memref<9x1x128xf32, #tpu.memory_space<vmem>>, vector<1x1x128xf32>
    %243 = vector.shape_cast %242 : vector<1x1x128xf32> to vector<1x128xf32>
    %244 = vector.broadcast %243 : vector<1x128xf32> to vector<16x128xf32>
    %245 = arith.mulf %229, %244 : vector<16x128xf32>
    %c4_176 = arith.constant 4 : index
    %c0_177 = arith.constant 0 : index
    %c0_178 = arith.constant 0 : index
    %246 = vector.load %arg32[%c4_176, %c0_177, %c0_178] : memref<9x1x128xf32, #tpu.memory_space<vmem>>, vector<1x1x128xf32>
    %247 = vector.shape_cast %246 : vector<1x1x128xf32> to vector<1x128xf32>
    %248 = vector.broadcast %247 : vector<1x128xf32> to vector<16x128xf32>
    %249 = arith.mulf %229, %248 : vector<16x128xf32>
    %c5_179 = arith.constant 5 : index
    %c0_180 = arith.constant 0 : index
    %c0_181 = arith.constant 0 : index
    %250 = vector.load %arg32[%c5_179, %c0_180, %c0_181] : memref<9x1x128xf32, #tpu.memory_space<vmem>>, vector<1x1x128xf32>
    %251 = vector.shape_cast %250 : vector<1x1x128xf32> to vector<1x128xf32>
    %252 = vector.broadcast %251 : vector<1x128xf32> to vector<16x128xf32>
    %253 = arith.mulf %229, %252 : vector<16x128xf32>
    %c6_182 = arith.constant 6 : index
    %c0_183 = arith.constant 0 : index
    %c0_184 = arith.constant 0 : index
    %254 = vector.load %arg32[%c6_182, %c0_183, %c0_184] : memref<9x1x128xf32, #tpu.memory_space<vmem>>, vector<1x1x128xf32>
    %255 = vector.shape_cast %254 : vector<1x1x128xf32> to vector<1x128xf32>
    %256 = vector.broadcast %255 : vector<1x128xf32> to vector<16x128xf32>
    %257 = arith.mulf %229, %256 : vector<16x128xf32>
    %c7_185 = arith.constant 7 : index
    %c0_186 = arith.constant 0 : index
    %c0_187 = arith.constant 0 : index
    %258 = vector.load %arg32[%c7_185, %c0_186, %c0_187] : memref<9x1x128xf32, #tpu.memory_space<vmem>>, vector<1x1x128xf32>
    %259 = vector.shape_cast %258 : vector<1x1x128xf32> to vector<1x128xf32>
    %260 = vector.broadcast %259 : vector<1x128xf32> to vector<16x128xf32>
    %261 = arith.mulf %229, %260 : vector<16x128xf32>
    %c8_188 = arith.constant 8 : index
    %c0_189 = arith.constant 0 : index
    %c0_190 = arith.constant 0 : index
    %262 = vector.load %arg32[%c8_188, %c0_189, %c0_190] : memref<9x1x128xf32, #tpu.memory_space<vmem>>, vector<1x1x128xf32>
    %263 = vector.shape_cast %262 : vector<1x1x128xf32> to vector<1x128xf32>
    %264 = vector.broadcast %263 : vector<1x128xf32> to vector<16x128xf32>
    %265 = arith.mulf %229, %264 : vector<16x128xf32>
    %266 = tpu.concatenate %233, %237, %241, %245, %249, %253, %257, %261, %265 in 0 : vector<16x128xf32>, vector<16x128xf32>, vector<16x128xf32>, vector<16x128xf32>, vector<16x128xf32>, vector<16x128xf32>, vector<16x128xf32>, vector<16x128xf32>, vector<16x128xf32> -> vector<144x128xf32>
    %c0_191 = arith.constant 0 : index
    %c0_192 = arith.constant 0 : index
    %267 = vector.load %arg11[%c0_191, %c0_192] : memref<16x144xbf16, #tpu.memory_space<vmem>>, vector<16x144xbf16>
    %268 = arith.truncf %266 : vector<144x128xf32> to vector<144x128xbf16>
    %cst_193 = arith.constant dense<0.000000e+00> : vector<16x128xf32>
    %269 = tpu.matmul %267, %268, %cst_193 {dimension_numbers = #tpu.dot_dimension_numbers<[1], [0], [0], [1], [0, 0, 1, 1], [], []>} : vector<16x144xbf16>, vector<144x128xbf16>, vector<16x128xf32> -> vector<16x128xf32>
    %c0_194 = arith.constant 0 : index
    %c0_195 = arith.constant 0 : index
    %270 = vector.load %arg33[%c0_194, %c0_195] : memref<1x128xf32, #tpu.memory_space<vmem>>, vector<1x128xf32>
    %271 = vector.broadcast %270 : vector<1x128xf32> to vector<16x128xf32>
    %272 = arith.addf %269, %271 : vector<16x128xf32>
    %cst_196 = arith.constant 0.000000e+00 : f32
    %cst_197 = arith.constant 6.000000e+00 : f32
    %273 = vector.broadcast %cst_196 : f32 to vector<16x128xf32>
    %274 = arith.maximumf %273, %272 : vector<16x128xf32>
    %275 = vector.broadcast %cst_197 : f32 to vector<16x128xf32>
    %276 = arith.minimumf %275, %274 : vector<16x128xf32>
    %277 = arith.truncf %276 : vector<16x128xf32> to vector<16x128xbf16>
    %c0_198 = arith.constant 0 : index
    %c0_199 = arith.constant 0 : index
    %278 = vector.load %arg34[%c0_198, %c0_199] : memref<128x128xbf16, #tpu.memory_space<vmem>>, vector<128x128xbf16>
    %cst_200 = arith.constant dense<0.000000e+00> : vector<16x128xf32>
    %279 = tpu.matmul %277, %278, %cst_200 {dimension_numbers = #tpu.dot_dimension_numbers<[1], [0], [0], [1], [0, 0, 1, 1], [], []>} : vector<16x128xbf16>, vector<128x128xbf16>, vector<16x128xf32> -> vector<16x128xf32>
    %c0_201 = arith.constant 0 : index
    %c0_202 = arith.constant 0 : index
    %280 = vector.load %arg35[%c0_201, %c0_202] : memref<1x128xf32, #tpu.memory_space<vmem>>, vector<1x128xf32>
    %281 = vector.broadcast %280 : vector<1x128xf32> to vector<16x128xf32>
    %282 = arith.addf %279, %281 : vector<16x128xf32>
    %c0_203 = arith.constant 0 : index
    %c0_204 = arith.constant 0 : index
    %c0_205 = arith.constant 0 : index
    %283 = vector.load %arg48[%c0_203, %c0_204, %c0_205] : memref<1x16x128xf32, #tpu.memory_space<vmem>>, vector<1x16x128xf32>
    %284 = vector.shape_cast %283 : vector<1x16x128xf32> to vector<16x128xf32>
    %285 = vector.shape_cast %282 : vector<16x128xf32> to vector<1x16x128xf32>
    tpu.vector_store %arg48[%c0_203, %c0_204, %c0_205], %285 {strides = array<i32>} : memref<1x16x128xf32, #tpu.memory_space<vmem>>, vector<1x16x128xf32>,
    %c0_206 = arith.constant 0 : index
    %c0_207 = arith.constant 0 : index
    %286 = vector.load %arg14[%c0_206, %c0_207] : memref<64x16xbf16, #tpu.memory_space<vmem>>, vector<64x16xbf16>
    %287 = arith.truncf %229 : vector<16x128xf32> to vector<16x128xbf16>
    %cst_208 = arith.constant dense<0.000000e+00> : vector<64x128xf32>
    %288 = tpu.matmul %286, %287, %cst_208 {dimension_numbers = #tpu.dot_dimension_numbers<[1], [0], [0], [1], [0, 0, 1, 1], [], []>} : vector<64x16xbf16>, vector<16x128xbf16>, vector<64x128xf32> -> vector<64x128xf32>
    %289 = arith.truncf %288 : vector<64x128xf32> to vector<64x128xbf16>
    %c0_209 = arith.constant 0 : index
    %c0_210 = arith.constant 0 : index
    %290 = vector.load %arg36[%c0_209, %c0_210] : memref<128x128xbf16, #tpu.memory_space<vmem>>, vector<128x128xbf16>
    %cst_211 = arith.constant dense<0.000000e+00> : vector<64x128xf32>
    %291 = tpu.matmul %289, %290, %cst_211 {dimension_numbers = #tpu.dot_dimension_numbers<[1], [0], [0], [1], [0, 0, 1, 1], [], []>} : vector<64x128xbf16>, vector<128x128xbf16>, vector<64x128xf32> -> vector<64x128xf32>
    %292 = arith.truncf %10 : vector<64x128xf32> to vector<64x128xbf16>
    %c0_212 = arith.constant 0 : index
    %c0_213 = arith.constant 0 : index
    %293 = vector.load %arg37[%c0_212, %c0_213] : memref<128x128xbf16, #tpu.memory_space<vmem>>, vector<128x128xbf16>
    %cst_214 = arith.constant dense<0.000000e+00> : vector<64x128xf32>
    %294 = tpu.matmul %292, %293, %cst_214 {dimension_numbers = #tpu.dot_dimension_numbers<[1], [0], [0], [1], [0, 0, 1, 1], [], []>} : vector<64x128xbf16>, vector<128x128xbf16>, vector<64x128xf32> -> vector<64x128xf32>
    %c0_215 = arith.constant 0 : index
    %c0_216 = arith.constant 0 : index
    %295 = vector.load %arg38[%c0_215, %c0_216] : memref<1x128xf32, #tpu.memory_space<vmem>>, vector<1x128xf32>
    %296 = vector.broadcast %295 : vector<1x128xf32> to vector<64x128xf32>
    %297 = arith.addf %294, %296 : vector<64x128xf32>
    %298 = arith.addf %291, %297 : vector<64x128xf32>
    %cst_217 = arith.constant 0.000000e+00 : f32
    %cst_218 = arith.constant 6.000000e+00 : f32
    %299 = vector.broadcast %cst_217 : f32 to vector<64x128xf32>
    %300 = arith.maximumf %299, %298 : vector<64x128xf32>
    %301 = vector.broadcast %cst_218 : f32 to vector<64x128xf32>
    %302 = arith.minimumf %301, %300 : vector<64x128xf32>
    %c0_219 = arith.constant 0 : index
    %c0_220 = arith.constant 0 : index
    %c0_221 = arith.constant 0 : index
    %303 = vector.load %arg39[%c0_219, %c0_220, %c0_221] : memref<9x1x128xf32, #tpu.memory_space<vmem>>, vector<1x1x128xf32>
    %304 = vector.shape_cast %303 : vector<1x1x128xf32> to vector<1x128xf32>
    %305 = vector.broadcast %304 : vector<1x128xf32> to vector<64x128xf32>
    %306 = arith.mulf %302, %305 : vector<64x128xf32>
    %c1_222 = arith.constant 1 : index
    %c0_223 = arith.constant 0 : index
    %c0_224 = arith.constant 0 : index
    %307 = vector.load %arg39[%c1_222, %c0_223, %c0_224] : memref<9x1x128xf32, #tpu.memory_space<vmem>>, vector<1x1x128xf32>
    %308 = vector.shape_cast %307 : vector<1x1x128xf32> to vector<1x128xf32>
    %309 = vector.broadcast %308 : vector<1x128xf32> to vector<64x128xf32>
    %310 = arith.mulf %302, %309 : vector<64x128xf32>
    %c2_225 = arith.constant 2 : index
    %c0_226 = arith.constant 0 : index
    %c0_227 = arith.constant 0 : index
    %311 = vector.load %arg39[%c2_225, %c0_226, %c0_227] : memref<9x1x128xf32, #tpu.memory_space<vmem>>, vector<1x1x128xf32>
    %312 = vector.shape_cast %311 : vector<1x1x128xf32> to vector<1x128xf32>
    %313 = vector.broadcast %312 : vector<1x128xf32> to vector<64x128xf32>
    %314 = arith.mulf %302, %313 : vector<64x128xf32>
    %c3_228 = arith.constant 3 : index
    %c0_229 = arith.constant 0 : index
    %c0_230 = arith.constant 0 : index
    %315 = vector.load %arg39[%c3_228, %c0_229, %c0_230] : memref<9x1x128xf32, #tpu.memory_space<vmem>>, vector<1x1x128xf32>
    %316 = vector.shape_cast %315 : vector<1x1x128xf32> to vector<1x128xf32>
    %317 = vector.broadcast %316 : vector<1x128xf32> to vector<64x128xf32>
    %318 = arith.mulf %302, %317 : vector<64x128xf32>
    %c4_231 = arith.constant 4 : index
    %c0_232 = arith.constant 0 : index
    %c0_233 = arith.constant 0 : index
    %319 = vector.load %arg39[%c4_231, %c0_232, %c0_233] : memref<9x1x128xf32, #tpu.memory_space<vmem>>, vector<1x1x128xf32>
    %320 = vector.shape_cast %319 : vector<1x1x128xf32> to vector<1x128xf32>
    %321 = vector.broadcast %320 : vector<1x128xf32> to vector<64x128xf32>
    %322 = arith.mulf %302, %321 : vector<64x128xf32>
    %c5_234 = arith.constant 5 : index
    %c0_235 = arith.constant 0 : index
    %c0_236 = arith.constant 0 : index
    %323 = vector.load %arg39[%c5_234, %c0_235, %c0_236] : memref<9x1x128xf32, #tpu.memory_space<vmem>>, vector<1x1x128xf32>
    %324 = vector.shape_cast %323 : vector<1x1x128xf32> to vector<1x128xf32>
    %325 = vector.broadcast %324 : vector<1x128xf32> to vector<64x128xf32>
    %326 = arith.mulf %302, %325 : vector<64x128xf32>
    %c6_237 = arith.constant 6 : index
    %c0_238 = arith.constant 0 : index
    %c0_239 = arith.constant 0 : index
    %327 = vector.load %arg39[%c6_237, %c0_238, %c0_239] : memref<9x1x128xf32, #tpu.memory_space<vmem>>, vector<1x1x128xf32>
    %328 = vector.shape_cast %327 : vector<1x1x128xf32> to vector<1x128xf32>
    %329 = vector.broadcast %328 : vector<1x128xf32> to vector<64x128xf32>
    %330 = arith.mulf %302, %329 : vector<64x128xf32>
    %c7_240 = arith.constant 7 : index
    %c0_241 = arith.constant 0 : index
    %c0_242 = arith.constant 0 : index
    %331 = vector.load %arg39[%c7_240, %c0_241, %c0_242] : memref<9x1x128xf32, #tpu.memory_space<vmem>>, vector<1x1x128xf32>
    %332 = vector.shape_cast %331 : vector<1x1x128xf32> to vector<1x128xf32>
    %333 = vector.broadcast %332 : vector<1x128xf32> to vector<64x128xf32>
    %334 = arith.mulf %302, %333 : vector<64x128xf32>
    %c8_243 = arith.constant 8 : index
    %c0_244 = arith.constant 0 : index
    %c0_245 = arith.constant 0 : index
    %335 = vector.load %arg39[%c8_243, %c0_244, %c0_245] : memref<9x1x128xf32, #tpu.memory_space<vmem>>, vector<1x1x128xf32>
    %336 = vector.shape_cast %335 : vector<1x1x128xf32> to vector<1x128xf32>
    %337 = vector.broadcast %336 : vector<1x128xf32> to vector<64x128xf32>
    %338 = arith.mulf %302, %337 : vector<64x128xf32>
    %339 = tpu.concatenate %306, %310, %314, %318, %322, %326, %330, %334, %338 in 0 : vector<64x128xf32>, vector<64x128xf32>, vector<64x128xf32>, vector<64x128xf32>, vector<64x128xf32>, vector<64x128xf32>, vector<64x128xf32>, vector<64x128xf32>, vector<64x128xf32> -> vector<576x128xf32>
    %c0_246 = arith.constant 0 : index
    %c0_247 = arith.constant 0 : index
    %340 = vector.load %arg12[%c0_246, %c0_247] : memref<64x576xbf16, #tpu.memory_space<vmem>>, vector<64x576xbf16>
    %341 = arith.truncf %339 : vector<576x128xf32> to vector<576x128xbf16>
    %cst_248 = arith.constant dense<0.000000e+00> : vector<64x128xf32>
    %342 = tpu.matmul %340, %341, %cst_248 {dimension_numbers = #tpu.dot_dimension_numbers<[1], [0], [0], [1], [0, 0, 1, 1], [], []>} : vector<64x576xbf16>, vector<576x128xbf16>, vector<64x128xf32> -> vector<64x128xf32>
    %c0_249 = arith.constant 0 : index
    %c0_250 = arith.constant 0 : index
    %343 = vector.load %arg40[%c0_249, %c0_250] : memref<1x128xf32, #tpu.memory_space<vmem>>, vector<1x128xf32>
    %344 = vector.broadcast %343 : vector<1x128xf32> to vector<64x128xf32>
    %345 = arith.addf %342, %344 : vector<64x128xf32>
    %cst_251 = arith.constant 0.000000e+00 : f32
    %cst_252 = arith.constant 6.000000e+00 : f32
    %346 = vector.broadcast %cst_251 : f32 to vector<64x128xf32>
    %347 = arith.maximumf %346, %345 : vector<64x128xf32>
    %348 = vector.broadcast %cst_252 : f32 to vector<64x128xf32>
    %349 = arith.minimumf %348, %347 : vector<64x128xf32>
    %350 = arith.truncf %349 : vector<64x128xf32> to vector<64x128xbf16>
    %c0_253 = arith.constant 0 : index
    %c0_254 = arith.constant 0 : index
    %351 = vector.load %arg41[%c0_253, %c0_254] : memref<128x128xbf16, #tpu.memory_space<vmem>>, vector<128x128xbf16>
    %cst_255 = arith.constant dense<0.000000e+00> : vector<64x128xf32>
    %352 = tpu.matmul %350, %351, %cst_255 {dimension_numbers = #tpu.dot_dimension_numbers<[1], [0], [0], [1], [0, 0, 1, 1], [], []>} : vector<64x128xbf16>, vector<128x128xbf16>, vector<64x128xf32> -> vector<64x128xf32>
    %c0_256 = arith.constant 0 : index
    %c0_257 = arith.constant 0 : index
    %353 = vector.load %arg42[%c0_256, %c0_257] : memref<1x128xf32, #tpu.memory_space<vmem>>, vector<1x128xf32>
    %354 = vector.broadcast %353 : vector<1x128xf32> to vector<64x128xf32>
    %355 = arith.addf %352, %354 : vector<64x128xf32>
    %cst_258 = arith.constant 0.000000e+00 : f32
    %cst_259 = arith.constant 6.000000e+00 : f32
    %356 = vector.broadcast %cst_258 : f32 to vector<64x128xf32>
    %357 = arith.maximumf %356, %355 : vector<64x128xf32>
    %358 = vector.broadcast %cst_259 : f32 to vector<64x128xf32>
    %359 = arith.minimumf %358, %357 : vector<64x128xf32>
    %c0_260 = arith.constant 0 : index
    %c0_261 = arith.constant 0 : index
    %c0_262 = arith.constant 0 : index
    %360 = vector.load %arg43[%c0_260, %c0_261, %c0_262] : memref<9x1x128xf32, #tpu.memory_space<vmem>>, vector<1x1x128xf32>
    %361 = vector.shape_cast %360 : vector<1x1x128xf32> to vector<1x128xf32>
    %362 = vector.broadcast %361 : vector<1x128xf32> to vector<64x128xf32>
    %363 = arith.mulf %359, %362 : vector<64x128xf32>
    %c1_263 = arith.constant 1 : index
    %c0_264 = arith.constant 0 : index
    %c0_265 = arith.constant 0 : index
    %364 = vector.load %arg43[%c1_263, %c0_264, %c0_265] : memref<9x1x128xf32, #tpu.memory_space<vmem>>, vector<1x1x128xf32>
    %365 = vector.shape_cast %364 : vector<1x1x128xf32> to vector<1x128xf32>
    %366 = vector.broadcast %365 : vector<1x128xf32> to vector<64x128xf32>
    %367 = arith.mulf %359, %366 : vector<64x128xf32>
    %c2_266 = arith.constant 2 : index
    %c0_267 = arith.constant 0 : index
    %c0_268 = arith.constant 0 : index
    %368 = vector.load %arg43[%c2_266, %c0_267, %c0_268] : memref<9x1x128xf32, #tpu.memory_space<vmem>>, vector<1x1x128xf32>
    %369 = vector.shape_cast %368 : vector<1x1x128xf32> to vector<1x128xf32>
    %370 = vector.broadcast %369 : vector<1x128xf32> to vector<64x128xf32>
    %371 = arith.mulf %359, %370 : vector<64x128xf32>
    %c3_269 = arith.constant 3 : index
    %c0_270 = arith.constant 0 : index
    %c0_271 = arith.constant 0 : index
    %372 = vector.load %arg43[%c3_269, %c0_270, %c0_271] : memref<9x1x128xf32, #tpu.memory_space<vmem>>, vector<1x1x128xf32>
    %373 = vector.shape_cast %372 : vector<1x1x128xf32> to vector<1x128xf32>
    %374 = vector.broadcast %373 : vector<1x128xf32> to vector<64x128xf32>
    %375 = arith.mulf %359, %374 : vector<64x128xf32>
    %c4_272 = arith.constant 4 : index
    %c0_273 = arith.constant 0 : index
    %c0_274 = arith.constant 0 : index
    %376 = vector.load %arg43[%c4_272, %c0_273, %c0_274] : memref<9x1x128xf32, #tpu.memory_space<vmem>>, vector<1x1x128xf32>
    %377 = vector.shape_cast %376 : vector<1x1x128xf32> to vector<1x128xf32>
    %378 = vector.broadcast %377 : vector<1x128xf32> to vector<64x128xf32>
    %379 = arith.mulf %359, %378 : vector<64x128xf32>
    %c5_275 = arith.constant 5 : index
    %c0_276 = arith.constant 0 : index
    %c0_277 = arith.constant 0 : index
    %380 = vector.load %arg43[%c5_275, %c0_276, %c0_277] : memref<9x1x128xf32, #tpu.memory_space<vmem>>, vector<1x1x128xf32>
    %381 = vector.shape_cast %380 : vector<1x1x128xf32> to vector<1x128xf32>
    %382 = vector.broadcast %381 : vector<1x128xf32> to vector<64x128xf32>
    %383 = arith.mulf %359, %382 : vector<64x128xf32>
    %c6_278 = arith.constant 6 : index
    %c0_279 = arith.constant 0 : index
    %c0_280 = arith.constant 0 : index
    %384 = vector.load %arg43[%c6_278, %c0_279, %c0_280] : memref<9x1x128xf32, #tpu.memory_space<vmem>>, vector<1x1x128xf32>
    %385 = vector.shape_cast %384 : vector<1x1x128xf32> to vector<1x128xf32>
    %386 = vector.broadcast %385 : vector<1x128xf32> to vector<64x128xf32>
    %387 = arith.mulf %359, %386 : vector<64x128xf32>
    %c7_281 = arith.constant 7 : index
    %c0_282 = arith.constant 0 : index
    %c0_283 = arith.constant 0 : index
    %388 = vector.load %arg43[%c7_281, %c0_282, %c0_283] : memref<9x1x128xf32, #tpu.memory_space<vmem>>, vector<1x1x128xf32>
    %389 = vector.shape_cast %388 : vector<1x1x128xf32> to vector<1x128xf32>
    %390 = vector.broadcast %389 : vector<1x128xf32> to vector<64x128xf32>
    %391 = arith.mulf %359, %390 : vector<64x128xf32>
    %c8_284 = arith.constant 8 : index
    %c0_285 = arith.constant 0 : index
    %c0_286 = arith.constant 0 : index
    %392 = vector.load %arg43[%c8_284, %c0_285, %c0_286] : memref<9x1x128xf32, #tpu.memory_space<vmem>>, vector<1x1x128xf32>
    %393 = vector.shape_cast %392 : vector<1x1x128xf32> to vector<1x128xf32>
    %394 = vector.broadcast %393 : vector<1x128xf32> to vector<64x128xf32>
    %395 = arith.mulf %359, %394 : vector<64x128xf32>
    %396 = tpu.concatenate %363, %367, %371, %375, %379, %383, %387, %391, %395 in 0 : vector<64x128xf32>, vector<64x128xf32>, vector<64x128xf32>, vector<64x128xf32>, vector<64x128xf32>, vector<64x128xf32>, vector<64x128xf32>, vector<64x128xf32>, vector<64x128xf32> -> vector<576x128xf32>
    %c0_287 = arith.constant 0 : index
    %c0_288 = arith.constant 0 : index
    %397 = vector.load %arg12[%c0_287, %c0_288] : memref<64x576xbf16, #tpu.memory_space<vmem>>, vector<64x576xbf16>
    %398 = arith.truncf %396 : vector<576x128xf32> to vector<576x128xbf16>
    %cst_289 = arith.constant dense<0.000000e+00> : vector<64x128xf32>
    %399 = tpu.matmul %397, %398, %cst_289 {dimension_numbers = #tpu.dot_dimension_numbers<[1], [0], [0], [1], [0, 0, 1, 1], [], []>} : vector<64x576xbf16>, vector<576x128xbf16>, vector<64x128xf32> -> vector<64x128xf32>
    %c0_290 = arith.constant 0 : index
    %c0_291 = arith.constant 0 : index
    %400 = vector.load %arg44[%c0_290, %c0_291] : memref<1x128xf32, #tpu.memory_space<vmem>>, vector<1x128xf32>
    %401 = vector.broadcast %400 : vector<1x128xf32> to vector<64x128xf32>
    %402 = arith.addf %399, %401 : vector<64x128xf32>
    %cst_292 = arith.constant 0.000000e+00 : f32
    %cst_293 = arith.constant 6.000000e+00 : f32
    %403 = vector.broadcast %cst_292 : f32 to vector<64x128xf32>
    %404 = arith.maximumf %403, %402 : vector<64x128xf32>
    %405 = vector.broadcast %cst_293 : f32 to vector<64x128xf32>
    %406 = arith.minimumf %405, %404 : vector<64x128xf32>
    %407 = arith.truncf %406 : vector<64x128xf32> to vector<64x128xbf16>
    %c0_294 = arith.constant 0 : index
    %c0_295 = arith.constant 0 : index
    %408 = vector.load %arg45[%c0_294, %c0_295] : memref<128x128xbf16, #tpu.memory_space<vmem>>, vector<128x128xbf16>
    %cst_296 = arith.constant dense<0.000000e+00> : vector<64x128xf32>
    %409 = tpu.matmul %407, %408, %cst_296 {dimension_numbers = #tpu.dot_dimension_numbers<[1], [0], [0], [1], [0, 0, 1, 1], [], []>} : vector<64x128xbf16>, vector<128x128xbf16>, vector<64x128xf32> -> vector<64x128xf32>
    %c0_297 = arith.constant 0 : index
    %c0_298 = arith.constant 0 : index
    %410 = vector.load %arg46[%c0_297, %c0_298] : memref<1x128xf32, #tpu.memory_space<vmem>>, vector<1x128xf32>
    %411 = vector.broadcast %410 : vector<1x128xf32> to vector<64x128xf32>
    %412 = arith.addf %409, %411 : vector<64x128xf32>
    %c0_299 = arith.constant 0 : index
    %c0_300 = arith.constant 0 : index
    %c0_301 = arith.constant 0 : index
    %413 = vector.load %arg49[%c0_299, %c0_300, %c0_301] : memref<1x64x128xf32, #tpu.memory_space<vmem>>, vector<1x64x128xf32>
    %414 = vector.shape_cast %413 : vector<1x64x128xf32> to vector<64x128xf32>
    %415 = vector.shape_cast %412 : vector<64x128xf32> to vector<1x64x128xf32>
    tpu.vector_store %arg49[%c0_299, %c0_300, %c0_301], %415 {strides = array<i32>} : memref<1x64x128xf32, #tpu.memory_space<vmem>>, vector<1x64x128xf32>,
    return
  }
  func.func @transform_0(%arg0: i32) -> (i32, i32, i32) {
    %c0_i32 = arith.constant 0 : i32
    %c0_i32_0 = arith.constant 0 : i32
    %c0_i32_1 = arith.constant 0 : i32
    return %arg0, %c0_i32, %c0_i32_0 : i32, i32, i32
  }
  func.func @transform_1(%arg0: i32) -> (i32, i32, i32) {
    %c0_i32 = arith.constant 0 : i32
    %c0_i32_0 = arith.constant 0 : i32
    %c0_i32_1 = arith.constant 0 : i32
    return %arg0, %c0_i32, %c0_i32_0 : i32, i32, i32
  }
  func.func @transform_2(%arg0: i32) -> (i32, i32, i32) {
    %c0_i32 = arith.constant 0 : i32
    %c0_i32_0 = arith.constant 0 : i32
    %c0_i32_1 = arith.constant 0 : i32
    return %arg0, %c0_i32, %c0_i32_0 : i32, i32, i32
  }
  func.func @transform_3(%arg0: i32) -> (i32, i32) {
    %c0_i32 = arith.constant 0 : i32
    %c0_i32_0 = arith.constant 0 : i32
    %c0_i32_1 = arith.constant 0 : i32
    return %c0_i32, %c0_i32_0 : i32, i32
  }
  func.func @transform_4(%arg0: i32) -> (i32, i32) {
    %c0_i32 = arith.constant 0 : i32
    %c0_i32_0 = arith.constant 0 : i32
    %c0_i32_1 = arith.constant 0 : i32
    return %c0_i32, %c0_i32_0 : i32, i32
  }
  func.func @transform_5(%arg0: i32) -> (i32, i32) {
    %c0_i32 = arith.constant 0 : i32
    %c0_i32_0 = arith.constant 0 : i32
    %c0_i32_1 = arith.constant 0 : i32
    return %c0_i32, %c0_i32_0 : i32, i32
  }
  func.func @transform_6(%arg0: i32) -> (i32, i32) {
    %c0_i32 = arith.constant 0 : i32
    %c0_i32_0 = arith.constant 0 : i32
    %c0_i32_1 = arith.constant 0 : i32
    return %c0_i32, %c0_i32_0 : i32, i32
  }
  func.func @transform_7(%arg0: i32) -> (i32, i32) {
    %c0_i32 = arith.constant 0 : i32
    %c0_i32_0 = arith.constant 0 : i32
    %c0_i32_1 = arith.constant 0 : i32
    return %c0_i32, %c0_i32_0 : i32, i32
  }
  func.func @transform_8(%arg0: i32) -> (i32, i32) {
    %c0_i32 = arith.constant 0 : i32
    %c0_i32_0 = arith.constant 0 : i32
    %c0_i32_1 = arith.constant 0 : i32
    return %c0_i32, %c0_i32_0 : i32, i32
  }
  func.func @transform_9(%arg0: i32) -> (i32, i32) {
    %c0_i32 = arith.constant 0 : i32
    %c0_i32_0 = arith.constant 0 : i32
    %c0_i32_1 = arith.constant 0 : i32
    return %c0_i32, %c0_i32_0 : i32, i32
  }
  func.func @transform_10(%arg0: i32) -> (i32, i32) {
    %c0_i32 = arith.constant 0 : i32
    %c0_i32_0 = arith.constant 0 : i32
    %c0_i32_1 = arith.constant 0 : i32
    return %c0_i32, %c0_i32_0 : i32, i32
  }
  func.func @transform_11(%arg0: i32) -> (i32, i32) {
    %c0_i32 = arith.constant 0 : i32
    %c0_i32_0 = arith.constant 0 : i32
    %c0_i32_1 = arith.constant 0 : i32
    return %c0_i32, %c0_i32_0 : i32, i32
  }
  func.func @transform_12(%arg0: i32) -> (i32, i32) {
    %c0_i32 = arith.constant 0 : i32
    %c0_i32_0 = arith.constant 0 : i32
    %c0_i32_1 = arith.constant 0 : i32
    return %c0_i32, %c0_i32_0 : i32, i32
  }
  func.func @transform_13(%arg0: i32) -> (i32, i32) {
    %c0_i32 = arith.constant 0 : i32
    %c0_i32_0 = arith.constant 0 : i32
    %c0_i32_1 = arith.constant 0 : i32
    return %c0_i32, %c0_i32_0 : i32, i32
  }
  func.func @transform_14(%arg0: i32) -> (i32, i32) {
    %c0_i32 = arith.constant 0 : i32
    %c0_i32_0 = arith.constant 0 : i32
    %c0_i32_1 = arith.constant 0 : i32
    return %c0_i32, %c0_i32_0 : i32, i32
  }
  func.func @transform_15(%arg0: i32) -> (i32, i32) {
    %c0_i32 = arith.constant 0 : i32
    %c0_i32_0 = arith.constant 0 : i32
    %c0_i32_1 = arith.constant 0 : i32
    return %c0_i32, %c0_i32_0 : i32, i32
  }
  func.func @transform_16(%arg0: i32) -> (i32, i32, i32) {
    %c0_i32 = arith.constant 0 : i32
    %c0_i32_0 = arith.constant 0 : i32
    %c0_i32_1 = arith.constant 0 : i32
    %c0_i32_2 = arith.constant 0 : i32
    return %c0_i32, %c0_i32_0, %c0_i32_1 : i32, i32, i32
  }
  func.func @transform_17(%arg0: i32) -> (i32, i32) {
    %c0_i32 = arith.constant 0 : i32
    %c0_i32_0 = arith.constant 0 : i32
    %c0_i32_1 = arith.constant 0 : i32
    return %c0_i32, %c0_i32_0 : i32, i32
  }
  func.func @transform_18(%arg0: i32) -> (i32, i32) {
    %c0_i32 = arith.constant 0 : i32
    %c0_i32_0 = arith.constant 0 : i32
    %c0_i32_1 = arith.constant 0 : i32
    return %c0_i32, %c0_i32_0 : i32, i32
  }
  func.func @transform_19(%arg0: i32) -> (i32, i32) {
    %c0_i32 = arith.constant 0 : i32
    %c0_i32_0 = arith.constant 0 : i32
    %c0_i32_1 = arith.constant 0 : i32
    return %c0_i32, %c0_i32_0 : i32, i32
  }
  func.func @transform_20(%arg0: i32) -> (i32, i32, i32) {
    %c0_i32 = arith.constant 0 : i32
    %c0_i32_0 = arith.constant 0 : i32
    %c0_i32_1 = arith.constant 0 : i32
    %c0_i32_2 = arith.constant 0 : i32
    return %c0_i32, %c0_i32_0, %c0_i32_1 : i32, i32, i32
  }
  func.func @transform_21(%arg0: i32) -> (i32, i32) {
    %c0_i32 = arith.constant 0 : i32
    %c0_i32_0 = arith.constant 0 : i32
    %c0_i32_1 = arith.constant 0 : i32
    return %c0_i32, %c0_i32_0 : i32, i32
  }
  func.func @transform_22(%arg0: i32) -> (i32, i32) {
    %c0_i32 = arith.constant 0 : i32
    %c0_i32_0 = arith.constant 0 : i32
    %c0_i32_1 = arith.constant 0 : i32
    return %c0_i32, %c0_i32_0 : i32, i32
  }
  func.func @transform_23(%arg0: i32) -> (i32, i32) {
    %c0_i32 = arith.constant 0 : i32
    %c0_i32_0 = arith.constant 0 : i32
    %c0_i32_1 = arith.constant 0 : i32
    return %c0_i32, %c0_i32_0 : i32, i32
  }
  func.func @transform_24(%arg0: i32) -> (i32, i32) {
    %c0_i32 = arith.constant 0 : i32
    %c0_i32_0 = arith.constant 0 : i32
    %c0_i32_1 = arith.constant 0 : i32
    return %c0_i32, %c0_i32_0 : i32, i32
  }
  func.func @transform_25(%arg0: i32) -> (i32, i32) {
    %c0_i32 = arith.constant 0 : i32
    %c0_i32_0 = arith.constant 0 : i32
    %c0_i32_1 = arith.constant 0 : i32
    return %c0_i32, %c0_i32_0 : i32, i32
  }
  func.func @transform_26(%arg0: i32) -> (i32, i32) {
    %c0_i32 = arith.constant 0 : i32
    %c0_i32_0 = arith.constant 0 : i32
    %c0_i32_1 = arith.constant 0 : i32
    return %c0_i32, %c0_i32_0 : i32, i32
  }
  func.func @transform_27(%arg0: i32) -> (i32, i32, i32) {
    %c0_i32 = arith.constant 0 : i32
    %c0_i32_0 = arith.constant 0 : i32
    %c0_i32_1 = arith.constant 0 : i32
    %c0_i32_2 = arith.constant 0 : i32
    return %c0_i32, %c0_i32_0, %c0_i32_1 : i32, i32, i32
  }
  func.func @transform_28(%arg0: i32) -> (i32, i32) {
    %c0_i32 = arith.constant 0 : i32
    %c0_i32_0 = arith.constant 0 : i32
    %c0_i32_1 = arith.constant 0 : i32
    return %c0_i32, %c0_i32_0 : i32, i32
  }
  func.func @transform_29(%arg0: i32) -> (i32, i32) {
    %c0_i32 = arith.constant 0 : i32
    %c0_i32_0 = arith.constant 0 : i32
    %c0_i32_1 = arith.constant 0 : i32
    return %c0_i32, %c0_i32_0 : i32, i32
  }
  func.func @transform_30(%arg0: i32) -> (i32, i32) {
    %c0_i32 = arith.constant 0 : i32
    %c0_i32_0 = arith.constant 0 : i32
    %c0_i32_1 = arith.constant 0 : i32
    return %c0_i32, %c0_i32_0 : i32, i32
  }
  func.func @transform_31(%arg0: i32) -> (i32, i32, i32) {
    %c0_i32 = arith.constant 0 : i32
    %c0_i32_0 = arith.constant 0 : i32
    %c0_i32_1 = arith.constant 0 : i32
    %c0_i32_2 = arith.constant 0 : i32
    return %c0_i32, %c0_i32_0, %c0_i32_1 : i32, i32, i32
  }
  func.func @transform_32(%arg0: i32) -> (i32, i32) {
    %c0_i32 = arith.constant 0 : i32
    %c0_i32_0 = arith.constant 0 : i32
    %c0_i32_1 = arith.constant 0 : i32
    return %c0_i32, %c0_i32_0 : i32, i32
  }
  func.func @transform_33(%arg0: i32) -> (i32, i32) {
    %c0_i32 = arith.constant 0 : i32
    %c0_i32_0 = arith.constant 0 : i32
    %c0_i32_1 = arith.constant 0 : i32
    return %c0_i32, %c0_i32_0 : i32, i32
  }
  func.func @transform_34(%arg0: i32) -> (i32, i32) {
    %c0_i32 = arith.constant 0 : i32
    %c0_i32_0 = arith.constant 0 : i32
    %c0_i32_1 = arith.constant 0 : i32
    return %c0_i32, %c0_i32_0 : i32, i32
  }
  func.func @transform_35(%arg0: i32) -> (i32, i32) {
    %c0_i32 = arith.constant 0 : i32
    %c0_i32_0 = arith.constant 0 : i32
    %c0_i32_1 = arith.constant 0 : i32
    return %c0_i32, %c0_i32_0 : i32, i32
  }
  func.func @transform_36(%arg0: i32) -> (i32, i32) {
    %c0_i32 = arith.constant 0 : i32
    %c0_i32_0 = arith.constant 0 : i32
    %c0_i32_1 = arith.constant 0 : i32
    return %c0_i32, %c0_i32_0 : i32, i32
  }
  func.func @transform_37(%arg0: i32) -> (i32, i32) {
    %c0_i32 = arith.constant 0 : i32
    %c0_i32_0 = arith.constant 0 : i32
    %c0_i32_1 = arith.constant 0 : i32
    return %c0_i32, %c0_i32_0 : i32, i32
  }
  func.func @transform_38(%arg0: i32) -> (i32, i32, i32) {
    %c0_i32 = arith.constant 0 : i32
    %c0_i32_0 = arith.constant 0 : i32
    %c0_i32_1 = arith.constant 0 : i32
    %c0_i32_2 = arith.constant 0 : i32
    return %c0_i32, %c0_i32_0, %c0_i32_1 : i32, i32, i32
  }
  func.func @transform_39(%arg0: i32) -> (i32, i32) {
    %c0_i32 = arith.constant 0 : i32
    %c0_i32_0 = arith.constant 0 : i32
    %c0_i32_1 = arith.constant 0 : i32
    return %c0_i32, %c0_i32_0 : i32, i32
  }
  func.func @transform_40(%arg0: i32) -> (i32, i32) {
    %c0_i32 = arith.constant 0 : i32
    %c0_i32_0 = arith.constant 0 : i32
    %c0_i32_1 = arith.constant 0 : i32
    return %c0_i32, %c0_i32_0 : i32, i32
  }
  func.func @transform_41(%arg0: i32) -> (i32, i32) {
    %c0_i32 = arith.constant 0 : i32
    %c0_i32_0 = arith.constant 0 : i32
    %c0_i32_1 = arith.constant 0 : i32
    return %c0_i32, %c0_i32_0 : i32, i32
  }
  func.func @transform_42(%arg0: i32) -> (i32, i32, i32) {
    %c0_i32 = arith.constant 0 : i32
    %c0_i32_0 = arith.constant 0 : i32
    %c0_i32_1 = arith.constant 0 : i32
    %c0_i32_2 = arith.constant 0 : i32
    return %c0_i32, %c0_i32_0, %c0_i32_1 : i32, i32, i32
  }
  func.func @transform_43(%arg0: i32) -> (i32, i32) {
    %c0_i32 = arith.constant 0 : i32
    %c0_i32_0 = arith.constant 0 : i32
    %c0_i32_1 = arith.constant 0 : i32
    return %c0_i32, %c0_i32_0 : i32, i32
  }
  func.func @transform_44(%arg0: i32) -> (i32, i32) {
    %c0_i32 = arith.constant 0 : i32
    %c0_i32_0 = arith.constant 0 : i32
    %c0_i32_1 = arith.constant 0 : i32
    return %c0_i32, %c0_i32_0 : i32, i32
  }
  func.func @transform_45(%arg0: i32) -> (i32, i32) {
    %c0_i32 = arith.constant 0 : i32
    %c0_i32_0 = arith.constant 0 : i32
    %c0_i32_1 = arith.constant 0 : i32
    return %c0_i32, %c0_i32_0 : i32, i32
  }
  func.func @transform_46(%arg0: i32) -> (i32, i32, i32) {
    %c0_i32 = arith.constant 0 : i32
    %c0_i32_0 = arith.constant 0 : i32
    %c0_i32_1 = arith.constant 0 : i32
    return %arg0, %c0_i32, %c0_i32_0 : i32, i32, i32
  }
  func.func @transform_47(%arg0: i32) -> (i32, i32, i32) {
    %c0_i32 = arith.constant 0 : i32
    %c0_i32_0 = arith.constant 0 : i32
    %c0_i32_1 = arith.constant 0 : i32
    return %arg0, %c0_i32, %c0_i32_0 : i32, i32, i32
  }
  func.func @transform_48(%arg0: i32) -> (i32, i32, i32) {
    %c0_i32 = arith.constant 0 : i32
    %c0_i32_0 = arith.constant 0 : i32
    %c0_i32_1 = arith.constant 0 : i32
    return %arg0, %c0_i32, %c0_i32_0 : i32, i32, i32
  }
}

</mosaic_0001>

<bundles_post_ra>
// kernel: mobile_yolo_forward.1
= control target key start
LH: loop header
LB: loop body
LE: loop exit
PB: predicated region body
PF: predicated region fallthrough
CT: control target
= control target key end

     0   :  { %s15944_s6 = smov 1   ;;  %s15945_s10 = smov 2   ;;  %s18498_s0 = inlined_call_operand.smem [shape: u32[49], index: -1, kind: input, shape index: {}] }
   0x1   :  { %s16009_s5 = sld [smem:[%s18498_s0]]   ;;  %s15946_s14 = smov 3  }
   0x2   :  { %s16014_s9 = sld [smem:[%s18498_s0 + %s15944_s6]]   ;;  %s15947_s18 = smov 4  }
   0x3   :  { %s16019_s13 = sld [smem:[%s18498_s0 + %s15945_s10]]   ;;  %s15948_s22 = smov 5  }
   0x4   :  { %s16024_s17 = sld [smem:[%s18498_s0 + %s15946_s14]]   ;;  %s15949_s26 = smov 6  }
   0x5   :  { %s16029_s21 = sld [smem:[%s18498_s0 + %s15947_s18]]   ;;  %s15950_s30 = smov 7  }
   0x6   :  { %s16034_s25 = sld [smem:[%s18498_s0 + %s15948_s22]]   ;;  %s15951_s4 = smov 8  }
   0x7   :  { %18552 = sst [smem:[#allocation12_spill]] %s16009_s5  ;;  %s15952_s10 = smov 9  }
   0x8   :  { %18553 = sst [smem:[#allocation13_spill]] %s16014_s9  ;;  %s15953_s15 = smov 10  }
   0x9   :  { %s16039_s29 = sld [smem:[%s18498_s0 + %s15949_s26]]   ;;  %s15954_s20 = smov 11  }
   0xa   :  { %s16044_s3 = sld [smem:[%s18498_s0 + %s15950_s30]]   ;;  %s15955_s26 = smov 12  }
   0xb   :  { %s16049_s8 = sld [smem:[%s18498_s0 + %s15951_s4]]   ;;  %s15956_s1 = smov 13  }
   0xc   :  { %s16054_s14 = sld [smem:[%s18498_s0 + %s15952_s10]]   ;;  %s15957_s7 = smov 14  }
   0xd   :  { %s16059_s19 = sld [smem:[%s18498_s0 + %s15953_s15]]   ;;  %s15958_s15 = smov 15  }
   0xe   :  { %s16064_s24 = sld [smem:[%s18498_s0 + %s15954_s20]]   ;;  %s15959_s22 = smov 16  }
   0xf   :  { %s16069_s30 = sld [smem:[%s18498_s0 + %s15955_s26]]   ;;  %s15960_s28 = smov 17  }
  0x10   :  { %18554 = sst [smem:[#allocation14_spill]] %s16044_s3 }
  0x11   :  { %18555 = sst [smem:[#allocation15_spill]] %s16049_s8 }
  0x12   :  { %18556 = sst [smem:[#allocation16_spill]] %s16054_s14 }
  0x13   :  { %18557 = sst [smem:[#allocation17_spill]] %s16059_s19 }
  0x14   :  { %18558 = sst [smem:[#allocation18_spill]] %s16064_s24 }
  0x15   :  { %18559 = sst [smem:[#allocation19_spill]] %s16069_s30 }
  0x16   :  { %s16074_s6 = sld [smem:[%s18498_s0 + %s15956_s1]]  }
  0x17   :  { %s16079_s12 = sld [smem:[%s18498_s0 + %s15957_s7]]   ;;  %s15961_s7 = smov 18  }
  0x18   :  { %s16084_s20 = sld [smem:[%s18498_s0 + %s15958_s15]]   ;;  %s15962_s15 = smov 19  }
  0x19   :  { %s16089_s27 = sld [smem:[%s18498_s0 + %s15959_s22]]   ;;  %s15963_s22 = smov 20  }
  0x1a   :  { %s16094_s4 = sld [smem:[%s18498_s0 + %s15960_s28]]   ;;  %s15964_s28 = smov 21  }
  0x1b   :  { %s16099_s24 = sld [smem:[%s18498_s0 + %s15961_s7]]   ;;  %s15965_s7 = smov 22  }
  0x1c   :  { %18560 = sst [smem:[#allocation20_spill]] %s16074_s6 }
  0x1d   :  { %s16104_s6 = sld [smem:[%s18498_s0 + %s15962_s15]]   ;;  %s15966_s15 = smov 23  }
  0x1e   :  { %s16109_s19 = sld [smem:[%s18498_s0 + %s15963_s22]]   ;;  %s15967_s22 = smov 24  }
  0x1f   :  { %s16114_s30 = sld [smem:[%s18498_s0 + %s15964_s28]]   ;;  %s15968_s28 = smov 25  }
  0x20   :  { %18561 = sst [smem:[#allocation21_spill]] %s16094_s4 }
  0x21   :  { %18562 = sst [smem:[#allocation22_spill]] %s16099_s24 }
  0x22   :  { %s16119_s4 = sld [smem:[%s18498_s0 + %s15965_s7]]   ;;  %s15969_s7 = smov 26  }
  0x23   :  { %18563 = sst [smem:[#allocation23_spill]] %s16104_s6 }
  0x24   :  { %18564 = sst [smem:[#allocation24_spill]] %s16109_s19 }
  0x25   :  { %18565 = sst [smem:[#allocation25_spill]] %s16114_s30 }
  0x26   :  { %s16124_s6 = sld [smem:[%s18498_s0 + %s15966_s15]]   ;;  %s15970_s15 = smov 27  }
  0x27   :  { %s16129_s19 = sld [smem:[%s18498_s0 + %s15967_s22]]   ;;  %s15971_s22 = smov 28  }
  0x28   :  { %18566 = sst [smem:[#allocation26_spill]] %s16119_s4 }
  0x29   :  { %s16134_s30 = sld [smem:[%s18498_s0 + %s15968_s28]]   ;;  %s15972_s28 = smov 29  }
  0x2a   :  { %s16139_s4 = sld [smem:[%s18498_s0 + %s15969_s7]]   ;;  %s15973_s7 = smov 30  }
  0x2c   :  { %18567 = sst [smem:[#allocation27_spill]] %s16124_s6 }
  0x2d   :  { %18568 = sst [smem:[#allocation28_spill]] %s16129_s19 }
  0x2e   :  { %s16144_s6 = sld [smem:[%s18498_s0 + %s15970_s15]]   ;;  %s15974_s15 = smov 31  }
  0x2f   :  { %18569 = sst [smem:[#allocation29_spill]] %s16134_s30 }
  0x30   :  { %18570 = sst [smem:[#allocation30_spill]] %s16139_s4 }
  0x31   :  { %s16149_s19 = sld [smem:[%s18498_s0 + %s15971_s22]]   ;;  %s15975_s22 = smov 32  }
  0x32   :  { %s16154_s30 = sld [smem:[%s18498_s0 + %s15972_s28]]   ;;  %s15976_s28 = smov 33  }
  0x33   :  { %s16159_s4 = sld [smem:[%s18498_s0 + %s15973_s7]]   ;;  %s15977_s7 = smov 34  }
  0x34   :  { %18571 = sst [smem:[#allocation31_spill]] %s16144_s6 }
  0x35   :  { %s16164_s6 = sld [smem:[%s18498_s0 + %s15974_s15]]   ;;  %s15978_s15 = smov 35  }
  0x37   :  { %18572 = sst [smem:[#allocation32_spill]] %s16149_s19 }
  0x38   :  { %18573 = sst [smem:[#allocation33_spill]] %s16154_s30 }
  0x39   :  { %18574 = sst [smem:[#allocation34_spill]] %s16159_s4 }
  0x3a   :  { %s16169_s19 = sld [smem:[%s18498_s0 + %s15975_s22]]   ;;  %s15979_s22 = smov 36  }
  0x3b   :  { %18575 = sst [smem:[#allocation35_spill]] %s16164_s6 }
  0x3c   :  { %s16174_s30 = sld [smem:[%s18498_s0 + %s15976_s28]]   ;;  %s15980_s28 = smov 37  }
  0x3d   :  { %s16179_s4 = sld [smem:[%s18498_s0 + %s15977_s7]]   ;;  %s15981_s7 = smov 38  }
  0x3e   :  { %s16184_s6 = sld [smem:[%s18498_s0 + %s15978_s15]]   ;;  %s15982_s15 = smov 39  }
  0x40   :  { %18576 = sst [smem:[#allocation36_spill]] %s16169_s19 }
  0x41   :  { %s16189_s19 = sld [smem:[%s18498_s0 + %s15979_s22]]   ;;  %s15983_s22 = smov 40  }
  0x42   :  { %18577 = sst [smem:[#allocation37_spill]] %s16174_s30 }
  0x43   :  { %18578 = sst [smem:[#allocation38_spill]] %s16179_s4 }
  0x44   :  { %18579 = sst [smem:[#allocation39_spill]] %s16184_s6 }
  0x45   :  { %s16194_s30 = sld [smem:[%s18498_s0 + %s15980_s28]]   ;;  %s15984_s28 = smov 41  }
  0x46   :  { %s16199_s4 = sld [smem:[%s18498_s0 + %s15981_s7]]   ;;  %s15985_s7 = smov 42  }
  0x47   :  { %18580 = sst [smem:[#allocation40_spill]] %s16189_s19 }
  0x48   :  { %s16204_s6 = sld [smem:[%s18498_s0 + %s15982_s15]]   ;;  %s15986_s15 = smov 43  }
  0x49   :  { %s16209_s19 = sld [smem:[%s18498_s0 + %s15983_s22]]   ;;  %s15987_s22 = smov 44  }
  0x4b   :  { %18581 = sst [smem:[#allocation41_spill]] %s16194_s30 }
  0x4c   :  { %18582 = sst [smem:[#allocation42_spill]] %s16199_s4 }
  0x4d   :  { %s16214_s30 = sld [smem:[%s18498_s0 + %s15984_s28]]   ;;  %s15988_s28 = smov 45  }
  0x4e   :  { %18583 = sst [smem:[#allocation43_spill]] %s16204_s6 }
  0x4f   :  { %18584 = sst [smem:[#allocation44_spill]] %s16209_s19 }
  0x50   :  { %s16219_s4 = sld [smem:[%s18498_s0 + %s15985_s7]]   ;;  %s15989_s7 = smov 46  }
  0x51   :  { %s16224_s6 = sld [smem:[%s18498_s0 + %s15986_s15]]   ;;  %s15990_s15 = smov 47  }
  0x52   :  { %s16229_s19 = sld [smem:[%s18498_s0 + %s15987_s22]]   ;;  %s15991_s22 = smov 48  }
  0x53   :  { %s16234_s24 = sld [smem:[%s18498_s0 + %s15988_s28]]  }
  0x54   :  { %s16244_s14 = sld [smem:[%s18498_s0 + %s15990_s15]]  }
  0x56   :  { %18585 = sst [smem:[#allocation45_spill]] %s16219_s4 }
  0x57   :  { %18586 = sst [smem:[#allocation46_spill]] %s16224_s6 }
  0x58   :  { %18587 = sst [smem:[#allocation47_spill]] %s16229_s19 }
  0x59   :  { %s16239_s4 = sld [smem:[%s18498_s0 + %s15989_s7]]  }
  0x5a   :  { %s16249_s19 = sld [smem:[%s18498_s0 + %s15991_s22]]  }
  0x5f   :  { %18588 = sst [smem:[#allocation48_spill]] %s16239_s4 }
  0x60   :  { %103 = vsyncpa [#allocation3], 0 }
  0x61   :  { %104 = vsyncpa [#allocation6], 0 }
  0x62   :  { %105 = vsyncpa [#allocation4], 0 }
  0x63   :  { %107 = vsyncpa [#allocation4 + $0x1], 0  ;;  %s16251_s28 = smov 0   ;;  %s16253_s1 = smov 0  }
  0x64   :  { %s16255_s2 = smov 0   ;;  %s16257_s7 = smov 0  }
  0x65 LB: > { %s18589_s8 = sld [smem:[#allocation15_spill]]  ;;  %s18590_s6 = sld [smem:[#allocation46_spill]]  ;;  %s15938_s2 = sphi %s16255_s2, %s18681_s2   ;;  %s15934_s1 = sphi %s16253_s1, %s18683_s1   ;;  %s15930_s28 = sphi %s16251_s28, %s18682_s28   ;;  %s15942_s7 = sphi %s16257_s7, %s18679_s7  }
  0x66   : > { %s18591_s3 = sld [smem:[#allocation14_spill]]  ;;  %18592 = sst [smem:[#allocation49_spill]] %s15930_s28 }
  0x67   : > { %18593 = sst [smem:[#allocation50_spill]] %s15938_s2  ;;  %s16272_s0 = sadd.s32 4294967295, %s15942_s7  }
  0x68   : > { %s12347_s10 = sadd.s32 4294967294, %s15942_s7   ;;  %s16276_s11 = sadd.s32 1, %s15942_s7  }
  0x69   : > { %18594 = sst [smem:[#allocation51_spill]] %s16276_s11  ;;  %s1127_s15 = sadd.s32 1, %s15938_s2 }
  0x6a   : > { %s1124_s16 = ssub.s32 %s15942_s7, %s16276_s11  ;;  %p1137_p0 = scmp.ne.s32.totalorder %s15938_s2, %s15934_s1 }
  0x6b   : > { %p1125_p1 = scmp.eq.s32.totalorder %s1124_s16, 0  ;;  %p1138_p2 = scmp.eq.s32.totalorder %s16272_s0, 1 }
  0x6c   : > { %p1143_p3 = scmp.ne.s32.totalorder %s15934_s1, %s15930_s28  ;;  %p1144_p4 = scmp.eq.s32.totalorder %s12347_s10, 1 }
  0x6d   : > { %s16287_s18 = scalar_select %p1125_p1, %s15938_s2, %s1127_s15  }
  0x6e   : > { %p16289_p5 = por %p1138_p2, %p1137_p0  ;;  %p16293_p6 = por %p1144_p4, %p1143_p3 }
  0x6f   : > { %18595 = sst [smem:[#allocation52_spill]] %s16287_s18  ;;  %p12348_p7 = scmp.ge.s32.totalorder %s15942_s7, 1 }
  0x70   : > { %s18596_s22 = scalar_select %p16289_p5, 1, 0 }
  0x71   : > { %s18597_s23 = scalar_select %p16293_p6, 1, 0 }
  0x72   : > { %p1177_p8 = scmp.lt.s32.totalorder %s15942_s7, 3  ;;  %p18522_p9 = scmp.eq.s32.totalorder %s16272_s0, 0 }
  0x73   : > { %18598 = sst [smem:[#allocation53_spill]] %s18597_s23  ;;  %s15992_s10 = smov [#allocation5]  }
  0x74   : > { %p16300_p10 = pnand %p12348_p7, %p1177_p8  ;;  %s1318_s15 = sshll.u32 %s15992_s10, 4  ;;  %s1319_s15 = int_to_ptr.vmem [resolvable:$true] %s1318_s15 }
  0x75   : > { %s15993_s16 = smov [#allocation2]   ;;  %s15994_s11 = smov [#allocation7]  }
  0x76   : > { %s18599_s26 = scalar_select %p16300_p10, 1, 0 }
  0x77   : > { %p14380_p11 = pneg %p16300_p10  ;;  %s1304_s18 = sshll.u32 %s15993_s16, 4  ;;  %s16312_s18 = int_to_ptr.vmem [resolvable:$true] %s1304_s18 }
  0x78   : > { %s1332_s23 = sshll.u32 %s15994_s11, 4  ;;  %s15788_s28 = scalar_lea.hbm %s18590_s6, 16  ;;  %s16314_s23 = int_to_ptr.vmem [resolvable:$true] %s1332_s23 }
  0x79   : > { %p16308_p12 = pnand %p18522_p9, %p14380_p11  ;;  %p15789_p13 = scmp.ne.s32.totalorder %s18590_s6, %s15788_s28 }
  0x7a   : > { %p15795_p3 = scmp.lt.u32.totalorder %s15788_s28, %s18590_s6 }
  0x7b   : > { %p16320_p0 = pneg %p16308_p12 }
  0x7d   : > { %p15791_p1 = pnand %p16320_p0, %p15789_p13 }
  0x7f   : > { %p15792_p2 = pneg %p15791_p1 }
  0x81   : > { %p15797_p4 = pnand %p15795_p3, %p15792_p2 }
  0x83   : > { %15800 = shalt.err (!%p15797_p4)
}
  0x84   : > { %s15801_s16 = scalar_lea.vmem %s1319_s15, 16  ;;  %s15808_s11 = scalar_lea.vmem %s1319_s15, 32 }
  0x85   : > { %p15802_p7 = scmp.ne.s32.totalorder %s1319_s15, %s15801_s16  ;;  %p15809_p9 = scmp.lt.s32.totalorder %s1319_s15, %s1319_s15 }
  0x86   : > { %p15810_p6 = scmp.lt.s32.totalorder %s15808_s11, %s15801_s16 }
  0x87   : > { %p15804_p8 = pnand %p15802_p7, %p16320_p0 }
  0x88   : > { %p15811_p5 = por %p15810_p6, %p15809_p9 }
  0x89   : > { %p15805_p11 = pneg %p15804_p8 }
  0x8b   : > { %p15812_p10 = pnand %p15811_p5, %p15805_p11 }
  0x8d   : > { %15815 = shalt.err (!%p15812_p10)
}
  0x8e   : > { %14386 = dma.hbm_to_vmem [thread:$0]  (!%p16308_p12), %s18590_s6, 16, %s1319_s15, [#allocation6]  }
  0x8f   : > { %s15816_s28 = scalar_lea.hbm %s16214_s30, 16 }
  0x90   : > { %p15817_p13 = scmp.ne.s32.totalorder %s16214_s30, %s15816_s28  ;;  %p15823_p3 = scmp.lt.u32.totalorder %s15816_s28, %s16214_s30 }
  0x92   : > { %p15819_p1 = pnand %p15817_p13, %p16320_p0 }
  0x94   : > { %p15820_p2 = pneg %p15819_p1 }
  0x96   : > { %p15825_p4 = pnand %p15823_p3, %p15820_p2 }
  0x98   : > { %15828 = shalt.err (!%p15825_p4)
}
  0x99   : > { %s15829_s16 = scalar_lea.vmem %s16312_s18, 16  ;;  %s15836_s11 = scalar_lea.vmem %s16312_s18, 32 }
  0x9a   : > { %p15830_p5 = scmp.ne.s32.totalorder %s16312_s18, %s15829_s16  ;;  %p15837_p10 = scmp.lt.s32.totalorder %s16312_s18, %s16312_s18 }
  0x9b   : > { %p15838_p7 = scmp.lt.s32.totalorder %s15836_s11, %s15829_s16 }
  0x9c   : > { %p15832_p6 = pnand %p15830_p5, %p16320_p0 }
  0x9d   : > { %p15839_p8 = por %p15838_p7, %p15837_p10 }
  0x9e   : > { %p15833_p9 = pneg %p15832_p6 }
  0xa0   : > { %p15840_p11 = pnand %p15839_p8, %p15833_p9 }
  0xa2   : > { %15843 = shalt.err (!%p15840_p11)
}
  0xa3   : > { %14383 = dma.hbm_to_vmem [thread:$0]  (!%p16308_p12), %s16214_s30, 16, %s16312_s18, [#allocation3]  }
  0xa4   : > { %s15844_s15 = scalar_lea.hbm %s16234_s24, 16 }
  0xa5   : > { %p15845_p13 = scmp.ne.s32.totalorder %s16234_s24, %s15844_s15  ;;  %p15851_p3 = scmp.lt.u32.totalorder %s15844_s15, %s16234_s24 }
  0xa7   : > { %p15847_p1 = pnand %p15845_p13, %p16320_p0 }
  0xa9   : > { %p15848_p2 = pneg %p15847_p1 }
  0xab   : > { %p15853_p4 = pnand %p15851_p3, %p15848_p2 }
  0xad   : > { %15856 = shalt.err (!%p15853_p4)
}
  0xae   : > { %s15857_s28 = scalar_lea.vmem %s16314_s23, 16  ;;  %s15864_s16 = scalar_lea.vmem %s16314_s23, 32 }
  0xaf   : > { %p15858_p5 = scmp.ne.s32.totalorder %s16314_s23, %s15857_s28  ;;  %p15865_p10 = scmp.lt.s32.totalorder %s16314_s23, %s16314_s23 }
  0xb0   : > { %p15866_p7 = scmp.lt.s32.totalorder %s15864_s16, %s15857_s28 }
  0xb1   : > { %p15860_p6 = pnand %p15858_p5, %p16320_p0 }
  0xb2   : > { %p15867_p8 = por %p15866_p7, %p15865_p10 }
  0xb3   : > { %p15861_p9 = pneg %p15860_p6 }
  0xb5   : > { %p15868_p11 = pnand %p15867_p8, %p15861_p9 }
  0xb7   : > { %15871 = shalt.err (!%p15868_p11)
}
  0xb8   : > { %14389 = dma.hbm_to_vmem [thread:$0]  (!%p16308_p12), %s16234_s24, 16, %s16314_s23, [#allocation6]  }
  0xb9   : > { %p18602_p13 = scmp.ne.s32.totalorder %s18599_s26, 0 }
  0xbb   : > { %1369 = sbr.rel (%p18602_p13) target bundleno = 4760 (0x1298), region = 204 }
  0xc2   : > { %p18603_p1 = scmp.eq.s32.totalorder %s16272_s0, 0 }
  0xc4   : > { %15917 = dma.done.wait (%p18603_p1), [#allocation3], 16   ;;  %p18604_p0 = pmov %p18603_p1 }
  0xc6   : > { %15919 = vsyncadd (%p18604_p0), [#allocation3], 4294967280  ;;  %p18605_p2 = pmov %p18604_p0 }
  0xc7   : > { %p18606_p3 = pmov %p18604_p0 }
  0xc8   : > { %15921 = dma.done.wait (%p18605_p2), [#allocation6], 32  }
  0xc9   : > { %15923 = vsyncadd (%p18606_p3), [#allocation6], 4294967264  ;;  %v14489_v0 = vld [vmem:[%s16024_s17 + $0x40] sm:$0xff]   ;;  %v14493_v4 = vld [vmem:[%s16024_s17 + $0x48] sm:$0xff]   ;;  %p1510_p12 = scmp.lt.s32.totalorder %s16272_s0, 1  ;;  %s18607_s5 = sld [smem:[#allocation12_spill]] }
  0xca   : > { %v14490_v1 = vld [vmem:[%s16024_s17] sm:$0xff]   ;;  %13466 = vmatprep.subr.bf16.mxu0 %v14489_v0  ;;  %v14494_v5 = vld [vmem:[%s16024_s17 + $0x8] sm:$0xff]   ;;  %v14497_v8 = vld [vmem:[%s16024_s17 + $0x50] sm:$0xff]   ;;  %s18608_s9 = sld [smem:[#allocation13_spill]]  ;;  %s18609_s28 = sld [smem:[#allocation16_spill]]  ;;  %vm8346_vm0 = vcmask 1043456  }
  0xcb   : > { %v14491_v2 = vld [vmem:[%s16034_s25 + $0x40] sm:$0xff]   ;;  %13467 = vmatpush3.bf16.msra.mxu0 %v14490_v1  ;;  %v14495_v6 = vld [vmem:[%s16034_s25 + $0x48] sm:$0xff]   ;;  %v14498_v9 = vld [vmem:[%s16024_s17 + $0x10] sm:$0xff]   ;;  %s16398_s2 = scalar_select %p1510_p12, %s16272_s0, 1  ;;  %vm8342_vm1 = vcmask 588800   ;;  %vm9329_vm2 = vcmask 64512  }
  0xcc   : > { %v14492_v3 = vld [vmem:[%s16034_s25] sm:$0xff]   ;;  %13506 = vmatprep.subr.bf16.mxu1 %v14491_v2  ;;  %13468 = vmatprep.subr.bf16.mxu0 %v14493_v4  ;;  %v14496_v7 = vld [vmem:[%s16034_s25 + $0x8] sm:$0xff]   ;;  %v14499_v10 = vld [vmem:[%s16034_s25 + $0x50] sm:$0xff]   ;;  %s18610_s16 = sld [smem:[#allocation22_spill]]  ;;  %vm9972_vm3 = vcmask 130048   ;;  %s18626_s4 = sld [smem:[#allocation48_spill]] }
  0xcd   : > { %13507 = vmatpush3.bf16.msra.mxu1 %v14492_v3  ;;  %v14500_v11 = vld [vmem:[%s16034_s25 + $0x10] sm:$0xff]   ;;  %v14501_v12 = vld [vmem:[%s16024_s17 + $0x58] sm:$0xff]   ;;  %v14505_v16 = vld [vmem:[%s16024_s17 + $0x60] sm:$0xff]   ;;  %s18525_s18 = sshll.u32 %s16398_s2, 6  ;;  %s14364_s26 = smul.u32 48, %s16398_s2  ;;  %vm15997_vm4 = vmmov 0  }
  0xce   : > { %13508 = vmatprep.subr.bf16.mxu1 %v14495_v6  ;;  %v14502_v13 = vld [vmem:[%s16024_s17 + $0x18] sm:$0xff]   ;;  %v14506_v17 = vld [vmem:[%s16024_s17 + $0x20] sm:$0xff]   ;;  %v14509_v20 = vld [vmem:[%s16024_s17 + $0x68] sm:$0xff]   ;;  %s14365_s11 = smul.u32 96, %s16398_s2  ;;  %s18627_s6 = sld [smem:[#allocation37_spill]]  ;;  %vm11179_vm5 = vcmask 523264  }
  0xcf   : > { %13469 = vmatpush3.bf16.msra.mxu0 %v14494_v5  ;;  %v14503_v14 = vld [vmem:[%s16034_s25 + $0x58] sm:$0xff]   ;;  %v14507_v18 = vld [vmem:[%s16034_s25 + $0x60] sm:$0xff]   ;;  %v14510_v21 = vld [vmem:[%s16024_s17 + $0x28] sm:$0xff]   ;;  %s16411_s23 = scalar_lea.vmem %s18607_s5, %s18525_s18  ;;  %s12362_s5 = sshll.u32 %s16398_s2, 3 }
  0xd0   : > { %13470 = vmatprep.subr.bf16.mxu0 %v14497_v8  ;;  %v14504_v15 = vld [vmem:[%s16034_s25 + $0x18] sm:$0xff]   ;;  %v14508_v19 = vld [vmem:[%s16034_s25 + $0x20] sm:$0xff]   ;;  %v14511_v22 = vld [vmem:[%s16034_s25 + $0x68] sm:$0xff]   ;;  %s16420_s10 = scalar_lea.vmem %s18608_s9, %s14364_s26  ;;  %s16479_s15 = scalar_lea.vmem %s16019_s13, %s14365_s11 }
  0xd1   : > { %13509 = vmatpush3.bf16.msra.mxu1 %v14496_v7  ;;  %v14512_v23 = vld [vmem:[%s16034_s25 + $0x28] sm:$0xff]   ;;  %v14513_v24 = vld [vmem:[%s16024_s17 + $0x70] sm:$0xff]   ;;  %v14517_v28 = vld [vmem:[%s16024_s17 + $0x78] sm:$0xff]   ;;  %s18612_s26 = sld [smem:[#allocation23_spill]]  ;;  %s18614_s11 = sld [smem:[#allocation29_spill]] }
  0xd2   : > { %13510 = vmatprep.subr.bf16.mxu1 %v14499_v10  ;;  %v14514_v25 = vld [vmem:[%s16024_s17 + $0x30] sm:$0xff]   ;;  %v14518_v29 = vld [vmem:[%s16024_s17 + $0x38] sm:$0xff]   ;;  %v14520_v31 = vld [vmem:[%s16411_s23] ss:$8 sps:$4 sm:$0xff]   ;;  %p18674_p5 = scmp.ne.s32.totalorder %s18596_s22, 0 }
  0xd3   : > { %13471 = vmatpush3.bf16.msra.mxu0 %v14498_v9  ;;  %v14515_v26 = vld [vmem:[%s16034_s25 + $0x70] sm:$0xff]   ;;  %v14519_v30 = vld [vmem:[%s16034_s25 + $0x78] sm:$0xff]   ;;  %v14522_v32 = vld [vmem:[%s16411_s23 + $0x4] ss:$8 sps:$4 sm:$0xff]  }
  0xd4   : > { %13472 = vmatprep.subr.bf16.mxu0 %v14501_v12  ;;  %v14516_v27 = vld [vmem:[%s16034_s25 + $0x30] sm:$0xff]   ;;  %v14523_v33 = vld [vmem:[%s16034_s25 + $0x38] sm:$0xff]   ;;  %1750 = vmatprep.mubr.bf16.mxu0 %v14522_v32  ;;  %v14524_v34 = vld [vmem:[%s16034_s25 + $0xc0] sm:$0xff]  }
  0xd5   : > { %13511 = vmatpush3.bf16.msra.mxu1 %v14500_v11  ;;  %v14525_v35 = vld [vmem:[%s16034_s25 + $0x80] sm:$0xff]   ;;  %v14531_v40 = vld [vmem:[%s16034_s25 + $0xc8] sm:$0xff]   ;;  %v14534_v43 = vld [vmem:[%s16411_s23 + $0x14] ss:$8 sps:$4 sm:$0xff]  }
  0xd6   : > { %13512 = vmatprep.subr.bf16.mxu1 %v14503_v14  ;;  %v14526_v36 = vld [vmem:[%s16420_s10] ss:$24 sps:$4 sm:$0xff]   ;;  %v14528_v37 = vld [vmem:[%s16420_s10 + $0x4] ss:$24 sps:$4 sm:$0xff]   ;;  %v14532_v41 = vld [vmem:[%s16034_s25 + $0x88] sm:$0xff]  }
  0xd7   : > { %13473 = vmatpush3.bf16.msra.mxu0 %v14502_v13  ;;  %v14529_v38 = vld [vmem:[%s16034_s25 + $0x140] sm:$0xff]   ;;  %2258 = vmatprep.mubr.bf16.mxu1 %v14528_v37  ;;  %v14533_v42 = vld [vmem:[%s16034_s25 + $0x148] sm:$0xff]   ;;  %v14537_v45 = vld [vmem:[%s16411_s23 + $0x10] ss:$8 sps:$4 sm:$0xff]  }
  0xd8   : > { %13474 = vmatprep.subr.bf16.mxu0 %v14505_v16  ;;  %v14530_v39 = vld [vmem:[%s16034_s25 + $0x100] sm:$0xff]   ;;  %v14536_v44 = vld [vmem:[%s16034_s25 + $0x108] sm:$0xff]   ;;  %v14538_v46 = vld [vmem:[%s16034_s25 + $0xd0] sm:$0xff]  }
  0xd9   : > { %13513 = vmatpush3.bf16.msra.mxu1 %v14504_v15  ;;  %v14539_v47 = vld [vmem:[%s16034_s25 + $0x90] sm:$0xff]   ;;  %v14542_v50 = vld [vmem:[%s16034_s25 + $0xd8] sm:$0xff]   ;;  %v14545_v53 = vld [vmem:[%s16411_s23 + $0x24] ss:$8 sps:$4 sm:$0xff]  }
  0xda   : > { %13514 = vmatprep.subr.bf16.mxu1 %v14507_v18  ;;  %v14540_v48 = vld [vmem:[%s16034_s25 + $0x150] sm:$0xff]   ;;  %v14543_v51 = vld [vmem:[%s16034_s25 + $0x98] sm:$0xff]   ;;  %v14548_v55 = vld [vmem:[%s16411_s23 + $0x20] ss:$8 sps:$4 sm:$0xff]  }
  0xdb   : > { %13475 = vmatpush3.bf16.msra.mxu0 %v14506_v17  ;;  %v14541_v49 = vld [vmem:[%s16034_s25 + $0x110] sm:$0xff]   ;;  %v14544_v52 = vld [vmem:[%s16034_s25 + $0x158] sm:$0xff]   ;;  %v14549_v56 = vld [vmem:[%s16034_s25 + $0xe0] sm:$0xff]  }
  0xdc   : > { %13476 = vmatprep.subr.bf16.mxu0 %v14509_v20  ;;  %v14547_v54 = vld [vmem:[%s16034_s25 + $0x118] sm:$0xff]   ;;  %v14550_v57 = vld [vmem:[%s16034_s25 + $0xa0] sm:$0xff]   ;;  %v14553_v60 = vld [vmem:[%s16034_s25 + $0xe8] sm:$0xff]  }
  0xdd   : > { %13515 = vmatpush3.bf16.msra.mxu1 %v14508_v19  ;;  %v14551_v58 = vld [vmem:[%s16034_s25 + $0x160] sm:$0xff]   ;;  %v14554_v61 = vld [vmem:[%s16034_s25 + $0xa8] sm:$0xff]   ;;  %v14556_v63 = vld [vmem:[%s16411_s23 + $0x34] ss:$8 sps:$4 sm:$0xff]  }
  0xde   : > { %13516 = vmatprep.subr.bf16.mxu1 %v14511_v22  ;;  %v14552_v59 = vld [vmem:[%s16034_s25 + $0x120] sm:$0xff]   ;;  %v14555_v62 = vld [vmem:[%s16034_s25 + $0x168] sm:$0xff]   ;;  %v14559_v1 = vld [vmem:[%s16411_s23 + $0x30] ss:$8 sps:$4 sm:$0xff]   ;;  %s18611_s23 = sld [smem:[#allocation21_spill]] }
  0xdf   : > { %13477 = vmatpush3.bf16.msra.mxu0 %v14510_v21  ;;  %v14558_v0 = vld [vmem:[%s16034_s25 + $0x128] sm:$0xff]   ;;  %v14560_v2 = vld [vmem:[%s16034_s25 + $0xf0] sm:$0xff]   ;;  %v14564_v6 = vld [vmem:[%s16034_s25 + $0xf8] sm:$0xff]  }
  0xe0   : > { %13478 = vmatprep.subr.bf16.mxu0 %v14513_v24  ;;  %v14561_v3 = vld [vmem:[%s16034_s25 + $0xb0] sm:$0xff]   ;;  %v14565_v7 = vld [vmem:[%s16034_s25 + $0xb8] sm:$0xff]   ;;  %v14567_v9 = vld [vmem:[%s16420_s10 + $0x8] ss:$24 sps:$4 sm:$0xff]  }
  0xe1   : > { %13517 = vmatpush3.bf16.msra.mxu1 %v14512_v23  ;;  %v14562_v4 = vld [vmem:[%s16034_s25 + $0x170] sm:$0xff]   ;;  %v14566_v8 = vld [vmem:[%s16034_s25 + $0x178] sm:$0xff]   ;;  %v14569_v10 = vld [vmem:[%s16420_s10 + $0xc] ss:$24 sps:$4 sm:$0xff]  }
  0xe2   : > { %13518 = vmatprep.subr.bf16.mxu1 %v14515_v26  ;;  %v14563_v5 = vld [vmem:[%s16034_s25 + $0x130] sm:$0xff]   ;;  %v14570_v11 = vld [vmem:[%s16034_s25 + $0x138] sm:$0xff]   ;;  %v14571_v12 = vld [vmem:[%s18591_s3] ss:$12 sps:$4 sm:$0xff]  }
  0xe3   : > { %13479 = vmatpush3.bf16.msra.mxu0 %v14514_v25  ;;  %v14573_v13 = vld [vmem:[%s18591_s3 + $0x4] ss:$12 sps:$4 sm:$0xff]   ;;  %v14576_v15 = vld [vmem:[%s16420_s10 + $0x14] ss:$24 sps:$4 sm:$0xff]   ;;  %v14579_v16 = vld [vmem:[%s18591_s3 + $0x1c] ss:$12 sps:$4 sm:$0xff]  }
  0xe4   : > { %13480 = vmatprep.subr.bf16.mxu0 %v14517_v28  ;;  %v14574_v14 = vld [vmem:[%s16420_s10 + $0x10] ss:$24 sps:$4 sm:$0xff]   ;;  %v14577_v17 = vld [vmem:[%s18591_s3 + $0x18] ss:$12 sps:$4 sm:$0xff]   ;;  %v14582_v18 = vld [vmem:[%s18591_s3 + $0x34] ss:$12 sps:$4 sm:$0xff]  }
  0xe5   : > { %13519 = vmatpush3.bf16.msra.mxu1 %v14516_v27  ;;  %v14580_v19 = vld [vmem:[%s18591_s3 + $0x30] ss:$12 sps:$4 sm:$0xff]   ;;  %v14585_v20 = vld [vmem:[%s18591_s3 + $0x4c] ss:$12 sps:$4 sm:$0xff]   ;;  %v14583_v21 = vld [vmem:[%s18591_s3 + $0x48] ss:$12 sps:$4 sm:$0xff]  }
  0xe6   : > { %13520 = vmatprep.subr.bf16.mxu1 %v14519_v30  ;;  %v14588_v22 = vld [vmem:[%s18591_s3 + $0x64] ss:$12 sps:$4 sm:$0xff]   ;;  %v14586_v23 = vld [vmem:[%s18591_s3 + $0x60] ss:$12 sps:$4 sm:$0xff]   ;;  %v14591_v24 = vld [vmem:[%s18591_s3 + $0x7c] ss:$12 sps:$4 sm:$0xff]  }
  0xe7   : > { %13481 = vmatpush3.bf16.msra.mxu0 %v14518_v29  ;;  %v14589_v25 = vld [vmem:[%s18591_s3 + $0x78] ss:$12 sps:$4 sm:$0xff]   ;;  %v14594_v26 = vld [vmem:[%s18591_s3 + $0x94] ss:$12 sps:$4 sm:$0xff]   ;;  %v14592_v29 = vld [vmem:[%s18591_s3 + $0x90] ss:$12 sps:$4 sm:$0xff]  }
  0xe8   : > { %13528 = vmatprep.subr.bf16.mxu0 %v14524_v34  ;;  %v16484_v27 = vld [vmem:[%s16479_s15] sm:$0xff]  ;;  %v14597_v30 = vld [vmem:[%s18591_s3 + $0xac] ss:$12 sps:$4 sm:$0xff]   ;;  %v14642_v34 = vld [vmem:[%s18591_s3 + $0xc8] ss:$12 sps:$4 sm:$0xff]   ;;  %s18613_s10 = sld [smem:[#allocation24_spill]] }
  0xe9   : > { %13521 = vmatpush3.bf16.msra.mxu1 %v14523_v33  ;;  %v12446_v28 = vcombine.high %v16484_v27, %v16484_v27  ;;  %v14600_v32 = vld [vmem:[%s18591_s3 + $0xc4] ss:$12 sps:$4 sm:$0xff]   ;;  %v14598_v33 = vld [vmem:[%s18591_s3 + $0xc0] ss:$12 sps:$4 sm:$0xff]  }
  0xea   : > { %1751 = vmatmul.mubr.bf16.vlgmr.msra.gmra.mrb[0].mxu0 %v14520_v31  ;;  %13550 = vmatprep.subr.bf16.mxu1 %v14529_v38  ;;  %v14595_v31 = vld [vmem:[%s18591_s3 + $0xa8] ss:$12 sps:$4 sm:$0xff]   ;;  %v14601_v37 = vld [vmem:[%s18591_s3 + $0xd8] ss:$12 sps:$4 sm:$0xff]   ;;  %v14647_v38 = vld [vmem:[%s18591_s3 + $0xe0] ss:$12 sps:$4 sm:$0xff]  }
  0xeb   : > { %13529 = vmatpush3.bf16.msra.mxu0 %v14525_v35  ;;  %1758 = vmatprep.mubr.bf16.mxu0 %v14534_v43  ;;  %v14643_v35 = vld [vmem:[%s18591_s3 + $0x8] ss:$12 sps:$4 sm:$0xff]   ;;  %v14604_v43 = vld [vmem:[%s18591_s3 + $0xf0] ss:$12 sps:$4 sm:$0xff]  }
  0xec   : > { %2259 = vmatmul.mubr.bf16.vlgmr.msra.gmra.mrb[0].mxu1 %v14526_v36  ;;  %13530 = vmatprep.subr.bf16.mxu0 %v14531_v40  ;;  %v14603_v36 = vld [vmem:[%s18591_s3 + $0xdc] ss:$12 sps:$4 sm:$0xff]   ;;  %v14606_v40 = vld [vmem:[%s18591_s3 + $0xf4] ss:$12 sps:$4 sm:$0xff]  }
  0xed   : > { %13551 = vmatpush3.bf16.msra.mxu1 %v14530_v39  ;;  %2340 = vmatprep.mubr.bf16.mxu1 %v14576_v15  ;;  %v14648_v39 = vld [vmem:[%s18591_s3 + $0x20] ss:$12 sps:$4 sm:$0xff]   ;;  %v14630_v15 = vld [vmem:[%s18591_s3 + $0x1b0] ss:$12 sps:$4 sm:$0xff]  }
  0xee   : > { %13552 = vmatprep.subr.bf16.mxu1 %v14533_v42  ;;  %v14653_v42 = vld [vmem:[%s18591_s3 + $0x38] ss:$12 sps:$4 sm:$0xff]  }
  0xef   : > { %13531 = vmatpush3.bf16.msra.mxu0 %v14532_v41  ;;  %v14652_v41 = vld [vmem:[%s18591_s3 + $0xf8] ss:$12 sps:$4 sm:$0xff]  }
  0xf0   : > { %13532 = vmatprep.subr.bf16.mxu0 %v14538_v46  ;;  %v14658_v46 = vld [vmem:[%s18591_s3 + $0x50] ss:$12 sps:$4 sm:$0xff]  }
  0xf1   : > { %13553 = vmatpush3.bf16.msra.mxu1 %v14536_v44  ;;  %v14609_v44 = vld [vmem:[%s18591_s3 + $0x10c] ss:$12 sps:$4 sm:$0xff]  }
  0xf2   : > { %1759 = vmatmul.mubr.bf16.gmra.mrb[4].mxu0 %v14537_v45  ;;  %13554 = vmatprep.subr.bf16.mxu1 %v14540_v48  ;;  %v14657_v45 = vld [vmem:[%s18591_s3 + $0x110] ss:$12 sps:$4 sm:$0xff]  }
  0xf3   : > { %13533 = vmatpush3.bf16.msra.mxu0 %v14539_v47  ;;  %1766 = vmatprep.mubr.bf16.mxu0 %v14545_v53  ;;  %v14607_v47 = vld [vmem:[%s18591_s3 + $0x108] ss:$12 sps:$4 sm:$0xff]   ;;  %v14612_v48 = vld [vmem:[%s18591_s3 + $0x124] ss:$12 sps:$4 sm:$0xff]  }
  0xf4   : > { %13534 = vmatprep.subr.bf16.mxu0 %v14542_v50  ;;  %v14663_v50 = vld [vmem:[%s18591_s3 + $0x68] ss:$12 sps:$4 sm:$0xff]  }
  0xf5   : > { %13555 = vmatpush3.bf16.msra.mxu1 %v14541_v49  ;;  %v14662_v49 = vld [vmem:[%s18591_s3 + $0x128] ss:$12 sps:$4 sm:$0xff]  }
  0xf6   : > { %13556 = vmatprep.subr.bf16.mxu1 %v14544_v52  ;;  %v14667_v52 = vld [vmem:[%s18591_s3 + $0x140] ss:$12 sps:$4 sm:$0xff]   ;;  %v14615_v53 = vld [vmem:[%s18591_s3 + $0x13c] ss:$12 sps:$4 sm:$0xff]  }
  0xf7   : > { %13535 = vmatpush3.bf16.msra.mxu0 %v14543_v51  ;;  %v14610_v51 = vld [vmem:[%s18591_s3 + $0x120] ss:$12 sps:$4 sm:$0xff]  }
  0xf8   : > { %13536 = vmatprep.subr.bf16.mxu0 %v14549_v56  ;;  %v14613_v56 = vld [vmem:[%s18591_s3 + $0x138] ss:$12 sps:$4 sm:$0xff]  }
  0xf9   : > { %13557 = vmatpush3.bf16.msra.mxu1 %v14547_v54  ;;  %v14668_v54 = vld [vmem:[%s18591_s3 + $0x80] ss:$12 sps:$4 sm:$0xff]  }
  0xfa   : > { %1767 = vmatmul.mubr.bf16.gmra.mrb[8].mxu0 %v14548_v55  ;;  %13558 = vmatprep.subr.bf16.mxu1 %v14551_v58  ;;  %v14672_v55 = vld [vmem:[%s18591_s3 + $0x158] ss:$12 sps:$4 sm:$0xff]  }
  0xfb   : > { %13537 = vmatpush3.bf16.msra.mxu0 %v14550_v57  ;;  %1774 = vmatprep.mubr.bf16.mxu0 %v14556_v63  ;;  %v14618_v57 = vld [vmem:[%s18591_s3 + $0x154] ss:$12 sps:$4 sm:$0xff]   ;;  %v14673_v58 = vld [vmem:[%s18591_s3 + $0x98] ss:$12 sps:$4 sm:$0xff]  }
  0xfc   : > { %13538 = vmatprep.subr.bf16.mxu0 %v14553_v60  ;;  %v14616_v60 = vld [vmem:[%s18591_s3 + $0x150] ss:$12 sps:$4 sm:$0xff]   ;;  %v14682_v63 = vld [vmem:[%s18591_s3 + $0x248] ss:$12 sps:$4 sm:$0xff]  }
  0xfd   : > { %13559 = vmatpush3.bf16.msra.mxu1 %v14552_v59  ;;  %v14677_v59 = vld [vmem:[%s18591_s3 + $0x170] ss:$12 sps:$4 sm:$0xff]  }
  0xfe   : > { %13560 = vmatprep.subr.bf16.mxu1 %v14555_v62  ;;  %v14678_v62 = vld [vmem:[%s18591_s3 + $0xb0] ss:$12 sps:$4 sm:$0xff]  }
  0xff   : > { %13539 = vmatpush3.bf16.msra.mxu0 %v14554_v61  ;;  %v14621_v61 = vld [vmem:[%s18591_s3 + $0x16c] ss:$12 sps:$4 sm:$0xff]  }
 0x100   : > { %13540 = vmatprep.subr.bf16.mxu0 %v14560_v2  ;;  %v14683_v2 = vld [vmem:[%s18591_s3 + $0x188] ss:$12 sps:$4 sm:$0xff]  }
 0x101   : > { %13561 = vmatpush3.bf16.msra.mxu1 %v14558_v0  ;;  %v14619_v0 = vld [vmem:[%s18591_s3 + $0x168] ss:$12 sps:$4 sm:$0xff]  }
 0x102   : > { %1775 = vmatmul.mubr.bf16.gmra.mrb[12].mxu0 %v14559_v1  ;;  %13562 = vmatprep.subr.bf16.mxu1 %v14562_v4  ;;  %v14626_v1 = vld [vmem:[%s18591_s3 + $0x184] ss:$12 sps:$4 sm:$0xff]   ;;  %v14687_v4 = vld [vmem:[%s18591_s3 + $0x260] ss:$12 sps:$4 sm:$0xff]  }
 0x103   : > { %13541 = vmatpush3.bf16.msra.mxu0 %v14561_v3  ;;  %2299 = vmatprep.mubr.bf16.mxu0 %v14569_v10  ;;  %v12445_v3 = vcombine.low %v16484_v27, %v16484_v27  ;;  %v14639_v27 = vld [vmem:[%s18591_s3 + $0x1f8] ss:$12 sps:$4 sm:$0xff]  }
 0x104   : > { %13542 = vmatprep.subr.bf16.mxu0 %v14564_v6  ;;  %v14629_v6 = vld [vmem:[%s18591_s3 + $0x19c] ss:$12 sps:$4 sm:$0xff]  }
 0x105   : > { %13563 = vmatpush3.bf16.msra.mxu1 %v14563_v5  ;;  %v14624_v5 = vld [vmem:[%s18591_s3 + $0x180] ss:$12 sps:$4 sm:$0xff]  }
 0x106   : > { %13564 = vmatprep.subr.bf16.mxu1 %v14566_v8  ;;  %v2354_v8 = vld [vmem:[%s16479_s15 + $0x8] sm:$0xff] }
 0x107   : > { %13543 = vmatpush3.bf16.msra.mxu0 %v14565_v7  ;;  %v14688_v7 = vld [vmem:[%s18591_s3 + $0x1a0] ss:$12 sps:$4 sm:$0xff]   ;;  %v12448_v10 = vcombine.high %v2354_v8, %v2354_v8 }
 0x108   : > { %6306 = vmatprep.subr.bf16.mxu0 %v14573_v13  ;;  %v14693_v13 = vld [vmem:[%s18591_s3 + $0x1b8] ss:$12 sps:$4 sm:$0xff]  }
 0x109   : > { %13565 = vmatpush3.bf16.msra.mxu1 %v14570_v11  ;;  %v14627_v11 = vld [vmem:[%s18591_s3 + $0x198] ss:$12 sps:$4 sm:$0xff]  }
 0x10a   : > { %2300 = vmatmul.mubr.bf16.vlgmr.msra.gmra.mrb[16].mxu0 %v14567_v9  ;;  %13572 = vmatprep.subr.bf16.mxu1 %v14642_v34  ;;  %v14692_v9 = vld [vmem:[%s18591_s3 + $0x278] ss:$12 sps:$4 sm:$0xff]   ;;  %v14724_v34 = vld [vmem:[%s18591_s3 + $0x3c8] ss:$12 sps:$4 sm:$0xff]  }
 0x10b   : > { %6307 = vmatpush1.bf16.msra.mxu0 %v14571_v12  ;;  %6338 = vmatprep.mubr.bf16.mxu0 %v12446_v28  ;;  %v14632_v12 = vld [vmem:[%s18591_s3 + $0x1b4] ss:$12 sps:$4 sm:$0xff]  }
 0x10c   : > { %2341 = vmatmul.mubr.bf16.vlgmr.msra.gmra.mrb[4].mxu1 %v14574_v14  ;;  %6308 = vmatprep.subr.bf16.mxu0 %v14579_v16  ;;  %v14699_v14 = vld [vmem:[%s18591_s3 + $0x290] ss:$12 sps:$4 sm:$0xff]   ;;  %v14635_v16 = vld [vmem:[%s18591_s3 + $0x1cc] ss:$12 sps:$4 sm:$0xff]  }
 0x10d   : > { %6830 = vmatprep.mubr.bf16.mxu1 %v12446_v28  ;;  %13573 = vmatpush3.bf16.msra.mxu1 %v14643_v35  ;;  %v14646_v28 = vld [vmem:[%s18591_s3 + $0x214] ss:$12 sps:$4 sm:$0xff]  }
 0x10e   : > { %13574 = vmatprep.subr.bf16.mxu1 %v14647_v38  ;;  %v14649_v35 = vld [vmem:[%s18591_s3 + $0x228] ss:$12 sps:$4 sm:$0xff]   ;;  %v16561_v38 = vcombine.low %v2354_v8, %v2354_v8 }
 0x10f   : > { %6309 = vmatpush1.bf16.msra.mxu0 %v14577_v17  ;;  %v14700_v17 = vld [vmem:[%s18591_s3 + $0x1d0] ss:$12 sps:$4 sm:$0xff]  }
 0x110   : > { %6310 = vmatprep.subr.bf16.mxu0 %v14582_v18  ;;  %v14704_v18 = vld [vmem:[%s18591_s3 + $0x2a8] ss:$12 sps:$4 sm:$0xff]  }
 0x111   : > { %13575 = vmatpush3.bf16.msra.mxu1 %v14648_v39  ;;  %v14729_v39 = vld [vmem:[%s18591_s3 + $0x3e0] ss:$12 sps:$4 sm:$0xff]  }
 0x112   : > { %13576 = vmatprep.subr.bf16.mxu1 %v14652_v41  ;;  %v14661_v41 = vld [vmem:[%s18591_s3 + $0x25c] ss:$12 sps:$4 sm:$0xff]  }
 0x113   : > { %6311 = vmatpush1.bf16.msra.mxu0 %v14580_v19  ;;  %v14633_v19 = vld [vmem:[%s18591_s3 + $0x1c8] ss:$12 sps:$4 sm:$0xff]  }
 0x114   : > { %6312 = vmatprep.subr.bf16.mxu0 %v14585_v20  ;;  %v14638_v20 = vld [vmem:[%s18591_s3 + $0x1e4] ss:$12 sps:$4 sm:$0xff]  }
 0x115   : > { %13577 = vmatpush3.bf16.msra.mxu1 %v14653_v42  ;;  %v14730_v42 = vld [vmem:[%s18591_s3 + $0x320] ss:$12 sps:$4 sm:$0xff]  }
 0x116   : > { %13578 = vmatprep.subr.bf16.mxu1 %v14657_v45  ;;  %v14666_v45 = vld [vmem:[%s18591_s3 + $0x274] ss:$12 sps:$4 sm:$0xff]  }
 0x117   : > { %6313 = vmatpush1.bf16.msra.mxu0 %v14583_v21  ;;  %v14705_v21 = vld [vmem:[%s18591_s3 + $0x1e8] ss:$12 sps:$4 sm:$0xff]  }
 0x118   : > { %6314 = vmatprep.subr.bf16.mxu0 %v14588_v22  ;;  %v14709_v22 = vld [vmem:[%s18591_s3 + $0x2c0] ss:$12 sps:$4 sm:$0xff]  }
 0x119   : > { %13579 = vmatpush3.bf16.msra.mxu1 %v14658_v46  ;;  %v14735_v46 = vld [vmem:[%s18591_s3 + $0x338] ss:$12 sps:$4 sm:$0xff]  }
 0x11a   : > { %13580 = vmatprep.subr.bf16.mxu1 %v14662_v49  ;;  %v14671_v49 = vld [vmem:[%s18591_s3 + $0x28c] ss:$12 sps:$4 sm:$0xff]  }
 0x11b   : > { %6315 = vmatpush1.bf16.msra.mxu0 %v14586_v23  ;;  %v14636_v23 = vld [vmem:[%s18591_s3 + $0x1e0] ss:$12 sps:$4 sm:$0xff]  }
 0x11c   : > { %6316 = vmatprep.subr.bf16.mxu0 %v14591_v24  ;;  %v14641_v24 = vld [vmem:[%s18591_s3 + $0x1fc] ss:$12 sps:$4 sm:$0xff]  }
 0x11d   : > { %13581 = vmatpush3.bf16.msra.mxu1 %v14663_v50  ;;  %v14740_v50 = vld [vmem:[%s18591_s3 + $0x350] ss:$12 sps:$4 sm:$0xff]  }
 0x11e   : > { %13582 = vmatprep.subr.bf16.mxu1 %v14667_v52  ;;  %v14669_v52 = vld [vmem:[%s18591_s3 + $0x288] ss:$12 sps:$4 sm:$0xff]  }
 0x11f   : > { %6317 = vmatpush1.bf16.msra.mxu0 %v14589_v25  ;;  %v14710_v25 = vld [vmem:[%s18591_s3 + $0x200] ss:$12 sps:$4 sm:$0xff]  }
 0x120   : > { %6318 = vmatprep.subr.bf16.mxu0 %v14594_v26  ;;  %v14714_v26 = vld [vmem:[%s18591_s3 + $0x2d8] ss:$12 sps:$4 sm:$0xff]  }
 0x121   : > { %13583 = vmatpush3.bf16.msra.mxu1 %v14668_v54  ;;  %v14745_v54 = vld [vmem:[%s18591_s3 + $0x368] ss:$12 sps:$4 sm:$0xff]  }
 0x122   : > { %13584 = vmatprep.subr.bf16.mxu1 %v14672_v55  ;;  %v14749_v55 = vld [vmem:[%s18591_s3 + $0x440] ss:$12 sps:$4 sm:$0xff]  }
 0x123   : > { %6319 = vmatpush1.bf16.msra.mxu0 %v14592_v29  ;;  %v14715_v29 = vld [vmem:[%s18591_s3 + $0x218] ss:$12 sps:$4 sm:$0xff]  }
 0x124   : > { %6320 = vmatprep.subr.bf16.mxu0 %v14597_v30  ;;  %v14719_v30 = vld [vmem:[%s18591_s3 + $0x2f0] ss:$12 sps:$4 sm:$0xff]  }
 0x125   : > { %13585 = vmatpush3.bf16.msra.mxu1 %v14673_v58 }
 0x126   : > { %13586 = vmatprep.subr.bf16.mxu1 %v14677_v59  ;;  %v14681_v59 = vld [vmem:[%s18591_s3 + $0x2bc] ss:$12 sps:$4 sm:$0xff]  }
 0x127   : > { %6321 = vmatpush1.bf16.msra.mxu0 %v14595_v31  ;;  %v14644_v31 = vld [vmem:[%s18591_s3 + $0x210] ss:$12 sps:$4 sm:$0xff]  }
 0x128   : > { %6322 = vmatprep.subr.bf16.mxu0 %v14600_v32  ;;  %v14651_v32 = vld [vmem:[%s18591_s3 + $0x22c] ss:$12 sps:$4 sm:$0xff]  }
 0x129   : > { %13587 = vmatpush3.bf16.msra.mxu1 %v14678_v62  ;;  %v14679_v62 = vld [vmem:[%s18591_s3 + $0x2b8] ss:$12 sps:$4 sm:$0xff]  }
 0x12a   : > { %13594 = vmatprep.subr.bf16.mxu1 %v14682_v63  ;;  %v14686_v63 = vld [vmem:[%s18591_s3 + $0x2d4] ss:$12 sps:$4 sm:$0xff]  }
 0x12b   : > { %6323 = vmatpush1.bf16.msra.mxu0 %v14598_v33  ;;  %v14720_v33 = vld [vmem:[%s18591_s3 + $0x230] ss:$12 sps:$4 sm:$0xff]  }
 0x12c   : > { %6324 = vmatprep.subr.bf16.mxu0 %v14603_v36  ;;  %6831 = vmatmul.mubr.bf16.vlgmr.msra.gmra.mrb[8].mxu1 %v12445_v3  ;;  %v14656_v36 = vld [vmem:[%s18591_s3 + $0x244] ss:$12 sps:$4 sm:$0xff]  }
 0x12d   : > { %13595 = vmatpush3.bf16.msra.mxu1 %v14683_v2  ;;  %6870 = vmatprep.mubr.bf16.mxu1 %v12448_v10  ;;  %v14684_v2 = vld [vmem:[%s18591_s3 + $0x2d0] ss:$12 sps:$4 sm:$0xff]  }
 0x12e   : > { %13596 = vmatprep.subr.bf16.mxu1 %v14687_v4  ;;  %v14760_v4 = vld [vmem:[%s18591_s3 + $0x3b0] ss:$12 sps:$4 sm:$0xff]  }
 0x12f   : > { %6325 = vmatpush1.bf16.msra.mxu0 %v14601_v37  ;;  %v14725_v37 = vld [vmem:[%s18591_s3 + $0x308] ss:$12 sps:$4 sm:$0xff]  }
 0x130   : > { %6326 = vmatprep.subr.bf16.mxu0 %v14606_v40  ;;  %v14654_v40 = vld [vmem:[%s18591_s3 + $0x240] ss:$12 sps:$4 sm:$0xff]  }
 0x131   : > { %13597 = vmatpush3.bf16.msra.mxu1 %v14688_v7  ;;  %v14698_v7 = vld [vmem:[%s18591_s3 + $0x304] ss:$12 sps:$4 sm:$0xff]  }
 0x132   : > { %13598 = vmatprep.subr.bf16.mxu1 %v14692_v9  ;;  %v14767_v9 = vld [vmem:[%s18591_s3 + $0x488] ss:$12 sps:$4 sm:$0xff]  }
 0x133   : > { %6327 = vmatpush1.bf16.msra.mxu0 %v14604_v43  ;;  %v14734_v43 = vld [vmem:[%s18591_s3 + $0x3f8] ss:$12 sps:$4 sm:$0xff]  }
 0x134   : > { %6328 = vmatprep.subr.bf16.mxu0 %v14609_v44  ;;  %v14659_v44 = vld [vmem:[%s18591_s3 + $0x258] ss:$12 sps:$4 sm:$0xff]  }
 0x135   : > { %13599 = vmatpush3.bf16.msra.mxu1 %v14693_v13  ;;  %v14772_v13 = vld [vmem:[%s18591_s3 + $0x4a0] ss:$12 sps:$4 sm:$0xff]  }
 0x136   : > { %13600 = vmatprep.subr.bf16.mxu1 %v14699_v14  ;;  %v14776_v14 = vld [vmem:[%s18591_s3 + $0x578] ss:$12 sps:$4 sm:$0xff]  }
 0x137   : > { %6329 = vmatpush1.bf16.msra.mxu0 %v14607_v47  ;;  %v14739_v47 = vld [vmem:[%s18591_s3 + $0x410] ss:$12 sps:$4 sm:$0xff]  }
 0x138   : > { %6330 = vmatprep.subr.bf16.mxu0 %v14612_v48  ;;  %v14664_v48 = vld [vmem:[%s18591_s3 + $0x270] ss:$12 sps:$4 sm:$0xff]  }
 0x139   : > { %13601 = vmatpush3.bf16.msra.mxu1 %v14700_v17  ;;  %v14777_v17 = vld [vmem:[%s18591_s3 + $0x4b8] ss:$12 sps:$4 sm:$0xff]  }
 0x13a   : > { %13602 = vmatprep.subr.bf16.mxu1 %v14704_v18  ;;  %v14781_v18 = vld [vmem:[%s18591_s3 + $0x590] ss:$12 sps:$4 sm:$0xff]  }
 0x13b   : > { %6331 = vmatpush1.bf16.msra.mxu0 %v14610_v51  ;;  %v14744_v51 = vld [vmem:[%s18591_s3 + $0x428] ss:$12 sps:$4 sm:$0xff]  }
 0x13c   : > { %6332 = vmatprep.subr.bf16.mxu0 %v14615_v53  ;;  %v14676_v53 = vld [vmem:[%s18591_s3 + $0x2a4] ss:$12 sps:$4 sm:$0xff]  }
 0x13d   : > { %13603 = vmatpush3.bf16.msra.mxu1 %v14705_v21  ;;  %v14782_v21 = vld [vmem:[%s18591_s3 + $0x4d0] ss:$12 sps:$4 sm:$0xff]  }
 0x13e   : > { %13604 = vmatprep.subr.bf16.mxu1 %v14709_v22  ;;  %v14786_v22 = vld [vmem:[%s18591_s3 + $0x5a8] ss:$12 sps:$4 sm:$0xff]  }
 0x13f   : > { %6333 = vmatpush1.bf16.msra.mxu0 %v14613_v56  ;;  %v2355_v56 = vld [vmem:[%s16479_s15 + $0x10] sm:$0xff] }
 0x140   : > { %6334 = vmatprep.subr.bf16.mxu0 %v14618_v57  ;;  %v14674_v57 = vld [vmem:[%s18591_s3 + $0x2a0] ss:$12 sps:$4 sm:$0xff]   ;;  %v12450_v58 = vcombine.high %v2355_v56, %v2355_v56  ;;  %v16596_v8 = vcombine.low %v2355_v56, %v2355_v56  ;;  %v14746_v56 = vld [vmem:[%s18591_s3 + $0x3f0] ss:$12 sps:$4 sm:$0xff]  }
 0x141   : > { %13605 = vmatpush3.bf16.msra.mxu1 %v14710_v25 }
 0x142   : > { %13606 = vmatprep.subr.bf16.mxu1 %v14714_v26  ;;  %v14718_v26 = vld [vmem:[%s18591_s3 + $0x364] ss:$12 sps:$4 sm:$0xff]  }
 0x143   : > { %6335 = vmatpush1.bf16.msra.mxu0 %v14616_v60  ;;  %v14750_v60 = vld [vmem:[%s18591_s3 + $0x380] ss:$12 sps:$4 sm:$0xff]  }
 0x144   : > { %6336 = vmatprep.subr.bf16.mxu0 %v14621_v61  ;;  %v14754_v61 = vld [vmem:[%s18591_s3 + $0x458] ss:$12 sps:$4 sm:$0xff]  }
 0x145   : > { %13607 = vmatpush3.bf16.msra.mxu1 %v14715_v29  ;;  %v14716_v29 = vld [vmem:[%s18591_s3 + $0x360] ss:$12 sps:$4 sm:$0xff]  }
 0x146   : > { %13608 = vmatprep.subr.bf16.mxu1 %v14719_v30  ;;  %v14723_v30 = vld [vmem:[%s18591_s3 + $0x37c] ss:$12 sps:$4 sm:$0xff]  }
 0x147   : > { %6337 = vmatpush1.bf16.msra.mxu0 %v14619_v0  ;;  %v14755_v0 = vld [vmem:[%s18591_s3 + $0x398] ss:$12 sps:$4 sm:$0xff]  }
 0x148   : > { %6347 = vmatprep.subr.bf16.mxu0 %v14626_v1  ;;  %v14759_v1 = vld [vmem:[%s18591_s3 + $0x470] ss:$12 sps:$4 sm:$0xff]  }
 0x149   : > { %13609 = vmatpush3.bf16.msra.mxu1 %v14720_v33  ;;  %v14721_v33 = vld [vmem:[%s18591_s3 + $0x378] ss:$12 sps:$4 sm:$0xff]  }
 0x14a   : > { %6339 = vmatmul.mubr.bf16.vlgmr.msra.gmra.mrb[20].mxu0 %v12445_v3  ;;  %13616 = vmatprep.subr.bf16.mxu1 %v14724_v34  ;;  %v14691_v3 = vld [vmem:[%s18591_s3 + $0x2ec] ss:$12 sps:$4 sm:$0xff]   ;;  %v14728_v34 = vld [vmem:[%s18591_s3 + $0x394] ss:$12 sps:$4 sm:$0xff]  }
 0x14b   : > { %6348 = vmatpush1.bf16.msra.mxu0 %v14624_v5  ;;  %6379 = vmatprep.mubr.bf16.mxu0 %v12448_v10  ;;  %v14766_v5 = vld [vmem:[%s18591_s3 + $0x548] ss:$12 sps:$4 sm:$0xff]   ;;  %v14771_v10 = vld [vmem:[%s18591_s3 + $0x560] ss:$12 sps:$4 sm:$0xff]  }
 0x14c   : > { %6349 = vmatprep.subr.bf16.mxu0 %v14629_v6  ;;  %6871 = vmatmul.mubr.bf16.vlgmr.msra.gmra.mrb[12].mxu1 %v16561_v38  ;;  %v14689_v6 = vld [vmem:[%s18591_s3 + $0x2e8] ss:$12 sps:$4 sm:$0xff]  }
 0x14d   : > { %13617 = vmatpush3.bf16.msra.mxu1 %v14725_v37  ;;  %6910 = vmatprep.mubr.bf16.mxu1 %v12450_v58  ;;  %v14726_v37 = vld [vmem:[%s18591_s3 + $0x390] ss:$12 sps:$4 sm:$0xff]  }
 0x14e   : > { %13618 = vmatprep.subr.bf16.mxu1 %v14729_v39  ;;  %v14802_v39 = vld [vmem:[%s18591_s3 + $0x530] ss:$12 sps:$4 sm:$0xff]  }
 0x14f   : > { %6350 = vmatpush1.bf16.msra.mxu0 %v14627_v11  ;;  %v14696_v11 = vld [vmem:[%s18591_s3 + $0x300] ss:$12 sps:$4 sm:$0xff]  }
 0x150   : > { %6351 = vmatprep.subr.bf16.mxu0 %v14632_v12  ;;  %v14703_v12 = vld [vmem:[%s18591_s3 + $0x31c] ss:$12 sps:$4 sm:$0xff]  }
 0x151   : > { %13619 = vmatpush3.bf16.msra.mxu1 %v14730_v42  ;;  %v14738_v42 = vld [vmem:[%s18591_s3 + $0x3c4] ss:$12 sps:$4 sm:$0xff]  }
 0x152   : > { %13620 = vmatprep.subr.bf16.mxu1 %v14734_v43 }
 0x153   : > { %6352 = vmatpush1.bf16.msra.mxu0 %v14630_v15  ;;  %v14701_v15 = vld [vmem:[%s18591_s3 + $0x318] ss:$12 sps:$4 sm:$0xff]  }
 0x154   : > { %6353 = vmatprep.subr.bf16.mxu0 %v14635_v16  ;;  %v14708_v16 = vld [vmem:[%s18591_s3 + $0x334] ss:$12 sps:$4 sm:$0xff]  }
 0x155   : > { %13621 = vmatpush3.bf16.msra.mxu1 %v14735_v46  ;;  %v14736_v46 = vld [vmem:[%s18591_s3 + $0x3c0] ss:$12 sps:$4 sm:$0xff]  }
 0x156   : > { %13622 = vmatprep.subr.bf16.mxu1 %v14739_v47  ;;  %v14743_v47 = vld [vmem:[%s18591_s3 + $0x3dc] ss:$12 sps:$4 sm:$0xff]  }
 0x157   : > { %6354 = vmatpush1.bf16.msra.mxu0 %v14633_v19  ;;  %v14706_v19 = vld [vmem:[%s18591_s3 + $0x330] ss:$12 sps:$4 sm:$0xff]  }
 0x158   : > { %6355 = vmatprep.subr.bf16.mxu0 %v14638_v20  ;;  %v14713_v20 = vld [vmem:[%s18591_s3 + $0x34c] ss:$12 sps:$4 sm:$0xff]  }
 0x159   : > { %13623 = vmatpush3.bf16.msra.mxu1 %v14740_v50  ;;  %v14741_v50 = vld [vmem:[%s18591_s3 + $0x3d8] ss:$12 sps:$4 sm:$0xff]  }
 0x15a   : > { %13624 = vmatprep.subr.bf16.mxu1 %v14744_v51  ;;  %v14748_v51 = vld [vmem:[%s18591_s3 + $0x3f4] ss:$12 sps:$4 sm:$0xff]  }
 0x15b   : > { %6356 = vmatpush1.bf16.msra.mxu0 %v14636_v23  ;;  %v2356_v23 = vld [vmem:[%s16479_s15 + $0x18] sm:$0xff] }
 0x15c   : > { %6357 = vmatprep.subr.bf16.mxu0 %v14641_v24  ;;  %v14711_v24 = vld [vmem:[%s18591_s3 + $0x348] ss:$12 sps:$4 sm:$0xff]   ;;  %v16616_v25 = vcombine.high %v2356_v23, %v2356_v23  ;;  %v16636_v43 = vcombine.low %v2356_v23, %v2356_v23 }
 0x15d   : > { %13625 = vmatpush3.bf16.msra.mxu1 %v14745_v54  ;;  %v14823_v54 = vld [vmem:[%s18591_s3 + $0x710] ss:$12 sps:$4 sm:$0xff]  }
 0x15e   : > { %13626 = vmatprep.subr.bf16.mxu1 %v14749_v55 }
 0x15f   : > { %6358 = vmatpush1.bf16.msra.mxu0 %v14639_v27  ;;  %v14787_v27 = vld [vmem:[%s18591_s3 + $0x4e8] ss:$12 sps:$4 sm:$0xff]  }
 0x160   : > { %6359 = vmatprep.subr.bf16.mxu0 %v14646_v28  ;;  %v14791_v28 = vld [vmem:[%s18591_s3 + $0x5c0] ss:$12 sps:$4 sm:$0xff]  }
 0x161   : > { %13627 = vmatpush3.bf16.msra.mxu1 %v14750_v60  ;;  %v14751_v60 = vld [vmem:[%s18591_s3 + $0x408] ss:$12 sps:$4 sm:$0xff]  }
 0x162   : > { %13628 = vmatprep.subr.bf16.mxu1 %v14754_v61  ;;  %v14758_v61 = vld [vmem:[%s18591_s3 + $0x424] ss:$12 sps:$4 sm:$0xff]  }
 0x163   : > { %6360 = vmatpush1.bf16.msra.mxu0 %v14644_v31  ;;  %v14792_v31 = vld [vmem:[%s18591_s3 + $0x500] ss:$12 sps:$4 sm:$0xff]  }
 0x164   : > { %6361 = vmatprep.subr.bf16.mxu0 %v14651_v32  ;;  %v14796_v32 = vld [vmem:[%s18591_s3 + $0x5d8] ss:$12 sps:$4 sm:$0xff]  }
 0x165   : > { %13629 = vmatpush3.bf16.msra.mxu1 %v14755_v0 }
 0x166   : > { %13630 = vmatprep.subr.bf16.mxu1 %v14759_v1  ;;  %v16666_v1 = vld [vmem:[%s16029_s21] ss:$0 sm:$0xff] }
 0x167   : > { %6362 = vmatpush1.bf16.msra.mxu0 %v14649_v35  ;;  %v14797_v35 = vld [vmem:[%s18591_s3 + $0x518] ss:$12 sps:$4 sm:$0xff]  }
 0x168   : > { %6363 = vmatprep.subr.bf16.mxu0 %v14656_v36  ;;  %v14801_v36 = vld [vmem:[%s18591_s3 + $0x5f0] ss:$12 sps:$4 sm:$0xff]  }
 0x169   : > { %13631 = vmatpush3.bf16.msra.mxu1 %v14760_v4 }
 0x16a   : > { %13638 = vmatprep.subr.bf16.mxu1 %v14766_v5  ;;  %v14763_v5 = vld [vmem:[%s18591_s3 + $0x43c] ss:$12 sps:$4 sm:$0xff]  }
 0x16b   : > { %6364 = vmatpush1.bf16.msra.mxu0 %v14654_v40  ;;  %v14808_v40 = vld [vmem:[%s18591_s3 + $0x6c8] ss:$12 sps:$4 sm:$0xff]  }
 0x16c   : > { %6365 = vmatprep.subr.bf16.mxu0 %v14661_v41  ;;  %6911 = vmatmul.mubr.bf16.vlgmr.msra.gmra.mrb[16].mxu1 %v16596_v8  ;;  %v14731_v41 = vld [vmem:[%s18591_s3 + $0x3a8] ss:$12 sps:$4 sm:$0xff]  }
 0x16d   : > { %13639 = vmatpush3.bf16.msra.mxu1 %v14767_v9  ;;  %6950 = vmatprep.mubr.bf16.mxu1 %v16616_v25  ;;  %v14834_v9 = vld [vmem:[%s18591_s3 + $0x680] ss:$12 sps:$4 sm:$0xff]  }
 0x16e   : > { %13640 = vmatprep.subr.bf16.mxu1 %v14771_v10 }
 0x16f   : > { %6366 = vmatpush1.bf16.msra.mxu0 %v14659_v44  ;;  %v14809_v44 = vld [vmem:[%s18591_s3 + $0x608] ss:$12 sps:$4 sm:$0xff]  }
 0x170   : > { %6367 = vmatprep.subr.bf16.mxu0 %v14666_v45  ;;  %v14813_v45 = vld [vmem:[%s18591_s3 + $0x6e0] ss:$12 sps:$4 sm:$0xff]  }
 0x171   : > { %13641 = vmatpush3.bf16.msra.mxu1 %v14772_v13  ;;  %v14761_v13 = vld [vmem:[%s18591_s3 + $0x438] ss:$12 sps:$4 sm:$0xff]  }
 0x172   : > { %13642 = vmatprep.subr.bf16.mxu1 %v14776_v14 }
 0x173   : > { %6368 = vmatpush1.bf16.msra.mxu0 %v14664_v48  ;;  %v14814_v48 = vld [vmem:[%s18591_s3 + $0x620] ss:$12 sps:$4 sm:$0xff]  }
 0x174   : > { %6369 = vmatprep.subr.bf16.mxu0 %v14671_v49  ;;  %v14818_v49 = vld [vmem:[%s18591_s3 + $0x6f8] ss:$12 sps:$4 sm:$0xff]  }
 0x175   : > { %13643 = vmatpush3.bf16.msra.mxu1 %v14777_v17 }
 0x176   : > { %13644 = vmatprep.subr.bf16.mxu1 %v14781_v18  ;;  %v14770_v18 = vld [vmem:[%s18591_s3 + $0x454] ss:$12 sps:$4 sm:$0xff]  }
 0x177   : > { %6370 = vmatpush1.bf16.msra.mxu0 %v14669_v52  ;;  %v14819_v52 = vld [vmem:[%s18591_s3 + $0x638] ss:$12 sps:$4 sm:$0xff]  }
 0x178   : > { %6371 = vmatprep.subr.bf16.mxu0 %v14676_v53  ;;  %v16649_v53 = vld [vmem:[%s16479_s15 + $0x20] sm:$0xff] }
 0x179   : > { %13645 = vmatpush3.bf16.msra.mxu1 %v14782_v21  ;;  %v16654_v55 = vcombine.high %v16649_v53, %v16649_v53 }
 0x17a   : > { %13646 = vmatprep.subr.bf16.mxu1 %v14786_v22  ;;  %v14839_v22 = vld [vmem:[%s18591_s3 + $0x698] ss:$12 sps:$4 sm:$0xff]  }
 0x17b   : > { %6372 = vmatpush1.bf16.msra.mxu0 %v14674_v57  ;;  %v14753_v57 = vld [vmem:[%s18591_s3 + $0x40c] ss:$12 sps:$4 sm:$0xff]  }
 0x17c   : > { %6373 = vmatprep.subr.bf16.mxu0 %v14681_v59  ;;  %v14828_v59 = vld [vmem:[%s18591_s3 + $0x728] ss:$12 sps:$4 sm:$0xff]  }
 0x17d   : > { %13647 = vmatpush3.bf16.msra.mxu1 %v14787_v27  ;;  %v14768_v27 = vld [vmem:[%s18591_s3 + $0x450] ss:$12 sps:$4 sm:$0xff]  }
 0x17e   : > { %13648 = vmatprep.subr.bf16.mxu1 %v14791_v28  ;;  %v14843_v28 = vld [vmem:[%s18591_s3 + $0x770] ss:$12 sps:$4 sm:$0xff]  }
 0x17f   : > { %6374 = vmatpush1.bf16.msra.mxu0 %v14679_v62  ;;  %v14829_v62 = vld [vmem:[%s18591_s3 + $0x668] ss:$12 sps:$4 sm:$0xff]  }
 0x180   : > { %6375 = vmatprep.subr.bf16.mxu0 %v14686_v63  ;;  %v14756_v63 = vld [vmem:[%s18591_s3 + $0x420] ss:$12 sps:$4 sm:$0xff]  }
 0x181   : > { %13649 = vmatpush3.bf16.msra.mxu1 %v14792_v31 }
 0x182   : > { %13650 = vmatprep.subr.bf16.mxu1 %v14796_v32  ;;  %v14775_v32 = vld [vmem:[%s18591_s3 + $0x46c] ss:$12 sps:$4 sm:$0xff]  }
 0x183   : > { %6376 = vmatpush1.bf16.msra.mxu0 %v14684_v2 }
 0x184   : > { %6377 = vmatprep.subr.bf16.mxu0 %v14691_v3  ;;  %v14833_v3 = vld [vmem:[%s18591_s3 + $0x740] ss:$12 sps:$4 sm:$0xff]  }
 0x185   : > { %13651 = vmatpush3.bf16.msra.mxu1 %v14797_v35  ;;  %v14844_v35 = vld [vmem:[%s18591_s3 + $0x6b0] ss:$12 sps:$4 sm:$0xff]  }
 0x186   : > { %13652 = vmatprep.subr.bf16.mxu1 %v14801_v36 }
 0x187   : > { %6378 = vmatpush1.bf16.msra.mxu0 %v14689_v6 }
 0x188   : > { %6388 = vmatprep.subr.bf16.mxu0 %v14698_v7 }
 0x189   : > { %13653 = vmatpush3.bf16.msra.mxu1 %v14802_v39 }
 0x18a   : > { %6380 = vmatmul.mubr.bf16.vlgmr.msra.gmra.mrb[20].mxu0 %v16561_v38  ;;  %v14733_v38 = vld [vmem:[%s18591_s3 + $0x3ac] ss:$12 sps:$4 sm:$0xff]   ;;  %13660 = vmatprep.subr.bf16.mxu1 %v14808_v40  ;;  %v14773_v40 = vld [vmem:[%s18591_s3 + $0x468] ss:$12 sps:$4 sm:$0xff]  }
 0x18b   : > { %6389 = vmatpush1.bf16.msra.mxu0 %v14696_v11  ;;  %6420 = vmatprep.mubr.bf16.mxu0 %v12450_v58  ;;  %v14824_v58 = vld [vmem:[%s18591_s3 + $0x650] ss:$12 sps:$4 sm:$0xff]  }
 0x18c   : > { %6390 = vmatprep.subr.bf16.mxu0 %v14703_v12  ;;  %6951 = vmatmul.mubr.bf16.vlgmr.msra.gmra.mrb[20].mxu1 %v16636_v43 }
 0x18d   : > { %13661 = vmatpush3.bf16.msra.mxu1 %v14809_v44  ;;  %6990 = vmatprep.mubr.bf16.mxu1 %v16654_v55  ;;  %v16697_v44 = vcombine.low %v16649_v53, %v16649_v53 }
 0x18e   : > { %13662 = vmatprep.subr.bf16.mxu1 %v14813_v45 }
 0x18f   : > { %6391 = vmatpush1.bf16.msra.mxu0 %v14701_v15  ;;  %v14838_v15 = vld [vmem:[%s18591_s3 + $0x758] ss:$12 sps:$4 sm:$0xff]  }
 0x190   : > { %6392 = vmatprep.subr.bf16.mxu0 %v14708_v16 }
 0x191   : > { %13663 = vmatpush3.bf16.msra.mxu1 %v14814_v48  ;;  %v14851_v48 = vld [vmem:[%s18591_s3 + $0x788] ss:$12 sps:$4 sm:$0xff]  }
 0x192   : > { %13664 = vmatprep.subr.bf16.mxu1 %v14818_v49  ;;  %v14785_v49 = vld [vmem:[%s18591_s3 + $0x49c] ss:$12 sps:$4 sm:$0xff]  }
 0x193   : > { %6393 = vmatpush1.bf16.msra.mxu0 %v14706_v19 }
 0x194   : > { %6394 = vmatprep.subr.bf16.mxu0 %v14713_v20 }
 0x195   : > { %13665 = vmatpush3.bf16.msra.mxu1 %v14819_v52  ;;  %v14856_v52 = vld [vmem:[%s18591_s3 + $0x7a0] ss:$12 sps:$4 sm:$0xff]  }
 0x196   : > { %13666 = vmatprep.subr.bf16.mxu1 %v14823_v54  ;;  %v14860_v54 = vld [vmem:[%s18591_s3 + $0x878] ss:$12 sps:$4 sm:$0xff]  }
 0x197   : > { %6395 = vmatpush1.bf16.msra.mxu0 %v14711_v24 }
 0x198   : > { %6396 = vmatprep.subr.bf16.mxu0 %v14718_v26 }
 0x199   : > { %13667 = vmatpush3.bf16.msra.mxu1 %v14824_v58  ;;  %v16712_v58 = vld [vmem:[%s16479_s15 + $0x28] sm:$0xff] }
 0x19a   : > { %13668 = vmatprep.subr.bf16.mxu1 %v14828_v59 }
 0x19b   : > { %6397 = vmatpush1.bf16.msra.mxu0 %v14716_v29 }
 0x19c   : > { %6398 = vmatprep.subr.bf16.mxu0 %v14723_v30 }
 0x19d   : > { %13669 = vmatpush3.bf16.msra.mxu1 %v14829_v62 }
 0x19e   : > { %13670 = vmatprep.subr.bf16.mxu1 %v14833_v3 }
 0x19f   : > { %6399 = vmatpush1.bf16.msra.mxu0 %v14721_v33 }
 0x1a0   : > { %6400 = vmatprep.subr.bf16.mxu0 %v14728_v34 }
 0x1a1   : > { %13671 = vmatpush3.bf16.msra.mxu1 %v14834_v9  ;;  %v14788_v9 = vld [vmem:[%s18591_s3 + $0x4b0] ss:$12 sps:$4 sm:$0xff]  }
 0x1a2   : > { %13672 = vmatprep.subr.bf16.mxu1 %v14838_v15 }
 0x1a3   : > { %6401 = vmatpush1.bf16.msra.mxu0 %v14726_v37 }
 0x1a4   : > { %6402 = vmatprep.subr.bf16.mxu0 %v14733_v38  ;;  %v14850_v38 = vld [vmem:[%s18591_s3 + $0x848] ss:$12 sps:$4 sm:$0xff]  }
 0x1a5   : > { %13673 = vmatpush3.bf16.msra.mxu1 %v14839_v22  ;;  %v14800_v22 = vld [vmem:[%s18591_s3 + $0x4e4] ss:$12 sps:$4 sm:$0xff]  }
 0x1a6   : > { %13674 = vmatprep.subr.bf16.mxu1 %v14843_v28 }
 0x1a7   : > { %6403 = vmatpush1.bf16.msra.mxu0 %v14731_v41 }
 0x1a8   : > { %6404 = vmatprep.subr.bf16.mxu0 %v14738_v42  ;;  %v14780_v42 = vld [vmem:[%s18591_s3 + $0x484] ss:$12 sps:$4 sm:$0xff]  }
 0x1a9   : > { %13675 = vmatpush3.bf16.msra.mxu1 %v14844_v35 }
 0x1aa   : > { %13682 = vmatprep.subr.bf16.mxu1 %v14850_v38  ;;  %v14805_v38 = vld [vmem:[%s18591_s3 + $0x4fc] ss:$12 sps:$4 sm:$0xff]  }
 0x1ab   : > { %6405 = vmatpush1.bf16.msra.mxu0 %v14736_v46 }
 0x1ac   : > { %6406 = vmatprep.subr.bf16.mxu0 %v14743_v47  ;;  %v14778_v47 = vld [vmem:[%s18591_s3 + $0x480] ss:$12 sps:$4 sm:$0xff]   ;;  %6991 = vmatmul.mubr.bf16.vlgmr.msra.gmra.mrb[24].mxu1 %v16697_v44 }
 0x1ad   : > { %13683 = vmatpush3.bf16.msra.mxu1 %v14851_v48  ;;  %v14881_v48 = vld [vmem:[%s18591_s3 + $0x818] ss:$12 sps:$4 sm:$0xff]  }
 0x1af   : > { %6407 = vmatpush1.bf16.msra.mxu0 %v14741_v50  ;;  %v14855_v50 = vld [vmem:[%s18591_s3 + $0x860] ss:$12 sps:$4 sm:$0xff]  }
 0x1b0   : > { %6408 = vmatprep.subr.bf16.mxu0 %v14748_v51  ;;  %13684 = vmatprep.subr.bf16.mxu1 %v14855_v50 }
 0x1b1   : > { %13685 = vmatpush3.bf16.msra.mxu1 %v14856_v52 }
 0x1b2   : > { %13686 = vmatprep.subr.bf16.mxu1 %v14860_v54 }
 0x1b3   : > { %6409 = vmatpush1.bf16.msra.mxu0 %v14746_v56 }
 0x1b4   : > { %6410 = vmatprep.subr.bf16.mxu0 %v14753_v57 }
 0x1b7   : > { %6411 = vmatpush1.bf16.msra.mxu0 %v14751_v60  ;;  %v16717_v60 = vcombine.high %v16712_v58, %v16712_v58 }
 0x1b8   : > { %6412 = vmatprep.subr.bf16.mxu0 %v14758_v61 }
 0x1b9   : > { %7030 = vmatprep.mubr.bf16.mxu1 %v16717_v60 }
 0x1bb   : > { %6413 = vmatpush1.bf16.msra.mxu0 %v14756_v63  ;;  %v14783_v63 = vld [vmem:[%s18591_s3 + $0x498] ss:$12 sps:$4 sm:$0xff]  }
 0x1bc   : > { %6414 = vmatprep.subr.bf16.mxu0 %v14763_v5  ;;  %v14861_v5 = vld [vmem:[%s18591_s3 + $0x7b8] ss:$12 sps:$4 sm:$0xff]  }
 0x1bd   : > { %v13482_v0 = vpop.f32.mrb[0].mxu0  ;;  %13687 = vmatpush3.bf16.msra.mxu1 %v14861_v5 }
 0x1be   : > { %v13483_v2 = vpop.f32.mrb[1].mxu0 }
 0x1bf   : > { %v13484_v4 = vadd.f32 %v13483_v2, %v13482_v0  ;;  %v13485_v6 = vpop.f32.mrb[2].mxu0  ;;  %v13522_v12 = vpop.f32.mrb[0].mxu1  ;;  %6415 = vmatpush1.bf16.msra.mxu0 %v14761_v13  ;;  %v14790_v2 = vld [vmem:[%s18591_s3 + $0x4b4] ss:$12 sps:$4 sm:$0xff]  }
 0x1c0   : > { %v13486_v7 = vpop.f32.mrb[3].mxu0  ;;  %v13523_v14 = vpop.f32.mrb[1].mxu1  ;;  %6416 = vmatprep.subr.bf16.mxu0 %v14770_v18  ;;  %v14870_v13 = vld [vmem:[%s18591_s3 + $0x8a8] ss:$12 sps:$4 sm:$0xff]  }
 0x1c1   : > { %v1753_v10 = vadd.f32 %v13484_v4, %v16666_v1  ;;  %v13487_v11 = vadd.f32 %v13486_v7, %v13485_v6  ;;  %v16676_v19 = vadd.f32 %v13523_v14, %v13522_v12  ;;  %v13525_v20 = vpop.f32.mrb[2].mxu1  ;;  %v14865_v6 = vld [vmem:[%s18591_s3 + $0x890] ss:$12 sps:$4 sm:$0xff]   ;;  %v14793_v18 = vld [vmem:[%s18591_s3 + $0x4c8] ss:$12 sps:$4 sm:$0xff]  }
 0x1c2   : > { %v13526_v21 = vpop.f32.mrb[3].mxu1  ;;  %13688 = vmatprep.subr.bf16.mxu1 %v14865_v6 }
 0x1c3   : > { %v1783_v16 = vmax.f32 %v1753_v10, 0.0  ;;  %v1756_v17 = vadd.f32 %v13487_v11, %v16666_v1  ;;  %v16679_v24 = vadd.f32 %v13526_v21, %v13525_v20  ;;  %6417 = vmatpush1.bf16.msra.mxu0 %v14768_v27  ;;  %v14795_v10 = vld [vmem:[%s18591_s3 + $0x4cc] ss:$12 sps:$4 sm:$0xff]   ;;  %v14866_v11 = vld [vmem:[%s18591_s3 + $0x7d0] ss:$12 sps:$4 sm:$0xff]  }
 0x1c4   : > { %6418 = vmatprep.subr.bf16.mxu0 %v14775_v32  ;;  %13689 = vmatpush3.bf16.msra.mxu1 %v14866_v11  ;;  %v14871_v27 = vld [vmem:[%s18591_s3 + $0x7e8] ss:$12 sps:$4 sm:$0xff]   ;;  %v14875_v32 = vld [vmem:[%s18591_s3 + $0x8c0] ss:$12 sps:$4 sm:$0xff]  }
 0x1c5   : > { %v1784_v23 = vmax.f32 %v1756_v17, 0.0  ;;  %v16681_v26 = vmin.f32 %v1783_v16, 6.0  ;;  %v13488_v30 = vpop.f32.mrb[4].mxu0  ;;  %13690 = vmatprep.subr.bf16.mxu1 %v14870_v13  ;;  %v14822_v13 = vld [vmem:[%s18591_s3 + $0x544] ss:$12 sps:$4 sm:$0xff]  }
 0x1c6   : > { %v13489_v31 = vpop.f32.mrb[5].mxu0 }
 0x1c7   : > { %v16685_v29 = vmin.f32 %v1784_v23, 6.0  ;;  %v13490_v33 = vadd.f32 %v13489_v31, %v13488_v30  ;;  %v13491_v34 = vpop.f32.mrb[6].mxu0  ;;  %6419 = vmatpush1.bf16.msra.mxu0 %v14773_v40  ;;  %v14876_v40 = vld [vmem:[%s18591_s3 + $0x800] ss:$12 sps:$4 sm:$0xff]  }
 0x1c8   : > { %v13492_v37 = vpop.f32.mrb[7].mxu0  ;;  %6429 = vmatprep.subr.bf16.mxu0 %v14780_v42  ;;  %13691 = vmatpush3.bf16.msra.mxu1 %v14871_v27  ;;  %v14812_v42 = vld [vmem:[%s18591_s3 + $0x514] ss:$12 sps:$4 sm:$0xff]  }
 0x1c9   : > { %v10600_v36 = vpack.c.bf16 %v16685_v29, %v16681_v26  ;;  %v1761_v39 = vadd.f32 %v13490_v33, %v16666_v1  ;;  %v13493_v41 = vadd.f32 %v13492_v37, %v13491_v34  ;;  %v14798_v33 = vld [vmem:[%s18591_s3 + $0x4e0] ss:$12 sps:$4 sm:$0xff]   ;;  %13692 = vmatprep.subr.bf16.mxu1 %v14875_v32 }
 0x1ca   : > { %6421 = vmatmul.mubr.bf16.vlgmr.msra.gmra.mrb[20].mxu0 %v16596_v8  ;;  %v12390_v34 = vld [vmem:[%s16039_s29] ss:$0 sm:$0xff] }
 0x1cb   : > { %v1785_v45 = vmax.f32 %v1761_v39, 0.0  ;;  %v1764_v46 = vadd.f32 %v13493_v41, %v16666_v1  ;;  %6430 = vmatpush1.bf16.msra.mxu0 %v14778_v47  ;;  %6461 = vmatprep.mubr.bf16.mxu0 %v16616_v25  ;;  %v14803_v39 = vld [vmem:[%s18591_s3 + $0x4f8] ss:$12 sps:$4 sm:$0xff]   ;;  %v14820_v27 = vld [vmem:[%s18591_s3 + $0x540] ss:$12 sps:$4 sm:$0xff]  }
 0x1cc   : > { %6431 = vmatprep.subr.bf16.mxu0 %v14785_v49  ;;  %13693 = vmatpush3.bf16.msra.mxu1 %v14876_v40  ;;  %v14830_v40 = vld [vmem:[%s18591_s3 + $0x570] ss:$12 sps:$4 sm:$0xff]  }
 0x1cd   : > { %v1786_v51 = vmax.f32 %v1764_v46, 0.0  ;;  %v16707_v53 = vmin.f32 %v1785_v45, 6.0  ;;  %v13494_v57 = vpop.f32.mrb[8].mxu0  ;;  %v14880_v45 = vld [vmem:[%s18591_s3 + $0x8d8] ss:$12 sps:$4 sm:$0xff]   ;;  %v2261_v46 = vadd.f32 %v16676_v19, %v12390_v34 }
 0x1ce   : > { %v13495_v59 = vpop.f32.mrb[9].mxu0  ;;  %13694 = vmatprep.subr.bf16.mxu1 %v14880_v45  ;;  %v14912_v45 = vld [vmem:[%s18591_s3 + $0xa28] ss:$12 sps:$4 sm:$0xff]  }
 0x1cf   : > { %v16709_v56 = vmin.f32 %v1786_v51, 6.0  ;;  %v13496_v62 = vadd.f32 %v13495_v59, %v13494_v57  ;;  %v13497_v0 = vpop.f32.mrb[10].mxu0  ;;  %6432 = vmatpush1.bf16.msra.mxu0 %v14783_v63  ;;  %v2264_v51 = vadd.f32 %v16679_v24, %v12390_v34  ;;  %v14810_v59 = vld [vmem:[%s18591_s3 + $0x510] ss:$12 sps:$4 sm:$0xff]  }
 0x1d0   : > { %v13498_v8 = vpop.f32.mrb[11].mxu0  ;;  %6433 = vmatprep.subr.bf16.mxu0 %v14790_v2  ;;  %v14817_v2 = vld [vmem:[%s18591_s3 + $0x52c] ss:$12 sps:$4 sm:$0xff]   ;;  %13695 = vmatpush3.bf16.msra.mxu1 %v14881_v48  ;;  %v14913_v48 = vld [vmem:[%s18591_s3 + $0x968] ss:$12 sps:$4 sm:$0xff]  }
 0x1d1   : > { %v10601_v61 = vpack.c.bf16 %v16709_v56, %v16707_v53  ;;  %v1769_v3 = vadd.f32 %v13496_v62, %v16666_v1  ;;  %v13499_v4 = vadd.f32 %v13498_v8, %v13497_v0  ;;  %v14885_v62 = vld [vmem:[%s18591_s3 + $0x8f0] ss:$12 sps:$4 sm:$0xff]  }
 0x1d2   : > { %13696 = vmatprep.subr.bf16.mxu1 %v14885_v62  ;;  %v14854_v62 = vld [vmem:[%s18591_s3 + $0x5d4] ss:$12 sps:$4 sm:$0xff]  }
 0x1d3   : > { %v1787_v7 = vmax.f32 %v1769_v3, 0.0  ;;  %v1772_v25 = vadd.f32 %v13499_v4, %v16666_v1  ;;  %6434 = vmatpush1.bf16.msra.mxu0 %v14788_v9  ;;  %v14886_v3 = vld [vmem:[%s18591_s3 + $0x830] ss:$12 sps:$4 sm:$0xff]  }
 0x1d4   : > { %6435 = vmatprep.subr.bf16.mxu0 %v14795_v10  ;;  %v16767_v9 = vld [vmem:[%s16479_s15 + $0x30] sm:$0xff]  ;;  %13697 = vmatpush3.bf16.msra.mxu1 %v14886_v3 }
 0x1d5   : > { %v1788_v12 = vmax.f32 %v1772_v25, 0.0  ;;  %v13500_v14 = vpop.f32.mrb[12].mxu0  ;;  %v16733_v15 = vmin.f32 %v1787_v7, 6.0  ;;  %v14892_v25 = vld [vmem:[%s18591_s3 + $0x9c8] ss:$12 sps:$4 sm:$0xff]  }
 0x1d6   : > { %v13501_v17 = vpop.f32.mrb[13].mxu0  ;;  %13704 = vmatprep.subr.bf16.mxu1 %v14892_v25  ;;  %v14934_v3 = vld [vmem:[%s18591_s3 + $0xb48] ss:$12 sps:$4 sm:$0xff]  }
 0x1d7   : > { %v16735_v16 = vmin.f32 %v1788_v12, 6.0  ;;  %v13502_v20 = vadd.f32 %v13501_v17, %v13500_v14  ;;  %v13503_v21 = vpop.f32.mrb[14].mxu0  ;;  %6436 = vmatpush1.bf16.msra.mxu0 %v14793_v18  ;;  %v14815_v12 = vld [vmem:[%s18591_s3 + $0x528] ss:$12 sps:$4 sm:$0xff]   ;;  %v16773_v14 = vcombine.low %v16712_v58, %v16712_v58 }
 0x1d8   : > { %v13504_v23 = vpop.f32.mrb[15].mxu0  ;;  %6437 = vmatprep.subr.bf16.mxu0 %v14800_v22  ;;  %v14897_v22 = vld [vmem:[%s18591_s3 + $0x9e0] ss:$12 sps:$4 sm:$0xff]   ;;  %v14827_v58 = vld [vmem:[%s18591_s3 + $0x55c] ss:$12 sps:$4 sm:$0xff]  }
 0x1d9   : > { %v10602_v28 = vpack.c.bf16 %v16735_v16, %v16733_v15  ;;  %v1777_v30 = vadd.f32 %v13502_v20, %v16666_v1  ;;  %v13505_v31 = vadd.f32 %v13504_v23, %v13503_v21  ;;  %v14893_v20 = vld [vmem:[%s18591_s3 + $0x908] ss:$12 sps:$4 sm:$0xff]   ;;  %v16778_v21 = vcombine.high %v16767_v9, %v16767_v9  ;;  %7031 = vmatmul.mubr.bf16.vlgmr.msra.gmra.mrb[28].mxu1 %v16773_v14 }
 0x1da   : > { %13705 = vmatpush3.bf16.msra.mxu1 %v14893_v20  ;;  %v14935_v25 = vld [vmem:[%s18591_s3 + $0xa88] ss:$12 sps:$4 sm:$0xff]  }
 0x1db   : > { %v1789_v35 = vmax.f32 %v1777_v30, 0.0  ;;  %v1780_v37 = vadd.f32 %v13505_v31, %v16666_v1  ;;  %6438 = vmatpush1.bf16.msra.mxu0 %v14798_v33  ;;  %v14898_v30 = vld [vmem:[%s18591_s3 + $0x920] ss:$12 sps:$4 sm:$0xff]   ;;  %7070 = vmatprep.mubr.bf16.mxu1 %v16778_v21  ;;  %v14902_v33 = vld [vmem:[%s18591_s3 + $0x9f8] ss:$12 sps:$4 sm:$0xff]  }
 0x1dc   : > { %6439 = vmatprep.subr.bf16.mxu0 %v14805_v38  ;;  %13706 = vmatprep.subr.bf16.mxu1 %v14897_v22  ;;  %v14903_v38 = vld [vmem:[%s18591_s3 + $0x938] ss:$12 sps:$4 sm:$0xff]   ;;  %v14874_v20 = vld [vmem:[%s18591_s3 + $0x634] ss:$12 sps:$4 sm:$0xff]  }
 0x1dd   : > { %v1790_v41 = vmax.f32 %v1780_v37, 0.0  ;;  %v13544_v47 = vpop.f32.mrb[16].mxu0  ;;  %v16754_v49 = vmin.f32 %v1789_v35, 6.0  ;;  %v14825_v35 = vld [vmem:[%s18591_s3 + $0x558] ss:$12 sps:$4 sm:$0xff]  }
 0x1de   : > { %v13545_v1 = vpop.f32.mrb[17].mxu0  ;;  %v14832_v37 = vld [vmem:[%s18591_s3 + $0x574] ss:$12 sps:$4 sm:$0xff]   ;;  %13707 = vmatpush3.bf16.msra.mxu1 %v14898_v30  ;;  %v14945_v22 = vld [vmem:[%s18591_s3 + $0xab8] ss:$12 sps:$4 sm:$0xff]  }
 0x1df   : > { %v16756_v50 = vmin.f32 %v1790_v41, 6.0  ;;  %v13546_v52 = vadd.f32 %v13545_v1, %v13544_v47  ;;  %v13547_v54 = vpop.f32.mrb[18].mxu0  ;;  %v13566_v0 = vpop.f32.mrb[4].mxu1  ;;  %6440 = vmatpush1.bf16.msra.mxu0 %v14803_v39  ;;  %13708 = vmatprep.subr.bf16.mxu1 %v14902_v33  ;;  %v14907_v39 = vld [vmem:[%s18591_s3 + $0xa10] ss:$12 sps:$4 sm:$0xff]  }
 0x1e0   : > { %v13548_v57 = vpop.f32.mrb[19].mxu0  ;;  %v13567_v24 = vpop.f32.mrb[5].mxu1  ;;  %6441 = vmatprep.subr.bf16.mxu0 %v14812_v42  ;;  %v14837_v41 = vld [vmem:[%s18591_s3 + $0x58c] ss:$12 sps:$4 sm:$0xff]   ;;  %v14908_v42 = vld [vmem:[%s18591_s3 + $0x950] ss:$12 sps:$4 sm:$0xff]  }
 0x1e1   : > { %v10603_v19 = vpack.c.bf16 %v16756_v50, %v16754_v49  ;;  %v2302_v63 = vadd.f32 %v13546_v52, %v2261_v46  ;;  %v13549_v8 = vadd.f32 %v13548_v57, %v13547_v54  ;;  %v13568_v5 = vadd.f32 %v13567_v24, %v13566_v0  ;;  %v13569_v6 = vpop.f32.mrb[6].mxu1  ;;  %v14835_v46 = vld [vmem:[%s18591_s3 + $0x588] ss:$12 sps:$4 sm:$0xff]   ;;  %v14842_v47 = vld [vmem:[%s18591_s3 + $0x5a4] ss:$12 sps:$4 sm:$0xff]  }
 0x1e2   : > { %v13570_v7 = vpop.f32.mrb[7].mxu1  ;;  %13709 = vmatpush3.bf16.msra.mxu1 %v14903_v38  ;;  %v14917_v1 = vld [vmem:[%s18591_s3 + $0xa40] ss:$12 sps:$4 sm:$0xff]   ;;  %v14847_v52 = vld [vmem:[%s18591_s3 + $0x5bc] ss:$12 sps:$4 sm:$0xff]  }
 0x1e3   : > { %v2305_v4 = vadd.f32 %v13549_v8, %v2264_v51  ;;  %v2343_v10 = vadd.f32 %v13568_v5, %v2302_v63  ;;  %v13571_v11 = vadd.f32 %v13570_v7, %v13569_v6  ;;  %6442 = vmatpush1.bf16.msra.mxu0 %v14810_v59  ;;  %13710 = vmatprep.subr.bf16.mxu1 %v14907_v39  ;;  %v14840_v51 = vld [vmem:[%s18591_s3 + $0x5a0] ss:$12 sps:$4 sm:$0xff]   ;;  %v14922_v57 = vld [vmem:[%s18591_s3 + $0xa58] ss:$12 sps:$4 sm:$0xff]   ;;  %v14927_v0 = vld [vmem:[%s18591_s3 + $0xa70] ss:$12 sps:$4 sm:$0xff]  }
 0x1e4   : > { %6443 = vmatprep.subr.bf16.mxu0 %v14817_v2  ;;  %v14918_v54 = vld [vmem:[%s18591_s3 + $0x980] ss:$12 sps:$4 sm:$0xff]   ;;  %v14845_v59 = vld [vmem:[%s18591_s3 + $0x5b8] ss:$12 sps:$4 sm:$0xff]   ;;  %v14852_v8 = vld [vmem:[%s18591_s3 + $0x5d0] ss:$12 sps:$4 sm:$0xff]   ;;  %v16824_v7 = vcombine.low %v16767_v9, %v16767_v9 }
 0x1e5   : > { %v2349_v17 = vmax.f32 %v2343_v10, 0.0  ;;  %v2346_v18 = vadd.f32 %v13571_v11, %v2305_v4  ;;  %v14923_v63 = vld [vmem:[%s18591_s3 + $0x998] ss:$12 sps:$4 sm:$0xff]   ;;  %v14928_v24 = vld [vmem:[%s18591_s3 + $0x9b0] ss:$12 sps:$4 sm:$0xff]  }
 0x1e6   : > { %13711 = vmatpush3.bf16.msra.mxu1 %v14908_v42  ;;  %v14859_v2 = vld [vmem:[%s18591_s3 + $0x5ec] ss:$12 sps:$4 sm:$0xff]   ;;  %v14857_v5 = vld [vmem:[%s18591_s3 + $0x5e8] ss:$12 sps:$4 sm:$0xff]   ;;  %v14864_v6 = vld [vmem:[%s18591_s3 + $0x604] ss:$12 sps:$4 sm:$0xff]  }
 0x1e7   : > { %v2350_v23 = vmax.f32 %v2346_v18, 0.0  ;;  %6444 = vmatpush1.bf16.msra.mxu0 %v14815_v12  ;;  %v16785_v31 = vmin.f32 %v2349_v17, 6.0  ;;  %13712 = vmatprep.subr.bf16.mxu1 %v14912_v45  ;;  %v16818_v4 = vld [vmem:[%s16479_s15 + $0x38] sm:$0xff]  ;;  %v14939_v11 = vld [vmem:[%s18591_s3 + $0xb60] ss:$12 sps:$4 sm:$0xff]  }
 0x1e8   : > { %6445 = vmatprep.subr.bf16.mxu0 %v14822_v13  ;;  %v16829_v10 = vcombine.high %v16818_v4, %v16818_v4  ;;  %v14862_v12 = vld [vmem:[%s18591_s3 + $0x600] ss:$12 sps:$4 sm:$0xff]   ;;  %v14869_v13 = vld [vmem:[%s18591_s3 + $0x61c] ss:$12 sps:$4 sm:$0xff]   ;;  %v14944_v17 = vld [vmem:[%s18591_s3 + $0xb78] ss:$12 sps:$4 sm:$0xff]  }
 0x1e9   : > { %v16787_v32 = vmin.f32 %v2350_v23, 6.0  ;;  %v14940_v9 = vld [vmem:[%s18591_s3 + $0xaa0] ss:$12 sps:$4 sm:$0xff]   ;;  %v14867_v18 = vld [vmem:[%s18591_s3 + $0x618] ss:$12 sps:$4 sm:$0xff]  }
 0x1ea   : > { %13713 = vmatpush3.bf16.msra.mxu1 %v14913_v48  ;;  %v14949_v23 = vld [vmem:[%s18591_s3 + $0xb90] ss:$12 sps:$4 sm:$0xff]   ;;  %v14877_v30 = vld [vmem:[%s18591_s3 + $0x648] ss:$12 sps:$4 sm:$0xff]   ;;  %v14882_v38 = vld [vmem:[%s18591_s3 + $0x660] ss:$12 sps:$4 sm:$0xff]  }
 0x1eb   : > { %v9416_v34 = vpack.c.bf16 %v16787_v32, %v16785_v31  ;;  %6446 = vmatpush1.bf16.msra.mxu0 %v14820_v27  ;;  %13714 = vmatprep.subr.bf16.mxu1 %v14917_v1  ;;  %v14879_v27 = vld [vmem:[%s18591_s3 + $0x64c] ss:$12 sps:$4 sm:$0xff]   ;;  %v14884_v33 = vld [vmem:[%s18591_s3 + $0x664] ss:$12 sps:$4 sm:$0xff]   ;;  %v14889_v39 = vld [vmem:[%s18591_s3 + $0x67c] ss:$12 sps:$4 sm:$0xff]  }
 0x1ec   : > { %6447 = vmatprep.subr.bf16.mxu0 %v14827_v58  ;;  %v14950_v58 = vld [vmem:[%s18591_s3 + $0xad0] ss:$12 sps:$4 sm:$0xff]   ;;  %v14887_v42 = vld [vmem:[%s18591_s3 + $0x678] ss:$12 sps:$4 sm:$0xff]   ;;  %v14896_v45 = vld [vmem:[%s18591_s3 + $0x694] ss:$12 sps:$4 sm:$0xff]  }
 0x1ed   : > { %v14894_v48 = vld [vmem:[%s18591_s3 + $0x690] ss:$12 sps:$4 sm:$0xff]   ;;  %v14901_v1 = vld [vmem:[%s18591_s3 + $0x6ac] ss:$12 sps:$4 sm:$0xff]  }
 0x1ee   : > { %13715 = vmatpush3.bf16.msra.mxu1 %v14918_v54  ;;  %v16865_v54 = vld [vmem:[%s16479_s15 + $0x40] sm:$0xff] }
 0x1ef   : > { %6448 = vmatpush1.bf16.msra.mxu0 %v14825_v35  ;;  %13716 = vmatprep.subr.bf16.mxu1 %v14922_v57  ;;  %v14955_v35 = vld [vmem:[%s18591_s3 + $0xae8] ss:$12 sps:$4 sm:$0xff]  }
 0x1f0   : > { %6449 = vmatprep.subr.bf16.mxu0 %v14832_v37  ;;  %v14959_v37 = vld [vmem:[%s18591_s3 + $0xbc0] ss:$12 sps:$4 sm:$0xff]   ;;  %v14899_v57 = vld [vmem:[%s18591_s3 + $0x6a8] ss:$12 sps:$4 sm:$0xff]  }
 0x1f2   : > { %13717 = vmatpush3.bf16.msra.mxu1 %v14923_v63  ;;  %v14977_v63 = vld [vmem:[%s18591_s3 + $0xc08] ss:$12 sps:$4 sm:$0xff]  }
 0x1f3   : > { %6450 = vmatpush1.bf16.msra.mxu0 %v14830_v40  ;;  %13718 = vmatprep.subr.bf16.mxu1 %v14927_v0  ;;  %v14960_v40 = vld [vmem:[%s18591_s3 + $0xb00] ss:$12 sps:$4 sm:$0xff]   ;;  %v16876_v0 = vcombine.high %v16865_v54, %v16865_v54 }
 0x1f4   : > { %6451 = vmatprep.subr.bf16.mxu0 %v14837_v41  ;;  %v14964_v41 = vld [vmem:[%s18591_s3 + $0xbd8] ss:$12 sps:$4 sm:$0xff]  }
 0x1f6   : > { %13719 = vmatpush3.bf16.msra.mxu1 %v14928_v24  ;;  %v14911_v24 = vld [vmem:[%s18591_s3 + $0x6dc] ss:$12 sps:$4 sm:$0xff]  }
 0x1f7   : > { %6452 = vmatpush1.bf16.msra.mxu0 %v14835_v46  ;;  %13726 = vmatprep.subr.bf16.mxu1 %v14934_v3  ;;  %v14965_v46 = vld [vmem:[%s18591_s3 + $0xb18] ss:$12 sps:$4 sm:$0xff]   ;;  %v14982_v3 = vld [vmem:[%s18591_s3 + $0xc20] ss:$12 sps:$4 sm:$0xff]  }
 0x1f8   : > { %6453 = vmatprep.subr.bf16.mxu0 %v14842_v47  ;;  %v14969_v47 = vld [vmem:[%s18591_s3 + $0xbf0] ss:$12 sps:$4 sm:$0xff]  }
 0x1f9   : > { %7071 = vmatmul.mubr.bf16.vlgmr.msra.gmra.mrb[32].mxu1 %v16824_v7 }
 0x1fa   : > { %13727 = vmatpush3.bf16.msra.mxu1 %v14935_v25  ;;  %7110 = vmatprep.mubr.bf16.mxu1 %v16829_v10  ;;  %v14987_v25 = vld [vmem:[%s18591_s3 + $0xc38] ss:$12 sps:$4 sm:$0xff]  }
 0x1fb   : > { %6454 = vmatpush1.bf16.msra.mxu0 %v14840_v51  ;;  %13728 = vmatprep.subr.bf16.mxu1 %v14939_v11  ;;  %v14970_v51 = vld [vmem:[%s18591_s3 + $0xb30] ss:$12 sps:$4 sm:$0xff]  }
 0x1fc   : > { %6455 = vmatprep.subr.bf16.mxu0 %v14847_v52  ;;  %v14976_v52 = vld [vmem:[%s18591_s3 + $0xcc8] ss:$12 sps:$4 sm:$0xff]   ;;  %v14991_v11 = vld [vmem:[%s18591_s3 + $0xd10] ss:$12 sps:$4 sm:$0xff]  }
 0x1fe   : > { %13729 = vmatpush3.bf16.msra.mxu1 %v14940_v9  ;;  %v14992_v9 = vld [vmem:[%s18591_s3 + $0xc50] ss:$12 sps:$4 sm:$0xff]  }
 0x1ff   : > { %6456 = vmatpush1.bf16.msra.mxu0 %v14845_v59  ;;  %13730 = vmatprep.subr.bf16.mxu1 %v14944_v17  ;;  %v14906_v59 = vld [vmem:[%s18591_s3 + $0x6c4] ss:$12 sps:$4 sm:$0xff]   ;;  %v14996_v17 = vld [vmem:[%s18591_s3 + $0xd28] ss:$12 sps:$4 sm:$0xff]  }
 0x200   : > { %6457 = vmatprep.subr.bf16.mxu0 %v14854_v62  ;;  %v16871_v62 = vcombine.low %v16818_v4, %v16818_v4  ;;  %v14986_v4 = vld [vmem:[%s18591_s3 + $0xcf8] ss:$12 sps:$4 sm:$0xff]  }
 0x202   : > { %13731 = vmatpush3.bf16.msra.mxu1 %v14945_v22  ;;  %v14997_v22 = vld [vmem:[%s18591_s3 + $0xc68] ss:$12 sps:$4 sm:$0xff]  }
 0x203   : > { %6458 = vmatpush1.bf16.msra.mxu0 %v14852_v8  ;;  %13732 = vmatprep.subr.bf16.mxu1 %v14949_v23  ;;  %v14981_v8 = vld [vmem:[%s18591_s3 + $0xce0] ss:$12 sps:$4 sm:$0xff]  }
 0x204   : > { %6459 = vmatprep.subr.bf16.mxu0 %v14859_v2  ;;  %v14904_v2 = vld [vmem:[%s18591_s3 + $0x6c0] ss:$12 sps:$4 sm:$0xff]  }
 0x205   : > { %v15001_v23 = vld [vmem:[%s18591_s3 + $0xd40] ss:$12 sps:$4 sm:$0xff]  }
 0x206   : > { %13733 = vmatpush3.bf16.msra.mxu1 %v14950_v58  ;;  %v15002_v58 = vld [vmem:[%s18591_s3 + $0xc80] ss:$12 sps:$4 sm:$0xff]  }
 0x207   : > { %6460 = vmatpush1.bf16.msra.mxu0 %v14857_v5  ;;  %v14909_v5 = vld [vmem:[%s18591_s3 + $0x6d8] ss:$12 sps:$4 sm:$0xff]  }
 0x208   : > { %6470 = vmatprep.subr.bf16.mxu0 %v14864_v6  ;;  %v14916_v6 = vld [vmem:[%s18591_s3 + $0x6f4] ss:$12 sps:$4 sm:$0xff]  }
 0x20a   : > { %6462 = vmatmul.mubr.bf16.vlgmr.msra.gmra.mrb[20].mxu0 %v16636_v43  ;;  %v14872_v43 = vld [vmem:[%s18591_s3 + $0x630] ss:$12 sps:$4 sm:$0xff]  }
 0x20b   : > { %6471 = vmatpush1.bf16.msra.mxu0 %v14862_v12  ;;  %6502 = vmatprep.mubr.bf16.mxu0 %v16654_v55  ;;  %v14954_v55 = vld [vmem:[%s18591_s3 + $0xba8] ss:$12 sps:$4 sm:$0xff]   ;;  %v14914_v12 = vld [vmem:[%s18591_s3 + $0x6f0] ss:$12 sps:$4 sm:$0xff]  }
 0x20c   : > { %6472 = vmatprep.subr.bf16.mxu0 %v14869_v13  ;;  %13734 = vmatprep.subr.bf16.mxu1 %v14954_v55  ;;  %v14921_v13 = vld [vmem:[%s18591_s3 + $0x70c] ss:$12 sps:$4 sm:$0xff]  }
 0x20d   : > { %13735 = vmatpush3.bf16.msra.mxu1 %v14955_v35  ;;  %v15006_v55 = vld [vmem:[%s18591_s3 + $0xd58] ss:$12 sps:$4 sm:$0xff]  }
 0x20e   : > { %13736 = vmatprep.subr.bf16.mxu1 %v14959_v37  ;;  %v15007_v35 = vld [vmem:[%s18591_s3 + $0xc98] ss:$12 sps:$4 sm:$0xff]   ;;  %v15011_v37 = vld [vmem:[%s18591_s3 + $0xd70] ss:$12 sps:$4 sm:$0xff]  }
 0x20f   : > { %6473 = vmatpush1.bf16.msra.mxu0 %v14867_v18  ;;  %v14919_v18 = vld [vmem:[%s18591_s3 + $0x708] ss:$12 sps:$4 sm:$0xff]  }
 0x210   : > { %6474 = vmatprep.subr.bf16.mxu0 %v14874_v20  ;;  %v14926_v20 = vld [vmem:[%s18591_s3 + $0x724] ss:$12 sps:$4 sm:$0xff]  }
 0x211   : > { %13737 = vmatpush3.bf16.msra.mxu1 %v14960_v40  ;;  %v15012_v40 = vld [vmem:[%s18591_s3 + $0xcb0] ss:$12 sps:$4 sm:$0xff]  }
 0x212   : > { %13738 = vmatprep.subr.bf16.mxu1 %v14964_v41  ;;  %v15018_v41 = vld [vmem:[%s18591_s3 + $0xe48] ss:$12 sps:$4 sm:$0xff]  }
 0x213   : > { %6475 = vmatpush1.bf16.msra.mxu0 %v14872_v43  ;;  %v14924_v43 = vld [vmem:[%s18591_s3 + $0x720] ss:$12 sps:$4 sm:$0xff]  }
 0x214   : > { %6476 = vmatprep.subr.bf16.mxu0 %v14879_v27  ;;  %v14931_v27 = vld [vmem:[%s18591_s3 + $0x73c] ss:$12 sps:$4 sm:$0xff]  }
 0x215   : > { %13739 = vmatpush3.bf16.msra.mxu1 %v14965_v46  ;;  %v14948_v46 = vld [vmem:[%s18591_s3 + $0x784] ss:$12 sps:$4 sm:$0xff]  }
 0x216   : > { %13740 = vmatprep.subr.bf16.mxu1 %v14969_v47  ;;  %v16916_v47 = vcombine.low %v16865_v54, %v16865_v54  ;;  %v15024_v54 = vld [vmem:[%s18591_s3 + $0xda0] ss:$12 sps:$4 sm:$0xff]  }
 0x217   : > { %6477 = vmatpush1.bf16.msra.mxu0 %v14877_v30  ;;  %v14929_v30 = vld [vmem:[%s18591_s3 + $0x738] ss:$12 sps:$4 sm:$0xff]  }
 0x218   : > { %6478 = vmatprep.subr.bf16.mxu0 %v14884_v33  ;;  %v14938_v33 = vld [vmem:[%s18591_s3 + $0x754] ss:$12 sps:$4 sm:$0xff]  }
 0x219   : > { %13741 = vmatpush3.bf16.msra.mxu1 %v14970_v51  ;;  %v15023_v51 = vld [vmem:[%s18591_s3 + $0xe60] ss:$12 sps:$4 sm:$0xff]  }
 0x21a   : > { %13748 = vmatprep.subr.bf16.mxu1 %v14976_v52  ;;  %v14946_v52 = vld [vmem:[%s18591_s3 + $0x780] ss:$12 sps:$4 sm:$0xff]  }
 0x21b   : > { %6479 = vmatpush1.bf16.msra.mxu0 %v14882_v38  ;;  %v14936_v38 = vld [vmem:[%s18591_s3 + $0x750] ss:$12 sps:$4 sm:$0xff]  }
 0x21c   : > { %6480 = vmatprep.subr.bf16.mxu0 %v14889_v39  ;;  %7111 = vmatmul.mubr.bf16.vlgmr.msra.gmra.mrb[36].mxu1 %v16871_v62  ;;  %v14943_v39 = vld [vmem:[%s18591_s3 + $0x76c] ss:$12 sps:$4 sm:$0xff]  }
 0x21d   : > { %13749 = vmatpush3.bf16.msra.mxu1 %v14977_v63  ;;  %7150 = vmatprep.mubr.bf16.mxu1 %v16876_v0  ;;  %v14951_v63 = vld [vmem:[%s18591_s3 + $0x798] ss:$12 sps:$4 sm:$0xff]  }
 0x21e   : > { %13750 = vmatprep.subr.bf16.mxu1 %v14981_v8  ;;  %v14958_v8 = vld [vmem:[%s18591_s3 + $0x7b4] ss:$12 sps:$4 sm:$0xff]  }
 0x21f   : > { %6481 = vmatpush1.bf16.msra.mxu0 %v14887_v42  ;;  %v16910_v42 = vld [vmem:[%s16479_s15 + $0x48] sm:$0xff] }
 0x220   : > { %6482 = vmatprep.subr.bf16.mxu0 %v14896_v45  ;;  %v14941_v45 = vld [vmem:[%s18591_s3 + $0x768] ss:$12 sps:$4 sm:$0xff]  }
 0x221   : > { %13751 = vmatpush3.bf16.msra.mxu1 %v14982_v3  ;;  %v14963_v3 = vld [vmem:[%s18591_s3 + $0x7cc] ss:$12 sps:$4 sm:$0xff]  }
 0x222   : > { %13752 = vmatprep.subr.bf16.mxu1 %v14986_v4  ;;  %v15034_v4 = vld [vmem:[%s18591_s3 + $0xdd0] ss:$12 sps:$4 sm:$0xff]  }
 0x223   : > { %6483 = vmatpush1.bf16.msra.mxu0 %v14894_v48  ;;  %v15019_v48 = vld [vmem:[%s18591_s3 + $0xd88] ss:$12 sps:$4 sm:$0xff]  }
 0x224   : > { %6484 = vmatprep.subr.bf16.mxu0 %v14901_v1  ;;  %v16921_v1 = vcombine.high %v16910_v42, %v16910_v42 }
 0x225   : > { %13753 = vmatpush3.bf16.msra.mxu1 %v14987_v25  ;;  %v15039_v25 = vld [vmem:[%s18591_s3 + $0xde8] ss:$12 sps:$4 sm:$0xff]  }
 0x226   : > { %13754 = vmatprep.subr.bf16.mxu1 %v14991_v11  ;;  %v15043_v11 = vld [vmem:[%s18591_s3 + $0xec0] ss:$12 sps:$4 sm:$0xff]  }
 0x227   : > { %6485 = vmatpush1.bf16.msra.mxu0 %v14899_v57  ;;  %v14953_v57 = vld [vmem:[%s18591_s3 + $0x79c] ss:$12 sps:$4 sm:$0xff]  }
 0x228   : > { %6486 = vmatprep.subr.bf16.mxu0 %v14906_v59  ;;  %v15028_v59 = vld [vmem:[%s18591_s3 + $0xe78] ss:$12 sps:$4 sm:$0xff]  }
 0x229   : > { %13755 = vmatpush3.bf16.msra.mxu1 %v14992_v9  ;;  %v15044_v9 = vld [vmem:[%s18591_s3 + $0xe00] ss:$12 sps:$4 sm:$0xff]  }
 0x22a   : > { %13756 = vmatprep.subr.bf16.mxu1 %v14996_v17  ;;  %v15048_v17 = vld [vmem:[%s18591_s3 + $0xed8] ss:$12 sps:$4 sm:$0xff]  }
 0x22b   : > { %6487 = vmatpush1.bf16.msra.mxu0 %v14904_v2  ;;  %v15029_v2 = vld [vmem:[%s18591_s3 + $0xdb8] ss:$12 sps:$4 sm:$0xff]  }
 0x22c   : > { %6488 = vmatprep.subr.bf16.mxu0 %v14911_v24  ;;  %v15033_v24 = vld [vmem:[%s18591_s3 + $0xe90] ss:$12 sps:$4 sm:$0xff]  }
 0x22d   : > { %13757 = vmatpush3.bf16.msra.mxu1 %v14997_v22  ;;  %v15049_v22 = vld [vmem:[%s18591_s3 + $0xe18] ss:$12 sps:$4 sm:$0xff]  }
 0x22e   : > { %13758 = vmatprep.subr.bf16.mxu1 %v15001_v23  ;;  %v15053_v23 = vld [vmem:[%s18591_s3 + $0xef0] ss:$12 sps:$4 sm:$0xff]  }
 0x22f   : > { %6489 = vmatpush1.bf16.msra.mxu0 %v14909_v5  ;;  %v14961_v5 = vld [vmem:[%s18591_s3 + $0x7c8] ss:$12 sps:$4 sm:$0xff]  }
 0x230   : > { %6490 = vmatprep.subr.bf16.mxu0 %v14916_v6  ;;  %v14968_v6 = vld [vmem:[%s18591_s3 + $0x7e4] ss:$12 sps:$4 sm:$0xff]  }
 0x231   : > { %13759 = vmatpush3.bf16.msra.mxu1 %v15002_v58  ;;  %v15054_v58 = vld [vmem:[%s18591_s3 + $0xe30] ss:$12 sps:$4 sm:$0xff]  }
 0x232   : > { %13760 = vmatprep.subr.bf16.mxu1 %v15006_v55  ;;  %v15060_v55 = vld [vmem:[%s18591_s3 + $0xfc8] ss:$12 sps:$4 sm:$0xff]  }
 0x233   : > { %6491 = vmatpush1.bf16.msra.mxu0 %v14914_v12  ;;  %v14966_v12 = vld [vmem:[%s18591_s3 + $0x7e0] ss:$12 sps:$4 sm:$0xff]  }
 0x234   : > { %6492 = vmatprep.subr.bf16.mxu0 %v14921_v13  ;;  %v14973_v13 = vld [vmem:[%s18591_s3 + $0x7fc] ss:$12 sps:$4 sm:$0xff]  }
 0x235   : > { %13761 = vmatpush3.bf16.msra.mxu1 %v15007_v35  ;;  %v14990_v35 = vld [vmem:[%s18591_s3 + $0x844] ss:$12 sps:$4 sm:$0xff]  }
 0x236   : > { %13762 = vmatprep.subr.bf16.mxu1 %v15011_v37  ;;  %v16963_v37 = vcombine.low %v16910_v42, %v16910_v42  ;;  %v15066_v42 = vld [vmem:[%s18591_s3 + $0xf20] ss:$12 sps:$4 sm:$0xff]  }
 0x237   : > { %6493 = vmatpush1.bf16.msra.mxu0 %v14919_v18  ;;  %v14971_v18 = vld [vmem:[%s18591_s3 + $0x7f8] ss:$12 sps:$4 sm:$0xff]  }
 0x238   : > { %6494 = vmatprep.subr.bf16.mxu0 %v14926_v20  ;;  %v14980_v20 = vld [vmem:[%s18591_s3 + $0x814] ss:$12 sps:$4 sm:$0xff]  }
 0x239   : > { %13763 = vmatpush3.bf16.msra.mxu1 %v15012_v40  ;;  %v15065_v40 = vld [vmem:[%s18591_s3 + $0xfe0] ss:$12 sps:$4 sm:$0xff]  }
 0x23a   : > { %13770 = vmatprep.subr.bf16.mxu1 %v15018_v41  ;;  %v14988_v41 = vld [vmem:[%s18591_s3 + $0x840] ss:$12 sps:$4 sm:$0xff]  }
 0x23b   : > { %6495 = vmatpush1.bf16.msra.mxu0 %v14924_v43  ;;  %v14978_v43 = vld [vmem:[%s18591_s3 + $0x810] ss:$12 sps:$4 sm:$0xff]  }
 0x23c   : > { %6496 = vmatprep.subr.bf16.mxu0 %v14931_v27  ;;  %7151 = vmatmul.mubr.bf16.vlgmr.msra.gmra.mrb[40].mxu1 %v16916_v47  ;;  %v14985_v27 = vld [vmem:[%s18591_s3 + $0x82c] ss:$12 sps:$4 sm:$0xff]  }
 0x23d   : > { %13771 = vmatpush3.bf16.msra.mxu1 %v15019_v48  ;;  %7190 = vmatprep.mubr.bf16.mxu1 %v16921_v1  ;;  %v14993_v48 = vld [vmem:[%s18591_s3 + $0x858] ss:$12 sps:$4 sm:$0xff]  }
 0x23e   : > { %13772 = vmatprep.subr.bf16.mxu1 %v15023_v51  ;;  %v15000_v51 = vld [vmem:[%s18591_s3 + $0x874] ss:$12 sps:$4 sm:$0xff]  }
 0x23f   : > { %6497 = vmatpush1.bf16.msra.mxu0 %v14929_v30  ;;  %v16957_v30 = vld [vmem:[%s16479_s15 + $0x50] sm:$0xff] }
 0x240   : > { %6498 = vmatprep.subr.bf16.mxu0 %v14938_v33  ;;  %v14983_v33 = vld [vmem:[%s18591_s3 + $0x828] ss:$12 sps:$4 sm:$0xff]  }
 0x241   : > { %13773 = vmatpush3.bf16.msra.mxu1 %v15024_v54  ;;  %v14998_v54 = vld [vmem:[%s18591_s3 + $0x870] ss:$12 sps:$4 sm:$0xff]  }
 0x242   : > { %13774 = vmatprep.subr.bf16.mxu1 %v15028_v59  ;;  %v15005_v59 = vld [vmem:[%s18591_s3 + $0x88c] ss:$12 sps:$4 sm:$0xff]  }
 0x243   : > { %6499 = vmatpush1.bf16.msra.mxu0 %v14936_v38  ;;  %v15061_v38 = vld [vmem:[%s18591_s3 + $0xf08] ss:$12 sps:$4 sm:$0xff]  }
 0x244   : > { %6500 = vmatprep.subr.bf16.mxu0 %v14943_v39  ;;  %v16968_v39 = vcombine.high %v16957_v30, %v16957_v30 }
 0x245   : > { %13775 = vmatpush3.bf16.msra.mxu1 %v15029_v2  ;;  %v15003_v2 = vld [vmem:[%s18591_s3 + $0x888] ss:$12 sps:$4 sm:$0xff]  }
 0x246   : > { %13776 = vmatprep.subr.bf16.mxu1 %v15033_v24  ;;  %v15010_v24 = vld [vmem:[%s18591_s3 + $0x8a4] ss:$12 sps:$4 sm:$0xff]  }
 0x247   : > { %6501 = vmatpush1.bf16.msra.mxu0 %v14941_v45  ;;  %v14995_v45 = vld [vmem:[%s18591_s3 + $0x85c] ss:$12 sps:$4 sm:$0xff]  }
 0x248   : > { %6511 = vmatprep.subr.bf16.mxu0 %v14948_v46  ;;  %v15070_v46 = vld [vmem:[%s18591_s3 + $0xff8] ss:$12 sps:$4 sm:$0xff]  }
 0x249   : > { %13777 = vmatpush3.bf16.msra.mxu1 %v15034_v4  ;;  %v15008_v4 = vld [vmem:[%s18591_s3 + $0x8a0] ss:$12 sps:$4 sm:$0xff]  }
 0x24a   : > { %6503 = vmatmul.mubr.bf16.vlgmr.msra.gmra.mrb[20].mxu0 %v16697_v44  ;;  %v14956_v44 = vld [vmem:[%s18591_s3 + $0x7b0] ss:$12 sps:$4 sm:$0xff]  }
 0x24b   : > { %6512 = vmatpush1.bf16.msra.mxu0 %v14946_v52  ;;  %6543 = vmatprep.mubr.bf16.mxu0 %v16717_v60  ;;  %v15038_v60 = vld [vmem:[%s18591_s3 + $0xea8] ss:$12 sps:$4 sm:$0xff]   ;;  %v15071_v52 = vld [vmem:[%s18591_s3 + $0xf38] ss:$12 sps:$4 sm:$0xff]  }
 0x24c   : > { %6513 = vmatprep.subr.bf16.mxu0 %v14953_v57  ;;  %13778 = vmatprep.subr.bf16.mxu1 %v15038_v60  ;;  %v15075_v57 = vld [vmem:[%s18591_s3 + $0x1010] ss:$12 sps:$4 sm:$0xff]  }
 0x24d   : > { %13779 = vmatpush3.bf16.msra.mxu1 %v15039_v25  ;;  %v15015_v60 = vld [vmem:[%s18591_s3 + $0x8bc] ss:$12 sps:$4 sm:$0xff]   ;;  %v15013_v25 = vld [vmem:[%s18591_s3 + $0x8b8] ss:$12 sps:$4 sm:$0xff]  }
 0x24e   : > { %13780 = vmatprep.subr.bf16.mxu1 %v15043_v11  ;;  %v15022_v11 = vld [vmem:[%s18591_s3 + $0x8d4] ss:$12 sps:$4 sm:$0xff]  }
 0x24f   : > { %6514 = vmatpush1.bf16.msra.mxu0 %v14951_v63  ;;  %v15076_v63 = vld [vmem:[%s18591_s3 + $0xf50] ss:$12 sps:$4 sm:$0xff]  }
 0x250   : > { %6515 = vmatprep.subr.bf16.mxu0 %v14958_v8  ;;  %v15080_v8 = vld [vmem:[%s18591_s3 + $0x1028] ss:$12 sps:$4 sm:$0xff]  }
 0x251   : > { %13781 = vmatpush3.bf16.msra.mxu1 %v15044_v9  ;;  %v15020_v9 = vld [vmem:[%s18591_s3 + $0x8d0] ss:$12 sps:$4 sm:$0xff]  }
 0x252   : > { %13782 = vmatprep.subr.bf16.mxu1 %v15048_v17  ;;  %v15027_v17 = vld [vmem:[%s18591_s3 + $0x8ec] ss:$12 sps:$4 sm:$0xff]  }
 0x253   : > { %6516 = vmatpush1.bf16.msra.mxu0 %v14956_v44  ;;  %v15081_v44 = vld [vmem:[%s18591_s3 + $0xf68] ss:$12 sps:$4 sm:$0xff]  }
 0x254   : > { %6517 = vmatprep.subr.bf16.mxu0 %v14963_v3  ;;  %v15085_v3 = vld [vmem:[%s18591_s3 + $0x1040] ss:$12 sps:$4 sm:$0xff]  }
 0x255   : > { %13783 = vmatpush3.bf16.msra.mxu1 %v15049_v22  ;;  %v17002_v22 = vld [vmem:[%s16479_s15 + $0x58] sm:$0xff]  ;;  %s18615_s15 = sld [smem:[#allocation19_spill]] }
 0x256   : > { %13784 = vmatprep.subr.bf16.mxu1 %v15053_v23  ;;  %v15025_v23 = vld [vmem:[%s18591_s3 + $0x8e8] ss:$12 sps:$4 sm:$0xff]  }
 0x257   : > { %6518 = vmatpush1.bf16.msra.mxu0 %v14961_v5  ;;  %v15086_v5 = vld [vmem:[%s18591_s3 + $0xf80] ss:$12 sps:$4 sm:$0xff]  }
 0x258   : > { %6519 = vmatprep.subr.bf16.mxu0 %v14968_v6  ;;  %v15090_v6 = vld [vmem:[%s18591_s3 + $0x1058] ss:$12 sps:$4 sm:$0xff]  }
 0x259   : > { %13785 = vmatpush3.bf16.msra.mxu1 %v15054_v58  ;;  %v17009_v58 = vcombine.low %v16957_v30, %v16957_v30  ;;  %v15112_v30 = vld [vmem:[%s18591_s3 + $0x1178] ss:$12 sps:$4 sm:$0xff]  }
 0x25a   : > { %13792 = vmatprep.subr.bf16.mxu1 %v15060_v55  ;;  %v15107_v55 = vld [vmem:[%s18591_s3 + $0x1160] ss:$12 sps:$4 sm:$0xff]  }
 0x25b   : > { %6520 = vmatpush1.bf16.msra.mxu0 %v14966_v12  ;;  %v15091_v12 = vld [vmem:[%s18591_s3 + $0xf98] ss:$12 sps:$4 sm:$0xff]  }
 0x25c   : > { %6521 = vmatprep.subr.bf16.mxu0 %v14973_v13  ;;  %7191 = vmatmul.mubr.bf16.vlgmr.msra.gmra.mrb[44].mxu1 %v16963_v37  ;;  %v15095_v13 = vld [vmem:[%s18591_s3 + $0x1070] ss:$12 sps:$4 sm:$0xff]  }
 0x25d   : > { %13793 = vmatpush3.bf16.msra.mxu1 %v15061_v38  ;;  %7230 = vmatprep.mubr.bf16.mxu1 %v16968_v39  ;;  %v15037_v38 = vld [vmem:[%s18591_s3 + $0x91c] ss:$12 sps:$4 sm:$0xff]  }
 0x25e   : > { %13794 = vmatprep.subr.bf16.mxu1 %v15065_v40  ;;  %v15108_v40 = vld [vmem:[%s18591_s3 + $0x10a0] ss:$12 sps:$4 sm:$0xff]  }
 0x25f   : > { %6522 = vmatpush1.bf16.msra.mxu0 %v14971_v18  ;;  %v15096_v18 = vld [vmem:[%s18591_s3 + $0xfb0] ss:$12 sps:$4 sm:$0xff]  }
 0x260   : > { %6523 = vmatprep.subr.bf16.mxu0 %v14980_v20  ;;  %v15102_v20 = vld [vmem:[%s18591_s3 + $0x1148] ss:$12 sps:$4 sm:$0xff]  }
 0x261   : > { %13795 = vmatpush3.bf16.msra.mxu1 %v15066_v42  ;;  %v15113_v42 = vld [vmem:[%s18591_s3 + $0x10b8] ss:$12 sps:$4 sm:$0xff]  }
 0x262   : > { %13796 = vmatprep.subr.bf16.mxu1 %v15070_v46  ;;  %v15117_v46 = vld [vmem:[%s18591_s3 + $0x1190] ss:$12 sps:$4 sm:$0xff]  }
 0x263   : > { %6524 = vmatpush1.bf16.msra.mxu0 %v14978_v43  ;;  %v15032_v43 = vld [vmem:[%s18591_s3 + $0x904] ss:$12 sps:$4 sm:$0xff]  }
 0x264   : > { %6525 = vmatprep.subr.bf16.mxu0 %v14985_v27  ;;  %v15103_v27 = vld [vmem:[%s18591_s3 + $0x1088] ss:$12 sps:$4 sm:$0xff]  }
 0x265   : > { %13797 = vmatpush3.bf16.msra.mxu1 %v15071_v52  ;;  %v15122_v52 = vld [vmem:[%s18591_s3 + $0x11a8] ss:$12 sps:$4 sm:$0xff]  }
 0x266   : > { %13798 = vmatprep.subr.bf16.mxu1 %v15075_v57  ;;  %v15045_v57 = vld [vmem:[%s18591_s3 + $0x948] ss:$12 sps:$4 sm:$0xff]  }
 0x267   : > { %6526 = vmatpush1.bf16.msra.mxu0 %v14983_v33  ;;  %v15030_v33 = vld [vmem:[%s18591_s3 + $0x900] ss:$12 sps:$4 sm:$0xff]  }
 0x268   : > { %6527 = vmatprep.subr.bf16.mxu0 %v14990_v35  ;;  %v17015_v35 = vcombine.high %v17002_v22, %v17002_v22 }
 0x269   : > { %13799 = vmatpush3.bf16.msra.mxu1 %v15076_v63  ;;  %v15050_v63 = vld [vmem:[%s18591_s3 + $0x960] ss:$12 sps:$4 sm:$0xff]  }
 0x26a   : > { %13800 = vmatprep.subr.bf16.mxu1 %v15080_v8  ;;  %v15057_v8 = vld [vmem:[%s18591_s3 + $0x97c] ss:$12 sps:$4 sm:$0xff]  }
 0x26b   : > { %6528 = vmatpush1.bf16.msra.mxu0 %v14988_v41  ;;  %v15035_v41 = vld [vmem:[%s18591_s3 + $0x918] ss:$12 sps:$4 sm:$0xff]  }
 0x26c   : > { %6529 = vmatprep.subr.bf16.mxu0 %v14995_v45  ;;  %v15042_v45 = vld [vmem:[%s18591_s3 + $0x934] ss:$12 sps:$4 sm:$0xff]  }
 0x26d   : > { %13801 = vmatpush3.bf16.msra.mxu1 %v15081_v44  ;;  %v15055_v44 = vld [vmem:[%s18591_s3 + $0x978] ss:$12 sps:$4 sm:$0xff]  }
 0x26e   : > { %13802 = vmatprep.subr.bf16.mxu1 %v15085_v3  ;;  %v15064_v3 = vld [vmem:[%s18591_s3 + $0x994] ss:$12 sps:$4 sm:$0xff]  }
 0x26f   : > { %6530 = vmatpush1.bf16.msra.mxu0 %v14993_v48  ;;  %v15040_v48 = vld [vmem:[%s18591_s3 + $0x930] ss:$12 sps:$4 sm:$0xff]  }
 0x270   : > { %6531 = vmatprep.subr.bf16.mxu0 %v15000_v51  ;;  %v15047_v51 = vld [vmem:[%s18591_s3 + $0x94c] ss:$12 sps:$4 sm:$0xff]  }
 0x271   : > { %13803 = vmatpush3.bf16.msra.mxu1 %v15086_v5  ;;  %v15062_v5 = vld [vmem:[%s18591_s3 + $0x990] ss:$12 sps:$4 sm:$0xff]  }
 0x272   : > { %13804 = vmatprep.subr.bf16.mxu1 %v15090_v6  ;;  %v15069_v6 = vld [vmem:[%s18591_s3 + $0x9ac] ss:$12 sps:$4 sm:$0xff]  }
 0x273   : > { %6532 = vmatpush1.bf16.msra.mxu0 %v14998_v54  ;;  %v15123_v54 = vld [vmem:[%s18591_s3 + $0x10e8] ss:$12 sps:$4 sm:$0xff]  }
 0x274   : > { %6533 = vmatprep.subr.bf16.mxu0 %v15005_v59  ;;  %v15127_v59 = vld [vmem:[%s18591_s3 + $0x11c0] ss:$12 sps:$4 sm:$0xff]  }
 0x275   : > { %13805 = vmatpush3.bf16.msra.mxu1 %v15091_v12  ;;  %v15074_v12 = vld [vmem:[%s18591_s3 + $0x9c4] ss:$12 sps:$4 sm:$0xff]  }
 0x276   : > { %13806 = vmatprep.subr.bf16.mxu1 %v15095_v13  ;;  %v17051_v13 = vcombine.low %v17002_v22, %v17002_v22  ;;  %v15082_v22 = vld [vmem:[%s18591_s3 + $0x9f0] ss:$12 sps:$4 sm:$0xff]  }
 0x277   : > { %6534 = vmatpush1.bf16.msra.mxu0 %v15003_v2  ;;  %v15128_v2 = vld [vmem:[%s18591_s3 + $0x1100] ss:$12 sps:$4 sm:$0xff]  }
 0x278   : > { %6535 = vmatprep.subr.bf16.mxu0 %v15010_v24  ;;  %v15132_v24 = vld [vmem:[%s18591_s3 + $0x11d8] ss:$12 sps:$4 sm:$0xff]  }
 0x279   : > { %13807 = vmatpush3.bf16.msra.mxu1 %v15096_v18  ;;  %v15077_v18 = vld [vmem:[%s18591_s3 + $0x9d8] ss:$12 sps:$4 sm:$0xff]  }
 0x27a   : > { %13814 = vmatprep.subr.bf16.mxu1 %v15102_v20  ;;  %v15084_v20 = vld [vmem:[%s18591_s3 + $0x9f4] ss:$12 sps:$4 sm:$0xff]  }
 0x27b   : > { %6536 = vmatpush1.bf16.msra.mxu0 %v15008_v4  ;;  %v15133_v4 = vld [vmem:[%s18591_s3 + $0x1118] ss:$12 sps:$4 sm:$0xff]  }
 0x27c   : > { %6537 = vmatprep.subr.bf16.mxu0 %v15015_v60  ;;  %7231 = vmatmul.mubr.bf16.vlgmr.msra.gmra.mrb[48].mxu1 %v17009_v58  ;;  %v15137_v60 = vld [vmem:[%s18591_s3 + $0x11f0] ss:$12 sps:$4 sm:$0xff]  }
 0x27d   : > { %13815 = vmatpush3.bf16.msra.mxu1 %v15103_v27  ;;  %7270 = vmatprep.mubr.bf16.mxu1 %v17015_v35  ;;  %v15094_v27 = vld [vmem:[%s18591_s3 + $0xa24] ss:$12 sps:$4 sm:$0xff]  }
 0x27e   : > { %13816 = vmatprep.subr.bf16.mxu1 %v15107_v55  ;;  %v15092_v55 = vld [vmem:[%s18591_s3 + $0xa20] ss:$12 sps:$4 sm:$0xff]  }
 0x27f   : > { %6538 = vmatpush1.bf16.msra.mxu0 %v15013_v25  ;;  %v15138_v25 = vld [vmem:[%s18591_s3 + $0x1130] ss:$12 sps:$4 sm:$0xff]  }
 0x280   : > { %6539 = vmatprep.subr.bf16.mxu0 %v15022_v11  ;;  %v15067_v11 = vld [vmem:[%s18591_s3 + $0x9a8] ss:$12 sps:$4 sm:$0xff]  }
 0x281   : > { %13817 = vmatpush3.bf16.msra.mxu1 %v15108_v40  ;;  %v15106_v40 = vld [vmem:[%s18591_s3 + $0xa54] ss:$12 sps:$4 sm:$0xff]  }
 0x282   : > { %13818 = vmatprep.subr.bf16.mxu1 %v15112_v30  ;;  %v15104_v30 = vld [vmem:[%s18591_s3 + $0xa50] ss:$12 sps:$4 sm:$0xff]  }
 0x283   : > { %6540 = vmatpush1.bf16.msra.mxu0 %v15020_v9  ;;  %v15072_v9 = vld [vmem:[%s18591_s3 + $0x9c0] ss:$12 sps:$4 sm:$0xff]  }
 0x284   : > { %6541 = vmatprep.subr.bf16.mxu0 %v15027_v17  ;;  %v15079_v17 = vld [vmem:[%s18591_s3 + $0x9dc] ss:$12 sps:$4 sm:$0xff]  }
 0x285   : > { %13819 = vmatpush3.bf16.msra.mxu1 %v15113_v42  ;;  %v15116_v42 = vld [vmem:[%s18591_s3 + $0xa84] ss:$12 sps:$4 sm:$0xff]  }
 0x286   : > { %13820 = vmatprep.subr.bf16.mxu1 %v15117_v46  ;;  %v15114_v46 = vld [vmem:[%s18591_s3 + $0xa80] ss:$12 sps:$4 sm:$0xff]  }
 0x287   : > { %6542 = vmatpush1.bf16.msra.mxu0 %v15025_v23  ;;  %v15089_v23 = vld [vmem:[%s18591_s3 + $0xa0c] ss:$12 sps:$4 sm:$0xff]  }
 0x288   : > { %6552 = vmatprep.subr.bf16.mxu0 %v15032_v43  ;;  %v15087_v43 = vld [vmem:[%s18591_s3 + $0xa08] ss:$12 sps:$4 sm:$0xff]  }
 0x28a   : > { %6544 = vmatmul.mubr.bf16.vlgmr.msra.gmra.mrb[20].mxu0 %v16773_v14  ;;  %v15118_v14 = vld [vmem:[%s18591_s3 + $0x10d0] ss:$12 sps:$4 sm:$0xff]  }
 0x28b   : > { %6553 = vmatpush1.bf16.msra.mxu0 %v15030_v33  ;;  %6584 = vmatprep.mubr.bf16.mxu0 %v16778_v21  ;;  %v15052_v21 = vld [vmem:[%s18591_s3 + $0x964] ss:$12 sps:$4 sm:$0xff]   ;;  %v15099_v33 = vld [vmem:[%s18591_s3 + $0xa3c] ss:$12 sps:$4 sm:$0xff]  }
 0x28c   : > { %6554 = vmatprep.subr.bf16.mxu0 %v15037_v38  ;;  %13821 = vmatpush3.bf16.msra.mxu1 %v15118_v14  ;;  %v15097_v38 = vld [vmem:[%s18591_s3 + $0xa38] ss:$12 sps:$4 sm:$0xff]   ;;  %v15126_v14 = vld [vmem:[%s18591_s3 + $0xab4] ss:$12 sps:$4 sm:$0xff]  }
 0x28d   : > { %13822 = vmatprep.subr.bf16.mxu1 %v15122_v52  ;;  %v15124_v52 = vld [vmem:[%s18591_s3 + $0xab0] ss:$12 sps:$4 sm:$0xff]  }
 0x28f   : > { %6555 = vmatpush1.bf16.msra.mxu0 %v15035_v41  ;;  %v15111_v41 = vld [vmem:[%s18591_s3 + $0xa6c] ss:$12 sps:$4 sm:$0xff]  }
 0x290   : > { %6556 = vmatprep.subr.bf16.mxu0 %v15042_v45  ;;  %13823 = vmatpush3.bf16.msra.mxu1 %v15123_v54  ;;  %v15109_v45 = vld [vmem:[%s18591_s3 + $0xa68] ss:$12 sps:$4 sm:$0xff]   ;;  %v15136_v54 = vld [vmem:[%s18591_s3 + $0xae4] ss:$12 sps:$4 sm:$0xff]  }
 0x291   : > { %13824 = vmatprep.subr.bf16.mxu1 %v15127_v59  ;;  %v15141_v59 = vld [vmem:[%s18591_s3 + $0xafc] ss:$12 sps:$4 sm:$0xff]  }
 0x293   : > { %6557 = vmatpush1.bf16.msra.mxu0 %v15040_v48  ;;  %v15121_v48 = vld [vmem:[%s18591_s3 + $0xa9c] ss:$12 sps:$4 sm:$0xff]  }
 0x294   : > { %6558 = vmatprep.subr.bf16.mxu0 %v15047_v51  ;;  %13825 = vmatpush3.bf16.msra.mxu1 %v15128_v2  ;;  %v15119_v51 = vld [vmem:[%s18591_s3 + $0xa98] ss:$12 sps:$4 sm:$0xff]  }
 0x295   : > { %13826 = vmatprep.subr.bf16.mxu1 %v15132_v24  ;;  %v15149_v2 = vld [vmem:[%s18591_s3 + $0xb2c] ss:$12 sps:$4 sm:$0xff]   ;;  %v15147_v24 = vld [vmem:[%s18591_s3 + $0xb28] ss:$12 sps:$4 sm:$0xff]  }
 0x297   : > { %6559 = vmatpush1.bf16.msra.mxu0 %v15045_v57  ;;  %v15131_v57 = vld [vmem:[%s18591_s3 + $0xacc] ss:$12 sps:$4 sm:$0xff]  }
 0x298   : > { %6560 = vmatprep.subr.bf16.mxu0 %v15052_v21  ;;  %13827 = vmatpush3.bf16.msra.mxu1 %v15133_v4  ;;  %v15129_v21 = vld [vmem:[%s18591_s3 + $0xac8] ss:$12 sps:$4 sm:$0xff]  }
 0x299   : > { %13828 = vmatprep.subr.bf16.mxu1 %v15137_v60  ;;  %v15155_v4 = vld [vmem:[%s18591_s3 + $0xb5c] ss:$12 sps:$4 sm:$0xff]   ;;  %v15153_v60 = vld [vmem:[%s18591_s3 + $0xb58] ss:$12 sps:$4 sm:$0xff]  }
 0x29b   : > { %6561 = vmatpush1.bf16.msra.mxu0 %v15050_v63  ;;  %v15146_v63 = vld [vmem:[%s18591_s3 + $0xb14] ss:$12 sps:$4 sm:$0xff]  }
 0x29c   : > { %6562 = vmatprep.subr.bf16.mxu0 %v15057_v8  ;;  %13829 = vmatpush3.bf16.msra.mxu1 %v15138_v25  ;;  %v15144_v8 = vld [vmem:[%s18591_s3 + $0xb10] ss:$12 sps:$4 sm:$0xff]   ;;  %v15161_v25 = vld [vmem:[%s18591_s3 + $0xb8c] ss:$12 sps:$4 sm:$0xff]  }
 0x29f   : > { %6563 = vmatpush1.bf16.msra.mxu0 %v15055_v44  ;;  %7271 = vmatmul.mubr.bf16.vlgmr.msra.gmra.mrb[52].mxu1 %v17051_v13  ;;  %v15152_v44 = vld [vmem:[%s18591_s3 + $0xb44] ss:$12 sps:$4 sm:$0xff]  }
 0x2a0   : > { %6564 = vmatprep.subr.bf16.mxu0 %v15064_v3  ;;  %v15150_v3 = vld [vmem:[%s18591_s3 + $0xb40] ss:$12 sps:$4 sm:$0xff]  }
 0x2a3   : > { %6565 = vmatpush1.bf16.msra.mxu0 %v15062_v5  ;;  %v15158_v5 = vld [vmem:[%s18591_s3 + $0xb74] ss:$12 sps:$4 sm:$0xff]  }
 0x2a4   : > { %6566 = vmatprep.subr.bf16.mxu0 %v15069_v6  ;;  %v15156_v6 = vld [vmem:[%s18591_s3 + $0xb70] ss:$12 sps:$4 sm:$0xff]  }
 0x2a7   : > { %6567 = vmatpush1.bf16.msra.mxu0 %v15067_v11  ;;  %v15159_v11 = vld [vmem:[%s18591_s3 + $0xb88] ss:$12 sps:$4 sm:$0xff]  }
 0x2a8   : > { %6568 = vmatprep.subr.bf16.mxu0 %v15074_v12  ;;  %v15164_v12 = vld [vmem:[%s18591_s3 + $0xba4] ss:$12 sps:$4 sm:$0xff]  }
 0x2ab   : > { %6569 = vmatpush1.bf16.msra.mxu0 %v15072_v9  ;;  %v15162_v9 = vld [vmem:[%s18591_s3 + $0xba0] ss:$12 sps:$4 sm:$0xff]  }
 0x2ac   : > { %6570 = vmatprep.subr.bf16.mxu0 %v15079_v17  ;;  %v15167_v17 = vld [vmem:[%s18591_s3 + $0xbbc] ss:$12 sps:$4 sm:$0xff]  }
 0x2af   : > { %6571 = vmatpush1.bf16.msra.mxu0 %v15077_v18  ;;  %v15165_v18 = vld [vmem:[%s18591_s3 + $0xbb8] ss:$12 sps:$4 sm:$0xff]  }
 0x2b0   : > { %6572 = vmatprep.subr.bf16.mxu0 %v15084_v20  ;;  %v15170_v20 = vld [vmem:[%s18591_s3 + $0xbd4] ss:$12 sps:$4 sm:$0xff]  }
 0x2b3   : > { %6573 = vmatpush1.bf16.msra.mxu0 %v15082_v22  ;;  %v15168_v22 = vld [vmem:[%s18591_s3 + $0xbd0] ss:$12 sps:$4 sm:$0xff]  }
 0x2b4   : > { %6574 = vmatprep.subr.bf16.mxu0 %v15089_v23  ;;  %v15173_v23 = vld [vmem:[%s18591_s3 + $0xbec] ss:$12 sps:$4 sm:$0xff]  }
 0x2b7   : > { %6575 = vmatpush1.bf16.msra.mxu0 %v15087_v43  ;;  %v15171_v43 = vld [vmem:[%s18591_s3 + $0xbe8] ss:$12 sps:$4 sm:$0xff]  }
 0x2b8   : > { %6576 = vmatprep.subr.bf16.mxu0 %v15094_v27  ;;  %v15176_v27 = vld [vmem:[%s18591_s3 + $0xc04] ss:$12 sps:$4 sm:$0xff]  }
 0x2bb   : > { %6577 = vmatpush1.bf16.msra.mxu0 %v15092_v55  ;;  %v13588_v55 = vpop.f32.mrb[8].mxu1 }
 0x2bc   : > { %6578 = vmatprep.subr.bf16.mxu0 %v15099_v33  ;;  %v15174_v33 = vld [vmem:[%s18591_s3 + $0xc00] ss:$12 sps:$4 sm:$0xff]  }
 0x2bf   : > { %6579 = vmatpush1.bf16.msra.mxu0 %v15097_v38  ;;  %v15179_v38 = vld [vmem:[%s18591_s3 + $0xc1c] ss:$12 sps:$4 sm:$0xff]  }
 0x2c0   : > { %6580 = vmatprep.subr.bf16.mxu0 %v15106_v40  ;;  %v3135_v40 = vlaneseq }
 0x2c3   : > { %6581 = vmatpush1.bf16.msra.mxu0 %v15104_v30  ;;  %v13589_v30 = vpop.f32.mrb[9].mxu1 }
 0x2c4   : > { %6582 = vmatprep.subr.bf16.mxu0 %v15111_v41  ;;  %v3133_v41 = vld [vmem:[%s18589_s8] sm:$0x7] }
 0x2c7   : > { %6583 = vmatpush1.bf16.msra.mxu0 %v15109_v45  ;;  %v13590_v45 = vadd.f32 %v13589_v30, %v13588_v55  ;;  %v15189_v30 = vld [vmem:[%s18591_s3 + $0xc78] ss:$12 sps:$4 sm:$0xff]  }
 0x2c8   : > { %6593 = vmatprep.subr.bf16.mxu0 %v15116_v42  ;;  %v13591_v42 = vpop.f32.mrb[10].mxu1 }
 0x2ca   : > { %6585 = vmatmul.mubr.bf16.vlgmr.msra.gmra.mrb[20].mxu0 %v16824_v7  ;;  %v15134_v7 = vld [vmem:[%s18591_s3 + $0xae0] ss:$12 sps:$4 sm:$0xff]  }
 0x2cb   : > { %6594 = vmatpush1.bf16.msra.mxu0 %v15114_v46  ;;  %6625 = vmatprep.mubr.bf16.mxu0 %v16829_v10  ;;  %v15139_v10 = vld [vmem:[%s18591_s3 + $0xaf8] ss:$12 sps:$4 sm:$0xff]   ;;  %v17107_v46 = vshrl.u32 %v3135_v40, 7 }
 0x2cc   : > { %6595 = vmatprep.subr.bf16.mxu0 %v15121_v48  ;;  %v13592_v48 = vpop.f32.mrb[11].mxu1 }
 0x2cf   : > { %6596 = vmatpush1.bf16.msra.mxu0 %v15119_v51  ;;  %v13610_v51 = vpop.f32.mrb[12].mxu1 }
 0x2d0   : > { %6597 = vmatprep.subr.bf16.mxu0 %v15126_v14  ;;  %v15177_v14 = vld [vmem:[%s18591_s3 + $0xc18] ss:$12 sps:$4 sm:$0xff]  }
 0x2d3   : > { %6598 = vmatpush1.bf16.msra.mxu0 %v15124_v52  ;;  %v17113_v52 = vsub.s32 2, %v17107_v46 }
 0x2d4   : > { %6599 = vmatprep.subr.bf16.mxu0 %v15131_v57  ;;  %v13611_v57 = vpop.f32.mrb[13].mxu1 }
 0x2d7   : > { %6600 = vmatpush1.bf16.msra.mxu0 %v15129_v21  ;;  %v15182_v21 = vld [vmem:[%s18591_s3 + $0xc34] ss:$12 sps:$4 sm:$0xff]  }
 0x2d8   : > { %6601 = vmatprep.subr.bf16.mxu0 %v15136_v54  ;;  %v13612_v54 = vadd.f32 %v13611_v57, %v13610_v51 }
 0x2db   : > { %6602 = vmatpush1.bf16.msra.mxu0 %v15134_v7  ;;  %v13613_v7 = vpop.f32.mrb[14].mxu1 }
 0x2dc   : > { %6603 = vmatprep.subr.bf16.mxu0 %v15141_v59  ;;  %v3146_v59 = vrot.slane %v3133_v41, %v17113_v52  ;;  %v15194_v41 = vld [vmem:[%s18591_s3 + $0xc94] ss:$12 sps:$4 sm:$0xff]  }
 0x2df   : > { %6604 = vmatpush1.bf16.msra.mxu0 %v15139_v10  ;;  %v13614_v10 = vpop.f32.mrb[15].mxu1 }
 0x2e0   : > { %6605 = vmatprep.subr.bf16.mxu0 %v15146_v63  ;;  %v15180_v63 = vld [vmem:[%s18591_s3 + $0xc30] ss:$12 sps:$4 sm:$0xff]  }
 0x2e3   : > { %6606 = vmatpush1.bf16.msra.mxu0 %v15144_v8  ;;  %v15185_v8 = vld [vmem:[%s18591_s3 + $0xc4c] ss:$12 sps:$4 sm:$0xff]  }
 0x2e4   : > { %6607 = vmatprep.subr.bf16.mxu0 %v15149_v2  ;;  %v6833_v2 = vadd.f32 %v13590_v45, %v3146_v59 }
 0x2e7   : > { %6608 = vmatpush1.bf16.msra.mxu0 %v15147_v24 }
 0x2e8   : > { %6609 = vmatprep.subr.bf16.mxu0 %v15152_v44 }
 0x2eb   : > { %6610 = vmatpush1.bf16.msra.mxu0 %v15150_v3  ;;  %v6873_v3 = vadd.f32 %v13612_v54, %v6833_v2  ;;  %v15197_v54 = vld [vmem:[%s18591_s3 + $0xcac] ss:$12 sps:$4 sm:$0xff]   ;;  %v15195_v2 = vld [vmem:[%s18591_s3 + $0xca8] ss:$12 sps:$4 sm:$0xff]  }
 0x2ec   : > { %6611 = vmatprep.subr.bf16.mxu0 %v15155_v4 }
 0x2ef   : > { %6612 = vmatpush1.bf16.msra.mxu0 %v15153_v60 }
 0x2f0   : > { %6613 = vmatprep.subr.bf16.mxu0 %v15158_v5  ;;  %v15183_v5 = vld [vmem:[%s18591_s3 + $0xc48] ss:$12 sps:$4 sm:$0xff]  }
 0x2f3   : > { %6614 = vmatpush1.bf16.msra.mxu0 %v15156_v6  ;;  %v15188_v6 = vld [vmem:[%s18591_s3 + $0xc64] ss:$12 sps:$4 sm:$0xff]  }
 0x2f4   : > { %6615 = vmatprep.subr.bf16.mxu0 %v15161_v25 }
 0x2f7   : > { %6616 = vmatpush1.bf16.msra.mxu0 %v15159_v11 }
 0x2f8   : > { %6617 = vmatprep.subr.bf16.mxu0 %v15164_v12 }
 0x2fb   : > { %6618 = vmatpush1.bf16.msra.mxu0 %v15162_v9 }
 0x2fc   : > { %6619 = vmatprep.subr.bf16.mxu0 %v15167_v17 }
 0x2ff   : > { %6620 = vmatpush1.bf16.msra.mxu0 %v15165_v18 }
 0x300   : > { %6621 = vmatprep.subr.bf16.mxu0 %v15170_v20 }
 0x303   : > { %6622 = vmatpush1.bf16.msra.mxu0 %v15168_v22  ;;  %v15186_v22 = vld [vmem:[%s18591_s3 + $0xc60] ss:$12 sps:$4 sm:$0xff]  }
 0x304   : > { %6623 = vmatprep.subr.bf16.mxu0 %v15173_v23  ;;  %v15191_v23 = vld [vmem:[%s18591_s3 + $0xc7c] ss:$12 sps:$4 sm:$0xff]  }
 0x307   : > { %6624 = vmatpush1.bf16.msra.mxu0 %v15171_v43 }
 0x308   : > { %6634 = vmatprep.subr.bf16.mxu0 %v15176_v27 }
 0x30a   : > { %6626 = vmatmul.mubr.bf16.vlgmr.msra.gmra.mrb[20].mxu0 %v16871_v62  ;;  %v13632_v62 = vpop.f32.mrb[16].mxu1 }
 0x30b   : > { %6635 = vmatpush1.bf16.msra.mxu0 %v15174_v33  ;;  %6666 = vmatprep.mubr.bf16.mxu0 %v16876_v0  ;;  %v13633_v24 = vpop.f32.mrb[17].mxu1 }
 0x30c   : > { %6636 = vmatprep.subr.bf16.mxu0 %v15179_v38  ;;  %v13634_v0 = vadd.f32 %v13633_v24, %v13632_v62  ;;  %v13635_v44 = vpop.f32.mrb[18].mxu1  ;;  %v15200_v24 = vld [vmem:[%s18591_s3 + $0xcc4] ss:$12 sps:$4 sm:$0xff]  }
 0x30d   : > { %v13636_v4 = vpop.f32.mrb[19].mxu1 }
 0x30e   : > { %v13654_v60 = vpop.f32.mrb[20].mxu1  ;;  %v6913_v25 = vadd.f32 %v13634_v0, %v6873_v3 }
 0x30f   : > { %6637 = vmatpush1.bf16.msra.mxu0 %v15177_v14  ;;  %v13655_v11 = vpop.f32.mrb[21].mxu1 }
 0x310   : > { %6638 = vmatprep.subr.bf16.mxu0 %v15182_v21  ;;  %v13656_v12 = vadd.f32 %v13655_v11, %v13654_v60  ;;  %v13657_v9 = vpop.f32.mrb[22].mxu1  ;;  %v15192_v21 = vld [vmem:[%s18591_s3 + $0xc90] ss:$12 sps:$4 sm:$0xff]  }
 0x311   : > { %v13658_v17 = vpop.f32.mrb[23].mxu1 }
 0x312   : > { %v6953_v18 = vadd.f32 %v13656_v12, %v6913_v25  ;;  %v13676_v20 = vpop.f32.mrb[24].mxu1  ;;  %v15203_v25 = vld [vmem:[%s18591_s3 + $0xcdc] ss:$12 sps:$4 sm:$0xff]  }
 0x313   : > { %6639 = vmatpush1.bf16.msra.mxu0 %v15180_v63  ;;  %v13677_v43 = vpop.f32.mrb[25].mxu1 }
 0x314   : > { %6640 = vmatprep.subr.bf16.mxu0 %v15185_v8  ;;  %v13678_v27 = vadd.f32 %v13677_v43, %v13676_v20  ;;  %v13679_v55 = vpop.f32.mrb[26].mxu1  ;;  %v15201_v20 = vld [vmem:[%s18591_s3 + $0xcd8] ss:$12 sps:$4 sm:$0xff]  }
 0x315   : > { %v13680_v33 = vpop.f32.mrb[27].mxu1  ;;  %v15209_v43 = vld [vmem:[%s18591_s3 + $0xd0c] ss:$12 sps:$4 sm:$0xff]   ;;  %v15212_v55 = vld [vmem:[%s18591_s3 + $0xd24] ss:$12 sps:$4 sm:$0xff]  }
 0x316   : > { %v6993_v38 = vadd.f32 %v13678_v27, %v6953_v18  ;;  %v13698_v40 = vpop.f32.mrb[28].mxu1  ;;  %v15207_v27 = vld [vmem:[%s18591_s3 + $0xd08] ss:$12 sps:$4 sm:$0xff]   ;;  %v15210_v33 = vld [vmem:[%s18591_s3 + $0xd20] ss:$12 sps:$4 sm:$0xff]  }
 0x317   : > { %6641 = vmatpush1.bf16.msra.mxu0 %v15183_v5  ;;  %v13699_v45 = vpop.f32.mrb[29].mxu1 }
 0x318   : > { %6642 = vmatprep.subr.bf16.mxu0 %v15188_v6  ;;  %v13700_v42 = vadd.f32 %v13699_v45, %v13698_v40  ;;  %v13701_v48 = vpop.f32.mrb[30].mxu1  ;;  %v15198_v6 = vld [vmem:[%s18591_s3 + $0xcc0] ss:$12 sps:$4 sm:$0xff]   ;;  %v15213_v40 = vld [vmem:[%s18591_s3 + $0xd38] ss:$12 sps:$4 sm:$0xff]  }
 0x319   : > { %v13702_v51 = vpop.f32.mrb[31].mxu1 }
 0x31a   : > { %v7033_v14 = vadd.f32 %v13700_v42, %v6993_v38  ;;  %v13720_v57 = vpop.f32.mrb[32].mxu1  ;;  %v15215_v38 = vld [vmem:[%s18591_s3 + $0xd3c] ss:$12 sps:$4 sm:$0xff]  }
 0x31b   : > { %6643 = vmatpush1.bf16.msra.mxu0 %v15186_v22  ;;  %v13721_v7 = vpop.f32.mrb[33].mxu1  ;;  %v15206_v22 = vld [vmem:[%s18591_s3 + $0xcf4] ss:$12 sps:$4 sm:$0xff]  }
 0x31c   : > { %6644 = vmatprep.subr.bf16.mxu0 %v15191_v23  ;;  %v13722_v59 = vadd.f32 %v13721_v7, %v13720_v57  ;;  %v13723_v10 = vpop.f32.mrb[34].mxu1  ;;  %v15204_v23 = vld [vmem:[%s18591_s3 + $0xcf0] ss:$12 sps:$4 sm:$0xff]   ;;  %v15221_v57 = vld [vmem:[%s18591_s3 + $0xd6c] ss:$12 sps:$4 sm:$0xff]  }
 0x31d   : > { %v13724_v62 = vpop.f32.mrb[35].mxu1  ;;  %v15224_v7 = vld [vmem:[%s18591_s3 + $0xd84] ss:$12 sps:$4 sm:$0xff]   ;;  %v15227_v10 = vld [vmem:[%s18591_s3 + $0xd9c] ss:$12 sps:$4 sm:$0xff]  }
 0x31e   : > { %v7073_v63 = vadd.f32 %v13722_v59, %v7033_v14  ;;  %v13742_v8 = vpop.f32.mrb[36].mxu1  ;;  %v15216_v14 = vld [vmem:[%s18591_s3 + $0xd50] ss:$12 sps:$4 sm:$0xff]   ;;  %v15222_v59 = vld [vmem:[%s18591_s3 + $0xd80] ss:$12 sps:$4 sm:$0xff]  }
 0x31f   : > { %6645 = vmatpush1.bf16.msra.mxu0 %v15189_v30  ;;  %v13743_v0 = vpop.f32.mrb[37].mxu1  ;;  %v15218_v30 = vld [vmem:[%s18591_s3 + $0xd54] ss:$12 sps:$4 sm:$0xff]   ;;  %v15225_v62 = vld [vmem:[%s18591_s3 + $0xd98] ss:$12 sps:$4 sm:$0xff]  }
 0x320   : > { %6646 = vmatprep.subr.bf16.mxu0 %v15194_v41  ;;  %v13744_v44 = vadd.f32 %v13743_v0, %v13742_v8  ;;  %v13745_v3 = vpop.f32.mrb[38].mxu1  ;;  %v15228_v8 = vld [vmem:[%s18591_s3 + $0xdb0] ss:$12 sps:$4 sm:$0xff]  }
 0x321   : > { %v13746_v4 = vpop.f32.mrb[39].mxu1  ;;  %v15236_v0 = vld [vmem:[%s18591_s3 + $0xde4] ss:$12 sps:$4 sm:$0xff]  }
 0x322   : > { %v7113_v60 = vadd.f32 %v13744_v44, %v7073_v63  ;;  %v13764_v5 = vpop.f32.mrb[40].mxu1  ;;  %v15230_v63 = vld [vmem:[%s18591_s3 + $0xdb4] ss:$12 sps:$4 sm:$0xff]   ;;  %v15239_v44 = vld [vmem:[%s18591_s3 + $0xdfc] ss:$12 sps:$4 sm:$0xff]  }
 0x323   : > { %6647 = vmatpush1.bf16.msra.mxu0 %v15192_v21  ;;  %v13765_v11 = vpop.f32.mrb[41].mxu1  ;;  %v15237_v3 = vld [vmem:[%s18591_s3 + $0xdf8] ss:$12 sps:$4 sm:$0xff]   ;;  %v15242_v4 = vld [vmem:[%s18591_s3 + $0xe14] ss:$12 sps:$4 sm:$0xff]  }
 0x324   : > { %6648 = vmatprep.subr.bf16.mxu0 %v15197_v54  ;;  %v13766_v12 = vadd.f32 %v13765_v11, %v13764_v5  ;;  %v13767_v9 = vpop.f32.mrb[42].mxu1  ;;  %v15219_v54 = vld [vmem:[%s18591_s3 + $0xd68] ss:$12 sps:$4 sm:$0xff]   ;;  %v15240_v11 = vld [vmem:[%s18591_s3 + $0xe10] ss:$12 sps:$4 sm:$0xff]  }
 0x325   : > { %v13768_v17 = vpop.f32.mrb[43].mxu1  ;;  %v15245_v9 = vld [vmem:[%s18591_s3 + $0xe2c] ss:$12 sps:$4 sm:$0xff]  }
 0x326   : > { %v7153_v18 = vadd.f32 %v13766_v12, %v7113_v60  ;;  %v15243_v17 = vld [vmem:[%s18591_s3 + $0xe28] ss:$12 sps:$4 sm:$0xff]  }
 0x327   : > { %6649 = vmatpush1.bf16.msra.mxu0 %v15195_v2  ;;  %v15233_v2 = vld [vmem:[%s18591_s3 + $0xdcc] ss:$12 sps:$4 sm:$0xff]  }
 0x328   : > { %6650 = vmatprep.subr.bf16.mxu0 %v15200_v24  ;;  %v15231_v24 = vld [vmem:[%s18591_s3 + $0xdc8] ss:$12 sps:$4 sm:$0xff]  }
 0x32b   : > { %6651 = vmatpush1.bf16.msra.mxu0 %v15198_v6 }
 0x32c   : > { %6652 = vmatprep.subr.bf16.mxu0 %v15203_v25 }
 0x32f   : > { %6653 = vmatpush1.bf16.msra.mxu0 %v15201_v20  ;;  %v13786_v41 = vpop.f32.mrb[44].mxu1  ;;  %v15246_v20 = vld [vmem:[%s18591_s3 + $0xe40] ss:$12 sps:$4 sm:$0xff]  }
 0x330   : > { %6654 = vmatprep.subr.bf16.mxu0 %v15206_v22  ;;  %v13787_v45 = vpop.f32.mrb[45].mxu1  ;;  %v15251_v22 = vld [vmem:[%s18591_s3 + $0xe5c] ss:$12 sps:$4 sm:$0xff]  }
 0x331   : > { %v13788_v42 = vadd.f32 %v13787_v45, %v13786_v41  ;;  %v13789_v48 = vpop.f32.mrb[46].mxu1  ;;  %v15261_v41 = vld [vmem:[%s18591_s3 + $0xeb8] ss:$12 sps:$4 sm:$0xff]  }
 0x332   : > { %v13790_v51 = vpop.f32.mrb[47].mxu1 }
 0x333   : > { %6655 = vmatpush1.bf16.msra.mxu0 %v15204_v23  ;;  %v7193_v21 = vadd.f32 %v13788_v42, %v7153_v18  ;;  %v15248_v18 = vld [vmem:[%s18591_s3 + $0xe44] ss:$12 sps:$4 sm:$0xff]   ;;  %v15266_v42 = vld [vmem:[%s18591_s3 + $0xed4] ss:$12 sps:$4 sm:$0xff]  }
 0x334   : > { %6656 = vmatprep.subr.bf16.mxu0 %v15209_v43  ;;  %v15249_v23 = vld [vmem:[%s18591_s3 + $0xe58] ss:$12 sps:$4 sm:$0xff]   ;;  %v15254_v43 = vld [vmem:[%s18591_s3 + $0xe74] ss:$12 sps:$4 sm:$0xff]  }
 0x337   : > { %6657 = vmatpush1.bf16.msra.mxu0 %v15207_v27  ;;  %v15252_v27 = vld [vmem:[%s18591_s3 + $0xe70] ss:$12 sps:$4 sm:$0xff]  }
 0x338   : > { %6658 = vmatprep.subr.bf16.mxu0 %v15212_v55  ;;  %v15257_v55 = vld [vmem:[%s18591_s3 + $0xe8c] ss:$12 sps:$4 sm:$0xff]  }
 0x33b   : > { %6659 = vmatpush1.bf16.msra.mxu0 %v15210_v33  ;;  %v15255_v33 = vld [vmem:[%s18591_s3 + $0xe88] ss:$12 sps:$4 sm:$0xff]  }
 0x33c   : > { %6660 = vmatprep.subr.bf16.mxu0 %v15215_v38  ;;  %v15260_v38 = vld [vmem:[%s18591_s3 + $0xea4] ss:$12 sps:$4 sm:$0xff]  }
 0x33f   : > { %6661 = vmatpush1.bf16.msra.mxu0 %v15213_v40  ;;  %v15258_v40 = vld [vmem:[%s18591_s3 + $0xea0] ss:$12 sps:$4 sm:$0xff]  }
 0x340   : > { %6662 = vmatprep.subr.bf16.mxu0 %v15218_v30  ;;  %v15263_v30 = vld [vmem:[%s18591_s3 + $0xebc] ss:$12 sps:$4 sm:$0xff]  }
 0x343   : > { %6663 = vmatpush1.bf16.msra.mxu0 %v15216_v14 }
 0x344   : > { %6664 = vmatprep.subr.bf16.mxu0 %v15221_v57 }
 0x347   : > { %6665 = vmatpush1.bf16.msra.mxu0 %v15219_v54 }
 0x348   : > { %6675 = vmatprep.subr.bf16.mxu0 %v15224_v7  ;;  %v15269_v7 = vld [vmem:[%s18591_s3 + $0xeec] ss:$12 sps:$4 sm:$0xff]  }
 0x34a   : > { %6667 = vmatmul.mubr.bf16.vlgmr.msra.gmra.mrb[20].mxu0 %v16916_v47  ;;  %v15234_v47 = vld [vmem:[%s18591_s3 + $0xde0] ss:$12 sps:$4 sm:$0xff]  }
 0x34b   : > { %6676 = vmatpush1.bf16.msra.mxu0 %v15222_v59  ;;  %6707 = vmatprep.mubr.bf16.mxu0 %v16921_v1  ;;  %v15267_v59 = vld [vmem:[%s18591_s3 + $0xee8] ss:$12 sps:$4 sm:$0xff]  }
 0x34c   : > { %6677 = vmatprep.subr.bf16.mxu0 %v15227_v10  ;;  %v15272_v10 = vld [vmem:[%s18591_s3 + $0xf04] ss:$12 sps:$4 sm:$0xff]  }
 0x34f   : > { %6678 = vmatpush1.bf16.msra.mxu0 %v15225_v62  ;;  %v13808_v1 = vpop.f32.mrb[48].mxu1  ;;  %v15270_v62 = vld [vmem:[%s18591_s3 + $0xf00] ss:$12 sps:$4 sm:$0xff]  }
 0x350   : > { %6679 = vmatprep.subr.bf16.mxu0 %v15230_v63  ;;  %v13809_v60 = vpop.f32.mrb[49].mxu1  ;;  %v15275_v63 = vld [vmem:[%s18591_s3 + $0xf1c] ss:$12 sps:$4 sm:$0xff]  }
 0x351   : > { %v13810_v5 = vadd.f32 %v13809_v60, %v13808_v1  ;;  %v13811_v6 = vpop.f32.mrb[50].mxu1  ;;  %v15281_v1 = vld [vmem:[%s18591_s3 + $0xf4c] ss:$12 sps:$4 sm:$0xff]   ;;  %v15279_v60 = vld [vmem:[%s18591_s3 + $0xf48] ss:$12 sps:$4 sm:$0xff]  }
 0x352   : > { %v13812_v25 = vpop.f32.mrb[51].mxu1  ;;  %v15375_v6 = vld [vmem:[%s16079_s12 + $0x60] ss:$16 sps:$4 sm:$0xff]  }
 0x353   : > { %6680 = vmatpush1.bf16.msra.mxu0 %v15228_v8  ;;  %v7233_v12 = vadd.f32 %v13810_v5, %v7193_v21  ;;  %v15264_v21 = vld [vmem:[%s18591_s3 + $0xed0] ss:$12 sps:$4 sm:$0xff]   ;;  %v15380_v25 = vld [vmem:[%s16079_s12 + $0x84] ss:$16 sps:$4 sm:$0xff]  }
 0x354   : > { %6681 = vmatprep.subr.bf16.mxu0 %v15233_v2  ;;  %v15366_v8 = vld [vmem:[%s16079_s12] ss:$16 sps:$4 sm:$0xff]   ;;  %v15368_v2 = vld [vmem:[%s16079_s12 + $0x4] ss:$16 sps:$4 sm:$0xff]  }
 0x355   : > { %7885 = vmatprep.subr.bf16.mxu1 %v15368_v2  ;;  %v15284_v5 = vld [vmem:[%s18591_s3 + $0xf64] ss:$12 sps:$4 sm:$0xff]  }
 0x356   : > { %7886 = vmatpush1.bf16.msra.mxu1 %v15366_v8  ;;  %v15303_v8 = vld [vmem:[%s18591_s3 + $0x1008] ss:$12 sps:$4 sm:$0xff]   ;;  %v15308_v2 = vld [vmem:[%s18591_s3 + $0x1024] ss:$12 sps:$4 sm:$0xff]  }
 0x357   : > { %6682 = vmatpush1.bf16.msra.mxu0 %v15231_v24  ;;  %v15273_v24 = vld [vmem:[%s18591_s3 + $0xf18] ss:$12 sps:$4 sm:$0xff]  }
 0x358   : > { %6683 = vmatprep.subr.bf16.mxu0 %v15236_v0  ;;  %v15371_v0 = vld [vmem:[%s16079_s12 + $0x24] ss:$16 sps:$4 sm:$0xff]  }
 0x359   : > { %7887 = vmatprep.subr.bf16.mxu1 %v15371_v0  ;;  %v15404_v0 = vld [vmem:[%s16079_s12 + $0x184] ss:$16 sps:$4 sm:$0xff]  }
 0x35b   : > { %6684 = vmatpush1.bf16.msra.mxu0 %v15234_v47  ;;  %v15278_v47 = vld [vmem:[%s18591_s3 + $0xf34] ss:$12 sps:$4 sm:$0xff]  }
 0x35c   : > { %6685 = vmatprep.subr.bf16.mxu0 %v15239_v44  ;;  %v15369_v44 = vld [vmem:[%s16079_s12 + $0x20] ss:$16 sps:$4 sm:$0xff]  }
 0x35d   : > { %7888 = vmatpush1.bf16.msra.mxu1 %v15369_v44  ;;  %v15311_v44 = vld [vmem:[%s18591_s3 + $0x103c] ss:$12 sps:$4 sm:$0xff]  }
 0x35f   : > { %6686 = vmatpush1.bf16.msra.mxu0 %v15237_v3  ;;  %v15276_v3 = vld [vmem:[%s18591_s3 + $0xf30] ss:$12 sps:$4 sm:$0xff]  }
 0x360   : > { %6687 = vmatprep.subr.bf16.mxu0 %v15242_v4  ;;  %v15377_v4 = vld [vmem:[%s16079_s12 + $0x64] ss:$16 sps:$4 sm:$0xff]  }
 0x363   : > { %6688 = vmatpush1.bf16.msra.mxu0 %v15240_v11  ;;  %v15282_v11 = vld [vmem:[%s18591_s3 + $0xf60] ss:$12 sps:$4 sm:$0xff]  }
 0x364   : > { %6689 = vmatprep.subr.bf16.mxu0 %v15245_v9  ;;  %v15378_v9 = vld [vmem:[%s16079_s12 + $0x80] ss:$16 sps:$4 sm:$0xff]  }
 0x367   : > { %6690 = vmatpush1.bf16.msra.mxu0 %v15243_v17  ;;  %v15383_v17 = vld [vmem:[%s16079_s12 + $0xa4] ss:$16 sps:$4 sm:$0xff]  }
 0x368   : > { %6691 = vmatprep.subr.bf16.mxu0 %v15248_v18  ;;  %v15285_v18 = vld [vmem:[%s18591_s3 + $0xf78] ss:$12 sps:$4 sm:$0xff]  }
 0x36b   : > { %6692 = vmatpush1.bf16.msra.mxu0 %v15246_v20  ;;  %v15290_v20 = vld [vmem:[%s18591_s3 + $0xf94] ss:$12 sps:$4 sm:$0xff]  }
 0x36c   : > { %6693 = vmatprep.subr.bf16.mxu0 %v15251_v22  ;;  %v15381_v22 = vld [vmem:[%s16079_s12 + $0xa0] ss:$16 sps:$4 sm:$0xff]  }
 0x36f   : > { %6694 = vmatpush1.bf16.msra.mxu0 %v15249_v23  ;;  %v15386_v23 = vld [vmem:[%s16079_s12 + $0xc4] ss:$16 sps:$4 sm:$0xff]  }
 0x370   : > { %6695 = vmatprep.subr.bf16.mxu0 %v15254_v43  ;;  %v15288_v43 = vld [vmem:[%s18591_s3 + $0xf90] ss:$12 sps:$4 sm:$0xff]  }
 0x372   : > { %v13830_v45 = vpop.f32.mrb[52].mxu1 }
 0x373   : > { %6696 = vmatpush1.bf16.msra.mxu0 %v15252_v27  ;;  %v13831_v48 = vpop.f32.mrb[53].mxu1  ;;  %v15293_v27 = vld [vmem:[%s18591_s3 + $0xfac] ss:$12 sps:$4 sm:$0xff]  }
 0x374   : > { %6697 = vmatprep.subr.bf16.mxu0 %v15257_v55  ;;  %v13832_v51 = vadd.f32 %v13831_v48, %v13830_v45  ;;  %v13833_v14 = vpop.f32.mrb[54].mxu1  ;;  %v15384_v55 = vld [vmem:[%s16079_s12 + $0xc0] ss:$16 sps:$4 sm:$0xff]  }
 0x375   : > { %v13834_v57 = vpop.f32.mrb[55].mxu1  ;;  %v15294_v45 = vld [vmem:[%s18591_s3 + $0xfc0] ss:$12 sps:$4 sm:$0xff]   ;;  %v15297_v14 = vld [vmem:[%s18591_s3 + $0xfd8] ss:$12 sps:$4 sm:$0xff]  }
 0x376   : > { %v17176_v54 = vadd.f32 %v13832_v51, %v7233_v12  ;;  %v15287_v12 = vld [vmem:[%s18591_s3 + $0xf7c] ss:$12 sps:$4 sm:$0xff]   ;;  %v15390_v48 = vld [vmem:[%s16079_s12 + $0x100] ss:$16 sps:$4 sm:$0xff]   ;;  %v15395_v51 = vld [vmem:[%s16079_s12 + $0x124] ss:$16 sps:$4 sm:$0xff]  }
 0x377   : > { %6698 = vmatpush1.bf16.msra.mxu0 %v15255_v33  ;;  %v15389_v33 = vld [vmem:[%s16079_s12 + $0xe4] ss:$16 sps:$4 sm:$0xff]  }
 0x378   : > { %6699 = vmatprep.subr.bf16.mxu0 %v15260_v38  ;;  %v15291_v38 = vld [vmem:[%s18591_s3 + $0xfa8] ss:$12 sps:$4 sm:$0xff]  }
 0x379   : > { %v15302_v57 = vld [vmem:[%s18591_s3 + $0xff4] ss:$12 sps:$4 sm:$0xff]  }
 0x37b   : > { %6700 = vmatpush1.bf16.msra.mxu0 %v15258_v40  ;;  %v15296_v40 = vld [vmem:[%s18591_s3 + $0xfc4] ss:$12 sps:$4 sm:$0xff]  }
 0x37c   : > { %6701 = vmatprep.subr.bf16.mxu0 %v15263_v30  ;;  %v15387_v30 = vld [vmem:[%s16079_s12 + $0xe0] ss:$16 sps:$4 sm:$0xff]  }
 0x37f   : > { %6702 = vmatpush1.bf16.msra.mxu0 %v15261_v41  ;;  %v15392_v41 = vld [vmem:[%s16079_s12 + $0x104] ss:$16 sps:$4 sm:$0xff]  }
 0x380   : > { %6703 = vmatprep.subr.bf16.mxu0 %v15266_v42  ;;  %v15299_v42 = vld [vmem:[%s18591_s3 + $0xfdc] ss:$12 sps:$4 sm:$0xff]  }
 0x383   : > { %6704 = vmatpush1.bf16.msra.mxu0 %v15264_v21  ;;  %v15393_v21 = vld [vmem:[%s16079_s12 + $0x120] ss:$16 sps:$4 sm:$0xff]  }
 0x384   : > { %6705 = vmatprep.subr.bf16.mxu0 %v15269_v7  ;;  %v15398_v7 = vld [vmem:[%s16079_s12 + $0x144] ss:$16 sps:$4 sm:$0xff]  }
 0x387   : > { %6706 = vmatpush1.bf16.msra.mxu0 %v15267_v59  ;;  %v15300_v59 = vld [vmem:[%s18591_s3 + $0xff0] ss:$12 sps:$4 sm:$0xff]  }
 0x388   : > { %6716 = vmatprep.subr.bf16.mxu0 %v15272_v10  ;;  %v15305_v10 = vld [vmem:[%s18591_s3 + $0x100c] ss:$12 sps:$4 sm:$0xff]  }
 0x38a   : > { %6708 = vmatmul.mubr.bf16.vlgmr.msra.gmra.mrb[20].mxu0 %v16963_v37  ;;  %v15374_v37 = vld [vmem:[%s16079_s12 + $0x44] ss:$16 sps:$4 sm:$0xff]  }
 0x38b   : > { %6717 = vmatpush1.bf16.msra.mxu0 %v15270_v62  ;;  %6748 = vmatprep.mubr.bf16.mxu0 %v16968_v39  ;;  %v15372_v39 = vld [vmem:[%s16079_s12 + $0x40] ss:$16 sps:$4 sm:$0xff]  }
 0x38c   : > { %6718 = vmatprep.subr.bf16.mxu0 %v15275_v63  ;;  %7889 = vmatprep.subr.bf16.mxu1 %v15374_v37  ;;  %v15396_v62 = vld [vmem:[%s16079_s12 + $0x140] ss:$16 sps:$4 sm:$0xff]   ;;  %v15401_v63 = vld [vmem:[%s16079_s12 + $0x164] ss:$16 sps:$4 sm:$0xff]  }
 0x38d   : > { %7890 = vmatpush1.bf16.msra.mxu1 %v15372_v39  ;;  %v15402_v37 = vld [vmem:[%s16079_s12 + $0x180] ss:$16 sps:$4 sm:$0xff]  }
 0x38e   : > { %7891 = vmatprep.subr.bf16.mxu1 %v15377_v4  ;;  %v15314_v39 = vld [vmem:[%s18591_s3 + $0x1054] ss:$12 sps:$4 sm:$0xff]  }
 0x38f   : > { %6719 = vmatpush1.bf16.msra.mxu0 %v15273_v24  ;;  %v15399_v24 = vld [vmem:[%s16079_s12 + $0x160] ss:$16 sps:$4 sm:$0xff]  }
 0x390   : > { %6720 = vmatprep.subr.bf16.mxu0 %v15278_v47  ;;  %v15306_v47 = vld [vmem:[%s18591_s3 + $0x1020] ss:$12 sps:$4 sm:$0xff]  }
 0x391   : > { %7892 = vmatpush1.bf16.msra.mxu1 %v15375_v6  ;;  %v15405_v4 = vld [vmem:[%s16079_s12 + $0x1a0] ss:$16 sps:$4 sm:$0xff]   ;;  %v15315_v6 = vld [vmem:[%s18591_s3 + $0x1068] ss:$12 sps:$4 sm:$0xff]  }
 0x392   : > { %7893 = vmatprep.subr.bf16.mxu1 %v15380_v25  ;;  %v15320_v25 = vld [vmem:[%s18591_s3 + $0x1084] ss:$12 sps:$4 sm:$0xff]  }
 0x393   : > { %6721 = vmatpush1.bf16.msra.mxu0 %v15276_v3  ;;  %v15407_v3 = vld [vmem:[%s16079_s12 + $0x1a4] ss:$16 sps:$4 sm:$0xff]  }
 0x394   : > { %6722 = vmatprep.subr.bf16.mxu0 %v15281_v1  ;;  %v15309_v1 = vld [vmem:[%s18591_s3 + $0x1038] ss:$12 sps:$4 sm:$0xff]  }
 0x395   : > { %7894 = vmatpush1.bf16.msra.mxu1 %v15378_v9  ;;  %v15321_v9 = vld [vmem:[%s18591_s3 + $0x1098] ss:$12 sps:$4 sm:$0xff]  }
 0x396   : > { %7895 = vmatprep.subr.bf16.mxu1 %v15383_v17  ;;  %v15326_v17 = vld [vmem:[%s18591_s3 + $0x10b4] ss:$12 sps:$4 sm:$0xff]  }
 0x397   : > { %6723 = vmatpush1.bf16.msra.mxu0 %v15279_v60  ;;  %v15312_v60 = vld [vmem:[%s18591_s3 + $0x1050] ss:$12 sps:$4 sm:$0xff]  }
 0x398   : > { %6724 = vmatprep.subr.bf16.mxu0 %v15284_v5  ;;  %v15317_v5 = vld [vmem:[%s18591_s3 + $0x106c] ss:$12 sps:$4 sm:$0xff]  }
 0x399   : > { %7896 = vmatpush1.bf16.msra.mxu1 %v15381_v22  ;;  %v15327_v22 = vld [vmem:[%s18591_s3 + $0x10c8] ss:$12 sps:$4 sm:$0xff]  }
 0x39a   : > { %7897 = vmatprep.subr.bf16.mxu1 %v15386_v23  ;;  %v15330_v23 = vld [vmem:[%s18591_s3 + $0x10e0] ss:$12 sps:$4 sm:$0xff]  }
 0x39b   : > { %6725 = vmatpush1.bf16.msra.mxu0 %v15282_v11  ;;  %v15318_v11 = vld [vmem:[%s18591_s3 + $0x1080] ss:$12 sps:$4 sm:$0xff]  }
 0x39c   : > { %6726 = vmatprep.subr.bf16.mxu0 %v15287_v12  ;;  %v15323_v12 = vld [vmem:[%s18591_s3 + $0x109c] ss:$12 sps:$4 sm:$0xff]  }
 0x39d   : > { %7898 = vmatpush1.bf16.msra.mxu1 %v15384_v55  ;;  %v15336_v55 = vld [vmem:[%s18591_s3 + $0x1110] ss:$12 sps:$4 sm:$0xff]  }
 0x39e   : > { %7899 = vmatprep.subr.bf16.mxu1 %v15389_v33  ;;  %v15341_v33 = vld [vmem:[%s18591_s3 + $0x112c] ss:$12 sps:$4 sm:$0xff]  }
 0x39f   : > { %6727 = vmatpush1.bf16.msra.mxu0 %v15285_v18  ;;  %v15324_v18 = vld [vmem:[%s18591_s3 + $0x10b0] ss:$12 sps:$4 sm:$0xff]  }
 0x3a0   : > { %6728 = vmatprep.subr.bf16.mxu0 %v15290_v20  ;;  %v15329_v20 = vld [vmem:[%s18591_s3 + $0x10cc] ss:$12 sps:$4 sm:$0xff]  }
 0x3a1   : > { %7900 = vmatpush1.bf16.msra.mxu1 %v15387_v30  ;;  %v15342_v30 = vld [vmem:[%s18591_s3 + $0x1140] ss:$12 sps:$4 sm:$0xff]  }
 0x3a2   : > { %7901 = vmatprep.subr.bf16.mxu1 %v15392_v41  ;;  %v15347_v41 = vld [vmem:[%s18591_s3 + $0x115c] ss:$12 sps:$4 sm:$0xff]  }
 0x3a3   : > { %6729 = vmatpush1.bf16.msra.mxu0 %v15288_v43  ;;  %v15333_v43 = vld [vmem:[%s18591_s3 + $0x10f8] ss:$12 sps:$4 sm:$0xff]  }
 0x3a4   : > { %6730 = vmatprep.subr.bf16.mxu0 %v15293_v27  ;;  %v15338_v27 = vld [vmem:[%s18591_s3 + $0x1114] ss:$12 sps:$4 sm:$0xff]  }
 0x3a5   : > { %7902 = vmatpush1.bf16.msra.mxu1 %v15390_v48  ;;  %v15348_v48 = vld [vmem:[%s18591_s3 + $0x1170] ss:$12 sps:$4 sm:$0xff]  }
 0x3a6   : > { %7903 = vmatprep.subr.bf16.mxu1 %v15395_v51  ;;  %v15353_v51 = vld [vmem:[%s18591_s3 + $0x118c] ss:$12 sps:$4 sm:$0xff]  }
 0x3a7   : > { %6731 = vmatpush1.bf16.msra.mxu0 %v15291_v38  ;;  %v15339_v38 = vld [vmem:[%s18591_s3 + $0x1128] ss:$12 sps:$4 sm:$0xff]  }
 0x3a8   : > { %6732 = vmatprep.subr.bf16.mxu0 %v15296_v40  ;;  %v15344_v40 = vld [vmem:[%s18591_s3 + $0x1144] ss:$12 sps:$4 sm:$0xff]  }
 0x3a9   : > { %7904 = vmatpush1.bf16.msra.mxu1 %v15393_v21  ;;  %v15354_v21 = vld [vmem:[%s18591_s3 + $0x11a0] ss:$12 sps:$4 sm:$0xff]  }
 0x3aa   : > { %7905 = vmatprep.subr.bf16.mxu1 %v15398_v7  ;;  %v15359_v7 = vld [vmem:[%s18591_s3 + $0x11bc] ss:$12 sps:$4 sm:$0xff]  }
 0x3ab   : > { %6733 = vmatpush1.bf16.msra.mxu0 %v15294_v45  ;;  %v15345_v45 = vld [vmem:[%s18591_s3 + $0x1158] ss:$12 sps:$4 sm:$0xff]  }
 0x3ac   : > { %6734 = vmatprep.subr.bf16.mxu0 %v15299_v42  ;;  %v15350_v42 = vld [vmem:[%s18591_s3 + $0x1174] ss:$12 sps:$4 sm:$0xff]  }
 0x3ad   : > { %7906 = vmatpush1.bf16.msra.mxu1 %v15396_v62  ;;  %v15360_v62 = vld [vmem:[%s18591_s3 + $0x11d0] ss:$12 sps:$4 sm:$0xff]  }
 0x3ae   : > { %7907 = vmatprep.subr.bf16.mxu1 %v15401_v63  ;;  %v15365_v63 = vld [vmem:[%s18591_s3 + $0x11ec] ss:$12 sps:$4 sm:$0xff]  }
 0x3af   : > { %6735 = vmatpush1.bf16.msra.mxu0 %v15297_v14  ;;  %v15351_v14 = vld [vmem:[%s18591_s3 + $0x1188] ss:$12 sps:$4 sm:$0xff]  }
 0x3b0   : > { %6736 = vmatprep.subr.bf16.mxu0 %v15302_v57  ;;  %v15356_v57 = vld [vmem:[%s18591_s3 + $0x11a4] ss:$12 sps:$4 sm:$0xff]  }
 0x3b1   : > { %7908 = vmatpush1.bf16.msra.mxu1 %v15399_v24  ;;  %v15408_v24 = vld [vmem:[%s16079_s12 + $0x1c0] ss:$16 sps:$4 sm:$0xff]  }
 0x3b2   : > { %7909 = vmatprep.subr.bf16.mxu1 %v15404_v0  ;;  %v15413_v0 = vld [vmem:[%s16079_s12 + $0x1e4] ss:$16 sps:$4 sm:$0xff]  }
 0x3b3   : > { %6737 = vmatpush1.bf16.msra.mxu0 %v15300_v59  ;;  %v15357_v59 = vld [vmem:[%s18591_s3 + $0x11b8] ss:$12 sps:$4 sm:$0xff]  }
 0x3b4   : > { %6738 = vmatprep.subr.bf16.mxu0 %v15305_v10  ;;  %v15362_v10 = vld [vmem:[%s18591_s3 + $0x11d4] ss:$12 sps:$4 sm:$0xff]  }
 0x3b5   : > { %7910 = vmatpush1.bf16.msra.mxu1 %v15402_v37  ;;  %v15995_v37 = vmov 0  }
 0x3b6   : > { %7911 = vmatprep.subr.bf16.mxu1 %v15407_v3  ;;  %v17284_v3 = vsub.s32 0, %v17107_v46 }
 0x3b7   : > { %6739 = vmatpush1.bf16.msra.mxu0 %v15303_v8  ;;  %v15363_v8 = vld [vmem:[%s18591_s3 + $0x11e8] ss:$12 sps:$4 sm:$0xff]  }
 0x3b8   : > { %6740 = vmatprep.subr.bf16.mxu0 %v15308_v2  ;;  %v15410_v2 = vld [vmem:[%s16079_s12 + $0x1c4] ss:$16 sps:$4 sm:$0xff]  }
 0x3b9   : > { %7912 = vmatpush1.bf16.msra.mxu1 %v15405_v4 }
 0x3ba   : > { %7913 = vmatprep.subr.bf16.mxu1 %v15410_v2  ;;  %v15449_v2 = vld [vmem:[%s16079_s12 + $0x6c] ss:$16 sps:$4 sm:$0xff]  }
 0x3bb   : > { %6741 = vmatpush1.bf16.msra.mxu0 %v15306_v47  ;;  %v15411_v47 = vld [vmem:[%s16079_s12 + $0x1e0] ss:$16 sps:$4 sm:$0xff]  }
 0x3bc   : > { %6742 = vmatprep.subr.bf16.mxu0 %v15311_v44  ;;  %v15416_v44 = vld [vmem:[%s16079_s12 + $0x204] ss:$16 sps:$4 sm:$0xff]  }
 0x3bd   : > { %7914 = vmatpush1.bf16.msra.mxu1 %v15408_v24  ;;  %v15447_v24 = vld [vmem:[%s16079_s12 + $0x68] ss:$16 sps:$4 sm:$0xff]  }
 0x3be   : > { %7915 = vmatprep.subr.bf16.mxu1 %v15413_v0  ;;  %v15452_v0 = vld [vmem:[%s16079_s12 + $0x8c] ss:$16 sps:$4 sm:$0xff]  }
 0x3bf   : > { %6743 = vmatpush1.bf16.msra.mxu0 %v15309_v1  ;;  %v17287_v1 = vsub.s32 1, %v17107_v46 }
 0x3c0   : > { %6744 = vmatprep.subr.bf16.mxu0 %v15314_v39 }
 0x3c1   : > { %7916 = vmatpush1.bf16.msra.mxu1 %v15411_v47  ;;  %v15450_v47 = vld [vmem:[%s16079_s12 + $0x88] ss:$16 sps:$4 sm:$0xff]  }
 0x3c2   : > { %7926 = vmatprep.subr.bf16.mxu1 %v15416_v44  ;;  %v15455_v44 = vld [vmem:[%s16079_s12 + $0xac] ss:$16 sps:$4 sm:$0xff]  }
 0x3c3   : > { %6745 = vmatpush1.bf16.msra.mxu0 %v15312_v60 }
 0x3c4   : > { %6746 = vmatprep.subr.bf16.mxu0 %v15317_v5 }
 0x3c7   : > { %6747 = vmatpush1.bf16.msra.mxu0 %v15315_v6 }
 0x3c8   : > { %6757 = vmatprep.subr.bf16.mxu0 %v15320_v25 }
 0x3ca   : > { %6749 = vmatmul.mubr.bf16.vlgmr.msra.gmra.mrb[20].mxu0 %v17009_v58  ;;  %v15332_v58 = vld [vmem:[%s18591_s3 + $0x10e4] ss:$12 sps:$4 sm:$0xff]  }
 0x3cb   : > { %6758 = vmatpush1.bf16.msra.mxu0 %v15318_v11  ;;  %6789 = vmatprep.mubr.bf16.mxu0 %v17015_v35  ;;  %v15335_v35 = vld [vmem:[%s18591_s3 + $0x10fc] ss:$12 sps:$4 sm:$0xff]   ;;  %s18622_s3 = sld [smem:[#allocation30_spill]] }
 0x3cc   : > { %6759 = vmatprep.subr.bf16.mxu0 %v15323_v12 }
 0x3cf   : > { %6760 = vmatpush1.bf16.msra.mxu0 %v15321_v9 }
 0x3d0   : > { %6761 = vmatprep.subr.bf16.mxu0 %v15326_v17 }
 0x3d3   : > { %6762 = vmatpush1.bf16.msra.mxu0 %v15324_v18 }
 0x3d4   : > { %6763 = vmatprep.subr.bf16.mxu0 %v15329_v20 }
 0x3d7   : > { %6764 = vmatpush1.bf16.msra.mxu0 %v15327_v22 }
 0x3d8   : > { %6765 = vmatprep.subr.bf16.mxu0 %v15332_v58  ;;  %v15414_v58 = vld [vmem:[%s16079_s12 + $0x200] ss:$16 sps:$4 sm:$0xff]  }
 0x3db   : > { %6766 = vmatpush1.bf16.msra.mxu0 %v15330_v23 }
 0x3dc   : > { %6767 = vmatprep.subr.bf16.mxu0 %v15335_v35  ;;  %v15419_v35 = vld [vmem:[%s16079_s12 + $0x224] ss:$16 sps:$4 sm:$0xff]  }
 0x3df   : > { %6768 = vmatpush1.bf16.msra.mxu0 %v15333_v43  ;;  %v15417_v43 = vld [vmem:[%s16079_s12 + $0x220] ss:$16 sps:$4 sm:$0xff]  }
 0x3e0   : > { %6769 = vmatprep.subr.bf16.mxu0 %v15338_v27  ;;  %v15422_v27 = vld [vmem:[%s16079_s12 + $0x244] ss:$16 sps:$4 sm:$0xff]  }
 0x3e3   : > { %6770 = vmatpush1.bf16.msra.mxu0 %v15336_v55  ;;  %v15420_v55 = vld [vmem:[%s16079_s12 + $0x240] ss:$16 sps:$4 sm:$0xff]  }
 0x3e4   : > { %6771 = vmatprep.subr.bf16.mxu0 %v15341_v33  ;;  %v15425_v33 = vld [vmem:[%s16079_s12 + $0x264] ss:$16 sps:$4 sm:$0xff]  }
 0x3e7   : > { %6772 = vmatpush1.bf16.msra.mxu0 %v15339_v38  ;;  %v15423_v38 = vld [vmem:[%s16079_s12 + $0x260] ss:$16 sps:$4 sm:$0xff]  }
 0x3e8   : > { %6773 = vmatprep.subr.bf16.mxu0 %v15344_v40  ;;  %v15428_v40 = vld [vmem:[%s16079_s12 + $0x284] ss:$16 sps:$4 sm:$0xff]  }
 0x3eb   : > { %6774 = vmatpush1.bf16.msra.mxu0 %v15342_v30  ;;  %v15426_v30 = vld [vmem:[%s16079_s12 + $0x280] ss:$16 sps:$4 sm:$0xff]  }
 0x3ec   : > { %6775 = vmatprep.subr.bf16.mxu0 %v15347_v41  ;;  %v15431_v41 = vld [vmem:[%s16079_s12 + $0x2a4] ss:$16 sps:$4 sm:$0xff]  }
 0x3ef   : > { %6776 = vmatpush1.bf16.msra.mxu0 %v15345_v45  ;;  %v15429_v45 = vld [vmem:[%s16079_s12 + $0x2a0] ss:$16 sps:$4 sm:$0xff]  }
 0x3f0   : > { %6777 = vmatprep.subr.bf16.mxu0 %v15350_v42  ;;  %v15434_v42 = vld [vmem:[%s16079_s12 + $0x2c4] ss:$16 sps:$4 sm:$0xff]  }
 0x3f3   : > { %6778 = vmatpush1.bf16.msra.mxu0 %v15348_v48  ;;  %v15432_v48 = vld [vmem:[%s16079_s12 + $0x2c0] ss:$16 sps:$4 sm:$0xff]  }
 0x3f4   : > { %6779 = vmatprep.subr.bf16.mxu0 %v15353_v51  ;;  %v7280_v51 = vmax.f32 %v17176_v54, 0.0  ;;  %v15441_v54 = vld [vmem:[%s16079_s12 + $0x28] ss:$16 sps:$4 sm:$0xff]  }
 0x3f7   : > { %6780 = vmatpush1.bf16.msra.mxu0 %v15351_v14  ;;  %v15437_v14 = vld [vmem:[%s16079_s12 + $0x2e4] ss:$16 sps:$4 sm:$0xff]  }
 0x3f8   : > { %6781 = vmatprep.subr.bf16.mxu0 %v15356_v57  ;;  %v15435_v57 = vld [vmem:[%s16079_s12 + $0x2e0] ss:$16 sps:$4 sm:$0xff]  }
 0x3fb   : > { %6782 = vmatpush1.bf16.msra.mxu0 %v15354_v21  ;;  %v7283_v21 = vmin.f32 %v7280_v51, 6.0  ;;  %v15497_v51 = vld [vmem:[%s16079_s12 + $0x26c] ss:$16 sps:$4 sm:$0xff]  }
 0x3fc   : > { %6783 = vmatprep.subr.bf16.mxu0 %v15359_v7  ;;  %v15440_v7 = vld [vmem:[%s16079_s12 + $0xc] ss:$16 sps:$4 sm:$0xff]  }
 0x3ff   : > { %6784 = vmatpush1.bf16.msra.mxu0 %v15357_v59  ;;  %v15438_v59 = vld [vmem:[%s16079_s12 + $0x8] ss:$16 sps:$4 sm:$0xff]  }
 0x400   : > { %6785 = vmatprep.subr.bf16.mxu0 %v15362_v10  ;;  %v17314_v10 = vpack.c.bf16 %v7283_v21, %v7283_v21  ;;  %v15503_v21 = vld [vmem:[%s16079_s12 + $0x2ac] ss:$16 sps:$4 sm:$0xff]  }
 0x403   : > { %6786 = vmatpush1.bf16.msra.mxu0 %v15360_v62  ;;  %v15443_v62 = vld [vmem:[%s16079_s12 + $0x2c] ss:$16 sps:$4 sm:$0xff]  }
 0x404   : > { %6787 = vmatprep.subr.bf16.mxu0 %v15365_v63  ;;  %v15446_v63 = vld [vmem:[%s16079_s12 + $0x4c] ss:$16 sps:$4 sm:$0xff]  }
 0x407   : > { %6788 = vmatpush1.bf16.msra.mxu0 %v15363_v8  ;;  %v15444_v8 = vld [vmem:[%s16079_s12 + $0x48] ss:$16 sps:$4 sm:$0xff]  }
 0x40a   : > { %6790 = vmatmul.mubr.bf16.vlgmr.msra.gmra.mrb[20].mxu0 %v17051_v13  ;;  %v15786_v13 = vld [vmem:[%s18589_s8] sm:$0x7]  ;;  %s1528_s8 = scalar_lea.vmem %s18626_s4, %s12362_s5  ;;  %s18628_s5 = sld [smem:[#allocation32_spill]] }
 0x40b   : > { %9371 = vmatprep.mubr.bf16.mxu0 %v15995_v37  ;;  %v3138_v39 = vrot.slane %v15786_v13, %v17284_v3  ;;  %v3142_v4 = vrot.slane %v15786_v13, %v17287_v1  ;;  %v15453_v13 = vld [vmem:[%s16079_s12 + $0xa8] ss:$16 sps:$4 sm:$0xff]   ;;  %s18635_s4 = sld [smem:[#allocation40_spill]] }
 0x4dd   : > { %v6791_v60 = vpop.f32.mrb[20].mxu0 }
 0x4de   : > { %v14276_v5 = vadd.f32 %v6791_v60, %v3138_v39  ;;  %v6793_v6 = vpop.f32.mrb[21].mxu0  ;;  %v15458_v39 = vld [vmem:[%s16079_s12 + $0xcc] ss:$16 sps:$4 sm:$0xff]  }
 0x4df   : > { %v14277_v25 = vadd.f32 %v6793_v6, %v3142_v4  ;;  %v6795_v11 = vpop.f32.mrb[22].mxu0  ;;  %v15456_v4 = vld [vmem:[%s16079_s12 + $0xc8] ss:$16 sps:$4 sm:$0xff]   ;;  %v15461_v60 = vld [vmem:[%s16079_s12 + $0xec] ss:$16 sps:$4 sm:$0xff]  }
 0x4e0   : > { %v7278_v12 = vmax.f32 %v14276_v5, 0.0  ;;  %v6796_v9 = vpop.f32.mrb[23].mxu0  ;;  %v15459_v5 = vld [vmem:[%s16079_s12 + $0xe8] ss:$16 sps:$4 sm:$0xff]   ;;  %v15464_v6 = vld [vmem:[%s16079_s12 + $0x10c] ss:$16 sps:$4 sm:$0xff]  }
 0x4e1   : > { %v7279_v17 = vmax.f32 %v14277_v25, 0.0  ;;  %v15462_v25 = vld [vmem:[%s16079_s12 + $0x108] ss:$16 sps:$4 sm:$0xff]   ;;  %v15467_v11 = vld [vmem:[%s16079_s12 + $0x12c] ss:$16 sps:$4 sm:$0xff]  }
 0x4e2   : > { %v7281_v18 = vmin.f32 %v7278_v12, 6.0  ;;  %v15465_v12 = vld [vmem:[%s16079_s12 + $0x128] ss:$16 sps:$4 sm:$0xff]   ;;  %v15470_v9 = vld [vmem:[%s16079_s12 + $0x14c] ss:$16 sps:$4 sm:$0xff]  }
 0x4e3   : > { %v7282_v20 = vmin.f32 %v7279_v17, 6.0  ;;  %v15468_v17 = vld [vmem:[%s16079_s12 + $0x148] ss:$16 sps:$4 sm:$0xff]  }
 0x4e4   : > { %v17293_v23 = vpack.c.bf16 %v7281_v18, %v7281_v18  ;;  %v15473_v18 = vld [vmem:[%s16079_s12 + $0x16c] ss:$16 sps:$4 sm:$0xff]  }
 0x4e5   : > { %v7285_v22 = vpack.c.bf16 %v7282_v20, %v7282_v20  ;;  %v15471_v20 = vld [vmem:[%s16079_s12 + $0x168] ss:$16 sps:$4 sm:$0xff]  }
 0x4e7   : > { %7917 = vmatprep.mubr.bf16.mxu1 %v7285_v22 }
 0x4e8   : > { %7918 = vmatmul.mubr.bf16.vlgmr.msra.gmra.mrb[56].mxu1 %v17293_v23 }
 0x4e9   : > { %7927 = vmatpush1.bf16.msra.mxu1 %v15414_v58  ;;  %7958 = vmatprep.mubr.bf16.mxu1 %v15995_v37  ;;  %v15474_v58 = vld [vmem:[%s16079_s12 + $0x188] ss:$16 sps:$4 sm:$0xff]  }
 0x4ea   : > { %7928 = vmatprep.subr.bf16.mxu1 %v15419_v35  ;;  %v15479_v35 = vld [vmem:[%s16079_s12 + $0x1ac] ss:$16 sps:$4 sm:$0xff]  }
 0x4ed   : > { %7929 = vmatpush1.bf16.msra.mxu1 %v15417_v43  ;;  %v15477_v43 = vld [vmem:[%s16079_s12 + $0x1a8] ss:$16 sps:$4 sm:$0xff]  }
 0x4ee   : > { %7930 = vmatprep.subr.bf16.mxu1 %v15422_v27  ;;  %v15482_v27 = vld [vmem:[%s16079_s12 + $0x1cc] ss:$16 sps:$4 sm:$0xff]  }
 0x4f1   : > { %7931 = vmatpush1.bf16.msra.mxu1 %v15420_v55  ;;  %v15480_v55 = vld [vmem:[%s16079_s12 + $0x1c8] ss:$16 sps:$4 sm:$0xff]  }
 0x4f2   : > { %7932 = vmatprep.subr.bf16.mxu1 %v15425_v33  ;;  %v15485_v33 = vld [vmem:[%s16079_s12 + $0x1ec] ss:$16 sps:$4 sm:$0xff]  }
 0x4f5   : > { %7933 = vmatpush1.bf16.msra.mxu1 %v15423_v38  ;;  %v15483_v38 = vld [vmem:[%s16079_s12 + $0x1e8] ss:$16 sps:$4 sm:$0xff]  }
 0x4f6   : > { %7934 = vmatprep.subr.bf16.mxu1 %v15428_v40  ;;  %v15488_v40 = vld [vmem:[%s16079_s12 + $0x20c] ss:$16 sps:$4 sm:$0xff]  }
 0x4f9   : > { %7935 = vmatpush1.bf16.msra.mxu1 %v15426_v30  ;;  %v15486_v30 = vld [vmem:[%s16079_s12 + $0x208] ss:$16 sps:$4 sm:$0xff]  }
 0x4fa   : > { %7936 = vmatprep.subr.bf16.mxu1 %v15431_v41  ;;  %v15491_v41 = vld [vmem:[%s16079_s12 + $0x22c] ss:$16 sps:$4 sm:$0xff]  }
 0x4fd   : > { %7937 = vmatpush1.bf16.msra.mxu1 %v15429_v45  ;;  %v15489_v45 = vld [vmem:[%s16079_s12 + $0x228] ss:$16 sps:$4 sm:$0xff]  }
 0x4fe   : > { %7938 = vmatprep.subr.bf16.mxu1 %v15434_v42  ;;  %v15494_v42 = vld [vmem:[%s16079_s12 + $0x24c] ss:$16 sps:$4 sm:$0xff]  }
 0x501   : > { %7939 = vmatpush1.bf16.msra.mxu1 %v15432_v48  ;;  %v15492_v48 = vld [vmem:[%s16079_s12 + $0x248] ss:$16 sps:$4 sm:$0xff]  }
 0x502   : > { %7940 = vmatprep.subr.bf16.mxu1 %v15437_v14  ;;  %v15495_v14 = vld [vmem:[%s16079_s12 + $0x268] ss:$16 sps:$4 sm:$0xff]  }
 0x505   : > { %7941 = vmatpush1.bf16.msra.mxu1 %v15435_v57  ;;  %v15498_v57 = vld [vmem:[%s16079_s12 + $0x288] ss:$16 sps:$4 sm:$0xff]  }
 0x506   : > { %7967 = vmatprep.subr.bf16.mxu1 %v15440_v7  ;;  %v15501_v7 = vld [vmem:[%s16079_s12 + $0x2a8] ss:$16 sps:$4 sm:$0xff]  }
 0x508   : > { %7959 = vmatmul.mubr.bf16.vlgmr.msra.gmra.mrb[56].mxu1 %v17314_v10 }
 0x509   : > { %7968 = vmatpush1.bf16.msra.mxu1 %v15438_v59  ;;  %7999 = vmatprep.mubr.bf16.mxu1 %v7285_v22  ;;  %v15476_v22 = vld [vmem:[%s16079_s12 + $0x18c] ss:$16 sps:$4 sm:$0xff]  }
 0x50a   : > { %7969 = vmatprep.subr.bf16.mxu1 %v15443_v62  ;;  %v15506_v59 = vld [vmem:[%s16079_s12 + $0x2cc] ss:$16 sps:$4 sm:$0xff]   ;;  %v15504_v62 = vld [vmem:[%s16079_s12 + $0x2c8] ss:$16 sps:$4 sm:$0xff]  }
 0x50d   : > { %7970 = vmatpush1.bf16.msra.mxu1 %v15441_v54  ;;  %v15509_v54 = vld [vmem:[%s16079_s12 + $0x2ec] ss:$16 sps:$4 sm:$0xff]  }
 0x50e   : > { %7971 = vmatprep.subr.bf16.mxu1 %v15446_v63  ;;  %v15507_v63 = vld [vmem:[%s16079_s12 + $0x2e8] ss:$16 sps:$4 sm:$0xff]  }
 0x511   : > { %7972 = vmatpush1.bf16.msra.mxu1 %v15444_v8  ;;  %v17368_v8 = vld [vmem:[%s16084_s20] sm:$0xf] }
 0x512   : > { %7973 = vmatprep.subr.bf16.mxu1 %v15449_v2  ;;  %v7388_v2 = vrot.slane %v17368_v8, %v17284_v3 }
 0x515   : > { %7974 = vmatpush1.bf16.msra.mxu1 %v15447_v24  ;;  %v7392_v24 = vrot.slane %v17368_v8, %v17287_v1 }
 0x516   : > { %7975 = vmatprep.subr.bf16.mxu1 %v15452_v0 }
 0x519   : > { %7976 = vmatpush1.bf16.msra.mxu1 %v15450_v47  ;;  %v17375_v47 = vld [vmem:[%s16089_s27] sm:$0xf] }
 0x51a   : > { %7977 = vmatprep.subr.bf16.mxu1 %v15455_v44  ;;  %v17378_v44 = vld [vmem:[%s16089_s27 + $0x4] sm:$0xf] }
 0x51d   : > { %7978 = vmatpush1.bf16.msra.mxu1 %v15453_v13 }
 0x51e   : > { %7979 = vmatprep.subr.bf16.mxu1 %v15458_v39 }
 0x521   : > { %7980 = vmatpush1.bf16.msra.mxu1 %v15456_v4  ;;  %v17384_v4 = vld [vmem:[%s16089_s27 + $0xc] sm:$0xf] }
 0x522   : > { %7981 = vmatprep.subr.bf16.mxu1 %v15461_v60 }
 0x525   : > { %7982 = vmatpush1.bf16.msra.mxu1 %v15459_v5 }
 0x526   : > { %7983 = vmatprep.subr.bf16.mxu1 %v15464_v6 }
 0x529   : > { %7984 = vmatpush1.bf16.msra.mxu1 %v15462_v25 }
 0x52a   : > { %7985 = vmatprep.subr.bf16.mxu1 %v15467_v11  ;;  %v8066_v11 = vrot.slane %v17375_v47, %v17287_v1 }
 0x52d   : > { %7986 = vmatpush1.bf16.msra.mxu1 %v15465_v12  ;;  %v8062_v12 = vrot.slane %v17375_v47, %v17284_v3 }
 0x52e   : > { %7987 = vmatprep.subr.bf16.mxu1 %v15470_v9  ;;  %v8089_v9 = vrot.slane %v17378_v44, %v17284_v3 }
 0x531   : > { %7988 = vmatpush1.bf16.msra.mxu1 %v15468_v17 }
 0x532   : > { %7989 = vmatprep.subr.bf16.mxu1 %v15473_v18  ;;  %v8093_v18 = vrot.slane %v17378_v44, %v17287_v1 }
 0x535   : > { %7990 = vmatpush1.bf16.msra.mxu1 %v15471_v20 }
 0x536   : > { %7991 = vmatprep.subr.bf16.mxu1 %v15476_v22  ;;  %v8147_v22 = vrot.slane %v17384_v4, %v17287_v1 }
 0x539   : > { %7992 = vmatpush1.bf16.msra.mxu1 %v15474_v58  ;;  %v17399_v58 = vld [vmem:[%s16089_s27 + $0x10] sm:$0xf] }
 0x53a   : > { %7993 = vmatprep.subr.bf16.mxu1 %v15479_v35  ;;  %v17402_v35 = vld [vmem:[%s16089_s27 + $0x14] sm:$0xf] }
 0x53d   : > { %7994 = vmatpush1.bf16.msra.mxu1 %v15477_v43 }
 0x53e   : > { %7995 = vmatprep.subr.bf16.mxu1 %v15482_v27 }
 0x541   : > { %7996 = vmatpush1.bf16.msra.mxu1 %v15480_v55 }
 0x542   : > { %7997 = vmatprep.subr.bf16.mxu1 %v15485_v33  ;;  %v8143_v33 = vrot.slane %v17384_v4, %v17284_v3 }
 0x545   : > { %7998 = vmatpush1.bf16.msra.mxu1 %v15483_v38 }
 0x546   : > { %8008 = vmatprep.subr.bf16.mxu1 %v15488_v40 }
 0x548   : > { %8000 = vmatmul.mubr.bf16.vlgmr.msra.gmra.mrb[60].mxu1 %v17293_v23  ;;  %v15500_v23 = vld [vmem:[%s16079_s12 + $0x28c] ss:$16 sps:$4 sm:$0xff]  }
 0x549   : > { %8009 = vmatpush1.bf16.msra.mxu1 %v15486_v30  ;;  %8040 = vmatprep.mubr.bf16.mxu1 %v15995_v37  ;;  %v8174_v30 = vrot.slane %v17399_v58, %v17287_v1 }
 0x54a   : > { %8010 = vmatprep.subr.bf16.mxu1 %v15491_v41  ;;  %v8201_v41 = vrot.slane %v17402_v35, %v17287_v1 }
 0x54d   : > { %8011 = vmatpush1.bf16.msra.mxu1 %v15489_v45 }
 0x54e   : > { %8012 = vmatprep.subr.bf16.mxu1 %v15494_v42 }
 0x551   : > { %8013 = vmatpush1.bf16.msra.mxu1 %v15492_v48 }
 0x552   : > { %8014 = vmatprep.subr.bf16.mxu1 %v15497_v51 }
 0x555   : > { %8015 = vmatpush1.bf16.msra.mxu1 %v15495_v14  ;;  %v17413_v14 = vld [vmem:[%s16089_s27 + $0x18] sm:$0xf] }
 0x556   : > { %8016 = vmatprep.subr.bf16.mxu1 %v15500_v23  ;;  %v17416_v23 = vld [vmem:[%s16089_s27 + $0x1c] sm:$0xf] }
 0x559   : > { %8017 = vmatpush1.bf16.msra.mxu1 %v15498_v57 }
 0x55a   : > { %8018 = vmatprep.subr.bf16.mxu1 %v15503_v21  ;;  %v8170_v21 = vrot.slane %v17399_v58, %v17284_v3 }
 0x55d   : > { %8019 = vmatpush1.bf16.msra.mxu1 %v15501_v7  ;;  %v8197_v7 = vrot.slane %v17402_v35, %v17284_v3 }
 0x55e   : > { %8020 = vmatprep.subr.bf16.mxu1 %v15506_v59 }
 0x561   : > { %8021 = vmatpush1.bf16.msra.mxu1 %v15504_v62 }
 0x562   : > { %8022 = vmatprep.subr.bf16.mxu1 %v15509_v54 }
 0x565   : > { %8023 = vmatpush1.bf16.msra.mxu1 %v15507_v63  ;;  %v8228_v63 = vrot.slane %v17413_v14, %v17287_v1 }
 0x568   : > { %8041 = vmatmul.mubr.bf16.vlgmr.msra.gmra.mrb[60].mxu1 %v17314_v10  ;;  %v17381_v10 = vld [vmem:[%s16089_s27 + $0x8] sm:$0xf] }
 0x569   : > { %8391 = vmatprep.mubr.bf16.mxu1 %v15995_v37  ;;  %v8120_v20 = vrot.slane %v17381_v10, %v17287_v1  ;;  %v8116_v55 = vrot.slane %v17381_v10, %v17284_v3 }
 0x5db   : > { %v7960_v0 = vpop.f32.mrb[56].mxu1 }
 0x5dc   : > { %v14278_v13 = vadd.f32 %v7960_v0, %v7388_v2  ;;  %v7962_v39 = vpop.f32.mrb[57].mxu1 }
 0x5dd   : > { %v14279_v60 = vadd.f32 %v7962_v39, %v7392_v24  ;;  %v7964_v5 = vpop.f32.mrb[58].mxu1  ;;  %v17427_v39 = vld [vmem:[%s16089_s27 + $0x20] sm:$0xf] }
 0x5de   : > { %v8049_v6 = vmax.f32 %v14278_v13, 0.0  ;;  %v7965_v25 = vpop.f32.mrb[59].mxu1  ;;  %v8255_v13 = vrot.slane %v17416_v23, %v17287_v1  ;;  %v8251_v5 = vrot.slane %v17416_v23, %v17284_v3 }
 0x5df   : > { %v8050_v17 = vmax.f32 %v14279_v60, 0.0  ;;  %v8224_v60 = vrot.slane %v17413_v14, %v17284_v3 }
 0x5e0   : > { %v8053_v43 = vmin.f32 %v8049_v6, 6.0 }
 0x5e1   : > { %v8054_v27 = vmin.f32 %v8050_v17, 6.0 }
 0x5e2   : > { %v8079_v38 = vmul.f32 %v8062_v12, %v8053_v43  ;;  %v8106_v40 = vmul.f32 %v8089_v9, %v8053_v43  ;;  %v8133_v62 = vmul.f32 %v8116_v55, %v8053_v43  ;;  %v8160_v54 = vmul.f32 %v8143_v33, %v8053_v43 }
 0x5e3   : > { %v8080_v45 = vmul.f32 %v8066_v11, %v8054_v27  ;;  %v8107_v42 = vmul.f32 %v8093_v18, %v8054_v27  ;;  %v8134_v48 = vmul.f32 %v8120_v20, %v8054_v27  ;;  %v8161_v51 = vmul.f32 %v8147_v22, %v8054_v27 }
 0x5e4   : > { %v8300_v59 = vpack.c.bf16 %v8106_v40, %v8079_v38  ;;  %v8188_v24 = vmul.f32 %v8174_v30, %v8054_v27  ;;  %v8215_v0 = vmul.f32 %v8201_v41, %v8054_v27  ;;  %v8304_v6 = vpack.c.bf16 %v8160_v54, %v8133_v62 }
 0x5e5   : > { %v8301_v57 = vpack.c.bf16 %v8107_v42, %v8080_v45  ;;  %v8305_v2 = vpack.c.bf16 %v8161_v51, %v8134_v48  ;;  %v8187_v25 = vmul.f32 %v8170_v21, %v8053_v43  ;;  %v8214_v11 = vmul.f32 %v8197_v7, %v8053_v43  ;;  %v17440_v51 = vld [vmem:[%s18609_s28] sm:$0xf]  ;;  %s18616_s28 = sld [smem:[#allocation28_spill]] }
 0x5e6   : > { %v8278_v12 = vrot.slane %v17427_v39, %v17284_v3  ;;  %v8309_v9 = vpack.c.bf16 %v8215_v0, %v8188_v24  ;;  %v8242_v17 = vmul.f32 %v8228_v63, %v8054_v27  ;;  %v8269_v18 = vmul.f32 %v8255_v13, %v8054_v27 }
 0x5e7   : > { %8359 = vmatprep.subr.bf16.mxu1 %v8301_v57  ;;  %v8282_v20 = vrot.slane %v17427_v39, %v17287_v1  ;;  %v8308_v22 = vpack.c.bf16 %v8214_v11, %v8187_v25  ;;  %v8241_v55 = vmul.f32 %v8224_v60, %v8053_v43  ;;  %v8268_v33 = vmul.f32 %v8251_v5, %v8053_v43 }
 0x5e8   : > { %8360 = vmatpush1.bf16.msra.mxu1 %v8300_v59  ;;  %v8313_v38 = vpack.c.bf16 %v8269_v18, %v8242_v17  ;;  %v8295_v30 = vmul.f32 %v8278_v12, %v8053_v43  ;;  %v17446_v43 = vsub.s32 3, %v17107_v46  ;;  %v8070_v46 = vrot.slane %v17375_v47, %v17113_v52 }
 0x5e9   : > { %8361 = vmatprep.subr.bf16.mxu1 %v8305_v2  ;;  %v8296_v40 = vmul.f32 %v8282_v20, %v8054_v27  ;;  %v8312_v41 = vpack.c.bf16 %v8268_v33, %v8241_v55  ;;  %v7396_v27 = vrot.slane %v17368_v8, %v17113_v52  ;;  %v8097_v0 = vrot.slane %v17378_v44, %v17113_v52 }
 0x5ea   : > { %v8316_v42 = vpack.c.bf16 %v8295_v30, %v8295_v30  ;;  %v7400_v57 = vrot.slane %v17368_v8, %v17446_v43  ;;  %v8074_v24 = vrot.slane %v17375_v47, %v17446_v43  ;;  %v8101_v8 = vrot.slane %v17378_v44, %v17446_v43 }
 0x5eb   : > { %v8317_v45 = vpack.c.bf16 %v8296_v40, %v8296_v40  ;;  %v8128_v60 = vrot.slane %v17381_v10, %v17446_v43  ;;  %v8155_v5 = vrot.slane %v17384_v4, %v17446_v43  ;;  %v8124_v11 = vrot.slane %v17381_v10, %v17113_v52 }
 0x5ec   : > { %8362 = vmatpush1.bf16.msra.mxu1 %v8304_v6  ;;  %v8348_v48 = vsel %vm8346_vm0, %v8316_v42, 0  ;;  %v8151_v47 = vrot.slane %v17384_v4, %v17113_v52  ;;  %v8182_v17 = vrot.slane %v17399_v58, %v17446_v43  ;;  %v8209_v44 = vrot.slane %v17402_v35, %v17446_v43 }
 0x5ed   : > { %8363 = vmatprep.subr.bf16.mxu1 %v8309_v9  ;;  %v8205_v10 = vrot.slane %v17402_v35, %v17113_v52  ;;  %v8259_v35 = vrot.slane %v17416_v23, %v17113_v52 }
 0x5f0   : > { %8364 = vmatpush1.bf16.msra.mxu1 %v8308_v22 }
 0x5f1   : > { %8365 = vmatprep.subr.bf16.mxu1 %v8313_v38  ;;  %v8178_v38 = vrot.slane %v17399_v58, %v17113_v52  ;;  %v8232_v58 = vrot.slane %v17413_v14, %v17113_v52 }
 0x5f4   : > { %8366 = vmatpush1.bf16.msra.mxu1 %v8312_v41  ;;  %v8236_v41 = vrot.slane %v17413_v14, %v17446_v43 }
 0x5f5   : > { %13149 = vmatprep.subr.msk.bf16.mxu1 %vm8346_vm0, %v8317_v45 }
 0x5f8   : > { %8368 = vmatpush1.bf16.msra.mxu1 %v8348_v48 }
 0x5fb   : > { %13150 = vmatmul.mubr.msk.bf16.vlgmr.msra.gmra.mrb[64].mxu1 %vm8342_vm1, %v17440_v51 }
 0x5fc   : > { %8432 = vmatprep.mubr.bf16.mxu1 %v15995_v37 }
 0x63b   : > { %v8042_v21 = vpop.f32.mrb[60].mxu1 }
 0x63c   : > { %v14280_v7 = vadd.f32 %v8042_v21, %v7396_v27  ;;  %v8044_v59 = vpop.f32.mrb[61].mxu1  ;;  %v8263_v27 = vrot.slane %v17416_v23, %v17446_v43 }
 0x63d   : > { %v14281_v62 = vadd.f32 %v8044_v59, %v7400_v57  ;;  %v8046_v54 = vpop.f32.mrb[62].mxu1  ;;  %v8290_v59 = vrot.slane %v17427_v39, %v17446_v43 }
 0x63e   : > { %v8051_v63 = vmax.f32 %v14280_v7, 0.0  ;;  %v8047_v2 = vpop.f32.mrb[63].mxu1 }
 0x63f   : > { %v8052_v13 = vmax.f32 %v14281_v62, 0.0  ;;  %v8286_v2 = vrot.slane %v17427_v39, %v17113_v52  ;;  %v15512_v39 = vld [vmem:[%s18610_s16 + $0x4] ss:$8 sps:$4 sm:$0xff]  }
 0x640   : > { %v8055_v6 = vmin.f32 %v8051_v63, 6.0 }
 0x641   : > { %v8056_v25 = vmin.f32 %v8052_v13, 6.0 }
 0x642   : > { %v8081_v12 = vmul.f32 %v8070_v46, %v8055_v6  ;;  %v8108_v9 = vmul.f32 %v8097_v0, %v8055_v6  ;;  %v8135_v40 = vmul.f32 %v8124_v11, %v8055_v6  ;;  %v8162_v30 = vmul.f32 %v8151_v47, %v8055_v6  ;;  %v15513_v47 = vld [vmem:[%s18610_s16 + $0x10] ss:$8 sps:$4 sm:$0xff]  }
 0x643   : > { %v8082_v18 = vmul.f32 %v8074_v24, %v8056_v25  ;;  %v8109_v20 = vmul.f32 %v8101_v8, %v8056_v25  ;;  %v8136_v22 = vmul.f32 %v8128_v60, %v8056_v25  ;;  %v8163_v55 = vmul.f32 %v8155_v5, %v8056_v25 }
 0x644   : > { %v8302_v4 = vpack.c.bf16 %v8108_v9, %v8081_v12  ;;  %v8190_v42 = vmul.f32 %v8182_v17, %v8056_v25  ;;  %v8217_v48 = vmul.f32 %v8209_v44, %v8056_v25  ;;  %v8306_v57 = vpack.c.bf16 %v8162_v30, %v8135_v40  ;;  %v15518_v12 = vld [vmem:[%s18610_s16 + $0x24] ss:$8 sps:$4 sm:$0xff]   ;;  %v15516_v9 = vld [vmem:[%s18610_s16 + $0x20] ss:$8 sps:$4 sm:$0xff]   ;;  %v15521_v17 = vld [vmem:[%s18610_s16 + $0x34] ss:$8 sps:$4 sm:$0xff]  }
 0x645   : > { %v8303_v33 = vpack.c.bf16 %v8109_v20, %v8082_v18  ;;  %v8307_v45 = vpack.c.bf16 %v8163_v55, %v8136_v22  ;;  %v8189_v21 = vmul.f32 %v8178_v38, %v8055_v6  ;;  %v8216_v7 = vmul.f32 %v8205_v10, %v8055_v6  ;;  %v15519_v44 = vld [vmem:[%s18610_s16 + $0x30] ss:$8 sps:$4 sm:$0xff]   ;;  %v15524_v18 = vld [vmem:[%s18610_s16 + $0x44] ss:$8 sps:$4 sm:$0xff]   ;;  %v15522_v20 = vld [vmem:[%s18610_s16 + $0x40] ss:$8 sps:$4 sm:$0xff]  }
 0x646   : > { %v8311_v62 = vpack.c.bf16 %v8217_v48, %v8190_v42  ;;  %v8244_v54 = vmul.f32 %v8236_v41, %v8056_v25  ;;  %v8271_v63 = vmul.f32 %v8263_v27, %v8056_v25  ;;  %v8243_v14 = vmul.f32 %v8232_v58, %v8055_v6  ;;  %v15527_v22 = vld [vmem:[%s18610_s16 + $0x54] ss:$8 sps:$4 sm:$0xff]   ;;  %v15525_v55 = vld [vmem:[%s18610_s16 + $0x50] ss:$8 sps:$4 sm:$0xff]   ;;  %v15528_v38 = vld [vmem:[%s18610_s16 + $0x60] ss:$8 sps:$4 sm:$0xff]  }
 0x647   : > { %8400 = vmatprep.subr.bf16.mxu1 %v8303_v33  ;;  %v8310_v24 = vpack.c.bf16 %v8216_v7, %v8189_v21  ;;  %v8270_v46 = vmul.f32 %v8259_v35, %v8055_v6  ;;  %v8298_v0 = vmul.f32 %v8290_v59, %v8056_v25  ;;  %v8297_v13 = vmul.f32 %v8286_v2, %v8055_v6  ;;  %v15510_v25 = vld [vmem:[%s18610_s16] ss:$8 sps:$4 sm:$0xff]   ;;  %v15515_v6 = vld [vmem:[%s18610_s16 + $0x14] ss:$8 sps:$4 sm:$0xff]   ;;  %v15530_v33 = vld [vmem:[%s18610_s16 + $0x64] ss:$8 sps:$4 sm:$0xff]  }
 0x648   : > { %8401 = vmatpush1.bf16.msra.mxu1 %v8302_v4  ;;  %v8315_v23 = vpack.c.bf16 %v8271_v63, %v8244_v54  ;;  %v15533_v10 = vld [vmem:[%s18610_s16 + $0x74] ss:$8 sps:$4 sm:$0xff]   ;;  %v15531_v4 = vld [vmem:[%s18610_s16 + $0x70] ss:$8 sps:$4 sm:$0xff]   ;;  %v15536_v40 = vld [vmem:[%s18610_s16 + $0x84] ss:$8 sps:$4 sm:$0xff]  }
 0x649   : > { %8402 = vmatprep.subr.bf16.mxu1 %v8307_v45  ;;  %v8314_v8 = vpack.c.bf16 %v8270_v46, %v8243_v14  ;;  %v8319_v60 = vpack.c.bf16 %v8298_v0, %v8298_v0  ;;  %v8318_v5 = vpack.c.bf16 %v8297_v13, %v8297_v13  ;;  %v15534_v30 = vld [vmem:[%s18610_s16 + $0x80] ss:$8 sps:$4 sm:$0xff]   ;;  %v15539_v41 = vld [vmem:[%s18610_s16 + $0x94] ss:$8 sps:$4 sm:$0xff]   ;;  %v15537_v45 = vld [vmem:[%s18610_s16 + $0x90] ss:$8 sps:$4 sm:$0xff]  }
 0x64a   : > { %v15542_v42 = vld [vmem:[%s18610_s16 + $0xa4] ss:$8 sps:$4 sm:$0xff]   ;;  %v15540_v48 = vld [vmem:[%s18610_s16 + $0xa0] ss:$8 sps:$4 sm:$0xff]   ;;  %v15545_v27 = vld [vmem:[%s18610_s16 + $0xb4] ss:$8 sps:$4 sm:$0xff]  }
 0x64b   : > { %v8354_v11 = vsel %vm8346_vm0, %v8318_v5, 0  ;;  %v15543_v58 = vld [vmem:[%s18610_s16 + $0xb0] ss:$8 sps:$4 sm:$0xff]   ;;  %v15548_v35 = vld [vmem:[%s18610_s16 + $0xc4] ss:$8 sps:$4 sm:$0xff]  }
 0x64c   : > { %8403 = vmatpush1.bf16.msra.mxu1 %v8306_v57  ;;  %v15546_v57 = vld [vmem:[%s18610_s16 + $0xc0] ss:$8 sps:$4 sm:$0xff]   ;;  %v15551_v21 = vld [vmem:[%s18610_s16 + $0xd4] ss:$8 sps:$4 sm:$0xff]   ;;  %v15549_v7 = vld [vmem:[%s18610_s16 + $0xd0] ss:$8 sps:$4 sm:$0xff]  }
 0x64d   : > { %8404 = vmatprep.subr.bf16.mxu1 %v8311_v62  ;;  %v15554_v59 = vld [vmem:[%s18610_s16 + $0xe4] ss:$8 sps:$4 sm:$0xff]   ;;  %v15552_v62 = vld [vmem:[%s18610_s16 + $0xe0] ss:$8 sps:$4 sm:$0xff]   ;;  %v15557_v54 = vld [vmem:[%s18610_s16 + $0xf4] ss:$8 sps:$4 sm:$0xff]  }
 0x64e   : > { %v15555_v63 = vld [vmem:[%s18610_s16 + $0xf0] ss:$8 sps:$4 sm:$0xff]   ;;  %v15560_v2 = vld [vmem:[%s18610_s16 + $0x104] ss:$8 sps:$4 sm:$0xff]  }
 0x650   : > { %8405 = vmatpush1.bf16.msra.mxu1 %v8310_v24  ;;  %v17526_v24 = vld [vmem:[%s18611_s23] sm:$0xf]  ;;  %s18617_s23 = smov %s18616_s28 }
 0x651   : > { %8406 = vmatprep.subr.bf16.mxu1 %v8315_v23  ;;  %v8325_v14 = vrot.slane %v17526_v24, %v17284_v3  ;;  %v8329_v46 = vrot.slane %v17526_v24, %v17287_v1  ;;  %v15643_v31 = vld [vmem:[%s18617_s23 + $0x40] ss:$8 sps:$4 sm:$0xff]   ;;  %v15648_v32 = vld [vmem:[%s18617_s23 + $0x54] ss:$8 sps:$4 sm:$0xff]  }
 0x654   : > { %8407 = vmatpush1.bf16.msra.mxu1 %v8314_v8 }
 0x655   : > { %13151 = vmatprep.subr.msk.bf16.mxu1 %vm8346_vm0, %v8319_v60 }
 0x658   : > { %8409 = vmatpush1.bf16.msra.mxu1 %v8354_v11 }
 0x659   : > { %8849 = vmatprep.subr.bf16.mxu1 %v15512_v39 }
 0x65b   : > { %13152 = vmatmul.mubr.msk.bf16.vlgmr.msra.gmra.mrb[68].mxu1 %vm8342_vm1, %v17440_v51 }
 0x65c   : > { %8850 = vmatpush1.bf16.msra.mxu1 %v15510_v25 }
 0x65d   : > { %8851 = vmatprep.subr.bf16.mxu1 %v15515_v6 }
 0x660   : > { %8852 = vmatpush1.bf16.msra.mxu1 %v15513_v47 }
 0x661   : > { %8853 = vmatprep.subr.bf16.mxu1 %v15518_v12 }
 0x664   : > { %8854 = vmatpush1.bf16.msra.mxu1 %v15516_v9  ;;  %v15558_v9 = vld [vmem:[%s18610_s16 + $0x100] ss:$8 sps:$4 sm:$0xff]  }
 0x665   : > { %8855 = vmatprep.subr.bf16.mxu1 %v15521_v17  ;;  %v15563_v17 = vld [vmem:[%s18610_s16 + $0x114] ss:$8 sps:$4 sm:$0xff]  }
 0x668   : > { %8856 = vmatpush1.bf16.msra.mxu1 %v15519_v44  ;;  %v15561_v44 = vld [vmem:[%s18610_s16 + $0x110] ss:$8 sps:$4 sm:$0xff]  }
 0x669   : > { %8857 = vmatprep.subr.bf16.mxu1 %v15524_v18  ;;  %v15566_v18 = vld [vmem:[%s18610_s16 + $0x124] ss:$8 sps:$4 sm:$0xff]  }
 0x66c   : > { %8858 = vmatpush1.bf16.msra.mxu1 %v15522_v20  ;;  %v15564_v20 = vld [vmem:[%s18610_s16 + $0x120] ss:$8 sps:$4 sm:$0xff]  }
 0x66d   : > { %8859 = vmatprep.subr.bf16.mxu1 %v15527_v22  ;;  %v15569_v22 = vld [vmem:[%s18610_s16 + $0x134] ss:$8 sps:$4 sm:$0xff]  }
 0x670   : > { %8860 = vmatpush1.bf16.msra.mxu1 %v15525_v55  ;;  %v15567_v55 = vld [vmem:[%s18610_s16 + $0x130] ss:$8 sps:$4 sm:$0xff]  }
 0x671   : > { %8861 = vmatprep.subr.bf16.mxu1 %v15530_v33  ;;  %v15572_v33 = vld [vmem:[%s18610_s16 + $0x144] ss:$8 sps:$4 sm:$0xff]  }
 0x674   : > { %8862 = vmatpush1.bf16.msra.mxu1 %v15528_v38  ;;  %v15570_v38 = vld [vmem:[%s18610_s16 + $0x140] ss:$8 sps:$4 sm:$0xff]  }
 0x675   : > { %8863 = vmatprep.subr.bf16.mxu1 %v15533_v10  ;;  %v15575_v10 = vld [vmem:[%s18610_s16 + $0x154] ss:$8 sps:$4 sm:$0xff]  }
 0x678   : > { %8864 = vmatpush1.bf16.msra.mxu1 %v15531_v4  ;;  %v15573_v4 = vld [vmem:[%s18610_s16 + $0x150] ss:$8 sps:$4 sm:$0xff]  }
 0x679   : > { %8865 = vmatprep.subr.bf16.mxu1 %v15536_v40  ;;  %v15578_v40 = vld [vmem:[%s18610_s16 + $0x164] ss:$8 sps:$4 sm:$0xff]  }
 0x67c   : > { %8866 = vmatpush1.bf16.msra.mxu1 %v15534_v30  ;;  %v15576_v30 = vld [vmem:[%s18610_s16 + $0x160] ss:$8 sps:$4 sm:$0xff]  }
 0x67d   : > { %8867 = vmatprep.subr.bf16.mxu1 %v15539_v41  ;;  %v15581_v41 = vld [vmem:[%s18610_s16 + $0x174] ss:$8 sps:$4 sm:$0xff]  }
 0x680   : > { %8868 = vmatpush1.bf16.msra.mxu1 %v15537_v45  ;;  %v15579_v45 = vld [vmem:[%s18610_s16 + $0x170] ss:$8 sps:$4 sm:$0xff]  }
 0x681   : > { %8869 = vmatprep.subr.bf16.mxu1 %v15542_v42  ;;  %v15584_v42 = vld [vmem:[%s18610_s16 + $0x184] ss:$8 sps:$4 sm:$0xff]  }
 0x684   : > { %8870 = vmatpush1.bf16.msra.mxu1 %v15540_v48  ;;  %v15582_v48 = vld [vmem:[%s18610_s16 + $0x180] ss:$8 sps:$4 sm:$0xff]  }
 0x685   : > { %8871 = vmatprep.subr.bf16.mxu1 %v15545_v27  ;;  %v15587_v27 = vld [vmem:[%s18610_s16 + $0x194] ss:$8 sps:$4 sm:$0xff]  }
 0x688   : > { %8872 = vmatpush1.bf16.msra.mxu1 %v15543_v58  ;;  %v15585_v58 = vld [vmem:[%s18610_s16 + $0x190] ss:$8 sps:$4 sm:$0xff]  }
 0x689   : > { %8873 = vmatprep.subr.bf16.mxu1 %v15548_v35  ;;  %v15590_v35 = vld [vmem:[%s18610_s16 + $0x1a4] ss:$8 sps:$4 sm:$0xff]  }
 0x68c   : > { %8874 = vmatpush1.bf16.msra.mxu1 %v15546_v57  ;;  %v15588_v57 = vld [vmem:[%s18610_s16 + $0x1a0] ss:$8 sps:$4 sm:$0xff]  }
 0x68d   : > { %8875 = vmatprep.subr.bf16.mxu1 %v15551_v21  ;;  %v15593_v21 = vld [vmem:[%s18610_s16 + $0x1b4] ss:$8 sps:$4 sm:$0xff]  }
 0x690   : > { %8876 = vmatpush1.bf16.msra.mxu1 %v15549_v7  ;;  %v15591_v7 = vld [vmem:[%s18610_s16 + $0x1b0] ss:$8 sps:$4 sm:$0xff]  }
 0x691   : > { %8877 = vmatprep.subr.bf16.mxu1 %v15554_v59  ;;  %v15596_v59 = vld [vmem:[%s18610_s16 + $0x1c4] ss:$8 sps:$4 sm:$0xff]  }
 0x694   : > { %8878 = vmatpush1.bf16.msra.mxu1 %v15552_v62  ;;  %v15594_v62 = vld [vmem:[%s18610_s16 + $0x1c0] ss:$8 sps:$4 sm:$0xff]  }
 0x695   : > { %8879 = vmatprep.subr.bf16.mxu1 %v15557_v54  ;;  %v15599_v54 = vld [vmem:[%s18610_s16 + $0x1d4] ss:$8 sps:$4 sm:$0xff]  }
 0x698   : > { %8880 = vmatpush1.bf16.msra.mxu1 %v15555_v63  ;;  %v15597_v63 = vld [vmem:[%s18610_s16 + $0x1d0] ss:$8 sps:$4 sm:$0xff]  }
 0x699   : > { %8890 = vmatprep.subr.bf16.mxu1 %v15560_v2  ;;  %v15602_v2 = vld [vmem:[%s18610_s16 + $0x1e4] ss:$8 sps:$4 sm:$0xff]  }
 0x6ce   : > { %v8393_v23 = vpop.f32.mrb[64].mxu1 }
 0x6cf   : > { %v8394_v0 = vadd.f32 %v8393_v23, %v8325_v14  ;;  %v8395_v13 = vpop.f32.mrb[65].mxu1  ;;  %v15600_v14 = vld [vmem:[%s18610_s16 + $0x1e0] ss:$8 sps:$4 sm:$0xff]   ;;  %v15603_v23 = vld [vmem:[%s18610_s16 + $0x1f0] ss:$8 sps:$4 sm:$0xff]  }
 0x6d0   : > { %v8396_v8 = vadd.f32 %v8395_v13, %v8329_v46  ;;  %v8397_v60 = vpop.f32.mrb[66].mxu1  ;;  %v15605_v46 = vld [vmem:[%s18610_s16 + $0x1f4] ss:$8 sps:$4 sm:$0xff]   ;;  %v8337_v13 = vrot.slane %v17526_v24, %v17446_v43  ;;  %v8517_v43 = vld [vmem:[%s18612_s26] sm:$0x3]  ;;  %s18618_s26 = sld [smem:[#allocation26_spill]] }
 0x6d1   : > { %v8441_v5 = vmax.f32 %v8394_v0, 0.0  ;;  %v8398_v39 = vpop.f32.mrb[67].mxu1  ;;  %v8333_v0 = vrot.slane %v17526_v24, %v17113_v52  ;;  %v8522_v24 = vrot.slane %v8517_v43, %v17284_v3 }
 0x6d2   : > { %v8442_v11 = vmax.f32 %v8396_v8, 0.0 }
 0x6d3   : > { %v8445_v25 = vmin.f32 %v8441_v5, 6.0 }
 0x6d4   : > { %v8446_v6 = vmin.f32 %v8442_v11, 6.0 }
 0x6d5   : > { %v8449_v47 = vpack.c.bf16 %v8445_v25, %v8445_v25 }
 0x6d6   : > { %v8450_v12 = vpack.c.bf16 %v8446_v6, %v8446_v6 }
 0x6d8   : > { %8881 = vmatprep.mubr.bf16.mxu1 %v8450_v12 }
 0x6d9   : > { %8882 = vmatmul.mubr.bf16.vlgmr.msra.gmra.mrb[72].mxu1 %v8449_v47 }
 0x6da   : > { %8891 = vmatpush1.bf16.msra.mxu1 %v15558_v9 }
 0x6db   : > { %8892 = vmatprep.subr.bf16.mxu1 %v15563_v17 }
 0x6de   : > { %8893 = vmatpush1.bf16.msra.mxu1 %v15561_v44  ;;  %v8526_v44 = vrot.slane %v8517_v43, %v17287_v1 }
 0x6df   : > { %8894 = vmatprep.subr.bf16.mxu1 %v15566_v18 }
 0x6e2   : > { %8895 = vmatpush1.bf16.msra.mxu1 %v15564_v20  ;;  %v8935_v20 = vld [vmem:[%s18613_s10] sm:$0x3] }
 0x6e3   : > { %8896 = vmatprep.subr.bf16.mxu1 %v15569_v22  ;;  %v13217_v22 = vld [vmem:[%s18613_s10 + $0x2] sm:$0x3] }
 0x6e6   : > { %8897 = vmatpush1.bf16.msra.mxu1 %v15567_v55 }
 0x6e7   : > { %8898 = vmatprep.subr.bf16.mxu1 %v15572_v33 }
 0x6ea   : > { %8899 = vmatpush1.bf16.msra.mxu1 %v15570_v38  ;;  %v13218_v38 = vld [vmem:[%s18613_s10 + $0x4] sm:$0x3] }
 0x6eb   : > { %8900 = vmatprep.subr.bf16.mxu1 %v15575_v10 }
 0x6ee   : > { %8901 = vmatpush1.bf16.msra.mxu1 %v15573_v4 }
 0x6ef   : > { %8902 = vmatprep.subr.bf16.mxu1 %v15578_v40  ;;  %v13219_v40 = vld [vmem:[%s18613_s10 + $0x6] sm:$0x3] }
 0x6f2   : > { %8903 = vmatpush1.bf16.msra.mxu1 %v15576_v30 }
 0x6f3   : > { %8904 = vmatprep.subr.bf16.mxu1 %v15581_v41 }
 0x6f6   : > { %8905 = vmatpush1.bf16.msra.mxu1 %v15579_v45  ;;  %v8940_v45 = vrot.slane %v8935_v20, %v17284_v3 }
 0x6f7   : > { %8906 = vmatprep.subr.bf16.mxu1 %v15584_v42  ;;  %v8955_v42 = vrot.slane %v13217_v22, %v17284_v3 }
 0x6fa   : > { %8907 = vmatpush1.bf16.msra.mxu1 %v15582_v48  ;;  %v13220_v48 = vld [vmem:[%s18613_s10 + $0x8] sm:$0x3] }
 0x6fb   : > { %8908 = vmatprep.subr.bf16.mxu1 %v15587_v27 }
 0x6fe   : > { %8909 = vmatpush1.bf16.msra.mxu1 %v15585_v58  ;;  %v8944_v58 = vrot.slane %v8935_v20, %v17287_v1 }
 0x6ff   : > { %8910 = vmatprep.subr.bf16.mxu1 %v15590_v35  ;;  %v8959_v35 = vrot.slane %v13217_v22, %v17287_v1 }
 0x702   : > { %8911 = vmatpush1.bf16.msra.mxu1 %v15588_v57  ;;  %v8974_v57 = vrot.slane %v13218_v38, %v17287_v1 }
 0x703   : > { %8912 = vmatprep.subr.bf16.mxu1 %v15593_v21  ;;  %v13221_v21 = vld [vmem:[%s18613_s10 + $0xa] sm:$0x3] }
 0x706   : > { %8913 = vmatpush1.bf16.msra.mxu1 %v15591_v7 }
 0x707   : > { %8914 = vmatprep.subr.bf16.mxu1 %v15596_v59  ;;  %v8989_v59 = vrot.slane %v13219_v40, %v17287_v1 }
 0x70a   : > { %8915 = vmatpush1.bf16.msra.mxu1 %v15594_v62 }
 0x70b   : > { %8916 = vmatprep.subr.bf16.mxu1 %v15599_v54  ;;  %v8970_v54 = vrot.slane %v13218_v38, %v17284_v3 }
 0x70e   : > { %8917 = vmatpush1.bf16.msra.mxu1 %v15597_v63  ;;  %v8985_v63 = vrot.slane %v13219_v40, %v17284_v3 }
 0x70f   : > { %8918 = vmatprep.subr.bf16.mxu1 %v15602_v2  ;;  %v9004_v2 = vrot.slane %v13220_v48, %v17287_v1 }
 0x712   : > { %8919 = vmatpush1.bf16.msra.mxu1 %v15600_v14 }
 0x713   : > { %8920 = vmatprep.subr.bf16.mxu1 %v15605_v46 }
 0x716   : > { %8921 = vmatpush1.bf16.msra.mxu1 %v15603_v23 }
 0x72e   : > { %v8434_v8 = vpop.f32.mrb[68].mxu1 }
 0x72f   : > { %v8435_v60 = vadd.f32 %v8434_v8, %v8333_v0  ;;  %v8436_v5 = vpop.f32.mrb[69].mxu1  ;;  %v9019_v0 = vrot.slane %v13221_v21, %v17287_v1 }
 0x730   : > { %v8437_v39 = vadd.f32 %v8436_v5, %v8337_v13  ;;  %v8438_v11 = vpop.f32.mrb[70].mxu1  ;;  %v13222_v13 = vld [vmem:[%s18613_s10 + $0xc] sm:$0x3] }
 0x731   : > { %v8443_v25 = vmax.f32 %v8435_v60, 0.0  ;;  %v8439_v6 = vpop.f32.mrb[71].mxu1  ;;  %v15609_v11 = vld [vmem:[%s18614_s11 + $0x4] ss:$8 sps:$4 sm:$0xff]   ;;  %v9034_v43 = vrot.slane %v13222_v13, %v17287_v1  ;;  %v9030_v40 = vrot.slane %v13222_v13, %v17284_v3 }
 0x732   : > { %v8444_v47 = vmax.f32 %v8437_v39, 0.0 }
 0x733   : > { %v8447_v12 = vmin.f32 %v8443_v25, 6.0  ;;  %v13223_v25 = vld [vmem:[%s18613_s10 + $0xe] sm:$0x3] }
 0x734   : > { %v8448_v9 = vmin.f32 %v8444_v47, 6.0  ;;  %v9049_v22 = vrot.slane %v13223_v25, %v17287_v1 }
 0x735   : > { %v8451_v52 = vpack.c.bf16 %v8447_v12, %v8447_v12  ;;  %v9000_v12 = vrot.slane %v13220_v48, %v17284_v3 }
 0x736   : > { %v8452_v17 = vpack.c.bf16 %v8448_v9, %v8448_v9 }
 0x738   : > { %8922 = vmatprep.mubr.bf16.mxu1 %v8452_v17  ;;  %v15606_v17 = vld [vmem:[%s18615_s15] sm:$0xff]   ;;  %s18619_s15 = sld [smem:[#allocation25_spill]] }
 0x739   : > { %8923 = vmatmul.mubr.bf16.vlgmr.msra.gmra.mrb[72].mxu1 %v8451_v52  ;;  %v9015_v52 = vrot.slane %v13221_v21, %v17284_v3  ;;  %v15615_v21 = vld [vmem:[%s18614_s11 + $0x24] ss:$8 sps:$4 sm:$0xff]  }
 0x73a   : > { %9129 = vmatprep.mubr.bf16.mxu1 %v15995_v37 }
 0x80c   : > { %v8924_v18 = vpop.f32.mrb[72].mxu1 }
 0x80d   : > { %v14282_v55 = vadd.f32 %v8924_v18, %v8522_v24  ;;  %v8926_v33 = vpop.f32.mrb[73].mxu1 }
 0x80e   : > { %v14283_v10 = vadd.f32 %v8926_v33, %v8526_v44  ;;  %v8928_v4 = vpop.f32.mrb[74].mxu1  ;;  %v15607_v44 = vld [vmem:[%s18614_s11] ss:$8 sps:$4 sm:$0xff]  }
 0x80f   : > { %v8931_v30 = vmax.f32 %v14282_v55, 0.0  ;;  %v8929_v41 = vpop.f32.mrb[75].mxu1  ;;  %v13224_v55 = vld [vmem:[%s18613_s10 + $0x10] sm:$0x3]  ;;  %v15612_v4 = vld [vmem:[%s18614_s11 + $0x14] ss:$8 sps:$4 sm:$0xff]  }
 0x810   : > { %v8932_v27 = vmax.f32 %v14283_v10, 0.0  ;;  %v9064_v41 = vrot.slane %v13224_v55, %v17287_v1  ;;  %s15998_s10 = smov [#allocation8]  }
 0x811   : > { %v17582_v7 = vmin.f32 %v8931_v30, 6.0  ;;  %v9045_v30 = vrot.slane %v13223_v25, %v17284_v3  ;;  %v15624_v25 = vld [vmem:[%s18614_s11 + $0x54] ss:$8 sps:$4 sm:$0xff]  }
 0x812   : > { %v17585_v62 = vmin.f32 %v8932_v27, 6.0 }
 0x813   : > { %v9322_v14 = vpack.c.bf16 %v17582_v7, %v17582_v7  ;;  %v8947_v46 = vmul.f32 %v8940_v45, %v17582_v7  ;;  %v8962_v23 = vmul.f32 %v8955_v42, %v17582_v7  ;;  %v8977_v18 = vmul.f32 %v8970_v54, %v17582_v7  ;;  %v15610_v42 = vld [vmem:[%s18614_s11 + $0x10] ss:$8 sps:$4 sm:$0xff]  }
 0x814   : > { %v9323_v8 = vpack.c.bf16 %v17585_v62, %v17585_v62  ;;  %v8948_v60 = vmul.f32 %v8944_v58, %v17585_v62  ;;  %v8963_v5 = vmul.f32 %v8959_v35, %v17585_v62  ;;  %v8978_v39 = vmul.f32 %v8974_v57, %v17585_v62 }
 0x815   : > { %v9334_v6 = vsel %vm8346_vm0, %v9322_v14, 0  ;;  %v8993_v47 = vmul.f32 %v8989_v59, %v17585_v62  ;;  %v9069_v24 = vpack.c.bf16 %v8962_v23, %v8947_v46  ;;  %v8992_v20 = vmul.f32 %v8985_v63, %v17582_v7  ;;  %v15613_v63 = vld [vmem:[%s18614_s11 + $0x20] ss:$8 sps:$4 sm:$0xff]  }
 0x816   : > { %13245 = vmatprep.subr.msk.bf16.mxu0 %vm8346_vm0, %v9323_v8  ;;  %v9070_v9 = vpack.c.bf16 %v8963_v5, %v8948_v60  ;;  %v9008_v38 = vmul.f32 %v9004_v2, %v17585_v62  ;;  %v9023_v10 = vmul.f32 %v9019_v0, %v17585_v62  ;;  %v9007_v48 = vmul.f32 %v9000_v12, %v17582_v7  ;;  %v15618_v0 = vld [vmem:[%s18614_s11 + $0x34] ss:$8 sps:$4 sm:$0xff]   ;;  %v15616_v60 = vld [vmem:[%s18614_s11 + $0x30] ss:$8 sps:$4 sm:$0xff]   ;;  %v15625_v12 = vld [vmem:[%s18614_s11 + $0x60] ss:$8 sps:$4 sm:$0xff]  }
 0x817   : > { %9340 = vmatpush1.bf16.msra.mxu0 %v9334_v6  ;;  %v9072_v33 = vpack.c.bf16 %v8993_v47, %v8978_v39  ;;  %v9071_v45 = vpack.c.bf16 %v8992_v20, %v8977_v18  ;;  %v9022_v27 = vmul.f32 %v9015_v52, %v17582_v7  ;;  %v9038_v35 = vmul.f32 %v9034_v43, %v17585_v62  ;;  %v15622_v6 = vld [vmem:[%s18614_s11 + $0x50] ss:$8 sps:$4 sm:$0xff]   ;;  %v15627_v47 = vld [vmem:[%s18614_s11 + $0x64] ss:$8 sps:$4 sm:$0xff]   ;;  %v15631_v43 = vld [vmem:[%s18617_s23] ss:$8 sps:$4 sm:$0xff]  }
 0x818   : > { %9097 = vmatprep.subr.bf16.mxu1 %v9070_v9  ;;  %9525 = vmatprep.subr.bf16.mxu0 %v15609_v11  ;;  %v9074_v58 = vpack.c.bf16 %v9023_v10, %v9008_v38  ;;  %v9053_v57 = vmul.f32 %v9049_v22, %v17585_v62  ;;  %v9060_v59 = vrot.slane %v13224_v55, %v17284_v3  ;;  %v15621_v11 = vld [vmem:[%s18614_s11 + $0x44] ss:$8 sps:$4 sm:$0xff]   ;;  %v15630_v9 = vld [vmem:[%s18614_s11 + $0x74] ss:$8 sps:$4 sm:$0xff]   ;;  %v15637_v18 = vld [vmem:[%s18617_s23 + $0x20] ss:$8 sps:$4 sm:$0xff]  }
 0x819   : > { %9098 = vmatpush1.bf16.msra.mxu1 %v9069_v24  ;;  %v9073_v54 = vpack.c.bf16 %v9022_v27, %v9007_v48  ;;  %v9037_v2 = vmul.f32 %v9030_v40, %v17582_v7  ;;  %v9052_v14 = vmul.f32 %v9045_v30, %v17582_v7  ;;  %v9068_v23 = vmul.f32 %v9064_v41, %v17585_v62  ;;  %v15633_v52 = vld [vmem:[%s18616_s28 + $0x4] ss:$8 sps:$4 sm:$0xff]   ;;  %v15636_v24 = vld [vmem:[%s18617_s23 + $0x14] ss:$8 sps:$4 sm:$0xff]   ;;  %v15640_v22 = vld [vmem:[%s18617_s23 + $0x30] ss:$8 sps:$4 sm:$0xff]  }
 0x81a   : > { %9099 = vmatprep.subr.bf16.mxu1 %v9072_v33  ;;  %13246 = vmatmul.mubr.msk.bf16.vlgmr.msra.gmra.mrb[24].mxu0 %vm9329_vm2, %v15606_v17  ;;  %v9076_v46 = vpack.c.bf16 %v9053_v57, %v9038_v35  ;;  %v9067_v13 = vmul.f32 %v9060_v59, %v17582_v7  ;;  %v15619_v7 = vld [vmem:[%s18614_s11 + $0x40] ss:$8 sps:$4 sm:$0xff]   ;;  %v15628_v17 = vld [vmem:[%s18614_s11 + $0x70] ss:$8 sps:$4 sm:$0xff]   ;;  %v15642_v20 = vld [vmem:[%s18617_s23 + $0x34] ss:$8 sps:$4 sm:$0xff]  }
 0x81b   : > { %9526 = vmatpush1.bf16.msra.mxu0 %v15607_v44  ;;  %9557 = vmatprep.mubr.bf16.mxu0 %v15995_v37  ;;  %v9075_v8 = vpack.c.bf16 %v9052_v14, %v9037_v2  ;;  %v9078_v5 = vpack.c.bf16 %v9068_v23, %v9068_v23  ;;  %v15639_v44 = vld [vmem:[%s18617_s23 + $0x24] ss:$8 sps:$4 sm:$0xff]   ;;  %v15649_v38 = vld [vmem:[%s18617_s23 + $0x60] ss:$8 sps:$4 sm:$0xff]   ;;  %v15654_v10 = vld [vmem:[%s18617_s23 + $0x74] ss:$8 sps:$4 sm:$0xff]  }
 0x81c   : > { %9527 = vmatprep.subr.bf16.mxu0 %v15612_v4  ;;  %v9077_v39 = vpack.c.bf16 %v9067_v13, %v9067_v13  ;;  %v15645_v55 = vld [vmem:[%s18617_s23 + $0x44] ss:$8 sps:$4 sm:$0xff]   ;;  %v15652_v4 = vld [vmem:[%s18617_s23 + $0x70] ss:$8 sps:$4 sm:$0xff]   ;;  %v15655_v30 = vld [vmem:[%s18617_s23 + $0x80] ss:$8 sps:$4 sm:$0xff]  }
 0x81d   : > { %9100 = vmatpush1.bf16.msra.mxu1 %v9071_v45  ;;  %v15651_v33 = vld [vmem:[%s18617_s23 + $0x64] ss:$8 sps:$4 sm:$0xff]   ;;  %v15660_v41 = vld [vmem:[%s18617_s23 + $0x94] ss:$8 sps:$4 sm:$0xff]   ;;  %v15658_v45 = vld [vmem:[%s18617_s23 + $0x90] ss:$8 sps:$4 sm:$0xff]  }
 0x81e   : > { %9101 = vmatprep.subr.bf16.mxu1 %v9074_v58  ;;  %v9092_v62 = vsel %vm8346_vm0, %v9077_v39, 0  ;;  %v15657_v40 = vld [vmem:[%s18617_s23 + $0x84] ss:$8 sps:$4 sm:$0xff]   ;;  %v15661_v48 = vld [vmem:[%s18617_s23 + $0xa0] ss:$8 sps:$4 sm:$0xff]   ;;  %v15686_v39 = vld [vmem:[%s18618_s26 + $0x18] sm:$0xff]  }
 0x81f   : > { %9528 = vmatpush1.bf16.msra.mxu0 %v15610_v42  ;;  %v15663_v42 = vld [vmem:[%s18617_s23 + $0xa4] ss:$8 sps:$4 sm:$0xff]   ;;  %v15666_v27 = vld [vmem:[%s18617_s23 + $0xb4] ss:$8 sps:$4 sm:$0xff]   ;;  %v15664_v58 = vld [vmem:[%s18617_s23 + $0xb0] ss:$8 sps:$4 sm:$0xff]  }
 0x820   : > { %9529 = vmatprep.subr.bf16.mxu0 %v15615_v21  ;;  %v15669_v35 = vld [vmem:[%s18617_s23 + $0xc4] ss:$8 sps:$4 sm:$0xff]   ;;  %v15667_v57 = vld [vmem:[%s18617_s23 + $0xc0] ss:$8 sps:$4 sm:$0xff]   ;;  %v15672_v21 = vld [vmem:[%s18617_s23 + $0xd4] ss:$8 sps:$4 sm:$0xff]  }
 0x821   : > { %9102 = vmatpush1.bf16.msra.mxu1 %v9073_v54  ;;  %v15670_v59 = vld [vmem:[%s18617_s23 + $0xd0] ss:$8 sps:$4 sm:$0xff]   ;;  %v15675_v54 = vld [vmem:[%s18617_s23 + $0xe4] ss:$8 sps:$4 sm:$0xff]   ;;  %v15678_v2 = vld [vmem:[%s18617_s23 + $0xf4] ss:$8 sps:$4 sm:$0xff]  }
 0x822   : > { %9103 = vmatprep.subr.bf16.mxu1 %v9076_v46  ;;  %v15676_v14 = vld [vmem:[%s18617_s23 + $0xf0] ss:$8 sps:$4 sm:$0xff]   ;;  %v15679_v46 = vld [vmem:[%s18618_s26 + $0x40] sm:$0xff]   ;;  %v15682_v13 = vld [vmem:[%s18618_s26 + $0x8] sm:$0xff]   ;;  %s18620_s28 = sld [smem:[#allocation17_spill]]  ;;  %s15876_s11 = sshll.u32 %s15998_s10, 4  ;;  %s15877_s11 = int_to_ptr.vmem [resolvable:$false] %s15876_s11 }
 0x823   : > { %9530 = vmatpush1.bf16.msra.mxu0 %v15613_v63  ;;  %v15673_v63 = vld [vmem:[%s18617_s23 + $0xe0] ss:$8 sps:$4 sm:$0xff]  }
 0x824   : > { %9531 = vmatprep.subr.bf16.mxu0 %v15618_v0  ;;  %v15680_v23 = vld [vmem:[%s18618_s26] sm:$0xff]   ;;  %v15681_v0 = vld [vmem:[%s18618_s26 + $0x48] sm:$0xff]  }
 0x825   : > { %9104 = vmatpush1.bf16.msra.mxu1 %v9075_v8  ;;  %v15683_v8 = vld [vmem:[%s18618_s26 + $0x50] sm:$0xff]  }
 0x826   : > { %13225 = vmatprep.subr.msk.bf16.mxu1 %vm8346_vm0, %v9078_v5  ;;  %v15685_v5 = vld [vmem:[%s18618_s26 + $0x58] sm:$0xff]  }
 0x827   : > { %9532 = vmatpush1.bf16.msra.mxu0 %v15616_v60  ;;  %v15684_v60 = vld [vmem:[%s18618_s26 + $0x10] sm:$0xff]  }
 0x828   : > { %9533 = vmatprep.subr.bf16.mxu0 %v15621_v11  ;;  %v15687_v11 = vld [vmem:[%s18618_s26 + $0x60] sm:$0xff]   ;;  %s18621_s18 = smov %s18620_s28 }
 0x829   : > { %9106 = vmatpush1.bf16.msra.mxu1 %v9092_v62 }
 0x82a   : > { %13836 = vmatprep.subr.bf16.mxu1 %v15679_v46 }
 0x82b   : > { %9534 = vmatpush1.bf16.msra.mxu0 %v15619_v7  ;;  %v15688_v7 = vld [vmem:[%s18618_s26 + $0x20] sm:$0xff]  }
 0x82c   : > { %9535 = vmatprep.subr.bf16.mxu0 %v15624_v25  ;;  %13226 = vmatmul.mubr.msk.bf16.vlgmr.msra.gmra.mrb[76].mxu1 %vm8342_vm1, %v17440_v51  ;;  %v15634_v51 = vld [vmem:[%s18617_s23 + $0x10] ss:$8 sps:$4 sm:$0xff]  }
 0x82d   : > { %13837 = vmatpush3.bf16.msra.mxu1 %v15680_v23 }
 0x82e   : > { %13838 = vmatprep.subr.bf16.mxu1 %v15681_v0 }
 0x82f   : > { %9536 = vmatpush1.bf16.msra.mxu0 %v15622_v6 }
 0x830   : > { %9537 = vmatprep.subr.bf16.mxu0 %v15627_v47 }
 0x831   : > { %13839 = vmatpush3.bf16.msra.mxu1 %v15682_v13 }
 0x832   : > { %13840 = vmatprep.subr.bf16.mxu1 %v15683_v8 }
 0x833   : > { %9538 = vmatpush1.bf16.msra.mxu0 %v15625_v12 }
 0x834   : > { %9539 = vmatprep.subr.bf16.mxu0 %v15630_v9 }
 0x835   : > { %13841 = vmatpush3.bf16.msra.mxu1 %v15684_v60 }
 0x836   : > { %13842 = vmatprep.subr.bf16.mxu1 %v15685_v5 }
 0x837   : > { %9540 = vmatpush1.bf16.msra.mxu0 %v15628_v17  ;;  %v15689_v17 = vld [vmem:[%s18618_s26 + $0x68] sm:$0xff]  }
 0x838   : > { %9728 = vmatprep.subr.bf16.mxu0 %v15633_v52  ;;  %v15690_v52 = vld [vmem:[%s18618_s26 + $0x28] sm:$0xff]  }
 0x839   : > { %13843 = vmatpush3.bf16.msra.mxu1 %v15686_v39 }
 0x83a   : > { %9558 = vmatmul.mubr.bf16.vlgmr.msra.gmra.mrb[28].mxu0 %v9416_v34  ;;  %v15646_v34 = vld [vmem:[%s18617_s23 + $0x50] ss:$8 sps:$4 sm:$0xff]   ;;  %13844 = vmatprep.subr.bf16.mxu1 %v15687_v11 }
 0x83b   : > { %9729 = vmatpush1.bf16.msra.mxu0 %v15631_v43  ;;  %v9079_v43 = vld [vmem:[%s18619_s15] sm:$0x3]  ;;  %s18623_s15 = sld [smem:[#allocation31_spill]] }
 0x83c   : > { %9730 = vmatprep.subr.bf16.mxu0 %v15636_v24 }
 0x83d   : > { %13845 = vmatpush3.bf16.msra.mxu1 %v15688_v7 }
 0x83e   : > { %13846 = vmatprep.subr.bf16.mxu1 %v15689_v17 }
 0x83f   : > { %9731 = vmatpush1.bf16.msra.mxu0 %v15634_v51  ;;  %v9088_v51 = vrot.slane %v9079_v43, %v17287_v1 }
 0x840   : > { %9732 = vmatprep.subr.bf16.mxu0 %v15639_v44  ;;  %v9084_v44 = vrot.slane %v9079_v43, %v17284_v3 }
 0x841   : > { %13847 = vmatpush3.bf16.msra.mxu1 %v15690_v52  ;;  %v13299_v0 = vld [vmem:[%s18623_s15 + $0xa] sm:$0x3]  ;;  %v13300_v11 = vld [vmem:[%s18623_s15 + $0xc] sm:$0x3] }
 0x842   : > { %v9869_v43 = vrot.slane %v13299_v0, %v17284_v3 }
 0x843   : > { %9733 = vmatpush1.bf16.msra.mxu0 %v15637_v18 }
 0x844   : > { %9734 = vmatprep.subr.bf16.mxu0 %v15642_v20  ;;  %v15691_v20 = vld [vmem:[%s18618_s26 + $0x70] sm:$0xff]  }
 0x845   : > { %13848 = vmatprep.subr.bf16.mxu1 %v15691_v20  ;;  %v9886_v20 = vrot.slane %v13300_v11, %v17284_v3 }
 0x847   : > { %9735 = vmatpush1.bf16.msra.mxu0 %v15640_v22 }
 0x848   : > { %9736 = vmatprep.subr.bf16.mxu0 %v15645_v55 }
 0x84b   : > { %9737 = vmatpush1.bf16.msra.mxu0 %v15643_v31  ;;  %v15692_v31 = vld [vmem:[%s18618_s26 + $0x30] sm:$0xff]  }
 0x84c   : > { %9738 = vmatprep.subr.bf16.mxu0 %v15648_v32  ;;  %13849 = vmatpush3.bf16.msra.mxu1 %v15692_v31 }
 0x84f   : > { %9739 = vmatpush1.bf16.msra.mxu0 %v15646_v34 }
 0x850   : > { %9740 = vmatprep.subr.bf16.mxu0 %v15651_v33  ;;  %v15693_v33 = vld [vmem:[%s18618_s26 + $0x78] sm:$0xff]  }
 0x851   : > { %13850 = vmatprep.subr.bf16.mxu1 %v15693_v33 }
 0x853   : > { %9741 = vmatpush1.bf16.msra.mxu0 %v15649_v38 }
 0x854   : > { %9742 = vmatprep.subr.bf16.mxu0 %v15654_v10  ;;  %v15694_v10 = vld [vmem:[%s18618_s26 + $0x38] sm:$0xff]  }
 0x855   : > { %13851 = vmatpush3.bf16.msra.mxu1 %v15694_v10 }
 0x857   : > { %9743 = vmatpush1.bf16.msra.mxu0 %v15652_v4 }
 0x858   : > { %9744 = vmatprep.subr.bf16.mxu0 %v15657_v40 }
 0x85b   : > { %9745 = vmatpush1.bf16.msra.mxu0 %v15655_v30 }
 0x85c   : > { %9746 = vmatprep.subr.bf16.mxu0 %v15660_v41 }
 0x85f   : > { %9747 = vmatpush1.bf16.msra.mxu0 %v15658_v45 }
 0x860   : > { %9748 = vmatprep.subr.bf16.mxu0 %v15663_v42  ;;  %v17704_v42 = vld [vmem:[%s18620_s28 + $0x4] ss:$8 sps:$4 sm:$0xff]   ;;  %s18625_s28 = sld [smem:[#allocation27_spill]] }
 0x863   : > { %9749 = vmatpush1.bf16.msra.mxu0 %v15661_v48  ;;  %v9433_v48 = vld [vmem:[%s18622_s3] sm:$0x3]  ;;  %s18624_s3 = sld [smem:[#allocation33_spill]] }
 0x864   : > { %9750 = vmatprep.subr.bf16.mxu0 %v15666_v27  ;;  %v9438_v27 = vrot.slane %v9433_v48, %v17284_v3 }
 0x867   : > { %9751 = vmatpush1.bf16.msra.mxu0 %v15664_v58  ;;  %v9779_v58 = vld [vmem:[%s18623_s15] sm:$0x3] }
 0x868   : > { %9752 = vmatprep.subr.bf16.mxu0 %v15669_v35  ;;  %v13295_v35 = vld [vmem:[%s18623_s15 + $0x2] sm:$0x3] }
 0x869   : > { %v9801_v46 = vrot.slane %v13295_v35, %v17284_v3  ;;  %v9805_v60 = vrot.slane %v13295_v35, %v17287_v1 }
 0x86b   : > { %9753 = vmatpush1.bf16.msra.mxu0 %v15667_v57  ;;  %v13296_v57 = vld [vmem:[%s18623_s15 + $0x4] sm:$0x3] }
 0x86c   : > { %9754 = vmatprep.subr.bf16.mxu0 %v15672_v21  ;;  %v9442_v21 = vrot.slane %v9433_v48, %v17287_v1  ;;  %v9818_v23 = vrot.slane %v13296_v57, %v17284_v3  ;;  %v9822_v5 = vrot.slane %v13296_v57, %v17287_v1 }
 0x86f   : > { %9755 = vmatpush1.bf16.msra.mxu0 %v15670_v59  ;;  %v13297_v59 = vld [vmem:[%s18623_s15 + $0x6] sm:$0x3] }
 0x870   : > { %9756 = vmatprep.subr.bf16.mxu0 %v15675_v54  ;;  %v13298_v54 = vld [vmem:[%s18623_s15 + $0x8] sm:$0x3]  ;;  %v9835_v39 = vrot.slane %v13297_v59, %v17284_v3 }
 0x873   : > { %9757 = vmatpush1.bf16.msra.mxu0 %v15673_v63 }
 0x874   : > { %9758 = vmatprep.subr.bf16.mxu0 %v15678_v2  ;;  %v9784_v2 = vrot.slane %v9779_v58, %v17284_v3 }
 0x877   : > { %9759 = vmatpush1.bf16.msra.mxu0 %v15676_v14  ;;  %v9788_v14 = vrot.slane %v9779_v58, %v17287_v1 }
 0x8ed   : > { %v9373_v62 = vpop.f32.mrb[24].mxu0 }
 0x8ee   : > { %v9375_v25 = vpop.f32.mrb[25].mxu0 }
 0x8ef   : > { %v9377_v6 = vpop.f32.mrb[26].mxu0 }
 0x8f0   : > { %v9382_v47 = vpack.c.bf16 %v9377_v6, %v9373_v62  ;;  %v9379_v12 = vpop.f32.mrb[27].mxu0  ;;  %v9852_v6 = vrot.slane %v13298_v54, %v17284_v3 }
 0x8f1   : > { %v9383_v9 = vpack.c.bf16 %v9379_v12, %v9375_v25  ;;  %v9839_v25 = vrot.slane %v13297_v59, %v17287_v1  ;;  %v13301_v12 = vld [vmem:[%s18623_s15 + $0xe] sm:$0x3] }
 0x8f3   : > { %9760 = vmatprep.mubr.bf16.mxu0 %v9383_v9 }
 0x8f4   : > { %9761 = vmatmul.mubr.bf16.vlgmr.msra.gmra.mrb[28].mxu0 %v9382_v47  ;;  %v9856_v47 = vrot.slane %v13298_v54, %v17287_v1 }
 0x8ff   : > { %v9131_v24 = vpop.f32.mrb[76].mxu1 }
 0x900   : > { %v9133_v18 = vpop.f32.mrb[77].mxu1  ;;  %v9132_v32 = vadd.f32 %v9131_v24, %v9084_v44  ;;  %v9873_v24 = vrot.slane %v13299_v0, %v17287_v1 }
 0x901   : > { %v9134_v22 = vadd.f32 %v9133_v18, %v9088_v51  ;;  %v9135_v55 = vpop.f32.mrb[78].mxu1  ;;  %v13302_v51 = vld [vmem:[%s18623_s15 + $0x10] sm:$0x3] }
 0x902   : > { %v9136_v34 = vpop.f32.mrb[79].mxu1  ;;  %v9138_v4 = vmax.f32 %v9132_v32, 0.0  ;;  %v9903_v32 = vrot.slane %v13301_v12, %v17284_v3  ;;  %v9920_v10 = vrot.slane %v13302_v51, %v17284_v3 }
 0x903   : > { %v9139_v38 = vmax.f32 %v9134_v22, 0.0  ;;  %v9890_v22 = vrot.slane %v13300_v11, %v17287_v1  ;;  %v9907_v34 = vrot.slane %v13301_v12, %v17287_v1 }
 0x904   : > { %v9140_v30 = vmin.f32 %v9138_v4, 6.0  ;;  %v9924_v4 = vrot.slane %v13302_v51, %v17287_v1 }
 0x905   : > { %v9141_v40 = vmin.f32 %v9139_v38, 6.0 }
 0x906   : > { %v9142_v45 = vpack.c.bf16 %v9140_v30, %v9140_v30 }
 0x907   : > { %v9143_v41 = vpack.c.bf16 %v9141_v40, %v9141_v40 }
 0x909   : > { %9311 = vmatprep.mubr.bf16.mxu1 %v9143_v41 }
 0x90a   : > { %9312 = vmatmul.mubr.bf16.vlgmr.msra.gmra.mrb[80].mxu1 %v9142_v45 }
 0x90b   : > { %13305 = vmatprep.mubr.msk.bf16.mxu1 %vm9972_vm3, %v17704_v42 }
 0x9c7   : > { %v9762_v63 = vpop.f32.mrb[28].mxu0 }
 0x9c8   : > { %v14284_v13 = vadd.f32 %v9762_v63, %v9438_v27  ;;  %v9764_v8 = vpop.f32.mrb[29].mxu0 }
 0x9c9   : > { %v14285_v7 = vadd.f32 %v9764_v8, %v9442_v21  ;;  %v9766_v62 = vpop.f32.mrb[30].mxu0 }
 0x9ca   : > { %v9771_v9 = vmax.f32 %v14284_v13, 0.0  ;;  %v14286_v17 = vadd.f32 %v9766_v62, %v9438_v27  ;;  %v9768_v52 = vpop.f32.mrb[31].mxu0 }
 0x9cb   : > { %v9772_v44 = vmax.f32 %v14285_v7, 0.0  ;;  %v14287_v18 = vadd.f32 %v9768_v52, %v9442_v21 }
 0x9cc   : > { %v17734_v55 = vmin.f32 %v9771_v9, 6.0  ;;  %v9773_v31 = vmax.f32 %v14286_v17, 0.0 }
 0x9cd   : > { %v9776_v33 = vmin.f32 %v9772_v44, 6.0  ;;  %v9774_v38 = vmax.f32 %v14287_v18, 0.0 }
 0x9ce   : > { %v9777_v40 = vmin.f32 %v9773_v31, 6.0  ;;  %v9791_v30 = vmul.f32 %v9784_v2, %v17734_v55  ;;  %v9808_v41 = vmul.f32 %v9801_v46, %v17734_v55  ;;  %v9825_v45 = vmul.f32 %v9818_v23, %v17734_v55 }
 0x9cf   : > { %v9778_v48 = vmin.f32 %v9774_v38, 6.0  ;;  %v9792_v27 = vmul.f32 %v9788_v14, %v9776_v33  ;;  %v9809_v58 = vmul.f32 %v9805_v60, %v9776_v33  ;;  %v9826_v35 = vmul.f32 %v9822_v5, %v9776_v33 }
 0x9d0   : > { %v9793_v57 = vmul.f32 %v9784_v2, %v9777_v40  ;;  %v9810_v21 = vmul.f32 %v9801_v46, %v9777_v40  ;;  %v9827_v59 = vmul.f32 %v9818_v23, %v9777_v40  ;;  %v9843_v54 = vmul.f32 %v9839_v25, %v9776_v33 }
 0x9d1   : > { %v9794_v63 = vmul.f32 %v9788_v14, %v9778_v48  ;;  %v9811_v0 = vmul.f32 %v9805_v60, %v9778_v48  ;;  %v9828_v13 = vmul.f32 %v9822_v5, %v9778_v48  ;;  %v9845_v8 = vmul.f32 %v9839_v25, %v9778_v48 }
 0x9d2   : > { %v9933_v11 = vpack.c.bf16 %v9793_v57, %v9791_v30  ;;  %v9935_v7 = vpack.c.bf16 %v9810_v21, %v9808_v41  ;;  %v9937_v62 = vpack.c.bf16 %v9827_v59, %v9825_v45  ;;  %v9842_v12 = vmul.f32 %v9835_v39, %v17734_v55 }
 0x9d3   : > { %v9934_v9 = vpack.c.bf16 %v9794_v63, %v9792_v27  ;;  %v9936_v17 = vpack.c.bf16 %v9811_v0, %v9809_v58  ;;  %v9938_v52 = vpack.c.bf16 %v9828_v13, %v9826_v35  ;;  %v9940_v51 = vpack.c.bf16 %v9845_v8, %v9843_v54 }
 0x9d4   : > { %v9844_v44 = vmul.f32 %v9835_v39, %v9777_v40  ;;  %v9860_v18 = vmul.f32 %v9856_v47, %v9776_v33  ;;  %v9862_v31 = vmul.f32 %v9856_v47, %v9778_v48  ;;  %v9859_v2 = vmul.f32 %v9852_v6, %v17734_v55 }
 0x9d5   : > { %9976 = vmatprep.subr.bf16.mxu1 %v9934_v9  ;;  %v9861_v46 = vmul.f32 %v9852_v6, %v9777_v40  ;;  %v9877_v14 = vmul.f32 %v9873_v24, %v9776_v33  ;;  %v9879_v23 = vmul.f32 %v9873_v24, %v9778_v48  ;;  %v9876_v60 = vmul.f32 %v9869_v43, %v17734_v55  ;;  %v13227_v9 = vld [vmem:[%s18625_s28] ss:$0 sm:$0xff]  ;;  %s18630_s28 = sld [smem:[#allocation35_spill]] }
 0x9d6   : > { %9977 = vmatpush1.bf16.msra.mxu1 %v9933_v11  ;;  %v9939_v5 = vpack.c.bf16 %v9844_v44, %v9842_v12  ;;  %v9942_v25 = vpack.c.bf16 %v9862_v31, %v9860_v18  ;;  %v9878_v38 = vmul.f32 %v9869_v43, %v9777_v40  ;;  %v9894_v30 = vmul.f32 %v9890_v22, %v9776_v33  ;;  %v15705_v11 = vld [vmem:[%s18624_s3 + $0x18] sm:$0xff]   ;;  %v15708_v31 = vld [vmem:[%s18624_s3 + $0x68] sm:$0xff]  }
 0x9d7   : > { %9978 = vmatprep.subr.bf16.mxu1 %v9936_v17  ;;  %v9941_v41 = vpack.c.bf16 %v9861_v46, %v9859_v2  ;;  %v9944_v45 = vpack.c.bf16 %v9879_v23, %v9877_v14  ;;  %v9896_v27 = vmul.f32 %v9890_v22, %v9778_v48  ;;  %v9893_v39 = vmul.f32 %v9886_v20, %v17734_v55  ;;  %v15709_v2 = vld [vmem:[%s18624_s3 + $0x28] sm:$0xff]   ;;  %v15710_v46 = vld [vmem:[%s18624_s3 + $0x70] sm:$0xff]   ;;  %v15712_v23 = vld [vmem:[%s18624_s3 + $0x78] sm:$0xff]  }
 0x9d8   : > { %v9943_v47 = vpack.c.bf16 %v9878_v38, %v9876_v60  ;;  %v9895_v58 = vmul.f32 %v9886_v20, %v9777_v40  ;;  %v9911_v35 = vmul.f32 %v9907_v34, %v9776_v33  ;;  %v9913_v57 = vmul.f32 %v9907_v34, %v9778_v48  ;;  %v15699_v34 = vld [vmem:[%s18624_s3] sm:$0xff]   ;;  %v15711_v14 = vld [vmem:[%s18624_s3 + $0x30] sm:$0xff]   ;;  %v15715_v38 = vld [vmem:[%s18627_s6 + $0x8] sm:$0xff]  }
 0x9d9   : > { %v9946_v6 = vpack.c.bf16 %v9896_v27, %v9894_v30  ;;  %v9910_v24 = vmul.f32 %v9903_v32, %v17734_v55  ;;  %v9912_v21 = vmul.f32 %v9903_v32, %v9777_v40  ;;  %v9928_v63 = vmul.f32 %v9924_v4, %v9776_v33  ;;  %v17751_v32 = vld [vmem:[%s18621_s18] ss:$8 sps:$4 sm:$0xff]   ;;  %v15716_v30 = vld [vmem:[%s18627_s6 + $0x10] sm:$0xff]  }
 0x9da   : > { %9979 = vmatpush1.bf16.msra.mxu1 %v9935_v7  ;;  %v9945_v59 = vpack.c.bf16 %v9895_v58, %v9893_v39  ;;  %v9948_v54 = vpack.c.bf16 %v9913_v57, %v9911_v35  ;;  %v9930_v43 = vmul.f32 %v9924_v4, %v9778_v48  ;;  %v9927_v13 = vmul.f32 %v9920_v10, %v17734_v55  ;;  %v15698_v55 = vld [vmem:[%s18624_s3 + $0x40] sm:$0xff]   ;;  %v15700_v33 = vld [vmem:[%s18624_s3 + $0x48] sm:$0xff]   ;;  %v15702_v4 = vld [vmem:[%s18624_s3 + $0x50] sm:$0xff]  }
 0x9db   : > { %9980 = vmatprep.subr.bf16.mxu1 %v9938_v52  ;;  %v9947_v0 = vpack.c.bf16 %v9912_v21, %v9910_v24  ;;  %v9929_v22 = vmul.f32 %v9920_v10, %v9777_v40  ;;  %v15701_v10 = vld [vmem:[%s18624_s3 + $0x8] sm:$0xff]   ;;  %v15703_v40 = vld [vmem:[%s18624_s3 + $0x10] sm:$0xff]   ;;  %v15704_v48 = vld [vmem:[%s18624_s3 + $0x58] sm:$0xff]  }
 0x9dc   : > { %v9950_v8 = vpack.c.bf16 %v9930_v43, %v9928_v63  ;;  %v15706_v7 = vld [vmem:[%s18624_s3 + $0x60] sm:$0xff]  }
 0x9dd   : > { %v9949_v20 = vpack.c.bf16 %v9929_v22, %v9927_v13  ;;  %v13852_v12 = vpop.f32.mrb[80].mxu1  ;;  %v15714_v60 = vld [vmem:[%s18627_s6] sm:$0xff]  }
 0x9de   : > { %9981 = vmatpush1.bf16.msra.mxu1 %v9937_v62  ;;  %v15707_v62 = vld [vmem:[%s18624_s3 + $0x20] sm:$0xff]   ;;  %v13853_v17 = vpop.f32.mrb[81].mxu1 }
 0x9df   : > { %9982 = vmatprep.subr.bf16.mxu1 %v9940_v51  ;;  %v13854_v52 = vadd.f32 %v13853_v17, %v13852_v12  ;;  %v13855_v51 = vpop.f32.mrb[82].mxu1 }
 0x9e0   : > { %v13856_v44 = vpop.f32.mrb[83].mxu1 }
 0x9e1   : > { %v9314_v18 = vadd.f32 %v13854_v52, %v13227_v9  ;;  %v13323_v52 = vld [vmem:[%s18630_s28] ss:$0 sm:$0xff] }
 0x9e2   : > { %9983 = vmatpush1.bf16.msra.mxu1 %v9939_v5  ;;  %v15996_v5 = vmov 0.0  }
 0x9e3   : > { %9984 = vmatprep.subr.bf16.mxu1 %v9942_v25  ;;  %9319 = vst [vmem:[%s1528_s8] sm:$0xff] %v9314_v18  ;;  %14118 = vmatprep.subr.bf16.mxu0 %v15996_v5  ;;  %v15713_v25 = vld [vmem:[%s18624_s3 + $0x38] sm:$0xff]   ;;  %s18629_s8 = sld [smem:[#allocation34_spill]] }
 0x9e4   : > { %14119 = vmatpush3.bf16.msra.mxu0 %v15714_v60  ;;  %14134 = vmatprep.mubr.msk.bf16.mxu0 %vm15997_vm4, %v15996_v5 }
 0x9e5   : > { %14120 = vmatprep.subr.bf16.mxu0 %v15996_v5 }
 0x9e6   : > { %9985 = vmatpush1.bf16.msra.mxu1 %v9941_v41  ;;  %v15717_v41 = vld [vmem:[%s18627_s6 + $0x18] sm:$0xff]  }
 0x9e7   : > { %9986 = vmatprep.subr.bf16.mxu1 %v9944_v45  ;;  %v9951_v45 = vld [vmem:[%s18628_s5] sm:$0x3]  ;;  %s18631_s5 = smov %s18630_s28  ;;  %s18633_s28 = sld [smem:[#allocation20_spill]] }
 0x9e8   : > { %14121 = vmatpush3.bf16.msra.mxu0 %v15715_v38  ;;  %v9956_v27 = vrot.slane %v9951_v45, %v17284_v3  ;;  %v9960_v39 = vrot.slane %v9951_v45, %v17287_v1  ;;  %v13325_v51 = vld [vmem:[%s18631_s5 + $0x1] ss:$0 sm:$0xff]  ;;  %v13327_v44 = vld [vmem:[%s18631_s5 + $0x2] ss:$0 sm:$0xff]  ;;  %v13329_v18 = vld [vmem:[%s18631_s5 + $0x3] ss:$0 sm:$0xff] }
 0x9e9   : > { %14122 = vmatprep.subr.bf16.mxu0 %v15996_v5 }
 0x9ea   : > { %9987 = vmatpush1.bf16.msra.mxu1 %v9943_v47 }
 0x9eb   : > { %9988 = vmatprep.subr.bf16.mxu1 %v9946_v6 }
 0x9ec   : > { %14123 = vmatpush3.bf16.msra.mxu0 %v15716_v30 }
 0x9ed   : > { %14124 = vmatprep.subr.bf16.mxu0 %v15996_v5  ;;  %s18634_s3 = smov %s18633_s28 }
 0x9ee   : > { %9989 = vmatpush1.bf16.msra.mxu1 %v9945_v59 }
 0x9ef   : > { %9990 = vmatprep.subr.bf16.mxu1 %v9948_v54 }
 0x9f0   : > { %14125 = vmatpush3.bf16.msra.mxu0 %v15717_v41 }
 0x9f1   : > { %14126 = vmatprep.subr.bf16.mxu0 %v15996_v5 }
 0x9f2   : > { %9991 = vmatpush1.bf16.msra.mxu1 %v9947_v0 }
 0x9f3   : > { %9992 = vmatprep.subr.bf16.mxu1 %v9950_v8 }
 0x9f6   : > { %9993 = vmatpush1.bf16.msra.mxu1 %v9949_v20 }
 0x9f7   : > { %13858 = vmatprep.subr.bf16.mxu1 %v15698_v55  ;;  %v15718_v55 = vld [vmem:[%s18627_s6 + $0x20] sm:$0xff]  }
 0x9f8   : > { %14127 = vmatpush3.bf16.msra.mxu0 %v15718_v55 }
 0x9f9   : > { %10009 = vmatmul.mubr.bf16.vlgmr.msra.gmra.mrb[84].mxu1 %v17751_v32  ;;  %14128 = vmatprep.subr.bf16.mxu0 %v15996_v5 }
 0x9fa   : > { %13859 = vmatpush3.bf16.msra.mxu1 %v15699_v34  ;;  %v15719_v34 = vld [vmem:[%s18627_s6 + $0x28] sm:$0xff]  }
 0x9fb   : > { %13860 = vmatprep.subr.bf16.mxu1 %v15700_v33  ;;  %v15720_v33 = vld [vmem:[%s18627_s6 + $0x30] sm:$0xff]  }
 0x9fc   : > { %14129 = vmatpush3.bf16.msra.mxu0 %v15719_v34 }
 0x9fd   : > { %14130 = vmatprep.subr.bf16.mxu0 %v15996_v5 }
 0x9fe   : > { %13861 = vmatpush3.bf16.msra.mxu1 %v15701_v10  ;;  %v15721_v10 = vld [vmem:[%s18627_s6 + $0x38] sm:$0xff]   ;;  %s18638_s6 = sld [smem:[#allocation18_spill]] }
 0x9ff   : > { %13862 = vmatprep.subr.bf16.mxu1 %v15702_v4  ;;  %v13306_v4 = vld [vmem:[%s18629_s8] ss:$0 sm:$0xff]  ;;  %s18632_s8 = sld [smem:[#allocation36_spill]] }
 0xa00   : > { %14131 = vmatpush3.bf16.msra.mxu0 %v15720_v33 }
 0xa01   : > { %14132 = vmatprep.subr.bf16.mxu0 %v15996_v5  ;;  %v15724_v5 = vld [vmem:[%s18634_s3 + $0x8] sm:$0xff]  }
 0xa02   : > { %13863 = vmatpush3.bf16.msra.mxu1 %v15703_v40 }
 0xa03   : > { %13864 = vmatprep.subr.bf16.mxu1 %v15704_v48 }
 0xa04   : > { %14133 = vmatpush3.bf16.msra.mxu0 %v15721_v10 }
 0xa06   : > { %13865 = vmatpush3.bf16.msra.mxu1 %v15705_v11 }
 0xa07   : > { %13866 = vmatprep.subr.bf16.mxu1 %v15706_v7 }
 0xa0a   : > { %13867 = vmatpush3.bf16.msra.mxu1 %v15707_v62 }
 0xa0b   : > { %13868 = vmatprep.subr.bf16.mxu1 %v15708_v31  ;;  %v13331_v31 = vld [vmem:[%s18631_s5 + $0x4] ss:$0 sm:$0xff] }
 0xa0e   : > { %13869 = vmatpush3.bf16.msra.mxu1 %v15709_v2 }
 0xa0f   : > { %13870 = vmatprep.subr.bf16.mxu1 %v15710_v46 }
 0xa12   : > { %13871 = vmatpush3.bf16.msra.mxu1 %v15711_v14  ;;  %v13333_v14 = vld [vmem:[%s18631_s5 + $0x5] ss:$0 sm:$0xff] }
 0xa13   : > { %13872 = vmatprep.subr.bf16.mxu1 %v15712_v23  ;;  %v13335_v23 = vld [vmem:[%s18631_s5 + $0x6] ss:$0 sm:$0xff] }
 0xa16   : > { %13873 = vmatpush3.bf16.msra.mxu1 %v15713_v25 }
 0xa17   : > { %10314 = vmatprep.subr.bf16.mxu1 %v15995_v37 }
 0xacc   : > { %v10010_v47 = vpop.f32.mrb[84].mxu1 }
 0xacd   : > { %v10011_v58 = vadd.f32 %v10010_v47, %v9956_v27  ;;  %v10012_v35 = vpop.f32.mrb[85].mxu1 }
 0xace   : > { %v10013_v57 = vadd.f32 %v10012_v35, %v9960_v39  ;;  %v10014_v6 = vpop.f32.mrb[86].mxu1 }
 0xacf   : > { %v10019_v24 = vmax.f32 %v10011_v58, 0.0  ;;  %v10015_v21 = vadd.f32 %v10014_v6, %v9956_v27  ;;  %v10016_v59 = vpop.f32.mrb[87].mxu1 }
 0xad0   : > { %v10020_v54 = vmax.f32 %v10013_v57, 0.0  ;;  %v10017_v63 = vadd.f32 %v10016_v59, %v9960_v39 }
 0xad1   : > { %v10021_v43 = vmax.f32 %v10015_v21, 0.0  ;;  %v10023_v13 = vmin.f32 %v10019_v24, 6.0 }
 0xad2   : > { %v10022_v0 = vmax.f32 %v10017_v63, 0.0  ;;  %v10024_v3 = vmin.f32 %v10020_v54, 6.0  ;;  %v13337_v54 = vld [vmem:[%s18631_s5 + $0x7] ss:$0 sm:$0xff]  ;;  %v13339_v63 = vld [vmem:[%s18631_s5 + $0x8] ss:$0 sm:$0xff] }
 0xad3   : > { %v10025_v22 = vmin.f32 %v10021_v43, 6.0 }
 0xad4   : > { %v10026_v1 = vmin.f32 %v10022_v0, 6.0 }
 0xad5   : > { %v10027_v8 = vpack.c.bf16 %v10025_v22, %v10023_v13 }
 0xad6   : > { %v10028_v20 = vpack.c.bf16 %v10026_v1, %v10024_v3 }
 0xad8   : > { %10196 = vmatprep.mubr.bf16.mxu1 %v10028_v20 }
 0xad9   : > { %10197 = vmatmul.mubr.bf16.vlgmr.msra.gmra.mrb[88].mxu1 %v10027_v8 }
 0xada   : > { %13341 = vmatprep.mubr.msk.bf16.mxu1 %vm9972_vm3, %v17704_v42 }
 0xbac   : > { %v13874_v42 = vpop.f32.mrb[88].mxu1 }
 0xbad   : > { %v13875_v40 = vpop.f32.mrb[89].mxu1 }
 0xbae   : > { %v13876_v48 = vadd.f32 %v13875_v40, %v13874_v42  ;;  %v13877_v11 = vpop.f32.mrb[90].mxu1 }
 0xbaf   : > { %v13878_v7 = vpop.f32.mrb[91].mxu1 }
 0xbb0   : > { %v10199_v62 = vadd.f32 %v13876_v48, %v13306_v4  ;;  %v13879_v12 = vadd.f32 %v13878_v7, %v13877_v11 }
 0xbb2   : > { %v10205_v9 = vmax.f32 %v10199_v62, 0.0  ;;  %v10202_v17 = vadd.f32 %v13879_v12, %v13306_v4  ;;  %v13340_v4 = vld [vmem:[%s18632_s8] ss:$0 sm:$0xff]  ;;  %s18636_s8 = sld [smem:[#allocation39_spill]] }
 0xbb4   : > { %v10207_v2 = vmin.f32 %v10205_v9, 6.0  ;;  %v10206_v46 = vmax.f32 %v10202_v17, 0.0 }
 0xbb6   : > { %v10208_v60 = vmin.f32 %v10206_v46, 6.0  ;;  %v10216_v25 = vmul.f32 %v13323_v52, %v10207_v2  ;;  %v10226_v38 = vmul.f32 %v13325_v51, %v10207_v2  ;;  %v10236_v30 = vmul.f32 %v13327_v44, %v10207_v2  ;;  %v15728_v46 = vld [vmem:[%s18634_s3 + $0x18] sm:$0xff]  }
 0xbb7   : > { %v10246_v41 = vmul.f32 %v13329_v18, %v10207_v2  ;;  %v10256_v45 = vmul.f32 %v13331_v31, %v10207_v2  ;;  %v10266_v27 = vmul.f32 %v13333_v14, %v10207_v2  ;;  %v10276_v39 = vmul.f32 %v13335_v23, %v10207_v2 }
 0xbb8   : > { %v10482_v47 = vpack.c.bf16 %v10208_v60, %v10207_v2  ;;  %v10217_v58 = vmul.f32 %v13323_v52, %v10208_v60  ;;  %v10227_v35 = vmul.f32 %v13325_v51, %v10208_v60  ;;  %v10237_v57 = vmul.f32 %v13327_v44, %v10208_v60  ;;  %v15723_v44 = vld [vmem:[%s18635_s4] sm:$0xff]   ;;  %v15735_v26 = vld [vmem:[%s18636_s8 + $0x8] sm:$0xff]   ;;  %v15736_v29 = vld [vmem:[%s18636_s8 + $0x10] sm:$0xff]  }
 0xbb9   : > { %v10247_v6 = vmul.f32 %v13329_v18, %v10208_v60  ;;  %v10257_v24 = vmul.f32 %v13331_v31, %v10208_v60  ;;  %v10267_v21 = vmul.f32 %v13333_v14, %v10208_v60  ;;  %v10277_v59 = vmul.f32 %v13335_v23, %v10208_v60  ;;  %v15726_v18 = vld [vmem:[%s18634_s3 + $0x10] sm:$0xff]   ;;  %v15725_v31 = vld [vmem:[%s18635_s4 + $0x8] sm:$0xff]   ;;  %v15729_v14 = vld [vmem:[%s18635_s4 + $0x18] sm:$0xff]   ;;  %s18534_s3 = sand.u32 1, %s15934_s1  }
 0xbba   : > { %14138 = vmatprep.subr.bf16.mxu0 %v10482_v47  ;;  %v10298_v43 = vpack.c.bf16 %v10217_v58, %v10216_v25  ;;  %v10299_v0 = vpack.c.bf16 %v10227_v35, %v10226_v38  ;;  %v10300_v13 = vpack.c.bf16 %v10237_v57, %v10236_v30  ;;  %v10286_v20 = vmul.f32 %v13337_v54, %v10207_v2  ;;  %v15730_v23 = vld [vmem:[%s18635_s4 + $0x20] sm:$0xff]   ;;  %v15732_v25 = vld [vmem:[%s18635_s4 + $0x30] sm:$0xff]   ;;  %v15733_v38 = vld [vmem:[%s18635_s4 + $0x38] sm:$0xff]  }
 0xbbb   : > { %v10301_v22 = vpack.c.bf16 %v10247_v6, %v10246_v41  ;;  %v10302_v3 = vpack.c.bf16 %v10257_v24, %v10256_v45  ;;  %v10303_v1 = vpack.c.bf16 %v10267_v21, %v10266_v27  ;;  %v10304_v8 = vpack.c.bf16 %v10277_v59, %v10276_v39  ;;  %v15734_v30 = vld [vmem:[%s18636_s8] sm:$0xff]   ;;  %v15739_v56 = vld [vmem:[%s18636_s8 + $0x28] sm:$0xff]   ;;  %v15741_v15 = vld [vmem:[%s18636_s8 + $0x38] sm:$0xff]  }
 0xbbc   : > { %10315 = vmatpush1.bf16.msra.mxu1 %v10298_v43  ;;  %v10287_v55 = vmul.f32 %v13337_v54, %v10208_v60  ;;  %v10296_v34 = vmul.f32 %v13339_v63, %v10207_v2  ;;  %v10297_v33 = vmul.f32 %v13339_v63, %v10208_v60  ;;  %v15727_v2 = vld [vmem:[%s18635_s4 + $0x10] sm:$0xff]   ;;  %v15731_v60 = vld [vmem:[%s18635_s4 + $0x28] sm:$0xff]   ;;  %v15738_v53 = vld [vmem:[%s18636_s8 + $0x20] sm:$0xff]   ;;  %s12357_s4 = sshll.u32 %s18534_s3, 4 }
 0xbbd   : > { %10316 = vmatprep.subr.bf16.mxu1 %v15995_v37  ;;  %s17855_s5 = scalar_lea.vmem [#allocation8], %s12357_s4  ;;  %s18640_s4 = sld [smem:[#allocation42_spill]]  ;;  %v17860_v43 = vld [vmem:[%s18638_s6 + $0x4] ss:$20 sps:$4 sm:$0xff]  }
 0xbbe   : > { %v10305_v10 = vpack.c.bf16 %v10287_v55, %v10286_v20  ;;  %v10306_v42 = vpack.c.bf16 %v10297_v33, %v10296_v34 }
 0xbc0   : > { %10317 = vmatpush1.bf16.msra.mxu1 %v10299_v0  ;;  %v15757_v0 = vld [vmem:[%s18638_s6 + $0x10] ss:$20 sps:$4 sm:$0xff]  }
 0xbc1   : > { %10318 = vmatprep.subr.bf16.mxu1 %v15995_v37 }
 0xbc4   : > { %10319 = vmatpush1.bf16.msra.mxu1 %v10300_v13 }
 0xbc5   : > { %10320 = vmatprep.subr.bf16.mxu1 %v15995_v37 }
 0xbc8   : > { %10321 = vmatpush1.bf16.msra.mxu1 %v10301_v22 }
 0xbc9   : > { %10322 = vmatprep.subr.bf16.mxu1 %v15995_v37 }
 0xbcc   : > { %10323 = vmatpush1.bf16.msra.mxu1 %v10302_v3 }
 0xbcd   : > { %10324 = vmatprep.subr.bf16.mxu1 %v15995_v37 }
 0xbd0   : > { %10325 = vmatpush1.bf16.msra.mxu1 %v10303_v1 }
 0xbd1   : > { %10326 = vmatprep.subr.bf16.mxu1 %v15995_v37 }
 0xbd4   : > { %10327 = vmatpush1.bf16.msra.mxu1 %v10304_v8 }
 0xbd5   : > { %10328 = vmatprep.subr.bf16.mxu1 %v15995_v37 }
 0xbd8   : > { %10329 = vmatpush1.bf16.msra.mxu1 %v10305_v10  ;;  %v17867_v10 = vld [vmem:[%s18640_s4 + $0x2] ss:$0 sm:$0xff] }
 0xbd9   : > { %10330 = vmatprep.subr.bf16.mxu1 %v15995_v37 }
 0xbdc   : > { %10331 = vmatpush1.bf16.msra.mxu1 %v10306_v42 }
 0xbdf   : > { %10347 = vmatmul.mubr.bf16.vlgmr.msra.gmra.mrb[92].mxu1 %v17751_v32  ;;  %v15722_v32 = vld [vmem:[%s18633_s28] sm:$0xff]   ;;  %s18637_s28 = sld [smem:[#allocation38_spill]] }
 0xbe0   : > { %11224 = vmatprep.mubr.bf16.mxu1 %v17860_v43 }
 0xbe5   : > { %v13342_v16 = vld [vmem:[%s18637_s28] ss:$0 sm:$0xff]  ;;  %s18639_s28 = sld [smem:[#allocation41_spill]] }
 0xbeb   : > { %v13359_v13 = vld [vmem:[%s18639_s28] ss:$0 sm:$0xff]  ;;  %s18647_s28 = sld [smem:[#allocation44_spill]] }
 0xbf1   : > { %s18648_s3 = smov %s18647_s28 }
 0xcb2   : > { %v10348_v40 = vpop.f32.mrb[92].mxu1 }
 0xcb3   : > { %v10349_v48 = vadd.f32 %v13340_v4, %v10348_v40  ;;  %v10350_v11 = vpop.f32.mrb[93].mxu1  ;;  %v17870_v40 = vld [vmem:[%s18640_s4 + $0x8] ss:$0 sm:$0xff] }
 0xcb4   : > { %v10351_v7 = vpop.f32.mrb[94].mxu1 }
 0xcb5   : > { %v10355_v62 = vmax.f32 %v10349_v48, 0.0  ;;  %v10352_v12 = vadd.f32 %v13340_v4, %v10351_v7  ;;  %v10353_v9 = vpop.f32.mrb[95].mxu1  ;;  %v17873_v48 = vld [vmem:[%s18640_s4] ss:$0 sm:$0xff] }
 0xcb7   : > { %v10356_v37 = vmax.f32 %v10352_v12, 0.0  ;;  %v10357_v17 = vmin.f32 %v10355_v62, 6.0 }
 0xcb9   : > { %v10358_v52 = vmin.f32 %v10356_v37, 6.0 }
 0xcbb   : > { %v10359_v51 = vpack.c.bf16 %v10358_v52, %v10357_v17 }
 0xcbd   : > { %14135 = vmatmul.mubr.bf16.vlgmr.msra.gmra.mrb[32].mxu0 %v10359_v51 }
 0xcbe   : > { %14139 = vmatpush3.bf16.msra.mxu0 %v10482_v47  ;;  %14140 = vmatprep.mubr.msk.bf16.mxu0 %vm9972_vm3, %v15722_v32 }
 0xcbf   : > { %14148 = vmatprep.subr.bf16.mxu0 %v15723_v44 }
 0xcc5   : > { %14141 = vmatmul.mubr.msk.bf16.vlgmr.msra.gmra.mrb[36].mxu0 %vm9972_vm3, %v15724_v5 }
 0xcc6   : > { %14149 = vmatpush3.bf16.msra.mxu0 %v15723_v44  ;;  %14144 = vmatprep.mubr.msk.bf16.mxu0 %vm9972_vm3, %v15726_v18 }
 0xcc7   : > { %14150 = vmatprep.subr.bf16.mxu0 %v15725_v31 }
 0xcca   : > { %14151 = vmatpush3.bf16.msra.mxu0 %v15725_v31 }
 0xccb   : > { %14152 = vmatprep.subr.bf16.mxu0 %v15727_v2 }
 0xccd   : > { %14145 = vmatmul.mubr.msk.bf16.gmra.mrb[40].mxu0 %vm9972_vm3, %v15728_v46 }
 0xcce   : > { %14153 = vmatpush3.bf16.msra.mxu0 %v15727_v2  ;;  %14164 = vmatprep.mubr.bf16.mxu0 %v10600_v36  ;;  %v15737_v36 = vld [vmem:[%s18636_s8 + $0x18] sm:$0xff]  }
 0xccf   : > { %14154 = vmatprep.subr.bf16.mxu0 %v15729_v14 }
 0xcd2   : > { %14155 = vmatpush3.bf16.msra.mxu0 %v15729_v14 }
 0xcd3   : > { %14156 = vmatprep.subr.bf16.mxu0 %v15730_v23 }
 0xcd6   : > { %14157 = vmatpush3.bf16.msra.mxu0 %v15730_v23 }
 0xcd7   : > { %14158 = vmatprep.subr.bf16.mxu0 %v15731_v60 }
 0xcda   : > { %14159 = vmatpush3.bf16.msra.mxu0 %v15731_v60 }
 0xcdb   : > { %14160 = vmatprep.subr.bf16.mxu0 %v15732_v25 }
 0xcde   : > { %14161 = vmatpush3.bf16.msra.mxu0 %v15732_v25 }
 0xcdf   : > { %14162 = vmatprep.subr.bf16.mxu0 %v15733_v38 }
 0xce2   : > { %14163 = vmatpush3.bf16.msra.mxu0 %v15733_v38 }
 0xce3   : > { %14172 = vmatprep.subr.bf16.mxu0 %v15734_v30 }
 0xce5   : > { %14165 = vmatmul.mubr.bf16.vlgmr.msra.gmra.mrb[44].mxu0 %v10601_v61  ;;  %v15740_v61 = vld [vmem:[%s18636_s8 + $0x30] sm:$0xff]  }
 0xce6   : > { %14168 = vmatprep.mubr.bf16.mxu0 %v10602_v28  ;;  %14173 = vmatpush3.bf16.msra.mxu0 %v15734_v30 }
 0xce7   : > { %14174 = vmatprep.subr.bf16.mxu0 %v15735_v26 }
 0xcea   : > { %14175 = vmatpush3.bf16.msra.mxu0 %v15735_v26 }
 0xceb   : > { %14176 = vmatprep.subr.bf16.mxu0 %v15736_v29 }
 0xced   : > { %14169 = vmatmul.mubr.bf16.gmra.mrb[48].mxu0 %v10603_v19 }
 0xcee   : > { %14177 = vmatpush3.bf16.msra.mxu0 %v15736_v29 }
 0xcef   : > { %14178 = vmatprep.subr.bf16.mxu0 %v15737_v36 }
 0xcf2   : > { %14179 = vmatpush3.bf16.msra.mxu0 %v15737_v36 }
 0xcf3   : > { %14180 = vmatprep.subr.bf16.mxu0 %v15738_v53 }
 0xcf6   : > { %14181 = vmatpush3.bf16.msra.mxu0 %v15738_v53 }
 0xcf7   : > { %14182 = vmatprep.subr.bf16.mxu0 %v15739_v56 }
 0xcfa   : > { %14183 = vmatpush3.bf16.msra.mxu0 %v15739_v56 }
 0xcfb   : > { %14184 = vmatprep.subr.bf16.mxu0 %v15740_v61 }
 0xcfe   : > { %14185 = vmatpush3.bf16.msra.mxu0 %v15740_v61 }
 0xcff   : > { %14186 = vmatprep.subr.bf16.mxu0 %v15741_v15 }
 0xd02   : > { %14187 = vmatpush3.bf16.msra.mxu0 %v15741_v15  ;;  %v17908_v15 = vld [vmem:[%s18640_s4 + $0x3] ss:$0 sm:$0xff] }
 0xd90   : > { %v10465_v28 = vpop.f32.mrb[32].mxu0 }
 0xd91   : > { %v10466_v49 = vadd.f32 %v13342_v16, %v10465_v28  ;;  %v14136_v50 = vpop.f32.mrb[33].mxu0 }
 0xd92   : > { %v10468_v19 = vpop.f32.mrb[34].mxu0 }
 0xd93   : > { %10472 = vst [vmem:[%s17855_s5] sm:$0xff] %v10466_v49  ;;  %v10469_v41 = vadd.f32 %v13342_v16, %v10468_v19  ;;  %v14137_v45 = vpop.f32.mrb[35].mxu0 }
 0xd95   : > { %10473 = vst [vmem:[%s17855_s5 + $0x8] sm:$0xff] %v10469_v41 }
 0xd98   : > { %v14142_v27 = vpop.f32.mrb[36].mxu0 }
 0xd99   : > { %v10549_v39 = vpop.f32.mrb[37].mxu0 }
 0xd9a   : > { %v14143_v47 = vpop.f32.mrb[38].mxu0 }
 0xd9b   : > { %v10581_v58 = vpack.c.bf16 %v14143_v47, %v14142_v27  ;;  %v10552_v35 = vpop.f32.mrb[39].mxu0 }
 0xd9c   : > { %v10580_v57 = vpack.c.bf16 %v10552_v35, %v10549_v39 }
 0xd9e   : > { %14188 = vmatprep.mubr.bf16.mxu0 %v10580_v57 }
 0xd9f   : > { %14189 = vmatmul.mubr.bf16.vlgmr.msra.gmra.mrb[44].mxu0 %v10581_v58 }
 0xda0   : > { %v14146_v6 = vpop.f32.mrb[40].mxu0 }
 0xda1   : > { %v10565_v24 = vpop.f32.mrb[41].mxu0 }
 0xda2   : > { %v14147_v21 = vpop.f32.mrb[42].mxu0 }
 0xda3   : > { %v10583_v59 = vpack.c.bf16 %v14147_v21, %v14146_v6  ;;  %v10568_v54 = vpop.f32.mrb[43].mxu0 }
 0xda4   : > { %v10582_v63 = vpack.c.bf16 %v10568_v54, %v10565_v24 }
 0xda6   : > { %14192 = vmatprep.mubr.bf16.mxu0 %v10582_v63 }
 0xda7   : > { %14193 = vmatmul.mubr.bf16.gmra.mrb[48].mxu0 %v10583_v59  ;;  %v13378_v59 = vld [vmem:[%s18640_s4 + $0x1] ss:$0 sm:$0xff] }
 0xda8   : > { %14204 = vmatprep.mubr.msk.bf16.mxu0 %vm11179_vm5, %v15757_v0 }
 0xe72   : > { %v14190_v22 = vpop.f32.mrb[44].mxu0 }
 0xe73   : > { %v14288_v3 = vadd.f32 %v14190_v22, %v13359_v13  ;;  %v10822_v1 = vpop.f32.mrb[45].mxu0 }
 0xe74   : > { %v14289_v8 = vadd.f32 %v13359_v13, %v10822_v1  ;;  %v14191_v20 = vpop.f32.mrb[46].mxu0 }
 0xe75   : > { %v10855_v55 = vmax.f32 %v14288_v3, 0.0  ;;  %v14290_v34 = vadd.f32 %v14191_v20, %v13359_v13  ;;  %v10825_v33 = vpop.f32.mrb[47].mxu0 }
 0xe76   : > { %v10853_v42 = vmax.f32 %v14289_v8, 0.0  ;;  %v14291_v4 = vadd.f32 %v13359_v13, %v10825_v33 }
 0xe77   : > { %v17875_v11 = vmin.f32 %v10855_v55, 6.0  ;;  %v10856_v7 = vmax.f32 %v14290_v34, 0.0 }
 0xe78   : > { %v17877_v62 = vmin.f32 %v10853_v42, 6.0  ;;  %v10854_v12 = vmax.f32 %v14291_v4, 0.0 }
 0xe79   : > { %v17879_v9 = vmin.f32 %v10856_v7, 6.0  ;;  %v10910_v37 = vmul.f32 %v17867_v10, %v17875_v11  ;;  %v11006_v17 = vmul.f32 %v17870_v40, %v17875_v11  ;;  %v10878_v52 = vmul.f32 %v17873_v48, %v17875_v11 }
 0xe7a   : > { %v17887_v32 = vmin.f32 %v10854_v12, 6.0  ;;  %v14194_v51 = vpop.f32.mrb[48].mxu0  ;;  %v10908_v44 = vmul.f32 %v17867_v10, %v17877_v62  ;;  %v11004_v5 = vmul.f32 %v17870_v40, %v17877_v62  ;;  %v10876_v18 = vmul.f32 %v17873_v48, %v17877_v62 }
 0xe7b   : > { %v14292_v31 = vadd.f32 %v14194_v51, %v13359_v13  ;;  %v10838_v2 = vpop.f32.mrb[49].mxu0  ;;  %v10911_v46 = vmul.f32 %v17867_v10, %v17879_v9  ;;  %v11007_v14 = vmul.f32 %v17870_v40, %v17879_v9  ;;  %v10879_v23 = vmul.f32 %v17873_v48, %v17879_v9 }
 0xe7c   : > { %v14293_v60 = vadd.f32 %v13359_v13, %v10838_v2  ;;  %v14195_v25 = vpop.f32.mrb[50].mxu0  ;;  %v10909_v38 = vmul.f32 %v17867_v10, %v17887_v32  ;;  %v11005_v30 = vmul.f32 %v17870_v40, %v17887_v32  ;;  %v10877_v26 = vmul.f32 %v17873_v48, %v17887_v32 }
 0xe7d   : > { %v10859_v29 = vmax.f32 %v14292_v31, 0.0  ;;  %v14294_v36 = vadd.f32 %v14195_v25, %v13359_v13  ;;  %v10841_v53 = vpop.f32.mrb[51].mxu0  ;;  %v11045_v56 = vpack.c.bf16 %v10911_v46, %v10910_v37  ;;  %v11069_v61 = vpack.c.bf16 %v11007_v14, %v11006_v17  ;;  %v13388_v31 = vld [vmem:[%s18640_s4 + $0x6] ss:$0 sm:$0xff] }
 0xe7e   : > { %v10857_v16 = vmax.f32 %v14293_v60, 0.0  ;;  %v14295_v28 = vadd.f32 %v13359_v13, %v10841_v53  ;;  %v11044_v49 = vpack.c.bf16 %v10909_v38, %v10908_v44  ;;  %v11068_v50 = vpack.c.bf16 %v11005_v30, %v11004_v5 }
 0xe7f   : > { %v17910_v19 = vmin.f32 %v10859_v29, 6.0  ;;  %v10860_v41 = vmax.f32 %v14294_v36, 0.0  ;;  %v11036_v45 = vpack.c.bf16 %v10877_v26, %v10876_v18  ;;  %v11037_v27 = vpack.c.bf16 %v10879_v23, %v10878_v52  ;;  %v13384_v23 = vld [vmem:[%s18640_s4 + $0x4] ss:$0 sm:$0xff] }
 0xe80   : > { %v17912_v39 = vmin.f32 %v10857_v16, 6.0  ;;  %v10858_v47 = vmax.f32 %v14295_v28, 0.0  ;;  %13918 = vmatprep.subr.bf16.mxu1 %v11044_v49  ;;  %14196 = vmatprep.subr.bf16.mxu0 %v11068_v50  ;;  %v17916_v58 = vmul.f32 %v17908_v15, %v17877_v62  ;;  %v17920_v35 = vmul.f32 %v17908_v15, %v17887_v32  ;;  %v18014_v16 = vld [vmem:[%s18638_s6 + $0x38] ss:$20 sps:$4 sm:$0xff]  }
 0xe81   : > { %v17922_v57 = vmin.f32 %v10860_v41, 6.0  ;;  %13919 = vmatpush3.bf16.msra.mxu1 %v11036_v45  ;;  %14197 = vmatpush3.bf16.msra.mxu0 %v11068_v50  ;;  %v10914_v6 = vmul.f32 %v17867_v10, %v17910_v19  ;;  %v11010_v24 = vmul.f32 %v17870_v40, %v17910_v19  ;;  %v10882_v21 = vmul.f32 %v17873_v48, %v17910_v19 }
 0xe82   : > { %v17931_v54 = vmin.f32 %v10858_v47, 6.0  ;;  %13920 = vmatprep.subr.bf16.mxu1 %v11045_v56  ;;  %14198 = vmatprep.subr.bf16.mxu0 %v11069_v61  ;;  %v10912_v63 = vmul.f32 %v17867_v10, %v17912_v39  ;;  %v11008_v0 = vmul.f32 %v17870_v40, %v17912_v39  ;;  %v10880_v13 = vmul.f32 %v17873_v48, %v17912_v39 }
 0xe83   : > { %v10915_v22 = vmul.f32 %v17867_v10, %v17922_v57  ;;  %v11011_v3 = vmul.f32 %v17870_v40, %v17922_v57  ;;  %v10883_v1 = vmul.f32 %v17873_v48, %v17922_v57  ;;  %v11048_v8 = vpack.c.bf16 %v17920_v35, %v17916_v58  ;;  %18641 = vst [vmem:[#allocation54_spill] sm:$0xff] %v18014_v16 }
 0xe84   : > { %v10913_v20 = vmul.f32 %v17867_v10, %v17931_v54  ;;  %v11009_v55 = vmul.f32 %v17870_v40, %v17931_v54  ;;  %v10881_v34 = vmul.f32 %v17873_v48, %v17931_v54  ;;  %v10892_v33 = vmul.f32 %v13378_v59, %v17877_v62 }
 0xe85   : > { %13921 = vmatpush3.bf16.msra.mxu1 %v11037_v27  ;;  %14199 = vmatpush3.bf16.msra.mxu0 %v11069_v61  ;;  %v11047_v42 = vpack.c.bf16 %v10915_v22, %v10914_v6  ;;  %v11071_v4 = vpack.c.bf16 %v11011_v3, %v11010_v24  ;;  %v11039_v7 = vpack.c.bf16 %v10883_v1, %v10882_v21  ;;  %v13390_v21 = vld [vmem:[%s18640_s4 + $0x7] ss:$0 sm:$0xff]  ;;  %v13386_v3 = vld [vmem:[%s18640_s4 + $0x5] ss:$0 sm:$0xff] }
 0xe86   : > { %v11046_v12 = vpack.c.bf16 %v10913_v20, %v10912_v63  ;;  %v11070_v37 = vpack.c.bf16 %v11009_v55, %v11008_v0  ;;  %v11038_v17 = vpack.c.bf16 %v10881_v34, %v10880_v13  ;;  %v10893_v52 = vmul.f32 %v13378_v59, %v17887_v32 }
 0xe87   : > { %v10926_v10 = vmul.f32 %v17908_v15, %v17875_v11  ;;  %v10927_v40 = vmul.f32 %v17908_v15, %v17879_v9  ;;  %v17960_v48 = vmul.f32 %v13378_v59, %v17875_v11  ;;  %v17963_v51 = vmul.f32 %v13378_v59, %v17879_v9 }
 0xe88   : > { %13922 = vmatprep.subr.bf16.mxu1 %v11046_v12  ;;  %14200 = vmatprep.subr.bf16.mxu0 %v11070_v37  ;;  %v11040_v44 = vpack.c.bf16 %v10893_v52, %v10892_v33  ;;  %v17967_v5 = vmul.f32 %v17908_v15, %v17912_v39  ;;  %v17971_v18 = vmul.f32 %v17908_v15, %v17931_v54 }
 0xe89   : > { %13923 = vmatpush3.bf16.msra.mxu1 %v11038_v17  ;;  %14201 = vmatpush3.bf16.msra.mxu0 %v11070_v37  ;;  %v11049_v2 = vpack.c.bf16 %v10927_v40, %v10926_v10  ;;  %v11041_v46 = vpack.c.bf16 %v17963_v51, %v17960_v48  ;;  %v17977_v14 = vmul.f32 %v13378_v59, %v17912_v39  ;;  %v18066_v51 = vld [vmem:[%s18638_s6 + $0x88] ss:$20 sps:$4 sm:$0xff]  }
 0xe8a   : > { %13924 = vmatprep.subr.bf16.mxu1 %v11047_v42  ;;  %14202 = vmatprep.subr.bf16.mxu0 %v11071_v4  ;;  %v11050_v60 = vpack.c.bf16 %v17971_v18, %v17967_v5  ;;  %v17983_v25 = vmul.f32 %v13378_v59, %v17931_v54  ;;  %v17987_v38 = vmul.f32 %v17908_v15, %v17910_v19 }
 0xe8b   : > { %v17991_v30 = vmul.f32 %v17908_v15, %v17922_v57  ;;  %v17994_v26 = vmul.f32 %v13378_v59, %v17910_v19  ;;  %v17997_v29 = vmul.f32 %v13378_v59, %v17922_v57  ;;  %v18000_v36 = vmul.f32 %v13388_v31, %v17877_v62  ;;  %v18041_v59 = vld [vmem:[%s18638_s6 + $0x60] ss:$20 sps:$4 sm:$0xff]   ;;  %18643 = vst [vmem:[#allocation56_spill] sm:$0xff] %v18066_v51 }
 0xe8c   : > { %v11042_v53 = vpack.c.bf16 %v17983_v25, %v17977_v14  ;;  %v18005_v56 = vmul.f32 %v13388_v31, %v17887_v32  ;;  %v18008_v61 = vmul.f32 %v13384_v23, %v17877_v62  ;;  %v18011_v15 = vmul.f32 %v13384_v23, %v17887_v32  ;;  %18642 = vst [vmem:[#allocation55_spill] sm:$0xff] %v18041_v59  ;;  %v18099_v14 = vld [vmem:[%s18638_s6 + $0x50] ss:$20 sps:$4 sm:$0xff]  }
 0xe8d   : > { %13925 = vmatpush3.bf16.msra.mxu1 %v11039_v7  ;;  %14203 = vmatpush3.bf16.msra.mxu0 %v11071_v4  ;;  %v11051_v28 = vpack.c.bf16 %v17991_v30, %v17987_v38  ;;  %v11043_v49 = vpack.c.bf16 %v17997_v29, %v17994_v26  ;;  %v18021_v50 = vmul.f32 %v13388_v31, %v17875_v11  ;;  %v18102_v25 = vld [vmem:[%s18638_s6 + $0x7c] ss:$20 sps:$4 sm:$0xff]   ;;  %v18107_v26 = vld [vmem:[%s18638_s6 + $0x78] ss:$20 sps:$4 sm:$0xff]  }
 0xe8e   : > { %13926 = vmatprep.subr.bf16.mxu1 %v11048_v8  ;;  %v11060_v41 = vpack.c.bf16 %v18005_v56, %v18000_v36  ;;  %v11052_v45 = vpack.c.bf16 %v18011_v15, %v18008_v61  ;;  %v10975_v27 = vmul.f32 %v13388_v31, %v17879_v9  ;;  %v18029_v47 = vmul.f32 %v13384_v23, %v17875_v11  ;;  %v18110_v29 = vld [vmem:[%s18638_s6 + $0xc] ss:$20 sps:$4 sm:$0xff]   ;;  %v18115_v36 = vld [vmem:[%s18638_s6 + $0x8] ss:$20 sps:$4 sm:$0xff]   ;;  %v18123_v56 = vld [vmem:[%s18638_s6 + $0x30] ss:$20 sps:$4 sm:$0xff]  }
 0xe8f   : > { %v10943_v58 = vmul.f32 %v13384_v23, %v17879_v9  ;;  %v18033_v35 = vmul.f32 %v13388_v31, %v17912_v39  ;;  %v10977_v6 = vmul.f32 %v13388_v31, %v17931_v54  ;;  %v18037_v24 = vmul.f32 %v13384_v23, %v17912_v39  ;;  %18644 = vst [vmem:[#allocation57_spill] sm:$0xff] %v18099_v14  ;;  %v18126_v61 = vld [vmem:[%s18638_s6 + $0x5c] ss:$20 sps:$4 sm:$0xff]   ;;  %v18131_v15 = vld [vmem:[%s18638_s6 + $0x58] ss:$20 sps:$4 sm:$0xff]  }
 0xe90   : > { %v11061_v63 = vpack.c.bf16 %v10975_v27, %v18021_v50  ;;  %v10945_v0 = vmul.f32 %v13384_v23, %v17931_v54  ;;  %v10978_v13 = vmul.f32 %v13388_v31, %v17910_v19  ;;  %v10979_v22 = vmul.f32 %v13388_v31, %v17922_v57  ;;  %14205 = vmatmul.mubr.msk.bf16.vlgmr.msra.gmra.mrb[52].mxu0 %vm11179_vm5, %v18014_v16  ;;  %v15770_v50 = vld [vmem:[%s18647_s28] sm:$0xff]   ;;  %v15773_v27 = vld [vmem:[%s18648_s3 + $0x18] sm:$0xff]   ;;  %s18652_s28 = sld [smem:[#allocation43_spill]] }
 0xe91   : > { %13927 = vmatpush3.bf16.msra.mxu1 %v11040_v44  ;;  %v11053_v1 = vpack.c.bf16 %v10943_v58, %v18029_v47  ;;  %v11062_v8 = vpack.c.bf16 %v10977_v6, %v18033_v35  ;;  %v10946_v20 = vmul.f32 %v13384_v23, %v17910_v19  ;;  %v10947_v55 = vmul.f32 %v13384_v23, %v17922_v57  ;;  %v15774_v47 = vld [vmem:[%s18648_s3 + $0x20] sm:$0xff]   ;;  %v15775_v58 = vld [vmem:[%s18648_s3 + $0x28] sm:$0xff]   ;;  %v15776_v35 = vld [vmem:[%s18648_s3 + $0x30] sm:$0xff]  }
 0xe92   : > { %13928 = vmatprep.subr.bf16.mxu1 %v11049_v2  ;;  %v11054_v34 = vpack.c.bf16 %v10945_v0, %v18037_v24  ;;  %v11063_v33 = vpack.c.bf16 %v10979_v22, %v10978_v13  ;;  %v10988_v42 = vmul.f32 %v13390_v21, %v17877_v62  ;;  %v10989_v4 = vmul.f32 %v13390_v21, %v17887_v32  ;;  %v15777_v6 = vld [vmem:[%s18648_s3 + $0x38] sm:$0xff]  }
 0xe93   : > { %v11055_v7 = vpack.c.bf16 %v10947_v55, %v10946_v20  ;;  %v10956_v12 = vmul.f32 %v13386_v3, %v17877_v62  ;;  %v10957_v37 = vmul.f32 %v13386_v3, %v17887_v32  ;;  %v10990_v17 = vmul.f32 %v13390_v21, %v17875_v11  ;;  %14208 = vmatprep.mubr.msk.bf16.mxu0 %vm11179_vm5, %v18041_v59 }
 0xe94   : > { %v11064_v52 = vpack.c.bf16 %v10989_v4, %v10988_v42  ;;  %v10991_v10 = vmul.f32 %v13390_v21, %v17879_v9  ;;  %v10958_v40 = vmul.f32 %v13386_v3, %v17875_v11  ;;  %v10959_v48 = vmul.f32 %v13386_v3, %v17879_v9  ;;  %18645 = vst [vmem:[#allocation58_spill] sm:$0xff] %v18102_v25 }
 0xe95   : > { %13929 = vmatpush3.bf16.msra.mxu1 %v11041_v46  ;;  %v11056_v44 = vpack.c.bf16 %v10957_v37, %v10956_v12  ;;  %v10992_v62 = vmul.f32 %v13390_v21, %v17912_v39  ;;  %v10993_v32 = vmul.f32 %v13390_v21, %v17931_v54  ;;  %v10960_v5 = vmul.f32 %v13386_v3, %v17912_v39 }
 0xe96   : > { %13930 = vmatprep.subr.bf16.mxu1 %v11050_v60  ;;  %v11065_v18 = vpack.c.bf16 %v10991_v10, %v10990_v17  ;;  %v11057_v31 = vpack.c.bf16 %v10959_v48, %v10958_v40  ;;  %v10961_v2 = vmul.f32 %v13386_v3, %v17931_v54  ;;  %v10994_v11 = vmul.f32 %v13390_v21, %v17910_v19  ;;  %v18083_v60 = vld [vmem:[%s18638_s6] ss:$20 sps:$4 sm:$0xff]  }
 0xe97   : > { %v11066_v9 = vpack.c.bf16 %v10993_v32, %v10992_v62  ;;  %v10995_v23 = vmul.f32 %v13390_v21, %v17922_v57  ;;  %v10962_v46 = vmul.f32 %v13386_v3, %v17910_v19  ;;  %v10963_v38 = vmul.f32 %v13386_v3, %v17922_v57  ;;  %v18086_v19 = vld [vmem:[%s18638_s6 + $0x2c] ss:$20 sps:$4 sm:$0xff]   ;;  %v18091_v57 = vld [vmem:[%s18638_s6 + $0x28] ss:$20 sps:$4 sm:$0xff]   ;;  %18646 = vst [vmem:[#allocation59_spill] sm:$0xff] %v18107_v26 }
 0xe98   : > { %v11058_v30 = vpack.c.bf16 %v10961_v2, %v10960_v5  ;;  %14209 = vmatmul.mubr.msk.bf16.gmra.mrb[56].mxu0 %vm11179_vm5, %v18066_v51  ;;  %18649 = vst [vmem:[#allocation60_spill] sm:$0xff] %v18131_v15 }
 0xe99   : > { %13931 = vmatpush3.bf16.msra.mxu1 %v11042_v53  ;;  %v11067_v39 = vpack.c.bf16 %v10995_v23, %v10994_v11  ;;  %v11059_v54 = vpack.c.bf16 %v10963_v38, %v10962_v46  ;;  %11777 = vmatprep.mubr.bf16.mxu0 %v17860_v43  ;;  %v18094_v43 = vld [vmem:[%s18638_s6 + $0x54] ss:$20 sps:$4 sm:$0xff]   ;;  %v13393_v23 = vld [vmem:[%s18652_s28] ss:$0 sm:$0xff]  ;;  %s18653_s28 = sld [smem:[#allocation45_spill]] }
 0xe9a   : > { %13932 = vmatprep.subr.bf16.mxu1 %v11051_v28  ;;  %v18118_v53 = vld [vmem:[%s18638_s6 + $0x34] ss:$20 sps:$4 sm:$0xff]   ;;  %v18134_v28 = vld [vmem:[%s18638_s6 + $0x84] ss:$20 sps:$4 sm:$0xff]  }
 0xe9b   : > { %18650 = vst [vmem:[#allocation61_spill] sm:$0xff] %v18134_v28 }
 0xe9d   : > { %13933 = vmatpush3.bf16.msra.mxu1 %v11043_v49  ;;  %v18139_v49 = vld [vmem:[%s18638_s6 + $0x80] ss:$20 sps:$4 sm:$0xff]  }
 0xe9e   : > { %13958 = vmatprep.subr.bf16.mxu1 %v11060_v41  ;;  %18651 = vst [vmem:[#allocation62_spill] sm:$0xff] %v18139_v49  ;;  %v15771_v41 = vld [vmem:[%s18648_s3 + $0x8] sm:$0xff]  }
 0xea0   : > { %11225 = vmatmul.mubr.bf16.vlgmr.msra.gmra.mrb[96].mxu1 %v18083_v60 }
 0xea1   : > { %13959 = vmatpush3.bf16.msra.mxu1 %v11052_v45  ;;  %11232 = vmatprep.mubr.bf16.mxu1 %v18086_v19  ;;  %v15772_v45 = vld [vmem:[%s18648_s3 + $0x10] sm:$0xff]   ;;  %s18654_s3 = smov %s18653_s28 }
 0xea2   : > { %13960 = vmatprep.subr.bf16.mxu1 %v11061_v63 }
 0xea5   : > { %13961 = vmatpush3.bf16.msra.mxu1 %v11053_v1 }
 0xea6   : > { %13962 = vmatprep.subr.bf16.mxu1 %v11062_v8 }
 0xea8   : > { %11233 = vmatmul.mubr.bf16.gmra.mrb[100].mxu1 %v18091_v57 }
 0xea9   : > { %13963 = vmatpush3.bf16.msra.mxu1 %v11054_v34  ;;  %11240 = vmatprep.mubr.bf16.mxu1 %v18094_v43 }
 0xeaa   : > { %13964 = vmatprep.subr.bf16.mxu1 %v11063_v33 }
 0xead   : > { %13965 = vmatpush3.bf16.msra.mxu1 %v11055_v7 }
 0xeae   : > { %13966 = vmatprep.subr.bf16.mxu1 %v11064_v52 }
 0xeb0   : > { %11241 = vmatmul.mubr.bf16.gmra.mrb[104].mxu1 %v18099_v14 }
 0xeb1   : > { %13967 = vmatpush3.bf16.msra.mxu1 %v11056_v44  ;;  %11248 = vmatprep.mubr.bf16.mxu1 %v18102_v25 }
 0xeb2   : > { %13968 = vmatprep.subr.bf16.mxu1 %v11065_v18 }
 0xeb5   : > { %13969 = vmatpush3.bf16.msra.mxu1 %v11057_v31 }
 0xeb6   : > { %13970 = vmatprep.subr.bf16.mxu1 %v11066_v9 }
 0xeb8   : > { %11249 = vmatmul.mubr.bf16.gmra.mrb[108].mxu1 %v18107_v26 }
 0xeb9   : > { %13971 = vmatpush3.bf16.msra.mxu1 %v11058_v30  ;;  %11289 = vmatprep.mubr.bf16.mxu1 %v18110_v29 }
 0xeba   : > { %13972 = vmatprep.subr.bf16.mxu1 %v11067_v39 }
 0xebd   : > { %13973 = vmatpush3.bf16.msra.mxu1 %v11059_v54 }
 0xebe   : > { %14212 = vmatprep.subr.bf16.mxu1 %v15770_v50 }
 0xec0   : > { %11290 = vmatmul.mubr.bf16.vlgmr.msra.gmra.mrb[112].mxu1 %v18115_v36 }
 0xec1   : > { %11297 = vmatprep.mubr.bf16.mxu1 %v18118_v53  ;;  %14213 = vmatpush3.bf16.msra.mxu1 %v15770_v50 }
 0xec2   : > { %14214 = vmatprep.subr.bf16.mxu1 %v15771_v41 }
 0xec5   : > { %14215 = vmatpush3.bf16.msra.mxu1 %v15771_v41 }
 0xec6   : > { %14216 = vmatprep.subr.bf16.mxu1 %v15772_v45 }
 0xec8   : > { %11298 = vmatmul.mubr.bf16.gmra.mrb[116].mxu1 %v18123_v56 }
 0xec9   : > { %11305 = vmatprep.mubr.bf16.mxu1 %v18126_v61  ;;  %14217 = vmatpush3.bf16.msra.mxu1 %v15772_v45 }
 0xeca   : > { %14218 = vmatprep.subr.bf16.mxu1 %v15773_v27 }
 0xecd   : > { %14219 = vmatpush3.bf16.msra.mxu1 %v15773_v27 }
 0xece   : > { %14220 = vmatprep.subr.bf16.mxu1 %v15774_v47 }
 0xed0   : > { %11306 = vmatmul.mubr.bf16.gmra.mrb[120].mxu1 %v18131_v15 }
 0xed1   : > { %11313 = vmatprep.mubr.bf16.mxu1 %v18134_v28  ;;  %14221 = vmatpush3.bf16.msra.mxu1 %v15774_v47 }
 0xed2   : > { %14222 = vmatprep.subr.bf16.mxu1 %v15775_v58 }
 0xed5   : > { %14223 = vmatpush3.bf16.msra.mxu1 %v15775_v58 }
 0xed6   : > { %14224 = vmatprep.subr.bf16.mxu1 %v15776_v35 }
 0xed8   : > { %11314 = vmatmul.mubr.bf16.gmra.mrb[124].mxu1 %v18139_v49 }
 0xed9   : > { %14225 = vmatpush3.bf16.msra.mxu1 %v15776_v35 }
 0xeda   : > { %14226 = vmatprep.subr.bf16.mxu1 %v15777_v6 }
 0xedd   : > { %14227 = vmatpush3.bf16.msra.mxu1 %v15777_v6 }
 0xf63   : > { %v14206_v24 = vpop.f32.mrb[52].mxu0 }
 0xf64   : > { %v11356_v21 = vpop.f32.mrb[53].mxu0 }
 0xf65   : > { %v14207_v63 = vpop.f32.mrb[54].mxu0 }
 0xf66   : > { %v11359_v0 = vpop.f32.mrb[55].mxu0 }
 0xf6b   : > { %v18150_v13 = vpop.f32.mrb[56].mxu0 }
 0xf6c   : > { %v18152_v22 = vpop.f32.mrb[57].mxu0 }
 0xf6d   : > { %v18154_v3 = vpop.f32.mrb[58].mxu0 }
 0xf6e   : > { %v18156_v1 = vpop.f32.mrb[59].mxu0 }
 0xf73   : > { %v13934_v8 = vpop.f32.mrb[96].mxu1 }
 0xf74   : > { %v13935_v20 = vpop.f32.mrb[97].mxu1 }
 0xf75   : > { %v13936_v55 = vadd.f32 %v13935_v20, %v13934_v8  ;;  %v13937_v34 = vpop.f32.mrb[98].mxu1 }
 0xf76   : > { %v13938_v33 = vpop.f32.mrb[99].mxu1 }
 0xf77   : > { %v13939_v42 = vadd.f32 %v13938_v33, %v13937_v34  ;;  %v11227_v30 = vadd.f32 %v13936_v55, %v13393_v23 }
 0xf79   : > { %v11230_v41 = vadd.f32 %v13939_v42, %v13393_v23 }
 0xf7b   : > { %v13940_v4 = vpop.f32.mrb[100].mxu1 }
 0xf7c   : > { %v13941_v7 = vpop.f32.mrb[101].mxu1 }
 0xf7d   : > { %v13942_v12 = vadd.f32 %v13941_v7, %v13940_v4  ;;  %v13943_v37 = vpop.f32.mrb[102].mxu1 }
 0xf7e   : > { %v13944_v17 = vpop.f32.mrb[103].mxu1 }
 0xf7f   : > { %v13945_v52 = vadd.f32 %v13944_v17, %v13943_v37  ;;  %v11235_v34 = vadd.f32 %v13942_v12, %v13393_v23 }
 0xf81   : > { %v11238_v37 = vadd.f32 %v13945_v52, %v13393_v23 }
 0xf83   : > { %v13946_v10 = vpop.f32.mrb[104].mxu1 }
 0xf84   : > { %v13947_v40 = vpop.f32.mrb[105].mxu1 }
 0xf85   : > { %v13948_v48 = vadd.f32 %v13947_v40, %v13946_v10  ;;  %v13949_v44 = vpop.f32.mrb[106].mxu1 }
 0xf86   : > { %v13950_v62 = vpop.f32.mrb[107].mxu1 }
 0xf87   : > { %v13951_v32 = vadd.f32 %v13950_v62, %v13949_v44 }
 0xf8b   : > { %v13952_v5 = vpop.f32.mrb[108].mxu1 }
 0xf8c   : > { %v13953_v18 = vpop.f32.mrb[109].mxu1 }
 0xf8d   : > { %v13954_v31 = vadd.f32 %v13953_v18, %v13952_v5  ;;  %v13955_v2 = vpop.f32.mrb[110].mxu1 }
 0xf8e   : > { %v13956_v11 = vpop.f32.mrb[111].mxu1 }
 0xf8f   : > { %v13957_v9 = vadd.f32 %v13956_v11, %v13955_v2  ;;  %v11243_v11 = vadd.f32 %v13948_v48, %v13393_v23  ;;  %v11251_v48 = vadd.f32 %v13954_v31, %v13393_v23 }
 0xf93   : > { %v13974_v46 = vpop.f32.mrb[112].mxu1 }
 0xf94   : > { %v13975_v38 = vpop.f32.mrb[113].mxu1 }
 0xf95   : > { %v13976_v39 = vadd.f32 %v13975_v38, %v13974_v46  ;;  %v13977_v54 = vpop.f32.mrb[114].mxu1 }
 0xf96   : > { %v13978_v50 = vpop.f32.mrb[115].mxu1 }
 0xf97   : > { %v13979_v45 = vadd.f32 %v13978_v50, %v13977_v54  ;;  %v11292_v27 = vadd.f32 %v13976_v39, %v11227_v30  ;;  %v11246_v30 = vadd.f32 %v13951_v32, %v13393_v23  ;;  %v11254_v32 = vadd.f32 %v13957_v9, %v13393_v23  ;;  %v18164_v9 = vld [vmem:[#allocation2] ss:$0 sm:$0xff] }
 0xf99   : > { %v11357_v47 = vadd.f32 %v11356_v21, %v11292_v27  ;;  %v11295_v58 = vadd.f32 %v13979_v45, %v11230_v41 }
 0xf9b   : > { %v11387_v35 = vmax.f32 %v11357_v47, 0.0  ;;  %v11360_v6 = vadd.f32 %v11359_v0, %v11295_v58  ;;  %v13980_v8 = vpop.f32.mrb[116].mxu1 }
 0xf9c   : > { %v13981_v20 = vpop.f32.mrb[117].mxu1 }
 0xf9d   : > { %v11388_v33 = vmax.f32 %v11360_v6, 0.0  ;;  %v13982_v4 = vadd.f32 %v13981_v20, %v13980_v8  ;;  %v13983_v7 = vpop.f32.mrb[118].mxu1  ;;  %v11395_v10 = vmin.f32 %v11387_v35, 6.0 }
 0xf9e   : > { %v13984_v17 = vpop.f32.mrb[119].mxu1 }
 0xf9f   : > { %v11396_v55 = vmin.f32 %v11388_v33, 6.0  ;;  %v11300_v40 = vadd.f32 %v13982_v4, %v11235_v34  ;;  %v13985_v44 = vadd.f32 %v13984_v17, %v13983_v7 }
 0xfa1   : > { %v11403_v62 = vpack.c.bf16 %v11396_v55, %v11395_v10  ;;  %v11365_v42 = vadd.f32 %v14206_v24, %v11300_v40  ;;  %v11303_v5 = vadd.f32 %v13985_v44, %v11238_v37 }
 0xfa3   : > { %v11389_v18 = vmax.f32 %v11365_v42, 0.0  ;;  %v11368_v21 = vadd.f32 %v14207_v63, %v11303_v5  ;;  %v13986_v2 = vpop.f32.mrb[120].mxu1  ;;  %14228 = vmatprep.mubr.bf16.mxu1 %v11403_v62 }
 0xfa4   : > { %v13987_v0 = vpop.f32.mrb[121].mxu1 }
 0xfa5   : > { %v11390_v46 = vmax.f32 %v11368_v21, 0.0  ;;  %v13988_v12 = vadd.f32 %v13987_v0, %v13986_v2  ;;  %v13989_v38 = vpop.f32.mrb[122].mxu1  ;;  %v11397_v52 = vmin.f32 %v11389_v18, 6.0  ;;  %v18170_v0 = vld [vmem:[%s18653_s28 + $0x2] ss:$0 sm:$0xff]  ;;  %s18662_s28 = sld [smem:[#allocation47_spill]] }
 0xfa6   : > { %v13990_v39 = vpop.f32.mrb[123].mxu1 }
 0xfa7   : > { %v11398_v54 = vmin.f32 %v11390_v46, 6.0  ;;  %v13991_v50 = vadd.f32 %v13990_v39, %v13989_v38  ;;  %v11308_v41 = vadd.f32 %v13988_v12, %v11243_v11  ;;  %v18177_v12 = vld [vmem:[%s18654_s3] ss:$0 sm:$0xff] }
 0xfa9   : > { %v11404_v45 = vpack.c.bf16 %v11398_v54, %v11397_v52  ;;  %v11373_v27 = vadd.f32 %v18152_v22, %v11308_v41  ;;  %v11311_v24 = vadd.f32 %v13991_v50, %v11246_v30  ;;  %v18184_v54 = vld [vmem:[%s18654_s3 + $0x4] ss:$0 sm:$0xff] }
 0xfab   : > { %v11391_v47 = vmax.f32 %v11373_v27, 0.0  ;;  %v11376_v63 = vadd.f32 %v18156_v1, %v11311_v24  ;;  %v13992_v58 = vpop.f32.mrb[124].mxu1  ;;  %14229 = vmatmul.mubr.bf16.vlgmr.msra.gmra.mrb[128].mxu1 %v11404_v45 }
 0xfac   : > { %v13993_v35 = vpop.f32.mrb[125].mxu1 }
 0xfad   : > { %v11392_v6 = vmax.f32 %v11376_v63, 0.0  ;;  %v13994_v8 = vadd.f32 %v13993_v35, %v13992_v58  ;;  %v13995_v20 = vpop.f32.mrb[126].mxu1  ;;  %v11399_v33 = vmin.f32 %v11391_v47, 6.0 }
 0xfae   : > { %v13996_v34 = vpop.f32.mrb[127].mxu1 }
 0xfaf   : > { %v11400_v4 = vmin.f32 %v11392_v6, 6.0  ;;  %v11316_v7 = vadd.f32 %v13994_v8, %v11251_v48  ;;  %v13997_v37 = vadd.f32 %v13996_v34, %v13995_v20 }
 0xfb1   : > { %v11405_v17 = vpack.c.bf16 %v11400_v4, %v11399_v33  ;;  %v11381_v22 = vadd.f32 %v18150_v13, %v11316_v7  ;;  %v11319_v10 = vadd.f32 %v13997_v37, %v11254_v32  ;;  %v18219_v4 = vld [vmem:[%s18654_s3 + $0x3] ss:$0 sm:$0xff]  ;;  %v18222_v7 = vld [vmem:[%s18654_s3 + $0x7] ss:$0 sm:$0xff] }
 0xfb3   : > { %v11393_v55 = vmax.f32 %v11381_v22, 0.0  ;;  %v11384_v1 = vadd.f32 %v18154_v3, %v11319_v10  ;;  %14232 = vmatprep.mubr.bf16.mxu1 %v11405_v17 }
 0xfb5   : > { %v11394_v40 = vmax.f32 %v11384_v1, 0.0  ;;  %v11401_v31 = vmin.f32 %v11393_v55, 6.0  ;;  %v18227_v55 = vld [vmem:[%s18654_s3 + $0x1] ss:$0 sm:$0xff] }
 0xfb7   : > { %v11402_v44 = vmin.f32 %v11394_v40, 6.0 }
 0xfb9   : > { %v11406_v62 = vpack.c.bf16 %v11402_v44, %v11401_v31 }
 0xfbb   : > { %14233 = vmatmul.mubr.bf16.gmra.mrb[132].mxu1 %v11406_v62  ;;  %v18230_v62 = vld [vmem:[%s18654_s3 + $0x5] ss:$0 sm:$0xff] }
 0xfbc   : > { %11842 = vmatprep.mubr.bf16.mxu1 %v18110_v29  ;;  %v18174_v29 = vld [vmem:[%s18654_s3 + $0x6] ss:$0 sm:$0xff] }
0x107e   : > { %v14230_v23 = vpop.f32.mrb[128].mxu1 }
0x107f   : > { %v11521_v13 = vadd.f32 %v14230_v23, %v18164_v9  ;;  %v11512_v42 = vpop.f32.mrb[129].mxu1 }
0x1080   : > { %v11513_v3 = vadd.f32 %v18164_v9, %v11512_v42  ;;  %v14231_v5 = vpop.f32.mrb[130].mxu1 }
0x1081   : > { %v11545_v18 = vmax.f32 %v11521_v13, 0.0  ;;  %v11524_v21 = vadd.f32 %v14231_v5, %v18164_v9  ;;  %v11515_v2 = vpop.f32.mrb[131].mxu1 }
0x1082   : > { %v11543_v11 = vmax.f32 %v11513_v3, 0.0  ;;  %v11516_v46 = vadd.f32 %v18164_v9, %v11515_v2 }
0x1083   : > { %v18179_v38 = vmin.f32 %v11545_v18, 6.0  ;;  %v11546_v30 = vmax.f32 %v11524_v21, 0.0 }
0x1084   : > { %v18181_v39 = vmin.f32 %v11543_v11, 6.0  ;;  %v11544_v52 = vmax.f32 %v11516_v46, 0.0 }
0x1085   : > { %v18186_v50 = vmin.f32 %v11546_v30, 6.0  ;;  %v11600_v41 = vmul.f32 %v18170_v0, %v18179_v38  ;;  %v11664_v45 = vmul.f32 %v18174_v29, %v18179_v38  ;;  %v11568_v27 = vmul.f32 %v18177_v12, %v18179_v38 }
0x1086   : > { %v18194_v24 = vmin.f32 %v11544_v52, 6.0  ;;  %v11598_v47 = vmul.f32 %v18170_v0, %v18181_v39  ;;  %v11662_v63 = vmul.f32 %v18174_v29, %v18181_v39  ;;  %v11566_v58 = vmul.f32 %v18177_v12, %v18181_v39 }
0x1087   : > { %v11630_v35 = vmul.f32 %v18184_v54, %v18181_v39  ;;  %v11601_v48 = vmul.f32 %v18170_v0, %v18186_v50  ;;  %v11665_v6 = vmul.f32 %v18174_v29, %v18186_v50  ;;  %v11569_v8 = vmul.f32 %v18177_v12, %v18186_v50 }
0x1088   : > { %v11599_v20 = vmul.f32 %v18170_v0, %v18194_v24  ;;  %v11663_v32 = vmul.f32 %v18174_v29, %v18194_v24  ;;  %v11567_v34 = vmul.f32 %v18177_v12, %v18194_v24  ;;  %v11631_v33 = vmul.f32 %v18184_v54, %v18194_v24 }
0x1089   : > { %v11711_v37 = vpack.c.bf16 %v11601_v48, %v11600_v41  ;;  %v11727_v17 = vpack.c.bf16 %v11665_v6, %v11664_v45  ;;  %v11703_v22 = vpack.c.bf16 %v11569_v8, %v11568_v27  ;;  %v11632_v10 = vmul.f32 %v18184_v54, %v18179_v38 }
0x108a   : > { %v11710_v1 = vpack.c.bf16 %v11599_v20, %v11598_v47  ;;  %v11726_v40 = vpack.c.bf16 %v11663_v32, %v11662_v63  ;;  %v11702_v31 = vpack.c.bf16 %v11567_v34, %v11566_v58  ;;  %v11718_v44 = vpack.c.bf16 %v11631_v33, %v11630_v35 }
0x108b   : > { %v11633_v23 = vmul.f32 %v18184_v54, %v18186_v50  ;;  %v18236_v13 = vmul.f32 %v18219_v4, %v18181_v39  ;;  %v18240_v42 = vmul.f32 %v18219_v4, %v18194_v24  ;;  %v18244_v3 = vmul.f32 %v18222_v7, %v18181_v39 }
0x108c   : > { %14018 = vmatprep.subr.bf16.mxu0 %v11710_v1  ;;  %14058 = vmatprep.subr.bf16.mxu1 %v11726_v40  ;;  %v18248_v5 = vmul.f32 %v18222_v7, %v18194_v24  ;;  %v18252_v18 = vmul.f32 %v18227_v55, %v18181_v39  ;;  %v18256_v21 = vmul.f32 %v18227_v55, %v18194_v24  ;;  %v18304_v1 = vld [vmem:[%s18654_s3 + $0x8] ss:$0 sm:$0xff]  ;;  %s18663_s3 = smov %s18662_s28 }
0x108d   : > { %14019 = vmatpush3.bf16.msra.mxu0 %v11702_v31  ;;  %14059 = vmatpush3.bf16.msra.mxu1 %v11718_v44  ;;  %v11719_v2 = vpack.c.bf16 %v11633_v23, %v11632_v10  ;;  %v18262_v46 = vmul.f32 %v18230_v62, %v18181_v39  ;;  %v18270_v45 = vmul.f32 %v18230_v62, %v18194_v24 }
0x108e   : > { %v14234_v30 = vpop.f32.mrb[132].mxu1  ;;  %14020 = vmatprep.subr.bf16.mxu0 %v11711_v37  ;;  %14060 = vmatprep.subr.bf16.mxu1 %v11727_v17  ;;  %v18275_v63 = vmul.f32 %v18219_v4, %v18179_v38  ;;  %v18279_v58 = vmul.f32 %v18219_v4, %v18186_v50  ;;  %v18283_v35 = vmul.f32 %v18222_v7, %v18179_v38 }
0x108f   : > { %v11537_v27 = vadd.f32 %v14234_v30, %v18164_v9  ;;  %v11528_v47 = vpop.f32.mrb[133].mxu1  ;;  %v18290_v20 = vmul.f32 %v18222_v7, %v18186_v50  ;;  %v18294_v32 = vmul.f32 %v18227_v55, %v18179_v38  ;;  %v18301_v10 = vmul.f32 %v18227_v55, %v18186_v50 }
0x1090   : > { %v11529_v48 = vadd.f32 %v18164_v9, %v11528_v47  ;;  %v14235_v6 = vpop.f32.mrb[134].mxu1  ;;  %v18311_v23 = vmul.f32 %v18230_v62, %v18179_v38 }
0x1091   : > { %v11549_v34 = vmax.f32 %v11537_v27, 0.0  ;;  %v11540_v33 = vadd.f32 %v14235_v6, %v18164_v9  ;;  %v11531_v37 = vpop.f32.mrb[135].mxu1  ;;  %14021 = vmatpush3.bf16.msra.mxu0 %v11703_v22  ;;  %14061 = vmatpush3.bf16.msra.mxu1 %v11719_v2  ;;  %v18319_v27 = vmul.f32 %v18230_v62, %v18186_v50  ;;  %v11695_v6 = vmul.f32 %v18304_v1, %v18194_v24 }
0x1092   : > { %v11547_v40 = vmax.f32 %v11529_v48, 0.0  ;;  %v11532_v31 = vadd.f32 %v18164_v9, %v11531_v37  ;;  %v11694_v48 = vmul.f32 %v18304_v1, %v18181_v39 }
0x1093   : > { %v18313_v22 = vmin.f32 %v11549_v34, 6.0  ;;  %v11550_v2 = vmax.f32 %v11540_v33, 0.0 }
0x1094   : > { %v18321_v47 = vmin.f32 %v11547_v40, 6.0  ;;  %v11548_v9 = vmax.f32 %v11532_v31, 0.0 }
0x1095   : > { %v18327_v37 = vmin.f32 %v11550_v2, 6.0  ;;  %v11604_v34 = vmul.f32 %v18170_v0, %v18313_v22  ;;  %v11668_v33 = vmul.f32 %v18174_v29, %v18313_v22  ;;  %v11572_v30 = vmul.f32 %v18177_v12, %v18313_v22 }
0x1096   : > { %v11556_v40 = vmin.f32 %v11548_v9, 6.0  ;;  %v11602_v31 = vmul.f32 %v18170_v0, %v18321_v47  ;;  %v11666_v39 = vmul.f32 %v18174_v29, %v18321_v47  ;;  %v11570_v24 = vmul.f32 %v18177_v12, %v18321_v47 }
0x1097   : > { %v11634_v2 = vmul.f32 %v18184_v54, %v18321_v47  ;;  %v11605_v44 = vmul.f32 %v18170_v0, %v18327_v37  ;;  %v11669_v17 = vmul.f32 %v18174_v29, %v18327_v37  ;;  %v11573_v9 = vmul.f32 %v18177_v12, %v18327_v37 }
0x1098   : > { %v11603_v8 = vmul.f32 %v18170_v0, %v11556_v40  ;;  %v11667_v41 = vmul.f32 %v18174_v29, %v11556_v40  ;;  %v11571_v52 = vmul.f32 %v18177_v12, %v11556_v40  ;;  %v11635_v11 = vmul.f32 %v18184_v54, %v11556_v40 }
0x1099   : > { %v11713_v51 = vpack.c.bf16 %v11605_v44, %v11604_v34  ;;  %v11729_v59 = vpack.c.bf16 %v11669_v17, %v11668_v33  ;;  %v11705_v16 = vpack.c.bf16 %v11573_v9, %v11572_v30  ;;  %v11636_v49 = vmul.f32 %v18184_v54, %v18313_v22  ;;  %v13444_v9 = vld [vmem:[#allocation5] ss:$0 sm:$0xff] }
0x109a   : > { %v11712_v26 = vpack.c.bf16 %v11603_v8, %v11602_v31  ;;  %v11728_v28 = vpack.c.bf16 %v11667_v41, %v11666_v39  ;;  %v11704_v25 = vpack.c.bf16 %v11571_v52, %v11570_v24  ;;  %v11720_v15 = vpack.c.bf16 %v11635_v11, %v11634_v2 }
0x109b   : > { %v11637_v14 = vmul.f32 %v18184_v54, %v18327_v37  ;;  %v11723_v0 = vpack.c.bf16 %v18319_v27, %v18311_v23  ;;  %v11618_v29 = vmul.f32 %v18219_v4, %v18321_v47  ;;  %v11619_v12 = vmul.f32 %v18219_v4, %v11556_v40 }
0x109c   : > { %14022 = vmatprep.subr.bf16.mxu0 %v11712_v26  ;;  %14062 = vmatprep.subr.bf16.mxu1 %v11728_v28  ;;  %v11682_v17 = vmul.f32 %v18222_v7, %v18321_v47  ;;  %v11683_v41 = vmul.f32 %v18222_v7, %v11556_v40  ;;  %v11586_v11 = vmul.f32 %v18227_v55, %v18321_v47 }
0x109d   : > { %14023 = vmatpush3.bf16.msra.mxu0 %v11704_v25  ;;  %14063 = vmatpush3.bf16.msra.mxu1 %v11720_v15  ;;  %v11721_v54 = vpack.c.bf16 %v11637_v14, %v11636_v49  ;;  %v11716_v52 = vpack.c.bf16 %v11619_v12, %v11618_v29  ;;  %v11587_v8 = vmul.f32 %v18227_v55, %v11556_v40 }
0x109e   : > { %14024 = vmatprep.subr.bf16.mxu0 %v11713_v51  ;;  %14064 = vmatprep.subr.bf16.mxu1 %v11729_v59  ;;  %v11732_v44 = vpack.c.bf16 %v11683_v41, %v11682_v17  ;;  %v11650_v26 = vmul.f32 %v18230_v62, %v18321_v47  ;;  %v11651_v28 = vmul.f32 %v18230_v62, %v11556_v40 }
0x109f   : > { %v11708_v23 = vpack.c.bf16 %v11587_v8, %v11586_v11  ;;  %v11620_v30 = vmul.f32 %v18219_v4, %v18313_v22  ;;  %v11621_v25 = vmul.f32 %v18219_v4, %v18327_v37  ;;  %v11684_v14 = vmul.f32 %v18222_v7, %v18313_v22 }
0x10a0   : > { %v11724_v15 = vpack.c.bf16 %v11651_v28, %v11650_v26  ;;  %v11685_v59 = vmul.f32 %v18222_v7, %v18327_v37  ;;  %v11588_v51 = vmul.f32 %v18227_v55, %v18313_v22  ;;  %v11589_v49 = vmul.f32 %v18227_v55, %v18327_v37 }
0x10a1   : > { %14025 = vmatpush3.bf16.msra.mxu0 %v11705_v16  ;;  %14065 = vmatpush3.bf16.msra.mxu1 %v11721_v54  ;;  %v11717_v27 = vpack.c.bf16 %v11621_v25, %v11620_v30  ;;  %v11652_v34 = vmul.f32 %v18230_v62, %v18313_v22  ;;  %v11653_v4 = vmul.f32 %v18230_v62, %v18327_v37 }
0x10a2   : > { %v18655_v33 = vpack.c.bf16 %v18240_v42, %v18236_v13  ;;  %v18656_v7 = vpack.c.bf16 %v18248_v5, %v18244_v3  ;;  %v11733_v31 = vpack.c.bf16 %v11685_v59, %v11684_v14  ;;  %v11709_v39 = vpack.c.bf16 %v11589_v49, %v11588_v51 }
0x10a3   : > { %v11734_v55 = vpack.c.bf16 %v11695_v6, %v11694_v48  ;;  %v11725_v16 = vpack.c.bf16 %v11653_v4, %v11652_v34  ;;  %v11696_v24 = vmul.f32 %v18304_v1, %v18179_v38  ;;  %v11697_v2 = vmul.f32 %v18304_v1, %v18186_v50 }
0x10a4   : > { %14026 = vmatprep.subr.bf16.mxu0 %v18655_v33  ;;  %14066 = vmatprep.subr.bf16.mxu1 %v18656_v7  ;;  %v11698_v62 = vmul.f32 %v18304_v1, %v18321_v47  ;;  %v11699_v13 = vmul.f32 %v18304_v1, %v11556_v40  ;;  %v11700_v42 = vmul.f32 %v18304_v1, %v18313_v22 }
0x10a5   : > { %v11701_v3 = vmul.f32 %v18304_v1, %v18327_v37  ;;  %v18657_v5 = vpack.c.bf16 %v18256_v21, %v18252_v18  ;;  %v18658_v38 = vpack.c.bf16 %v18270_v45, %v18262_v46  ;;  %v11735_v50 = vpack.c.bf16 %v11697_v2, %v11696_v24  ;;  %v18670_v18 = vld [vmem:[#allocation54_spill] sm:$0xff]  ;;  %v18672_v21 = vld [vmem:[#allocation56_spill] sm:$0xff] }
0x10a6   : > { %v18659_v47 = vpack.c.bf16 %v18279_v58, %v18275_v63  ;;  %v18660_v48 = vpack.c.bf16 %v18290_v20, %v18283_v35  ;;  %v11736_v22 = vpack.c.bf16 %v11699_v13, %v11698_v62  ;;  %v18661_v1 = vpack.c.bf16 %v18301_v10, %v18294_v32  ;;  %v15778_v46 = vld [vmem:[%s18662_s28] sm:$0xff]   ;;  %v15779_v45 = vld [vmem:[%s18663_s3 + $0x8] sm:$0xff]   ;;  %v15780_v63 = vld [vmem:[%s18663_s3 + $0x10] sm:$0xff]   ;;  %s12130_s28 = sshll.u32 %s17855_s5, 4  ;;  %s15878_s5 = scalar_lea.vmem %s15877_s11, 512  ;;  %s18450_s28 = int_to_ptr.vmem [resolvable:$true] %s12130_s28 }
0x10a7   : > { %14027 = vmatpush3.bf16.msra.mxu0 %v18657_v5  ;;  %14067 = vmatpush3.bf16.msra.mxu1 %v18658_v38  ;;  %v11737_v6 = vpack.c.bf16 %v11701_v3, %v11700_v42  ;;  %v15781_v58 = vld [vmem:[%s18663_s3 + $0x18] sm:$0xff]   ;;  %v15782_v35 = vld [vmem:[%s18663_s3 + $0x20] sm:$0xff]   ;;  %v15783_v20 = vld [vmem:[%s18663_s3 + $0x28] sm:$0xff]   ;;  %s15872_s9 = scalar_lea.vmem %s18450_s28, 256  ;;  %p15879_p10 = scmp.lt.s32.totalorder %s18450_s28, %s15877_s11 }
0x10a8   : > { %14028 = vmatprep.subr.bf16.mxu0 %v18659_v47  ;;  %14068 = vmatprep.subr.bf16.mxu1 %v18660_v48  ;;  %v15784_v32 = vld [vmem:[%s18663_s3 + $0x30] sm:$0xff]   ;;  %v15785_v10 = vld [vmem:[%s18663_s3 + $0x38] sm:$0xff]   ;;  %s13465_s3 = sshll.u32 %s16272_s0, 8  ;;  %p15873_p4 = scmp.ne.s32.totalorder %s18450_s28, %s15872_s9 }
0x10a9   : > { %s18454_s4 = scalar_lea.hbm %s16244_s14, %s13465_s3  ;;  %p15880_p7 = scmp.lt.s32.totalorder %s15878_s5, %s15872_s9 }
0x10aa   : > { %p15874_p6 = pnand %p15873_p4, %p18674_p5 }
0x10ab   : > { %14029 = vmatpush3.bf16.msra.mxu0 %v18661_v1  ;;  %14069 = vmatpush3.bf16.msra.mxu1 %v11723_v0  ;;  %p15881_p8 = por %p15880_p7, %p15879_p10 }
0x10ac   : > { %14030 = vmatprep.subr.bf16.mxu0 %v11716_v52  ;;  %14070 = vmatprep.subr.bf16.mxu1 %v11732_v44  ;;  %p15875_p9 = pneg %p15874_p6 }
0x10ae   : > { %p15882_p11 = pnand %p15881_p8, %p15875_p9 }
0x10af   : > { %14031 = vmatpush3.bf16.msra.mxu0 %v11708_v23  ;;  %14071 = vmatpush3.bf16.msra.mxu1 %v11724_v15 }
0x10b0   : > { %14032 = vmatprep.subr.bf16.mxu0 %v11717_v27  ;;  %14072 = vmatprep.subr.bf16.mxu1 %v11733_v31 }
0x10b3   : > { %14033 = vmatpush3.bf16.msra.mxu0 %v11709_v39  ;;  %14073 = vmatpush3.bf16.msra.mxu1 %v11725_v16 }
0x10b4   : > { %14236 = vmatprep.subr.bf16.mxu0 %v11734_v55  ;;  %14252 = vmatprep.subr.bf16.mxu1 %v15778_v46 }
0x10b6   : > { %11778 = vmatmul.mubr.bf16.vlgmr.msra.gmra.mrb[60].mxu0 %v18083_v60  ;;  %11843 = vmatmul.mubr.bf16.vlgmr.msra.gmra.mrb[136].mxu1 %v18115_v36  ;;  %v18664_v60 = vld [vmem:[#allocation57_spill] sm:$0xff]  ;;  %v18666_v36 = vld [vmem:[#allocation58_spill] sm:$0xff] }
0x10b7   : > { %14237 = vmatpush3.bf16.msra.mxu0 %v11734_v55  ;;  %11785 = vmatprep.mubr.bf16.mxu0 %v18086_v19  ;;  %v18665_v19 = vld [vmem:[#allocation60_spill] sm:$0xff] }
0x10b8   : > { %14238 = vmatprep.subr.bf16.mxu0 %v11735_v50  ;;  %11850 = vmatprep.mubr.bf16.mxu1 %v18118_v53  ;;  %v18667_v53 = vld [vmem:[#allocation61_spill] sm:$0xff] }
0x10b9   : > { %14253 = vmatpush3.bf16.msra.mxu1 %v15778_v46 }
0x10ba   : > { %14254 = vmatprep.subr.bf16.mxu1 %v15779_v45 }
0x10bb   : > { %14239 = vmatpush3.bf16.msra.mxu0 %v11735_v50 }
0x10bc   : > { %14240 = vmatprep.subr.bf16.mxu0 %v11736_v22 }
0x10bd   : > { %14255 = vmatpush3.bf16.msra.mxu1 %v15779_v45 }
0x10be   : > { %11786 = vmatmul.mubr.bf16.gmra.mrb[64].mxu0 %v18091_v57  ;;  %11851 = vmatmul.mubr.bf16.gmra.mrb[140].mxu1 %v18123_v56  ;;  %v18668_v57 = vld [vmem:[#allocation59_spill] sm:$0xff]  ;;  %v18669_v56 = vld [vmem:[#allocation62_spill] sm:$0xff] }
0x10bf   : > { %14241 = vmatpush3.bf16.msra.mxu0 %v11736_v22  ;;  %11793 = vmatprep.mubr.bf16.mxu0 %v18094_v43  ;;  %v15787_v43 = vld [vmem:[%s18638_s6 + $0x10] ss:$20 sps:$4 sm:$0xff]   ;;  %s18673_s6 = sand.u32 1, %s15934_s1  }
0x10c0   : > { %14242 = vmatprep.subr.bf16.mxu0 %v11737_v6  ;;  %11858 = vmatprep.mubr.bf16.mxu1 %v18126_v61  ;;  %v18671_v61 = vld [vmem:[#allocation55_spill] sm:$0xff]  ;;  %s18458_s8 = scalar_lea.sflag [#allocation4], %s18673_s6 }
0x10c1   : > { %14256 = vmatprep.subr.bf16.mxu1 %v15780_v63 }
0x10c2   : > { %14257 = vmatpush3.bf16.msra.mxu1 %v15780_v63 }
0x10c3   : > { %14243 = vmatpush3.bf16.msra.mxu0 %v11737_v6  ;;  %14258 = vmatprep.subr.bf16.mxu1 %v15781_v58 }
0x10c6   : > { %11794 = vmatmul.mubr.bf16.gmra.mrb[68].mxu0 %v18664_v60  ;;  %11859 = vmatmul.mubr.bf16.gmra.mrb[144].mxu1 %v18665_v19 }
0x10c7   : > { %11801 = vmatprep.mubr.bf16.mxu0 %v18666_v36  ;;  %11866 = vmatprep.mubr.bf16.mxu1 %v18667_v53 }
0x10c8   : > { %14259 = vmatpush3.bf16.msra.mxu1 %v15781_v58 }
0x10c9   : > { %14260 = vmatprep.subr.bf16.mxu1 %v15782_v35 }
0x10cc   : > { %14261 = vmatpush3.bf16.msra.mxu1 %v15782_v35 }
0x10cd   : > { %14262 = vmatprep.subr.bf16.mxu1 %v15783_v20 }
0x10ce   : > { %11802 = vmatmul.mubr.bf16.gmra.mrb[72].mxu0 %v18668_v57  ;;  %11867 = vmatmul.mubr.bf16.gmra.mrb[148].mxu1 %v18669_v56 }
0x10cf   : > { %14244 = vmatprep.mubr.msk.bf16.mxu0 %vm11179_vm5, %v15787_v43 }
0x10d0   : > { %14263 = vmatpush3.bf16.msra.mxu1 %v15783_v20 }
0x10d1   : > { %14264 = vmatprep.subr.bf16.mxu1 %v15784_v32 }
0x10d4   : > { %14265 = vmatpush3.bf16.msra.mxu1 %v15784_v32 }
0x10d5   : > { %14266 = vmatprep.subr.bf16.mxu1 %v15785_v10 }
0x10d6   : > { %14245 = vmatmul.mubr.msk.bf16.vlgmr.msra.gmra.mrb[76].mxu0 %vm11179_vm5, %v18670_v18 }
0x10d7   : > { %14248 = vmatprep.mubr.msk.bf16.mxu0 %vm11179_vm5, %v18671_v61 }
0x10d8   : > { %14267 = vmatpush3.bf16.msra.mxu1 %v15785_v10 }
0x10de   : > { %14249 = vmatmul.mubr.msk.bf16.gmra.mrb[80].mxu0 %vm11179_vm5, %v18672_v21 }
0x1189   : > { %v14034_v37 = vpop.f32.mrb[60].mxu0  ;;  %v14074_v40 = vpop.f32.mrb[136].mxu1 }
0x118a   : > { %v14035_v0 = vpop.f32.mrb[61].mxu0  ;;  %v14075_v29 = vpop.f32.mrb[137].mxu1 }
0x118b   : > { %v14036_v12 = vadd.f32 %v14035_v0, %v14034_v37  ;;  %v14037_v17 = vpop.f32.mrb[62].mxu0  ;;  %v14076_v41 = vadd.f32 %v14075_v29, %v14074_v40  ;;  %v14077_v11 = vpop.f32.mrb[138].mxu1 }
0x118c   : > { %v14038_v54 = vpop.f32.mrb[63].mxu0  ;;  %v14078_v52 = vpop.f32.mrb[139].mxu1 }
0x118d   : > { %v11780_v8 = vadd.f32 %v14036_v12, %v13444_v9  ;;  %v14039_v44 = vadd.f32 %v14038_v54, %v14037_v17  ;;  %v14079_v26 = vadd.f32 %v14078_v52, %v14077_v11 }
0x118f   : > { %v11783_v28 = vadd.f32 %v14039_v44, %v13444_v9  ;;  %v11845_v23 = vadd.f32 %v14076_v41, %v11780_v8 }
0x1191   : > { %v14040_v30 = vpop.f32.mrb[64].mxu0  ;;  %v14080_v25 = vpop.f32.mrb[140].mxu1  ;;  %v11848_v14 = vadd.f32 %v14079_v26, %v11783_v28 }
0x1192   : > { %v14041_v15 = vpop.f32.mrb[65].mxu0  ;;  %v14081_v59 = vpop.f32.mrb[141].mxu1 }
0x1193   : > { %v14042_v51 = vadd.f32 %v14041_v15, %v14040_v30  ;;  %v14043_v49 = vpop.f32.mrb[66].mxu0  ;;  %v14082_v27 = vadd.f32 %v14081_v59, %v14080_v25  ;;  %v14083_v34 = vpop.f32.mrb[142].mxu1 }
0x1194   : > { %v14044_v4 = vpop.f32.mrb[67].mxu0  ;;  %v14084_v33 = vpop.f32.mrb[143].mxu1 }
0x1195   : > { %v11788_v7 = vadd.f32 %v14042_v51, %v13444_v9  ;;  %v14045_v31 = vadd.f32 %v14044_v4, %v14043_v49  ;;  %v14085_v39 = vadd.f32 %v14084_v33, %v14083_v34 }
0x1197   : > { %v11791_v55 = vadd.f32 %v14045_v31, %v13444_v9  ;;  %v11853_v16 = vadd.f32 %v14082_v27, %v11788_v7 }
0x1199   : > { %v14046_v24 = vpop.f32.mrb[68].mxu0  ;;  %v14086_v2 = vpop.f32.mrb[144].mxu1  ;;  %v11856_v62 = vadd.f32 %v14085_v39, %v11791_v55 }
0x119a   : > { %v14047_v13 = vpop.f32.mrb[69].mxu0  ;;  %v14087_v42 = vpop.f32.mrb[145].mxu1 }
0x119b   : > { %v14048_v3 = vadd.f32 %v14047_v13, %v14046_v24  ;;  %v14049_v5 = vpop.f32.mrb[70].mxu0  ;;  %v14088_v38 = vadd.f32 %v14087_v42, %v14086_v2  ;;  %v14089_v50 = vpop.f32.mrb[146].mxu1 }
0x119c   : > { %v14050_v47 = vpop.f32.mrb[71].mxu0  ;;  %v14090_v48 = vpop.f32.mrb[147].mxu1 }
0x119d   : > { %v11796_v22 = vadd.f32 %v14048_v3, %v13444_v9  ;;  %v14051_v6 = vadd.f32 %v14050_v47, %v14049_v5  ;;  %v14091_v1 = vadd.f32 %v14090_v48, %v14089_v50 }
0x119f   : > { %v11799_v60 = vadd.f32 %v14051_v6, %v13444_v9  ;;  %v11861_v19 = vadd.f32 %v14088_v38, %v11796_v22 }
0x11a1   : > { %v14052_v36 = vpop.f32.mrb[72].mxu0  ;;  %v14092_v53 = vpop.f32.mrb[148].mxu1  ;;  %v11864_v57 = vadd.f32 %v14091_v1, %v11799_v60 }
0x11a2   : > { %v14053_v56 = vpop.f32.mrb[73].mxu0  ;;  %v14093_v43 = vpop.f32.mrb[149].mxu1 }
0x11a3   : > { %v14054_v18 = vadd.f32 %v14053_v56, %v14052_v36  ;;  %v14055_v61 = vpop.f32.mrb[74].mxu0  ;;  %v14094_v21 = vadd.f32 %v14093_v43, %v14092_v53  ;;  %v14095_v46 = vpop.f32.mrb[150].mxu1 }
0x11a4   : > { %v14056_v45 = vpop.f32.mrb[75].mxu0  ;;  %v14096_v63 = vpop.f32.mrb[151].mxu1 }
0x11a5   : > { %v11804_v58 = vadd.f32 %v14054_v18, %v13444_v9  ;;  %v14057_v35 = vadd.f32 %v14056_v45, %v14055_v61  ;;  %v14097_v20 = vadd.f32 %v14096_v63, %v14095_v46 }
0x11a7   : > { %v11807_v32 = vadd.f32 %v14057_v35, %v13444_v9  ;;  %v11869_v10 = vadd.f32 %v14094_v21, %v11804_v58 }
0x11a9   : > { %v14246_v37 = vpop.f32.mrb[76].mxu0  ;;  %v11872_v40 = vadd.f32 %v14097_v20, %v11807_v32 }
0x11aa   : > { %v11918_v0 = vadd.f32 %v14246_v37, %v11853_v16  ;;  %v11909_v29 = vpop.f32.mrb[77].mxu0 }
0x11ab   : > { %v11910_v12 = vadd.f32 %v11909_v29, %v11845_v23  ;;  %v14247_v17 = vpop.f32.mrb[78].mxu0 }
0x11ac   : > { %v11942_v41 = vmax.f32 %v11918_v0, 0.0  ;;  %v11921_v11 = vadd.f32 %v14247_v17, %v11856_v62  ;;  %v11912_v54 = vpop.f32.mrb[79].mxu0 }
0x11ad   : > { %v11940_v52 = vmax.f32 %v11910_v12, 0.0  ;;  %v11913_v8 = vadd.f32 %v11912_v54, %v11848_v14 }
0x11ae   : > { %v11943_v44 = vmax.f32 %v11921_v11, 0.0  ;;  %v11950_v28 = vmin.f32 %v11942_v41, 6.0 }
0x11af   : > { %v11941_v26 = vmax.f32 %v11913_v8, 0.0  ;;  %v11948_v25 = vmin.f32 %v11940_v52, 6.0 }
0x11b0   : > { %v11951_v30 = vmin.f32 %v11943_v44, 6.0 }
0x11b1   : > { %v11949_v15 = vmin.f32 %v11941_v26, 6.0  ;;  %v14250_v59 = vpop.f32.mrb[80].mxu0 }
0x11b2   : > { %v11957_v9 = vpack.c.bf16 %v11951_v30, %v11950_v28  ;;  %v11934_v51 = vadd.f32 %v14250_v59, %v11869_v10  ;;  %v11925_v49 = vpop.f32.mrb[81].mxu0 }
0x11b3   : > { %v11956_v27 = vpack.c.bf16 %v11949_v15, %v11948_v25  ;;  %v11926_v34 = vadd.f32 %v11925_v49, %v11861_v19  ;;  %v14251_v4 = vpop.f32.mrb[82].mxu0 }
0x11b4   : > { %v11946_v23 = vmax.f32 %v11934_v51, 0.0  ;;  %v11937_v33 = vadd.f32 %v14251_v4, %v11872_v40  ;;  %v11928_v7 = vpop.f32.mrb[83].mxu0 }
0x11b5   : > { %v11944_v31 = vmax.f32 %v11926_v34, 0.0  ;;  %v11929_v14 = vadd.f32 %v11928_v7, %v11864_v57  ;;  %14268 = vmatprep.mubr.bf16.mxu1 %v11956_v27 }
0x11b6   : > { %v11947_v39 = vmax.f32 %v11937_v33, 0.0  ;;  %14269 = vmatmul.mubr.bf16.vlgmr.msra.gmra.mrb[152].mxu1 %v11957_v9  ;;  %v11954_v16 = vmin.f32 %v11946_v23, 6.0 }
0x11b7   : > { %v11945_v55 = vmax.f32 %v11929_v14, 0.0  ;;  %v11952_v2 = vmin.f32 %v11944_v31, 6.0 }
0x11b8   : > { %v11955_v24 = vmin.f32 %v11947_v39, 6.0 }
0x11b9   : > { %v11953_v62 = vmin.f32 %v11945_v55, 6.0 }
0x11ba   : > { %v11959_v13 = vpack.c.bf16 %v11955_v24, %v11954_v16 }
0x11bb   : > { %v11958_v42 = vpack.c.bf16 %v11953_v62, %v11952_v2 }
0x11bd   : > { %14272 = vmatprep.mubr.bf16.mxu1 %v11958_v42 }
0x11be   : > { %14273 = vmatmul.mubr.bf16.gmra.mrb[156].mxu1 %v11959_v13 }
0x11bf   : > { %15885 = shalt.err (!%p15882_p11)
}
0x11c0   : > { %s15886_s6 = scalar_lea.hbm %s18454_s4, 256  ;;  %s15890_s0 = scalar_lea.hbm %s16244_s14, 512 }
0x11c1   : > { %p15887_p13 = scmp.ne.s32.totalorder %s18454_s4, %s15886_s6  ;;  %p15891_p2 = scmp.lt.u32.totalorder %s18454_s4, %s16244_s14 }
0x11c2   : > { %p15892_p3 = scmp.lt.u32.totalorder %s15890_s0, %s15886_s6  ;;  %p15894_p4 = scmp.lt.u32.totalorder %s15886_s6, %s18454_s4 }
0x11c3   : > { %p15888_p1 = pnand %p15887_p13, %p18674_p5 }
0x11c4   : > { %p15893_p12 = por %p15892_p3, %p15891_p2 }
0x11c5   : > { %p15889_p0 = pneg %p15888_p1 }
0x11c6   : > { %p15895_p6 = por %p15894_p4, %p15893_p12 }
0x11c8   : > { %p15896_p9 = pnand %p15895_p6, %p15889_p0 }
0x11ca   : > { %15899 = shalt.err (!%p15896_p9)
}
0x11cb   : > { %s15999_s9 = smov 128   ;;  %s16000_s10 = smov 8   ;;  %v13449_v3 = vld [vmem:[#allocation7] ss:$0 sm:$0xff] }
0x11cc   : > { %14378 = dma.vmem_to_hbm [thread:$0]  (%p18674_p5), %s18450_s28, 256, %s18454_s4, %s18458_s8, %s15999_s9, %s15999_s9, %s16000_s10  }
0x11cd   : > { %s18675_s11 = sshll.u32 %s16398_s2, 6 }
0x11ce   : > { %s1533_s3 = scalar_lea.vmem %s16249_s19, %s18675_s11 }
0x1289   : > { %v14270_v5 = vpop.f32.mrb[152].mxu1 }
0x128a   : > { %v12074_v38 = vadd.f32 %v14270_v5, %v13449_v3  ;;  %v12065_v50 = vpop.f32.mrb[153].mxu1 }
0x128b   : > { %v12066_v47 = vadd.f32 %v13449_v3, %v12065_v50  ;;  %v14271_v48 = vpop.f32.mrb[154].mxu1 }
0x128c   : > { %12098 = vst [vmem:[%s1533_s3 + $0x10] sm:$0xff] %v12074_v38  ;;  %v12077_v22 = vadd.f32 %v14271_v48, %v13449_v3  ;;  %v12068_v6 = vpop.f32.mrb[155].mxu1 }
0x128d   : > { %12096 = vst [vmem:[%s1533_s3] sm:$0xff] %v12066_v47  ;;  %v12069_v1 = vadd.f32 %v13449_v3, %v12068_v6 }
0x128e   : > { %12099 = vst [vmem:[%s1533_s3 + $0x18] sm:$0xff] %v12077_v22 }
0x128f   : > { %12097 = vst [vmem:[%s1533_s3 + $0x8] sm:$0xff] %v12069_v1 }
0x1291   : > { %v14274_v60 = vpop.f32.mrb[156].mxu1 }
0x1292   : > { %v12090_v19 = vadd.f32 %v14274_v60, %v13449_v3  ;;  %v12081_v36 = vpop.f32.mrb[157].mxu1 }
0x1293   : > { %v12082_v53 = vadd.f32 %v13449_v3, %v12081_v36  ;;  %v14275_v57 = vpop.f32.mrb[158].mxu1 }
0x1294   : > { %12102 = vst [vmem:[%s1533_s3 + $0x30] sm:$0xff] %v12090_v19  ;;  %v12093_v56 = vadd.f32 %v14275_v57, %v13449_v3  ;;  %v12084_v43 = vpop.f32.mrb[159].mxu1 }
0x1295   : > { %12100 = vst [vmem:[%s1533_s3 + $0x20] sm:$0xff] %v12082_v53  ;;  %v12085_v18 = vadd.f32 %v13449_v3, %v12084_v43 }
0x1296   : > { %12103 = vst [vmem:[%s1533_s3 + $0x38] sm:$0xff] %v12093_v56 }
0x1297   : > { %12101 = vst [vmem:[%s1533_s3 + $0x28] sm:$0xff] %v12085_v18 }
0x1298 PF: > { %s18676_s22 = sld [smem:[#allocation49_spill]]  ;;  %s18677_s2 = sld [smem:[#allocation53_spill]] }
0x1299   : > { %p14400_p5 = scmp.ge.s32.totalorder %s15942_s7, 2 }
0x129e   : > { %s12155_s8 = sand.u32 1, %s18676_s22   ;;  %p18678_p10 = scmp.ne.s32.totalorder %s18677_s2, 0 }
0x129f   : > { %s12156_s4 = scalar_lea.sflag [#allocation4], %s12155_s8 }
0x12a0   : > { %p14391_p7 = pnand %p14400_p5, %p18678_p10 }
0x12a2   : > { %15925 = dma.done.wait (!%p14391_p7), %s12156_s4, 256  }
0x12a3   : > { %15927 = vsyncadd (!%p14391_p7), %s12156_s4, 4294967040  ;;  %s18679_s7 = sld [smem:[#allocation51_spill]]  ;;  %s18680_s5 = sld [smem:[#allocation50_spill]] }
0x12a4   : > { %s18681_s2 = sld [smem:[#allocation52_spill]]  ;;  %s18682_s28 = smov %s15934_s1 }
0x12a9   : > { %p110_p8 = scmp.ge.s32.totalorder %s18679_s7, 4   ;;  %s18683_s1 = smov %s18680_s5 }
0x12ab   :  { %112 = sbr.rel (!%p110_p8) target bundleno = 101 (0x65), region = 378 }
0x12b2   :  { %12169 = vsyncpa [#allocation3], 1 }
0x12b3   :  { %12171 = vsyncpa [#allocation3 + $0x1], 1 }
0x12b4   :  { %12172 = vsyncpa [#allocation6], 1 }
0x12b5   :  { %12173 = vsyncpa [#allocation4], 1 }
0x12b6   :  { %12175 = vsyncpa [#allocation4 + $0x1], 1 }

</bundles_post_ra>
